<compile_context>
chip_gen: v7x
topology: tpu7x:2x2x1
jax: 0.10.0
libtpu: 0.0.40
codegen_flags: <defaults>
</compile_context>

<pallas_src>
import jax
import jax.numpy as jnp
from jax import lax
from jax.experimental import pallas as pl
from jax.experimental.pallas import tpu as pltpu

LANE = 128
VMEM_LIMIT = 32 * 1024 * 1024


def _round_up(x, m):
    return (x + m - 1) // m * m


# --------------------------------------------------------------------------- #
# Conv kernels: in-kernel im2col (9 shifted taps), bf16 operands, f32 accum.
# --------------------------------------------------------------------------- #
def _make_conv_kernel(h, w_pad, c_in):
    """Conv2d(3x3, padding=1), no pooling.  One batch element per grid step."""
    def kernel(x_ref, w_ref, b_ref, o_ref):
        # x_ref: (1, h+2, w_pad+2, c_in) bf16   spatially zero-padded input
        # w_ref: (9, c_in, c_out_pad)    bf16   tap-major weights
        # b_ref: (1, c_out_pad)          f32
        # o_ref: (1, h*w_pad, c_out_pad) bf16
        acc = None
        for dy in range(3):
            for dx in range(3):
                tap = x_ref[0, dy:dy + h, dx:dx + w_pad, :]
                tap = tap.reshape(h * w_pad, c_in)
                part = jnp.dot(tap, w_ref[dy * 3 + dx],
                               preferred_element_type=jnp.float32)
                acc = part if acc is None else acc + part
        o_ref[0] = (acc + b_ref[...]).astype(o_ref.dtype)
    return kernel


def _make_conv_pool_kernel(ho, wo_pad, c_in):
    """Conv2d(3x3, padding=1) fused with MaxPool2d(2); input arrives parity-split."""
    def kernel(x_ref, w_ref, b_ref, o_ref):
        # x_ref: (4, ho+1, wo_pad+1, c_in) bf16 parity planes of the padded input:
        #        x_ref[2p+q, i, j, :] == x_padded[2i+p, 2j+q, :]
        # w_ref: (9, c_in, c_out_pad) bf16 ; b_ref: (1, c_out_pad) f32
        # o_ref: (1, ho*wo_pad, c_out_pad) bf16, pooled rows ordered y'*wo_pad + x'
        res = None
        for a in range(2):                       # pooling-window row offset
            for bq in range(2):                  # pooling-window col offset
                acc = None
                for dy in range(3):
                    for dx in range(3):
                        r, s = a + dy, bq + dx
                        plane = (r % 2) * 2 + (s % 2)
                        tap = x_ref[plane,
                                    r // 2:r // 2 + ho,
                                    s // 2:s // 2 + wo_pad, :]
                        tap = tap.reshape(ho * wo_pad, c_in)
                        part = jnp.dot(tap, w_ref[dy * 3 + dx],
                                       preferred_element_type=jnp.float32)
                        acc = part if acc is None else acc + part
                res = acc if res is None else jnp.maximum(res, acc)
        o_ref[0] = (res + b_ref[...]).astype(o_ref.dtype)
    return kernel


def _prep_conv_params(w_hwio, bias, c_in_eff):
    """Zero-extend an HWIO (3,3,c_in,c_out) weight to (9, c_in_eff, c_out_pad) bf16
    plus a (1, c_out_pad) f32 bias (c_out_pad = multiple of 128 lanes)."""
    c_in, c_out = w_hwio.shape[2], w_hwio.shape[3]
    c_out_pad = _round_up(c_out, LANE)
    w = jnp.zeros((3, 3, c_in_eff, c_out_pad), jnp.float32)
    w = w.at[:, :, :c_in, :c_out].set(w_hwio)
    b = jnp.zeros((1, c_out_pad), jnp.float32).at[0, :c_out].set(bias.reshape(-1))
    return w.reshape(9, c_in_eff, c_out_pad).astype(jnp.bfloat16), b, c_out_pad


def conv3x3(x_nhwc, w_hwio, bias):
    """Conv2d(3, padding=1).  NHWC bf16 in -> NHWC bf16 out (c_out padded to 128)."""
    n, h, w, c_in_eff = x_nhwc.shape
    w_pad = _round_up(w, 8)                      # keep in-kernel reshape 8-aligned
    w9, b_row, c_out_pad = _prep_conv_params(w_hwio, bias, c_in_eff)
    xp = jnp.pad(x_nhwc, ((0, 0), (1, 1), (1, 1 + (w_pad - w)), (0, 0)))
    out = pl.pallas_call(
        _make_conv_kernel(h, w_pad, c_in_eff),
        out_shape=jax.ShapeDtypeStruct((n, h * w_pad, c_out_pad), jnp.bfloat16),
        grid_spec=pltpu.PrefetchScalarGridSpec(
            num_scalar_prefetch=0,
            grid=(n,),
            in_specs=[
                pl.BlockSpec((1, h + 2, w_pad + 2, c_in_eff),
                             lambda i: (i, 0, 0, 0)),
                # Grid-invariant operands: fetched once, reused across steps.
                pl.BlockSpec((9, c_in_eff, c_out_pad), lambda i: (0, 0, 0)),
                pl.BlockSpec((1, c_out_pad), lambda i: (0, 0)),
            ],
            out_specs=pl.BlockSpec((1, h * w_pad, c_out_pad),
                                   lambda i: (i, 0, 0)),
        ),
        compiler_params=pltpu.CompilerParams(
            dimension_semantics=("parallel",),
            vmem_limit_bytes=VMEM_LIMIT),
    )(xp, w9, b_row)
    out = out.reshape(n, h, w_pad, c_out_pad)
    return out[:, :, :w, :] if w_pad != w else out


def conv3x3_maxpool(x_nhwc, w_hwio, bias):
    """Conv2d(3, padding=1) + MaxPool2d(2) fused.  NHWC bf16 in -> NHWC bf16 out."""
    n, h, w, c_in_eff = x_nhwc.shape
    assert h % 2 == 0 and w % 2 == 0, "MaxPool2d(2) needs even spatial dims"
    w_pad = _round_up(w, 16)                     # pooled width stays 8-aligned
    ho, wo_pad = h // 2, w_pad // 2
    w9, b_row, c_out_pad = _prep_conv_params(w_hwio, bias, c_in_eff)
    xp = jnp.pad(x_nhwc, ((0, 0), (1, 1), (1, 1 + (w_pad - w)), (0, 0)))
    # Parity-split the padded input: xpp[4n + 2p + q, i, j, :] == xp[n, 2i+p, 2j+q, :]
    hh, wh = (h + 2) // 2, (w_pad + 2) // 2
    xpp = xp.reshape(n, hh, 2, wh, 2, c_in_eff)
    xpp = xpp.transpose(0, 2, 4, 1, 3, 5).reshape(n * 4, hh, wh, c_in_eff)
    out = pl.pallas_call(
        _make_conv_pool_kernel(ho, wo_pad, c_in_eff),
        out_shape=jax.ShapeDtypeStruct((n, ho * wo_pad, c_out_pad), jnp.bfloat16),
        grid_spec=pltpu.PrefetchScalarGridSpec(
            num_scalar_prefetch=0,
            grid=(n,),
            in_specs=[
                pl.BlockSpec((4, hh, wh, c_in_eff), lambda i: (i, 0, 0, 0)),
                pl.BlockSpec((9, c_in_eff, c_out_pad), lambda i: (0, 0, 0)),
                pl.BlockSpec((1, c_out_pad), lambda i: (0, 0)),
            ],
            out_specs=pl.BlockSpec((1, ho * wo_pad, c_out_pad),
                                   lambda i: (i, 0, 0)),
        ),
        compiler_params=pltpu.CompilerParams(
            dimension_semantics=("parallel",),
            vmem_limit_bytes=VMEM_LIMIT),
    )(xpp, w9, b_row)
    out = out.reshape(n, ho, wo_pad, c_out_pad)
    wo = w // 2
    return out[:, :, :wo, :] if wo_pad != wo else out


# --------------------------------------------------------------------------- #
# Fused MLP kernel: Linear -> ReLU -> (eval-mode) Dropout ... -> Linear.
# --------------------------------------------------------------------------- #
def _make_mlp_kernel(n_layers):
    def kernel(*refs):
        x_ref, o_ref = refs[0], refs[-1]
        h = x_ref[...]                                        # bf16 (tb, d0)
        for i in range(n_layers):
            w_ref, b_ref = refs[1 + 2 * i], refs[2 + 2 * i]
            z = jnp.dot(h, w_ref[...],
                        preferred_element_type=jnp.float32) + b_ref[...]
            if i < n_layers - 1:
                h = jnp.maximum(z, 0.0).astype(jnp.bfloat16)  # ReLU; dropout = id
            else:
                o_ref[...] = z.astype(o_ref.dtype)
    return kernel


def mlp_forward(x_bf16, weights, biases, *, max_tile=256):
    """x: (N, d0) bf16; weights[i]: (d_i_pad, d_{i+1}_pad) bf16; biases f32."""
    n, d0 = x_bf16.shape
    d_out = weights[-1].shape[1]
    n_pad = _round_up(n, 8)
    tb = min(n_pad, max_tile)
    n_pad = _round_up(n_pad, tb)
    if n_pad != n:
        x_bf16 = jnp.pad(x_bf16, ((0, n_pad - n), (0, 0)))
    operands, in_specs = [], [pl.BlockSpec((tb, d0), lambda i: (i, 0))]
    for w, b in zip(weights, biases):
        operands += [w, b]
        in_specs += [pl.BlockSpec(w.shape, lambda i: (0, 0)),
                     pl.BlockSpec(b.shape, lambda i: (0, 0))]
    out = pl.pallas_call(
        _make_mlp_kernel(len(weights)),
        out_shape=jax.ShapeDtypeStruct((n_pad, d_out), jnp.float32),
        grid_spec=pltpu.PrefetchScalarGridSpec(
            num_scalar_prefetch=0,
            grid=(n_pad // tb,),
            in_specs=in_specs,
            out_specs=pl.BlockSpec((tb, d_out), lambda i: (i, 0)),
        ),
        compiler_params=pltpu.CompilerParams(
            dimension_semantics=("parallel",),
            vmem_limit_bytes=VMEM_LIMIT),
    )(x_bf16, *operands)
    return out[:n]


# --------------------------------------------------------------------------- #
# Full CNN forward (ConvBlock -> Flatten -> MLPBlock), module defaults:
# max pooling, no conv activation, ReLU + eval-mode Dropout in MLP, no out act.
# --------------------------------------------------------------------------- #
@jax.jit
def cnn_forward(x_nchw, conv_params, mlp_weights, mlp_biases):
    x = jnp.transpose(x_nchw, (0, 2, 3, 1)).astype(jnp.bfloat16)   # NCHW -> NHWC
    for sub in conv_params:                      # ConvSubBlocks (convs + MaxPool2d)
        for li, (w, b) in enumerate(sub):
            if li < len(sub) - 1:
                # TODO(synk): chain intra-sub-block convs through VMEM scratch
                # instead of a bf16 HBM round trip.
                x = conv3x3(x, w, b)
            else:
                x = conv3x3_maxpool(x, w, b)     # last conv fused with the pool
    n, ho, wo, c_pad = x.shape
    c_real = conv_params[-1][-1][0].shape[-1]

    # Fold nn.Flatten's NCHW ordering + channel padding into the first MLP weight.
    d1 = mlp_weights[0].shape[1]
    w0 = mlp_weights[0].reshape(c_real, ho, wo, d1)      # rows were c*ho*wo + h*wo + w
    w0 = jnp.transpose(w0, (1, 2, 0, 3))                 # -> (h, w, c, d1)
    w0 = jnp.pad(w0, ((0, 0), (0, 0), (0, c_pad - c_real), (0, 0)))
    w0 = w0.reshape(ho * wo * c_pad, d1)

    # Zero-pad every MLP layer to 128 output lanes (sliced back at the very end).
    ws, bs = [], []
    d_in_pad = ho * wo * c_pad
    folded = [w0] + list(mlp_weights[1:])
    for wmat, bvec in zip(folded, mlp_biases):
        di, do = wmat.shape
        do_pad = _round_up(do, LANE)
        wp = jnp.zeros((d_in_pad, do_pad), jnp.float32).at[:di, :do].set(wmat)
        bp = jnp.zeros((1, do_pad), jnp.float32).at[:, :do].set(bvec.reshape(1, -1))
        ws.append(wp.astype(jnp.bfloat16))
        bs.append(bp)
        d_in_pad = do_pad

    x2 = x.reshape(n, ho * wo * c_pad)           # flatten is free: layout metadata
    out = mlp_forward(x2, ws, bs)
    return out[:, :mlp_weights[-1].shape[1]]


# --------------------------------------------------------------------------- #
# Pure-JAX f32 reference (eval mode: dropout = identity).
# --------------------------------------------------------------------------- #
def reference_forward(x_nchw, conv_params, mlp_weights, mlp_biases):
    x = jnp.transpose(x_nchw, (0, 2, 3, 1)).astype(jnp.float32)
    for sub in conv_params:
        for (w, b) in sub:
            x = lax.conv_general_dilated(
                x, w, (1, 1), "SAME",
                dimension_numbers=("NHWC", "HWIO", "NHWC")) + b.reshape(1, 1, 1, -1)
        x = lax.reduce_window(x, -jnp.inf, lax.max,
                              (1, 2, 2, 1), (1, 2, 2, 1), "VALID")
    x = jnp.transpose(x, (0, 3, 1, 2)).reshape(x.shape[0], -1)
    for i, (w, b) in enumerate(zip(mlp_weights, mlp_biases)):
        x = x @ w + b
        if i < len(mlp_weights) - 1:
            x = jnp.maximum(x, 0.0)
    return x


# --------------------------------------------------------------------------- #
# Deterministic init mimicking PyTorch defaults (uniform +-1/sqrt(fan_in)).
# --------------------------------------------------------------------------- #
def _init_conv(key, c_in, c_out, dtype=jnp.float32):
    kw, kb = jax.random.split(key)
    bound = 1.0 / ((c_in * 9) ** 0.5)
    w = jax.random.uniform(kw, (3, 3, c_in, c_out), dtype, -bound, bound)  # HWIO
    b = jax.random.uniform(kb, (c_out,), dtype, -bound, bound)
    return w, b


def _init_linear(key, d_in, d_out, dtype=jnp.float32):
    kw, kb = jax.random.split(key)
    bound = 1.0 / (d_in ** 0.5)
    w = jax.random.uniform(kw, (d_in, d_out), dtype, -bound, bound)  # (in, out)
    b = jax.random.uniform(kb, (1, d_out), dtype, -bound, bound)
    return w, b


if __name__ == "__main__":
    # CNN(channels_all=[[4, 8, 8], [8, 16]], mlp_dims=[256, 64, 32, 8]) on (2,4,16,16):
    #   sub-block 1: Conv(4->8), Conv(8->8), MaxPool2 -> (2, 8, 8, 8)
    #   sub-block 2: Conv(8->16), MaxPool2            -> (2, 16, 4, 4)
    #   Flatten -> (2, 256); MLP 256->64->32->8 (ReLU + eval-mode Dropout between).
    channels_all = [[4, 8, 8], [8, 16]]
    batch, height, width = 2, 16, 16
    mlp_dims = [16 * 4 * 4, 64, 32, 8]

    key = jax.random.PRNGKey(0)

    conv_params = []
    for channels in channels_all:
        sub = []
        for c_in, c_out in zip(channels, channels[1:]):
            key, sk = jax.random.split(key)
            sub.append(_init_conv(sk, c_in, c_out))
        conv_params.append(sub)

    mlp_ws, mlp_bs = [], []
    for d_in, d_out in zip(mlp_dims, mlp_dims[1:]):
        key, sk = jax.random.split(key)
        w, b = _init_linear(sk, d_in, d_out)
        mlp_ws.append(w)
        mlp_bs.append(b)

    key, sk = jax.random.split(key)
    x = jax.random.normal(sk, (batch, channels_all[0][0], height, width),
                          jnp.float32)

    out = jax.block_until_ready(cnn_forward(x, conv_params, mlp_ws, mlp_bs))
    ref = reference_forward(x, conv_params, mlp_ws, mlp_bs)

    assert out.shape == (batch, mlp_dims[-1])
    # bf16 matmul operands / bf16 inter-layer activations with f32 accumulation:
    # tolerance covers the expected rounding while catching real indexing bugs.
    assert jnp.allclose(out, ref, atol=5e-2, rtol=5e-2), (
        f"max abs diff = {float(jnp.max(jnp.abs(out - ref)))}")

    print("KERNEL_OK")
</pallas_src>

<mosaic_0001>
module attributes {stable_mosaic.version = 11 : i64} {
  func.func @kernel(%arg0: i32, %arg1: memref<1x18x18x4xbf16, #tpu.memory_space<vmem>>, %arg2: memref<9x4x128xbf16, #tpu.memory_space<vmem>>, %arg3: memref<1x128xf32, #tpu.memory_space<vmem>>, %arg4: memref<1x256x128xbf16, #tpu.memory_space<vmem>>) attributes {dimension_semantics = [#tpu.dimension_semantics<parallel>], iteration_bounds = array<i64: 2>, scalar_prefetch = 0 : i64, scratch_operands = 0 : i64, tpu.core_type = #tpu.core_type<tc>, window_params = [{transform_indices = @transform_0, window_bounds = array<i64: 1, 18, 18, 4>}, {pipeline_mode = #tpu.pipeline_mode<synchronous>, transform_indices = @transform_1, window_bounds = array<i64: 9, 4, 128>}, {pipeline_mode = #tpu.pipeline_mode<synchronous>, transform_indices = @transform_2, window_bounds = array<i64: 1, 128>}, {transform_indices = @transform_3, window_bounds = array<i64: 1, 256, 128>}]} {
    %c0 = arith.constant 0 : index
    %c0_0 = arith.constant 0 : index
    %c0_1 = arith.constant 0 : index
    %c0_2 = arith.constant 0 : index
    %0 = vector.load %arg1[%c0, %c0_0, %c0_1, %c0_2] : memref<1x18x18x4xbf16, #tpu.memory_space<vmem>>, vector<1x16x16x4xbf16>
    %1 = vector.shape_cast %0 : vector<1x16x16x4xbf16> to vector<16x16x4xbf16>
    %2 = vector.shape_cast %1 : vector<16x16x4xbf16> to vector<256x4xbf16>
    %c0_3 = arith.constant 0 : index
    %c0_4 = arith.constant 0 : index
    %c0_5 = arith.constant 0 : index
    %3 = vector.load %arg2[%c0_3, %c0_4, %c0_5] : memref<9x4x128xbf16, #tpu.memory_space<vmem>>, vector<1x4x128xbf16>
    %4 = vector.shape_cast %3 : vector<1x4x128xbf16> to vector<4x128xbf16>
    %cst = arith.constant dense<0.000000e+00> : vector<256x128xf32>
    %5 = tpu.matmul %2, %4, %cst {dimension_numbers = #tpu.dot_dimension_numbers<[1], [0], [0], [1], [0, 0, 1, 1], [], []>} : vector<256x4xbf16>, vector<4x128xbf16>, vector<256x128xf32> -> vector<256x128xf32>
    %c0_6 = arith.constant 0 : index
    %c0_7 = arith.constant 0 : index
    %c1 = arith.constant 1 : index
    %c0_8 = arith.constant 0 : index
    %6 = vector.load %arg1[%c0_6, %c0_7, %c1, %c0_8] : memref<1x18x18x4xbf16, #tpu.memory_space<vmem>>, vector<1x16x16x4xbf16>
    %7 = vector.shape_cast %6 : vector<1x16x16x4xbf16> to vector<16x16x4xbf16>
    %8 = vector.shape_cast %7 : vector<16x16x4xbf16> to vector<256x4xbf16>
    %c1_9 = arith.constant 1 : index
    %c0_10 = arith.constant 0 : index
    %c0_11 = arith.constant 0 : index
    %9 = vector.load %arg2[%c1_9, %c0_10, %c0_11] : memref<9x4x128xbf16, #tpu.memory_space<vmem>>, vector<1x4x128xbf16>
    %10 = vector.shape_cast %9 : vector<1x4x128xbf16> to vector<4x128xbf16>
    %cst_12 = arith.constant dense<0.000000e+00> : vector<256x128xf32>
    %11 = tpu.matmul %8, %10, %cst_12 {dimension_numbers = #tpu.dot_dimension_numbers<[1], [0], [0], [1], [0, 0, 1, 1], [], []>} : vector<256x4xbf16>, vector<4x128xbf16>, vector<256x128xf32> -> vector<256x128xf32>
    %12 = arith.addf %5, %11 : vector<256x128xf32>
    %c0_13 = arith.constant 0 : index
    %c0_14 = arith.constant 0 : index
    %c2 = arith.constant 2 : index
    %c0_15 = arith.constant 0 : index
    %13 = vector.load %arg1[%c0_13, %c0_14, %c2, %c0_15] : memref<1x18x18x4xbf16, #tpu.memory_space<vmem>>, vector<1x16x16x4xbf16>
    %14 = vector.shape_cast %13 : vector<1x16x16x4xbf16> to vector<16x16x4xbf16>
    %15 = vector.shape_cast %14 : vector<16x16x4xbf16> to vector<256x4xbf16>
    %c2_16 = arith.constant 2 : index
    %c0_17 = arith.constant 0 : index
    %c0_18 = arith.constant 0 : index
    %16 = vector.load %arg2[%c2_16, %c0_17, %c0_18] : memref<9x4x128xbf16, #tpu.memory_space<vmem>>, vector<1x4x128xbf16>
    %17 = vector.shape_cast %16 : vector<1x4x128xbf16> to vector<4x128xbf16>
    %cst_19 = arith.constant dense<0.000000e+00> : vector<256x128xf32>
    %18 = tpu.matmul %15, %17, %cst_19 {dimension_numbers = #tpu.dot_dimension_numbers<[1], [0], [0], [1], [0, 0, 1, 1], [], []>} : vector<256x4xbf16>, vector<4x128xbf16>, vector<256x128xf32> -> vector<256x128xf32>
    %19 = arith.addf %12, %18 : vector<256x128xf32>
    %c0_20 = arith.constant 0 : index
    %c1_21 = arith.constant 1 : index
    %c0_22 = arith.constant 0 : index
    %c0_23 = arith.constant 0 : index
    %20 = vector.load %arg1[%c0_20, %c1_21, %c0_22, %c0_23] : memref<1x18x18x4xbf16, #tpu.memory_space<vmem>>, vector<1x16x16x4xbf16>
    %21 = vector.shape_cast %20 : vector<1x16x16x4xbf16> to vector<16x16x4xbf16>
    %22 = vector.shape_cast %21 : vector<16x16x4xbf16> to vector<256x4xbf16>
    %c3 = arith.constant 3 : index
    %c0_24 = arith.constant 0 : index
    %c0_25 = arith.constant 0 : index
    %23 = vector.load %arg2[%c3, %c0_24, %c0_25] : memref<9x4x128xbf16, #tpu.memory_space<vmem>>, vector<1x4x128xbf16>
    %24 = vector.shape_cast %23 : vector<1x4x128xbf16> to vector<4x128xbf16>
    %cst_26 = arith.constant dense<0.000000e+00> : vector<256x128xf32>
    %25 = tpu.matmul %22, %24, %cst_26 {dimension_numbers = #tpu.dot_dimension_numbers<[1], [0], [0], [1], [0, 0, 1, 1], [], []>} : vector<256x4xbf16>, vector<4x128xbf16>, vector<256x128xf32> -> vector<256x128xf32>
    %26 = arith.addf %19, %25 : vector<256x128xf32>
    %c0_27 = arith.constant 0 : index
    %c1_28 = arith.constant 1 : index
    %c1_29 = arith.constant 1 : index
    %c0_30 = arith.constant 0 : index
    %27 = vector.load %arg1[%c0_27, %c1_28, %c1_29, %c0_30] : memref<1x18x18x4xbf16, #tpu.memory_space<vmem>>, vector<1x16x16x4xbf16>
    %28 = vector.shape_cast %27 : vector<1x16x16x4xbf16> to vector<16x16x4xbf16>
    %29 = vector.shape_cast %28 : vector<16x16x4xbf16> to vector<256x4xbf16>
    %c4 = arith.constant 4 : index
    %c0_31 = arith.constant 0 : index
    %c0_32 = arith.constant 0 : index
    %30 = vector.load %arg2[%c4, %c0_31, %c0_32] : memref<9x4x128xbf16, #tpu.memory_space<vmem>>, vector<1x4x128xbf16>
    %31 = vector.shape_cast %30 : vector<1x4x128xbf16> to vector<4x128xbf16>
    %cst_33 = arith.constant dense<0.000000e+00> : vector<256x128xf32>
    %32 = tpu.matmul %29, %31, %cst_33 {dimension_numbers = #tpu.dot_dimension_numbers<[1], [0], [0], [1], [0, 0, 1, 1], [], []>} : vector<256x4xbf16>, vector<4x128xbf16>, vector<256x128xf32> -> vector<256x128xf32>
    %33 = arith.addf %26, %32 : vector<256x128xf32>
    %c0_34 = arith.constant 0 : index
    %c1_35 = arith.constant 1 : index
    %c2_36 = arith.constant 2 : index
    %c0_37 = arith.constant 0 : index
    %34 = vector.load %arg1[%c0_34, %c1_35, %c2_36, %c0_37] : memref<1x18x18x4xbf16, #tpu.memory_space<vmem>>, vector<1x16x16x4xbf16>
    %35 = vector.shape_cast %34 : vector<1x16x16x4xbf16> to vector<16x16x4xbf16>
    %36 = vector.shape_cast %35 : vector<16x16x4xbf16> to vector<256x4xbf16>
    %c5 = arith.constant 5 : index
    %c0_38 = arith.constant 0 : index
    %c0_39 = arith.constant 0 : index
    %37 = vector.load %arg2[%c5, %c0_38, %c0_39] : memref<9x4x128xbf16, #tpu.memory_space<vmem>>, vector<1x4x128xbf16>
    %38 = vector.shape_cast %37 : vector<1x4x128xbf16> to vector<4x128xbf16>
    %cst_40 = arith.constant dense<0.000000e+00> : vector<256x128xf32>
    %39 = tpu.matmul %36, %38, %cst_40 {dimension_numbers = #tpu.dot_dimension_numbers<[1], [0], [0], [1], [0, 0, 1, 1], [], []>} : vector<256x4xbf16>, vector<4x128xbf16>, vector<256x128xf32> -> vector<256x128xf32>
    %40 = arith.addf %33, %39 : vector<256x128xf32>
    %c0_41 = arith.constant 0 : index
    %c2_42 = arith.constant 2 : index
    %c0_43 = arith.constant 0 : index
    %c0_44 = arith.constant 0 : index
    %41 = vector.load %arg1[%c0_41, %c2_42, %c0_43, %c0_44] : memref<1x18x18x4xbf16, #tpu.memory_space<vmem>>, vector<1x16x16x4xbf16>
    %42 = vector.shape_cast %41 : vector<1x16x16x4xbf16> to vector<16x16x4xbf16>
    %43 = vector.shape_cast %42 : vector<16x16x4xbf16> to vector<256x4xbf16>
    %c6 = arith.constant 6 : index
    %c0_45 = arith.constant 0 : index
    %c0_46 = arith.constant 0 : index
    %44 = vector.load %arg2[%c6, %c0_45, %c0_46] : memref<9x4x128xbf16, #tpu.memory_space<vmem>>, vector<1x4x128xbf16>
    %45 = vector.shape_cast %44 : vector<1x4x128xbf16> to vector<4x128xbf16>
    %cst_47 = arith.constant dense<0.000000e+00> : vector<256x128xf32>
    %46 = tpu.matmul %43, %45, %cst_47 {dimension_numbers = #tpu.dot_dimension_numbers<[1], [0], [0], [1], [0, 0, 1, 1], [], []>} : vector<256x4xbf16>, vector<4x128xbf16>, vector<256x128xf32> -> vector<256x128xf32>
    %47 = arith.addf %40, %46 : vector<256x128xf32>
    %c0_48 = arith.constant 0 : index
    %c2_49 = arith.constant 2 : index
    %c1_50 = arith.constant 1 : index
    %c0_51 = arith.constant 0 : index
    %48 = vector.load %arg1[%c0_48, %c2_49, %c1_50, %c0_51] : memref<1x18x18x4xbf16, #tpu.memory_space<vmem>>, vector<1x16x16x4xbf16>
    %49 = vector.shape_cast %48 : vector<1x16x16x4xbf16> to vector<16x16x4xbf16>
    %50 = vector.shape_cast %49 : vector<16x16x4xbf16> to vector<256x4xbf16>
    %c7 = arith.constant 7 : index
    %c0_52 = arith.constant 0 : index
    %c0_53 = arith.constant 0 : index
    %51 = vector.load %arg2[%c7, %c0_52, %c0_53] : memref<9x4x128xbf16, #tpu.memory_space<vmem>>, vector<1x4x128xbf16>
    %52 = vector.shape_cast %51 : vector<1x4x128xbf16> to vector<4x128xbf16>
    %cst_54 = arith.constant dense<0.000000e+00> : vector<256x128xf32>
    %53 = tpu.matmul %50, %52, %cst_54 {dimension_numbers = #tpu.dot_dimension_numbers<[1], [0], [0], [1], [0, 0, 1, 1], [], []>} : vector<256x4xbf16>, vector<4x128xbf16>, vector<256x128xf32> -> vector<256x128xf32>
    %54 = arith.addf %47, %53 : vector<256x128xf32>
    %c0_55 = arith.constant 0 : index
    %c2_56 = arith.constant 2 : index
    %c2_57 = arith.constant 2 : index
    %c0_58 = arith.constant 0 : index
    %55 = vector.load %arg1[%c0_55, %c2_56, %c2_57, %c0_58] : memref<1x18x18x4xbf16, #tpu.memory_space<vmem>>, vector<1x16x16x4xbf16>
    %56 = vector.shape_cast %55 : vector<1x16x16x4xbf16> to vector<16x16x4xbf16>
    %57 = vector.shape_cast %56 : vector<16x16x4xbf16> to vector<256x4xbf16>
    %c8 = arith.constant 8 : index
    %c0_59 = arith.constant 0 : index
    %c0_60 = arith.constant 0 : index
    %58 = vector.load %arg2[%c8, %c0_59, %c0_60] : memref<9x4x128xbf16, #tpu.memory_space<vmem>>, vector<1x4x128xbf16>
    %59 = vector.shape_cast %58 : vector<1x4x128xbf16> to vector<4x128xbf16>
    %cst_61 = arith.constant dense<0.000000e+00> : vector<256x128xf32>
    %60 = tpu.matmul %57, %59, %cst_61 {dimension_numbers = #tpu.dot_dimension_numbers<[1], [0], [0], [1], [0, 0, 1, 1], [], []>} : vector<256x4xbf16>, vector<4x128xbf16>, vector<256x128xf32> -> vector<256x128xf32>
    %61 = arith.addf %54, %60 : vector<256x128xf32>
    %c0_62 = arith.constant 0 : index
    %c0_63 = arith.constant 0 : index
    %62 = vector.load %arg3[%c0_62, %c0_63] : memref<1x128xf32, #tpu.memory_space<vmem>>, vector<1x128xf32>
    %63 = vector.broadcast %62 : vector<1x128xf32> to vector<256x128xf32>
    %64 = arith.addf %61, %63 : vector<256x128xf32>
    %65 = arith.truncf %64 : vector<256x128xf32> to vector<256x128xbf16>
    %c0_64 = arith.constant 0 : index
    %c0_65 = arith.constant 0 : index
    %c0_66 = arith.constant 0 : index
    %66 = vector.load %arg4[%c0_64, %c0_65, %c0_66] : memref<1x256x128xbf16, #tpu.memory_space<vmem>>, vector<1x256x128xbf16>
    %67 = vector.shape_cast %66 : vector<1x256x128xbf16> to vector<256x128xbf16>
    %68 = vector.shape_cast %65 : vector<256x128xbf16> to vector<1x256x128xbf16>
    tpu.vector_store %arg4[%c0_64, %c0_65, %c0_66], %68 {strides = array<i32>} : memref<1x256x128xbf16, #tpu.memory_space<vmem>>, vector<1x256x128xbf16>,
    return
  }
  func.func @transform_0(%arg0: i32) -> (i32, i32, i32, i32) {
    %c0_i32 = arith.constant 0 : i32
    %c0_i32_0 = arith.constant 0 : i32
    %c0_i32_1 = arith.constant 0 : i32
    %c0_i32_2 = arith.constant 0 : i32
    return %arg0, %c0_i32, %c0_i32_0, %c0_i32_1 : i32, i32, i32, i32
  }
  func.func @transform_1(%arg0: i32) -> (i32, i32, i32) {
    %c0_i32 = arith.constant 0 : i32
    %c0_i32_0 = arith.constant 0 : i32
    %c0_i32_1 = arith.constant 0 : i32
    %c0_i32_2 = arith.constant 0 : i32
    return %c0_i32, %c0_i32_0, %c0_i32_1 : i32, i32, i32
  }
  func.func @transform_2(%arg0: i32) -> (i32, i32) {
    %c0_i32 = arith.constant 0 : i32
    %c0_i32_0 = arith.constant 0 : i32
    %c0_i32_1 = arith.constant 0 : i32
    return %c0_i32, %c0_i32_0 : i32, i32
  }
  func.func @transform_3(%arg0: i32) -> (i32, i32, i32) {
    %c0_i32 = arith.constant 0 : i32
    %c0_i32_0 = arith.constant 0 : i32
    %c0_i32_1 = arith.constant 0 : i32
    return %arg0, %c0_i32, %c0_i32_0 : i32, i32, i32
  }
}

module attributes {stable_mosaic.version = 11 : i64} {
  func.func @kernel(%arg0: i32, %arg1: memref<4x9x9x128xbf16, #tpu.memory_space<vmem>>, %arg2: memref<9x128x128xbf16, #tpu.memory_space<vmem>>, %arg3: memref<1x128xf32, #tpu.memory_space<vmem>>, %arg4: memref<1x64x128xbf16, #tpu.memory_space<vmem>>) attributes {dimension_semantics = [#tpu.dimension_semantics<parallel>], iteration_bounds = array<i64: 2>, scalar_prefetch = 0 : i64, scratch_operands = 0 : i64, tpu.core_type = #tpu.core_type<tc>, window_params = [{transform_indices = @transform_0, window_bounds = array<i64: 4, 9, 9, 128>}, {pipeline_mode = #tpu.pipeline_mode<synchronous>, transform_indices = @transform_1, window_bounds = array<i64: 9, 128, 128>}, {pipeline_mode = #tpu.pipeline_mode<synchronous>, transform_indices = @transform_2, window_bounds = array<i64: 1, 128>}, {transform_indices = @transform_3, window_bounds = array<i64: 1, 64, 128>}]} {
    %c0 = arith.constant 0 : index
    %c0_0 = arith.constant 0 : index
    %c0_1 = arith.constant 0 : index
    %c0_2 = arith.constant 0 : index
    %0 = vector.load %arg1[%c0, %c0_0, %c0_1, %c0_2] : memref<4x9x9x128xbf16, #tpu.memory_space<vmem>>, vector<1x8x8x128xbf16>
    %1 = vector.shape_cast %0 : vector<1x8x8x128xbf16> to vector<8x8x128xbf16>
    %2 = vector.shape_cast %1 : vector<8x8x128xbf16> to vector<64x128xbf16>
    %c0_3 = arith.constant 0 : index
    %c0_4 = arith.constant 0 : index
    %c0_5 = arith.constant 0 : index
    %3 = vector.load %arg2[%c0_3, %c0_4, %c0_5] : memref<9x128x128xbf16, #tpu.memory_space<vmem>>, vector<1x128x128xbf16>
    %4 = vector.shape_cast %3 : vector<1x128x128xbf16> to vector<128x128xbf16>
    %cst = arith.constant dense<0.000000e+00> : vector<64x128xf32>
    %5 = tpu.matmul %2, %4, %cst {dimension_numbers = #tpu.dot_dimension_numbers<[1], [0], [0], [1], [0, 0, 1, 1], [], []>} : vector<64x128xbf16>, vector<128x128xbf16>, vector<64x128xf32> -> vector<64x128xf32>
    %c1 = arith.constant 1 : index
    %c0_6 = arith.constant 0 : index
    %c0_7 = arith.constant 0 : index
    %c0_8 = arith.constant 0 : index
    %6 = vector.load %arg1[%c1, %c0_6, %c0_7, %c0_8] : memref<4x9x9x128xbf16, #tpu.memory_space<vmem>>, vector<1x8x8x128xbf16>
    %7 = vector.shape_cast %6 : vector<1x8x8x128xbf16> to vector<8x8x128xbf16>
    %8 = vector.shape_cast %7 : vector<8x8x128xbf16> to vector<64x128xbf16>
    %c1_9 = arith.constant 1 : index
    %c0_10 = arith.constant 0 : index
    %c0_11 = arith.constant 0 : index
    %9 = vector.load %arg2[%c1_9, %c0_10, %c0_11] : memref<9x128x128xbf16, #tpu.memory_space<vmem>>, vector<1x128x128xbf16>
    %10 = vector.shape_cast %9 : vector<1x128x128xbf16> to vector<128x128xbf16>
    %cst_12 = arith.constant dense<0.000000e+00> : vector<64x128xf32>
    %11 = tpu.matmul %8, %10, %cst_12 {dimension_numbers = #tpu.dot_dimension_numbers<[1], [0], [0], [1], [0, 0, 1, 1], [], []>} : vector<64x128xbf16>, vector<128x128xbf16>, vector<64x128xf32> -> vector<64x128xf32>
    %12 = arith.addf %5, %11 : vector<64x128xf32>
    %c0_13 = arith.constant 0 : index
    %c0_14 = arith.constant 0 : index
    %c1_15 = arith.constant 1 : index
    %c0_16 = arith.constant 0 : index
    %13 = vector.load %arg1[%c0_13, %c0_14, %c1_15, %c0_16] : memref<4x9x9x128xbf16, #tpu.memory_space<vmem>>, vector<1x8x8x128xbf16>
    %14 = vector.shape_cast %13 : vector<1x8x8x128xbf16> to vector<8x8x128xbf16>
    %15 = vector.shape_cast %14 : vector<8x8x128xbf16> to vector<64x128xbf16>
    %c2 = arith.constant 2 : index
    %c0_17 = arith.constant 0 : index
    %c0_18 = arith.constant 0 : index
    %16 = vector.load %arg2[%c2, %c0_17, %c0_18] : memref<9x128x128xbf16, #tpu.memory_space<vmem>>, vector<1x128x128xbf16>
    %17 = vector.shape_cast %16 : vector<1x128x128xbf16> to vector<128x128xbf16>
    %cst_19 = arith.constant dense<0.000000e+00> : vector<64x128xf32>
    %18 = tpu.matmul %15, %17, %cst_19 {dimension_numbers = #tpu.dot_dimension_numbers<[1], [0], [0], [1], [0, 0, 1, 1], [], []>} : vector<64x128xbf16>, vector<128x128xbf16>, vector<64x128xf32> -> vector<64x128xf32>
    %19 = arith.addf %12, %18 : vector<64x128xf32>
    %c2_20 = arith.constant 2 : index
    %c0_21 = arith.constant 0 : index
    %c0_22 = arith.constant 0 : index
    %c0_23 = arith.constant 0 : index
    %20 = vector.load %arg1[%c2_20, %c0_21, %c0_22, %c0_23] : memref<4x9x9x128xbf16, #tpu.memory_space<vmem>>, vector<1x8x8x128xbf16>
    %21 = vector.shape_cast %20 : vector<1x8x8x128xbf16> to vector<8x8x128xbf16>
    %22 = vector.shape_cast %21 : vector<8x8x128xbf16> to vector<64x128xbf16>
    %c3 = arith.constant 3 : index
    %c0_24 = arith.constant 0 : index
    %c0_25 = arith.constant 0 : index
    %23 = vector.load %arg2[%c3, %c0_24, %c0_25] : memref<9x128x128xbf16, #tpu.memory_space<vmem>>, vector<1x128x128xbf16>
    %24 = vector.shape_cast %23 : vector<1x128x128xbf16> to vector<128x128xbf16>
    %cst_26 = arith.constant dense<0.000000e+00> : vector<64x128xf32>
    %25 = tpu.matmul %22, %24, %cst_26 {dimension_numbers = #tpu.dot_dimension_numbers<[1], [0], [0], [1], [0, 0, 1, 1], [], []>} : vector<64x128xbf16>, vector<128x128xbf16>, vector<64x128xf32> -> vector<64x128xf32>
    %26 = arith.addf %19, %25 : vector<64x128xf32>
    %c3_27 = arith.constant 3 : index
    %c0_28 = arith.constant 0 : index
    %c0_29 = arith.constant 0 : index
    %c0_30 = arith.constant 0 : index
    %27 = vector.load %arg1[%c3_27, %c0_28, %c0_29, %c0_30] : memref<4x9x9x128xbf16, #tpu.memory_space<vmem>>, vector<1x8x8x128xbf16>
    %28 = vector.shape_cast %27 : vector<1x8x8x128xbf16> to vector<8x8x128xbf16>
    %29 = vector.shape_cast %28 : vector<8x8x128xbf16> to vector<64x128xbf16>
    %c4 = arith.constant 4 : index
    %c0_31 = arith.constant 0 : index
    %c0_32 = arith.constant 0 : index
    %30 = vector.load %arg2[%c4, %c0_31, %c0_32] : memref<9x128x128xbf16, #tpu.memory_space<vmem>>, vector<1x128x128xbf16>
    %31 = vector.shape_cast %30 : vector<1x128x128xbf16> to vector<128x128xbf16>
    %cst_33 = arith.constant dense<0.000000e+00> : vector<64x128xf32>
    %32 = tpu.matmul %29, %31, %cst_33 {dimension_numbers = #tpu.dot_dimension_numbers<[1], [0], [0], [1], [0, 0, 1, 1], [], []>} : vector<64x128xbf16>, vector<128x128xbf16>, vector<64x128xf32> -> vector<64x128xf32>
    %33 = arith.addf %26, %32 : vector<64x128xf32>
    %c2_34 = arith.constant 2 : index
    %c0_35 = arith.constant 0 : index
    %c1_36 = arith.constant 1 : index
    %c0_37 = arith.constant 0 : index
    %34 = vector.load %arg1[%c2_34, %c0_35, %c1_36, %c0_37] : memref<4x9x9x128xbf16, #tpu.memory_space<vmem>>, vector<1x8x8x128xbf16>
    %35 = vector.shape_cast %34 : vector<1x8x8x128xbf16> to vector<8x8x128xbf16>
    %36 = vector.shape_cast %35 : vector<8x8x128xbf16> to vector<64x128xbf16>
    %c5 = arith.constant 5 : index
    %c0_38 = arith.constant 0 : index
    %c0_39 = arith.constant 0 : index
    %37 = vector.load %arg2[%c5, %c0_38, %c0_39] : memref<9x128x128xbf16, #tpu.memory_space<vmem>>, vector<1x128x128xbf16>
    %38 = vector.shape_cast %37 : vector<1x128x128xbf16> to vector<128x128xbf16>
    %cst_40 = arith.constant dense<0.000000e+00> : vector<64x128xf32>
    %39 = tpu.matmul %36, %38, %cst_40 {dimension_numbers = #tpu.dot_dimension_numbers<[1], [0], [0], [1], [0, 0, 1, 1], [], []>} : vector<64x128xbf16>, vector<128x128xbf16>, vector<64x128xf32> -> vector<64x128xf32>
    %40 = arith.addf %33, %39 : vector<64x128xf32>
    %c0_41 = arith.constant 0 : index
    %c1_42 = arith.constant 1 : index
    %c0_43 = arith.constant 0 : index
    %c0_44 = arith.constant 0 : index
    %41 = vector.load %arg1[%c0_41, %c1_42, %c0_43, %c0_44] : memref<4x9x9x128xbf16, #tpu.memory_space<vmem>>, vector<1x8x8x128xbf16>
    %42 = vector.shape_cast %41 : vector<1x8x8x128xbf16> to vector<8x8x128xbf16>
    %43 = vector.shape_cast %42 : vector<8x8x128xbf16> to vector<64x128xbf16>
    %c6 = arith.constant 6 : index
    %c0_45 = arith.constant 0 : index
    %c0_46 = arith.constant 0 : index
    %44 = vector.load %arg2[%c6, %c0_45, %c0_46] : memref<9x128x128xbf16, #tpu.memory_space<vmem>>, vector<1x128x128xbf16>
    %45 = vector.shape_cast %44 : vector<1x128x128xbf16> to vector<128x128xbf16>
    %cst_47 = arith.constant dense<0.000000e+00> : vector<64x128xf32>
    %46 = tpu.matmul %43, %45, %cst_47 {dimension_numbers = #tpu.dot_dimension_numbers<[1], [0], [0], [1], [0, 0, 1, 1], [], []>} : vector<64x128xbf16>, vector<128x128xbf16>, vector<64x128xf32> -> vector<64x128xf32>
    %47 = arith.addf %40, %46 : vector<64x128xf32>
    %c1_48 = arith.constant 1 : index
    %c1_49 = arith.constant 1 : index
    %c0_50 = arith.constant 0 : index
    %c0_51 = arith.constant 0 : index
    %48 = vector.load %arg1[%c1_48, %c1_49, %c0_50, %c0_51] : memref<4x9x9x128xbf16, #tpu.memory_space<vmem>>, vector<1x8x8x128xbf16>
    %49 = vector.shape_cast %48 : vector<1x8x8x128xbf16> to vector<8x8x128xbf16>
    %50 = vector.shape_cast %49 : vector<8x8x128xbf16> to vector<64x128xbf16>
    %c7 = arith.constant 7 : index
    %c0_52 = arith.constant 0 : index
    %c0_53 = arith.constant 0 : index
    %51 = vector.load %arg2[%c7, %c0_52, %c0_53] : memref<9x128x128xbf16, #tpu.memory_space<vmem>>, vector<1x128x128xbf16>
    %52 = vector.shape_cast %51 : vector<1x128x128xbf16> to vector<128x128xbf16>
    %cst_54 = arith.constant dense<0.000000e+00> : vector<64x128xf32>
    %53 = tpu.matmul %50, %52, %cst_54 {dimension_numbers = #tpu.dot_dimension_numbers<[1], [0], [0], [1], [0, 0, 1, 1], [], []>} : vector<64x128xbf16>, vector<128x128xbf16>, vector<64x128xf32> -> vector<64x128xf32>
    %54 = arith.addf %47, %53 : vector<64x128xf32>
    %c0_55 = arith.constant 0 : index
    %c1_56 = arith.constant 1 : index
    %c1_57 = arith.constant 1 : index
    %c0_58 = arith.constant 0 : index
    %55 = vector.load %arg1[%c0_55, %c1_56, %c1_57, %c0_58] : memref<4x9x9x128xbf16, #tpu.memory_space<vmem>>, vector<1x8x8x128xbf16>
    %56 = vector.shape_cast %55 : vector<1x8x8x128xbf16> to vector<8x8x128xbf16>
    %57 = vector.shape_cast %56 : vector<8x8x128xbf16> to vector<64x128xbf16>
    %c8 = arith.constant 8 : index
    %c0_59 = arith.constant 0 : index
    %c0_60 = arith.constant 0 : index
    %58 = vector.load %arg2[%c8, %c0_59, %c0_60] : memref<9x128x128xbf16, #tpu.memory_space<vmem>>, vector<1x128x128xbf16>
    %59 = vector.shape_cast %58 : vector<1x128x128xbf16> to vector<128x128xbf16>
    %cst_61 = arith.constant dense<0.000000e+00> : vector<64x128xf32>
    %60 = tpu.matmul %57, %59, %cst_61 {dimension_numbers = #tpu.dot_dimension_numbers<[1], [0], [0], [1], [0, 0, 1, 1], [], []>} : vector<64x128xbf16>, vector<128x128xbf16>, vector<64x128xf32> -> vector<64x128xf32>
    %61 = arith.addf %54, %60 : vector<64x128xf32>
    %c1_62 = arith.constant 1 : index
    %c0_63 = arith.constant 0 : index
    %c0_64 = arith.constant 0 : index
    %c0_65 = arith.constant 0 : index
    %62 = vector.load %arg1[%c1_62, %c0_63, %c0_64, %c0_65] : memref<4x9x9x128xbf16, #tpu.memory_space<vmem>>, vector<1x8x8x128xbf16>
    %63 = vector.shape_cast %62 : vector<1x8x8x128xbf16> to vector<8x8x128xbf16>
    %64 = vector.shape_cast %63 : vector<8x8x128xbf16> to vector<64x128xbf16>
    %c0_66 = arith.constant 0 : index
    %c0_67 = arith.constant 0 : index
    %c0_68 = arith.constant 0 : index
    %65 = vector.load %arg2[%c0_66, %c0_67, %c0_68] : memref<9x128x128xbf16, #tpu.memory_space<vmem>>, vector<1x128x128xbf16>
    %66 = vector.shape_cast %65 : vector<1x128x128xbf16> to vector<128x128xbf16>
    %cst_69 = arith.constant dense<0.000000e+00> : vector<64x128xf32>
    %67 = tpu.matmul %64, %66, %cst_69 {dimension_numbers = #tpu.dot_dimension_numbers<[1], [0], [0], [1], [0, 0, 1, 1], [], []>} : vector<64x128xbf16>, vector<128x128xbf16>, vector<64x128xf32> -> vector<64x128xf32>
    %c0_70 = arith.constant 0 : index
    %c0_71 = arith.constant 0 : index
    %c1_72 = arith.constant 1 : index
    %c0_73 = arith.constant 0 : index
    %68 = vector.load %arg1[%c0_70, %c0_71, %c1_72, %c0_73] : memref<4x9x9x128xbf16, #tpu.memory_space<vmem>>, vector<1x8x8x128xbf16>
    %69 = vector.shape_cast %68 : vector<1x8x8x128xbf16> to vector<8x8x128xbf16>
    %70 = vector.shape_cast %69 : vector<8x8x128xbf16> to vector<64x128xbf16>
    %c1_74 = arith.constant 1 : index
    %c0_75 = arith.constant 0 : index
    %c0_76 = arith.constant 0 : index
    %71 = vector.load %arg2[%c1_74, %c0_75, %c0_76] : memref<9x128x128xbf16, #tpu.memory_space<vmem>>, vector<1x128x128xbf16>
    %72 = vector.shape_cast %71 : vector<1x128x128xbf16> to vector<128x128xbf16>
    %cst_77 = arith.constant dense<0.000000e+00> : vector<64x128xf32>
    %73 = tpu.matmul %70, %72, %cst_77 {dimension_numbers = #tpu.dot_dimension_numbers<[1], [0], [0], [1], [0, 0, 1, 1], [], []>} : vector<64x128xbf16>, vector<128x128xbf16>, vector<64x128xf32> -> vector<64x128xf32>
    %74 = arith.addf %67, %73 : vector<64x128xf32>
    %c1_78 = arith.constant 1 : index
    %c0_79 = arith.constant 0 : index
    %c1_80 = arith.constant 1 : index
    %c0_81 = arith.constant 0 : index
    %75 = vector.load %arg1[%c1_78, %c0_79, %c1_80, %c0_81] : memref<4x9x9x128xbf16, #tpu.memory_space<vmem>>, vector<1x8x8x128xbf16>
    %76 = vector.shape_cast %75 : vector<1x8x8x128xbf16> to vector<8x8x128xbf16>
    %77 = vector.shape_cast %76 : vector<8x8x128xbf16> to vector<64x128xbf16>
    %c2_82 = arith.constant 2 : index
    %c0_83 = arith.constant 0 : index
    %c0_84 = arith.constant 0 : index
    %78 = vector.load %arg2[%c2_82, %c0_83, %c0_84] : memref<9x128x128xbf16, #tpu.memory_space<vmem>>, vector<1x128x128xbf16>
    %79 = vector.shape_cast %78 : vector<1x128x128xbf16> to vector<128x128xbf16>
    %cst_85 = arith.constant dense<0.000000e+00> : vector<64x128xf32>
    %80 = tpu.matmul %77, %79, %cst_85 {dimension_numbers = #tpu.dot_dimension_numbers<[1], [0], [0], [1], [0, 0, 1, 1], [], []>} : vector<64x128xbf16>, vector<128x128xbf16>, vector<64x128xf32> -> vector<64x128xf32>
    %81 = arith.addf %74, %80 : vector<64x128xf32>
    %c3_86 = arith.constant 3 : index
    %c0_87 = arith.constant 0 : index
    %c0_88 = arith.constant 0 : index
    %c0_89 = arith.constant 0 : index
    %82 = vector.load %arg1[%c3_86, %c0_87, %c0_88, %c0_89] : memref<4x9x9x128xbf16, #tpu.memory_space<vmem>>, vector<1x8x8x128xbf16>
    %83 = vector.shape_cast %82 : vector<1x8x8x128xbf16> to vector<8x8x128xbf16>
    %84 = vector.shape_cast %83 : vector<8x8x128xbf16> to vector<64x128xbf16>
    %c3_90 = arith.constant 3 : index
    %c0_91 = arith.constant 0 : index
    %c0_92 = arith.constant 0 : index
    %85 = vector.load %arg2[%c3_90, %c0_91, %c0_92] : memref<9x128x128xbf16, #tpu.memory_space<vmem>>, vector<1x128x128xbf16>
    %86 = vector.shape_cast %85 : vector<1x128x128xbf16> to vector<128x128xbf16>
    %cst_93 = arith.constant dense<0.000000e+00> : vector<64x128xf32>
    %87 = tpu.matmul %84, %86, %cst_93 {dimension_numbers = #tpu.dot_dimension_numbers<[1], [0], [0], [1], [0, 0, 1, 1], [], []>} : vector<64x128xbf16>, vector<128x128xbf16>, vector<64x128xf32> -> vector<64x128xf32>
    %88 = arith.addf %81, %87 : vector<64x128xf32>
    %c2_94 = arith.constant 2 : index
    %c0_95 = arith.constant 0 : index
    %c1_96 = arith.constant 1 : index
    %c0_97 = arith.constant 0 : index
    %89 = vector.load %arg1[%c2_94, %c0_95, %c1_96, %c0_97] : memref<4x9x9x128xbf16, #tpu.memory_space<vmem>>, vector<1x8x8x128xbf16>
    %90 = vector.shape_cast %89 : vector<1x8x8x128xbf16> to vector<8x8x128xbf16>
    %91 = vector.shape_cast %90 : vector<8x8x128xbf16> to vector<64x128xbf16>
    %c4_98 = arith.constant 4 : index
    %c0_99 = arith.constant 0 : index
    %c0_100 = arith.constant 0 : index
    %92 = vector.load %arg2[%c4_98, %c0_99, %c0_100] : memref<9x128x128xbf16, #tpu.memory_space<vmem>>, vector<1x128x128xbf16>
    %93 = vector.shape_cast %92 : vector<1x128x128xbf16> to vector<128x128xbf16>
    %cst_101 = arith.constant dense<0.000000e+00> : vector<64x128xf32>
    %94 = tpu.matmul %91, %93, %cst_101 {dimension_numbers = #tpu.dot_dimension_numbers<[1], [0], [0], [1], [0, 0, 1, 1], [], []>} : vector<64x128xbf16>, vector<128x128xbf16>, vector<64x128xf32> -> vector<64x128xf32>
    %95 = arith.addf %88, %94 : vector<64x128xf32>
    %c3_102 = arith.constant 3 : index
    %c0_103 = arith.constant 0 : index
    %c1_104 = arith.constant 1 : index
    %c0_105 = arith.constant 0 : index
    %96 = vector.load %arg1[%c3_102, %c0_103, %c1_104, %c0_105] : memref<4x9x9x128xbf16, #tpu.memory_space<vmem>>, vector<1x8x8x128xbf16>
    %97 = vector.shape_cast %96 : vector<1x8x8x128xbf16> to vector<8x8x128xbf16>
    %98 = vector.shape_cast %97 : vector<8x8x128xbf16> to vector<64x128xbf16>
    %c5_106 = arith.constant 5 : index
    %c0_107 = arith.constant 0 : index
    %c0_108 = arith.constant 0 : index
    %99 = vector.load %arg2[%c5_106, %c0_107, %c0_108] : memref<9x128x128xbf16, #tpu.memory_space<vmem>>, vector<1x128x128xbf16>
    %100 = vector.shape_cast %99 : vector<1x128x128xbf16> to vector<128x128xbf16>
    %cst_109 = arith.constant dense<0.000000e+00> : vector<64x128xf32>
    %101 = tpu.matmul %98, %100, %cst_109 {dimension_numbers = #tpu.dot_dimension_numbers<[1], [0], [0], [1], [0, 0, 1, 1], [], []>} : vector<64x128xbf16>, vector<128x128xbf16>, vector<64x128xf32> -> vector<64x128xf32>
    %102 = arith.addf %95, %101 : vector<64x128xf32>
    %c1_110 = arith.constant 1 : index
    %c1_111 = arith.constant 1 : index
    %c0_112 = arith.constant 0 : index
    %c0_113 = arith.constant 0 : index
    %103 = vector.load %arg1[%c1_110, %c1_111, %c0_112, %c0_113] : memref<4x9x9x128xbf16, #tpu.memory_space<vmem>>, vector<1x8x8x128xbf16>
    %104 = vector.shape_cast %103 : vector<1x8x8x128xbf16> to vector<8x8x128xbf16>
    %105 = vector.shape_cast %104 : vector<8x8x128xbf16> to vector<64x128xbf16>
    %c6_114 = arith.constant 6 : index
    %c0_115 = arith.constant 0 : index
    %c0_116 = arith.constant 0 : index
    %106 = vector.load %arg2[%c6_114, %c0_115, %c0_116] : memref<9x128x128xbf16, #tpu.memory_space<vmem>>, vector<1x128x128xbf16>
    %107 = vector.shape_cast %106 : vector<1x128x128xbf16> to vector<128x128xbf16>
    %cst_117 = arith.constant dense<0.000000e+00> : vector<64x128xf32>
    %108 = tpu.matmul %105, %107, %cst_117 {dimension_numbers = #tpu.dot_dimension_numbers<[1], [0], [0], [1], [0, 0, 1, 1], [], []>} : vector<64x128xbf16>, vector<128x128xbf16>, vector<64x128xf32> -> vector<64x128xf32>
    %109 = arith.addf %102, %108 : vector<64x128xf32>
    %c0_118 = arith.constant 0 : index
    %c1_119 = arith.constant 1 : index
    %c1_120 = arith.constant 1 : index
    %c0_121 = arith.constant 0 : index
    %110 = vector.load %arg1[%c0_118, %c1_119, %c1_120, %c0_121] : memref<4x9x9x128xbf16, #tpu.memory_space<vmem>>, vector<1x8x8x128xbf16>
    %111 = vector.shape_cast %110 : vector<1x8x8x128xbf16> to vector<8x8x128xbf16>
    %112 = vector.shape_cast %111 : vector<8x8x128xbf16> to vector<64x128xbf16>
    %c7_122 = arith.constant 7 : index
    %c0_123 = arith.constant 0 : index
    %c0_124 = arith.constant 0 : index
    %113 = vector.load %arg2[%c7_122, %c0_123, %c0_124] : memref<9x128x128xbf16, #tpu.memory_space<vmem>>, vector<1x128x128xbf16>
    %114 = vector.shape_cast %113 : vector<1x128x128xbf16> to vector<128x128xbf16>
    %cst_125 = arith.constant dense<0.000000e+00> : vector<64x128xf32>
    %115 = tpu.matmul %112, %114, %cst_125 {dimension_numbers = #tpu.dot_dimension_numbers<[1], [0], [0], [1], [0, 0, 1, 1], [], []>} : vector<64x128xbf16>, vector<128x128xbf16>, vector<64x128xf32> -> vector<64x128xf32>
    %116 = arith.addf %109, %115 : vector<64x128xf32>
    %c1_126 = arith.constant 1 : index
    %c1_127 = arith.constant 1 : index
    %c1_128 = arith.constant 1 : index
    %c0_129 = arith.constant 0 : index
    %117 = vector.load %arg1[%c1_126, %c1_127, %c1_128, %c0_129] : memref<4x9x9x128xbf16, #tpu.memory_space<vmem>>, vector<1x8x8x128xbf16>
    %118 = vector.shape_cast %117 : vector<1x8x8x128xbf16> to vector<8x8x128xbf16>
    %119 = vector.shape_cast %118 : vector<8x8x128xbf16> to vector<64x128xbf16>
    %c8_130 = arith.constant 8 : index
    %c0_131 = arith.constant 0 : index
    %c0_132 = arith.constant 0 : index
    %120 = vector.load %arg2[%c8_130, %c0_131, %c0_132] : memref<9x128x128xbf16, #tpu.memory_space<vmem>>, vector<1x128x128xbf16>
    %121 = vector.shape_cast %120 : vector<1x128x128xbf16> to vector<128x128xbf16>
    %cst_133 = arith.constant dense<0.000000e+00> : vector<64x128xf32>
    %122 = tpu.matmul %119, %121, %cst_133 {dimension_numbers = #tpu.dot_dimension_numbers<[1], [0], [0], [1], [0, 0, 1, 1], [], []>} : vector<64x128xbf16>, vector<128x128xbf16>, vector<64x128xf32> -> vector<64x128xf32>
    %123 = arith.addf %116, %122 : vector<64x128xf32>
    %124 = arith.maximumf %61, %123 : vector<64x128xf32>
    %c2_134 = arith.constant 2 : index
    %c0_135 = arith.constant 0 : index
    %c0_136 = arith.constant 0 : index
    %c0_137 = arith.constant 0 : index
    %125 = vector.load %arg1[%c2_134, %c0_135, %c0_136, %c0_137] : memref<4x9x9x128xbf16, #tpu.memory_space<vmem>>, vector<1x8x8x128xbf16>
    %126 = vector.shape_cast %125 : vector<1x8x8x128xbf16> to vector<8x8x128xbf16>
    %127 = vector.shape_cast %126 : vector<8x8x128xbf16> to vector<64x128xbf16>
    %c0_138 = arith.constant 0 : index
    %c0_139 = arith.constant 0 : index
    %c0_140 = arith.constant 0 : index
    %128 = vector.load %arg2[%c0_138, %c0_139, %c0_140] : memref<9x128x128xbf16, #tpu.memory_space<vmem>>, vector<1x128x128xbf16>
    %129 = vector.shape_cast %128 : vector<1x128x128xbf16> to vector<128x128xbf16>
    %cst_141 = arith.constant dense<0.000000e+00> : vector<64x128xf32>
    %130 = tpu.matmul %127, %129, %cst_141 {dimension_numbers = #tpu.dot_dimension_numbers<[1], [0], [0], [1], [0, 0, 1, 1], [], []>} : vector<64x128xbf16>, vector<128x128xbf16>, vector<64x128xf32> -> vector<64x128xf32>
    %c3_142 = arith.constant 3 : index
    %c0_143 = arith.constant 0 : index
    %c0_144 = arith.constant 0 : index
    %c0_145 = arith.constant 0 : index
    %131 = vector.load %arg1[%c3_142, %c0_143, %c0_144, %c0_145] : memref<4x9x9x128xbf16, #tpu.memory_space<vmem>>, vector<1x8x8x128xbf16>
    %132 = vector.shape_cast %131 : vector<1x8x8x128xbf16> to vector<8x8x128xbf16>
    %133 = vector.shape_cast %132 : vector<8x8x128xbf16> to vector<64x128xbf16>
    %c1_146 = arith.constant 1 : index
    %c0_147 = arith.constant 0 : index
    %c0_148 = arith.constant 0 : index
    %134 = vector.load %arg2[%c1_146, %c0_147, %c0_148] : memref<9x128x128xbf16, #tpu.memory_space<vmem>>, vector<1x128x128xbf16>
    %135 = vector.shape_cast %134 : vector<1x128x128xbf16> to vector<128x128xbf16>
    %cst_149 = arith.constant dense<0.000000e+00> : vector<64x128xf32>
    %136 = tpu.matmul %133, %135, %cst_149 {dimension_numbers = #tpu.dot_dimension_numbers<[1], [0], [0], [1], [0, 0, 1, 1], [], []>} : vector<64x128xbf16>, vector<128x128xbf16>, vector<64x128xf32> -> vector<64x128xf32>
    %137 = arith.addf %130, %136 : vector<64x128xf32>
    %c2_150 = arith.constant 2 : index
    %c0_151 = arith.constant 0 : index
    %c1_152 = arith.constant 1 : index
    %c0_153 = arith.constant 0 : index
    %138 = vector.load %arg1[%c2_150, %c0_151, %c1_152, %c0_153] : memref<4x9x9x128xbf16, #tpu.memory_space<vmem>>, vector<1x8x8x128xbf16>
    %139 = vector.shape_cast %138 : vector<1x8x8x128xbf16> to vector<8x8x128xbf16>
    %140 = vector.shape_cast %139 : vector<8x8x128xbf16> to vector<64x128xbf16>
    %c2_154 = arith.constant 2 : index
    %c0_155 = arith.constant 0 : index
    %c0_156 = arith.constant 0 : index
    %141 = vector.load %arg2[%c2_154, %c0_155, %c0_156] : memref<9x128x128xbf16, #tpu.memory_space<vmem>>, vector<1x128x128xbf16>
    %142 = vector.shape_cast %141 : vector<1x128x128xbf16> to vector<128x128xbf16>
    %cst_157 = arith.constant dense<0.000000e+00> : vector<64x128xf32>
    %143 = tpu.matmul %140, %142, %cst_157 {dimension_numbers = #tpu.dot_dimension_numbers<[1], [0], [0], [1], [0, 0, 1, 1], [], []>} : vector<64x128xbf16>, vector<128x128xbf16>, vector<64x128xf32> -> vector<64x128xf32>
    %144 = arith.addf %137, %143 : vector<64x128xf32>
    %c0_158 = arith.constant 0 : index
    %c1_159 = arith.constant 1 : index
    %c0_160 = arith.constant 0 : index
    %c0_161 = arith.constant 0 : index
    %145 = vector.load %arg1[%c0_158, %c1_159, %c0_160, %c0_161] : memref<4x9x9x128xbf16, #tpu.memory_space<vmem>>, vector<1x8x8x128xbf16>
    %146 = vector.shape_cast %145 : vector<1x8x8x128xbf16> to vector<8x8x128xbf16>
    %147 = vector.shape_cast %146 : vector<8x8x128xbf16> to vector<64x128xbf16>
    %c3_162 = arith.constant 3 : index
    %c0_163 = arith.constant 0 : index
    %c0_164 = arith.constant 0 : index
    %148 = vector.load %arg2[%c3_162, %c0_163, %c0_164] : memref<9x128x128xbf16, #tpu.memory_space<vmem>>, vector<1x128x128xbf16>
    %149 = vector.shape_cast %148 : vector<1x128x128xbf16> to vector<128x128xbf16>
    %cst_165 = arith.constant dense<0.000000e+00> : vector<64x128xf32>
    %150 = tpu.matmul %147, %149, %cst_165 {dimension_numbers = #tpu.dot_dimension_numbers<[1], [0], [0], [1], [0, 0, 1, 1], [], []>} : vector<64x128xbf16>, vector<128x128xbf16>, vector<64x128xf32> -> vector<64x128xf32>
    %151 = arith.addf %144, %150 : vector<64x128xf32>
    %c1_166 = arith.constant 1 : index
    %c1_167 = arith.constant 1 : index
    %c0_168 = arith.constant 0 : index
    %c0_169 = arith.constant 0 : index
    %152 = vector.load %arg1[%c1_166, %c1_167, %c0_168, %c0_169] : memref<4x9x9x128xbf16, #tpu.memory_space<vmem>>, vector<1x8x8x128xbf16>
    %153 = vector.shape_cast %152 : vector<1x8x8x128xbf16> to vector<8x8x128xbf16>
    %154 = vector.shape_cast %153 : vector<8x8x128xbf16> to vector<64x128xbf16>
    %c4_170 = arith.constant 4 : index
    %c0_171 = arith.constant 0 : index
    %c0_172 = arith.constant 0 : index
    %155 = vector.load %arg2[%c4_170, %c0_171, %c0_172] : memref<9x128x128xbf16, #tpu.memory_space<vmem>>, vector<1x128x128xbf16>
    %156 = vector.shape_cast %155 : vector<1x128x128xbf16> to vector<128x128xbf16>
    %cst_173 = arith.constant dense<0.000000e+00> : vector<64x128xf32>
    %157 = tpu.matmul %154, %156, %cst_173 {dimension_numbers = #tpu.dot_dimension_numbers<[1], [0], [0], [1], [0, 0, 1, 1], [], []>} : vector<64x128xbf16>, vector<128x128xbf16>, vector<64x128xf32> -> vector<64x128xf32>
    %158 = arith.addf %151, %157 : vector<64x128xf32>
    %c0_174 = arith.constant 0 : index
    %c1_175 = arith.constant 1 : index
    %c1_176 = arith.constant 1 : index
    %c0_177 = arith.constant 0 : index
    %159 = vector.load %arg1[%c0_174, %c1_175, %c1_176, %c0_177] : memref<4x9x9x128xbf16, #tpu.memory_space<vmem>>, vector<1x8x8x128xbf16>
    %160 = vector.shape_cast %159 : vector<1x8x8x128xbf16> to vector<8x8x128xbf16>
    %161 = vector.shape_cast %160 : vector<8x8x128xbf16> to vector<64x128xbf16>
    %c5_178 = arith.constant 5 : index
    %c0_179 = arith.constant 0 : index
    %c0_180 = arith.constant 0 : index
    %162 = vector.load %arg2[%c5_178, %c0_179, %c0_180] : memref<9x128x128xbf16, #tpu.memory_space<vmem>>, vector<1x128x128xbf16>
    %163 = vector.shape_cast %162 : vector<1x128x128xbf16> to vector<128x128xbf16>
    %cst_181 = arith.constant dense<0.000000e+00> : vector<64x128xf32>
    %164 = tpu.matmul %161, %163, %cst_181 {dimension_numbers = #tpu.dot_dimension_numbers<[1], [0], [0], [1], [0, 0, 1, 1], [], []>} : vector<64x128xbf16>, vector<128x128xbf16>, vector<64x128xf32> -> vector<64x128xf32>
    %165 = arith.addf %158, %164 : vector<64x128xf32>
    %c2_182 = arith.constant 2 : index
    %c1_183 = arith.constant 1 : index
    %c0_184 = arith.constant 0 : index
    %c0_185 = arith.constant 0 : index
    %166 = vector.load %arg1[%c2_182, %c1_183, %c0_184, %c0_185] : memref<4x9x9x128xbf16, #tpu.memory_space<vmem>>, vector<1x8x8x128xbf16>
    %167 = vector.shape_cast %166 : vector<1x8x8x128xbf16> to vector<8x8x128xbf16>
    %168 = vector.shape_cast %167 : vector<8x8x128xbf16> to vector<64x128xbf16>
    %c6_186 = arith.constant 6 : index
    %c0_187 = arith.constant 0 : index
    %c0_188 = arith.constant 0 : index
    %169 = vector.load %arg2[%c6_186, %c0_187, %c0_188] : memref<9x128x128xbf16, #tpu.memory_space<vmem>>, vector<1x128x128xbf16>
    %170 = vector.shape_cast %169 : vector<1x128x128xbf16> to vector<128x128xbf16>
    %cst_189 = arith.constant dense<0.000000e+00> : vector<64x128xf32>
    %171 = tpu.matmul %168, %170, %cst_189 {dimension_numbers = #tpu.dot_dimension_numbers<[1], [0], [0], [1], [0, 0, 1, 1], [], []>} : vector<64x128xbf16>, vector<128x128xbf16>, vector<64x128xf32> -> vector<64x128xf32>
    %172 = arith.addf %165, %171 : vector<64x128xf32>
    %c3_190 = arith.constant 3 : index
    %c1_191 = arith.constant 1 : index
    %c0_192 = arith.constant 0 : index
    %c0_193 = arith.constant 0 : index
    %173 = vector.load %arg1[%c3_190, %c1_191, %c0_192, %c0_193] : memref<4x9x9x128xbf16, #tpu.memory_space<vmem>>, vector<1x8x8x128xbf16>
    %174 = vector.shape_cast %173 : vector<1x8x8x128xbf16> to vector<8x8x128xbf16>
    %175 = vector.shape_cast %174 : vector<8x8x128xbf16> to vector<64x128xbf16>
    %c7_194 = arith.constant 7 : index
    %c0_195 = arith.constant 0 : index
    %c0_196 = arith.constant 0 : index
    %176 = vector.load %arg2[%c7_194, %c0_195, %c0_196] : memref<9x128x128xbf16, #tpu.memory_space<vmem>>, vector<1x128x128xbf16>
    %177 = vector.shape_cast %176 : vector<1x128x128xbf16> to vector<128x128xbf16>
    %cst_197 = arith.constant dense<0.000000e+00> : vector<64x128xf32>
    %178 = tpu.matmul %175, %177, %cst_197 {dimension_numbers = #tpu.dot_dimension_numbers<[1], [0], [0], [1], [0, 0, 1, 1], [], []>} : vector<64x128xbf16>, vector<128x128xbf16>, vector<64x128xf32> -> vector<64x128xf32>
    %179 = arith.addf %172, %178 : vector<64x128xf32>
    %c2_198 = arith.constant 2 : index
    %c1_199 = arith.constant 1 : index
    %c1_200 = arith.constant 1 : index
    %c0_201 = arith.constant 0 : index
    %180 = vector.load %arg1[%c2_198, %c1_199, %c1_200, %c0_201] : memref<4x9x9x128xbf16, #tpu.memory_space<vmem>>, vector<1x8x8x128xbf16>
    %181 = vector.shape_cast %180 : vector<1x8x8x128xbf16> to vector<8x8x128xbf16>
    %182 = vector.shape_cast %181 : vector<8x8x128xbf16> to vector<64x128xbf16>
    %c8_202 = arith.constant 8 : index
    %c0_203 = arith.constant 0 : index
    %c0_204 = arith.constant 0 : index
    %183 = vector.load %arg2[%c8_202, %c0_203, %c0_204] : memref<9x128x128xbf16, #tpu.memory_space<vmem>>, vector<1x128x128xbf16>
    %184 = vector.shape_cast %183 : vector<1x128x128xbf16> to vector<128x128xbf16>
    %cst_205 = arith.constant dense<0.000000e+00> : vector<64x128xf32>
    %185 = tpu.matmul %182, %184, %cst_205 {dimension_numbers = #tpu.dot_dimension_numbers<[1], [0], [0], [1], [0, 0, 1, 1], [], []>} : vector<64x128xbf16>, vector<128x128xbf16>, vector<64x128xf32> -> vector<64x128xf32>
    %186 = arith.addf %179, %185 : vector<64x128xf32>
    %187 = arith.maximumf %124, %186 : vector<64x128xf32>
    %c3_206 = arith.constant 3 : index
    %c0_207 = arith.constant 0 : index
    %c0_208 = arith.constant 0 : index
    %c0_209 = arith.constant 0 : index
    %188 = vector.load %arg1[%c3_206, %c0_207, %c0_208, %c0_209] : memref<4x9x9x128xbf16, #tpu.memory_space<vmem>>, vector<1x8x8x128xbf16>
    %189 = vector.shape_cast %188 : vector<1x8x8x128xbf16> to vector<8x8x128xbf16>
    %190 = vector.shape_cast %189 : vector<8x8x128xbf16> to vector<64x128xbf16>
    %c0_210 = arith.constant 0 : index
    %c0_211 = arith.constant 0 : index
    %c0_212 = arith.constant 0 : index
    %191 = vector.load %arg2[%c0_210, %c0_211, %c0_212] : memref<9x128x128xbf16, #tpu.memory_space<vmem>>, vector<1x128x128xbf16>
    %192 = vector.shape_cast %191 : vector<1x128x128xbf16> to vector<128x128xbf16>
    %cst_213 = arith.constant dense<0.000000e+00> : vector<64x128xf32>
    %193 = tpu.matmul %190, %192, %cst_213 {dimension_numbers = #tpu.dot_dimension_numbers<[1], [0], [0], [1], [0, 0, 1, 1], [], []>} : vector<64x128xbf16>, vector<128x128xbf16>, vector<64x128xf32> -> vector<64x128xf32>
    %c2_214 = arith.constant 2 : index
    %c0_215 = arith.constant 0 : index
    %c1_216 = arith.constant 1 : index
    %c0_217 = arith.constant 0 : index
    %194 = vector.load %arg1[%c2_214, %c0_215, %c1_216, %c0_217] : memref<4x9x9x128xbf16, #tpu.memory_space<vmem>>, vector<1x8x8x128xbf16>
    %195 = vector.shape_cast %194 : vector<1x8x8x128xbf16> to vector<8x8x128xbf16>
    %196 = vector.shape_cast %195 : vector<8x8x128xbf16> to vector<64x128xbf16>
    %c1_218 = arith.constant 1 : index
    %c0_219 = arith.constant 0 : index
    %c0_220 = arith.constant 0 : index
    %197 = vector.load %arg2[%c1_218, %c0_219, %c0_220] : memref<9x128x128xbf16, #tpu.memory_space<vmem>>, vector<1x128x128xbf16>
    %198 = vector.shape_cast %197 : vector<1x128x128xbf16> to vector<128x128xbf16>
    %cst_221 = arith.constant dense<0.000000e+00> : vector<64x128xf32>
    %199 = tpu.matmul %196, %198, %cst_221 {dimension_numbers = #tpu.dot_dimension_numbers<[1], [0], [0], [1], [0, 0, 1, 1], [], []>} : vector<64x128xbf16>, vector<128x128xbf16>, vector<64x128xf32> -> vector<64x128xf32>
    %200 = arith.addf %193, %199 : vector<64x128xf32>
    %c3_222 = arith.constant 3 : index
    %c0_223 = arith.constant 0 : index
    %c1_224 = arith.constant 1 : index
    %c0_225 = arith.constant 0 : index
    %201 = vector.load %arg1[%c3_222, %c0_223, %c1_224, %c0_225] : memref<4x9x9x128xbf16, #tpu.memory_space<vmem>>, vector<1x8x8x128xbf16>
    %202 = vector.shape_cast %201 : vector<1x8x8x128xbf16> to vector<8x8x128xbf16>
    %203 = vector.shape_cast %202 : vector<8x8x128xbf16> to vector<64x128xbf16>
    %c2_226 = arith.constant 2 : index
    %c0_227 = arith.constant 0 : index
    %c0_228 = arith.constant 0 : index
    %204 = vector.load %arg2[%c2_226, %c0_227, %c0_228] : memref<9x128x128xbf16, #tpu.memory_space<vmem>>, vector<1x128x128xbf16>
    %205 = vector.shape_cast %204 : vector<1x128x128xbf16> to vector<128x128xbf16>
    %cst_229 = arith.constant dense<0.000000e+00> : vector<64x128xf32>
    %206 = tpu.matmul %203, %205, %cst_229 {dimension_numbers = #tpu.dot_dimension_numbers<[1], [0], [0], [1], [0, 0, 1, 1], [], []>} : vector<64x128xbf16>, vector<128x128xbf16>, vector<64x128xf32> -> vector<64x128xf32>
    %207 = arith.addf %200, %206 : vector<64x128xf32>
    %c1_230 = arith.constant 1 : index
    %c1_231 = arith.constant 1 : index
    %c0_232 = arith.constant 0 : index
    %c0_233 = arith.constant 0 : index
    %208 = vector.load %arg1[%c1_230, %c1_231, %c0_232, %c0_233] : memref<4x9x9x128xbf16, #tpu.memory_space<vmem>>, vector<1x8x8x128xbf16>
    %209 = vector.shape_cast %208 : vector<1x8x8x128xbf16> to vector<8x8x128xbf16>
    %210 = vector.shape_cast %209 : vector<8x8x128xbf16> to vector<64x128xbf16>
    %c3_234 = arith.constant 3 : index
    %c0_235 = arith.constant 0 : index
    %c0_236 = arith.constant 0 : index
    %211 = vector.load %arg2[%c3_234, %c0_235, %c0_236] : memref<9x128x128xbf16, #tpu.memory_space<vmem>>, vector<1x128x128xbf16>
    %212 = vector.shape_cast %211 : vector<1x128x128xbf16> to vector<128x128xbf16>
    %cst_237 = arith.constant dense<0.000000e+00> : vector<64x128xf32>
    %213 = tpu.matmul %210, %212, %cst_237 {dimension_numbers = #tpu.dot_dimension_numbers<[1], [0], [0], [1], [0, 0, 1, 1], [], []>} : vector<64x128xbf16>, vector<128x128xbf16>, vector<64x128xf32> -> vector<64x128xf32>
    %214 = arith.addf %207, %213 : vector<64x128xf32>
    %c0_238 = arith.constant 0 : index
    %c1_239 = arith.constant 1 : index
    %c1_240 = arith.constant 1 : index
    %c0_241 = arith.constant 0 : index
    %215 = vector.load %arg1[%c0_238, %c1_239, %c1_240, %c0_241] : memref<4x9x9x128xbf16, #tpu.memory_space<vmem>>, vector<1x8x8x128xbf16>
    %216 = vector.shape_cast %215 : vector<1x8x8x128xbf16> to vector<8x8x128xbf16>
    %217 = vector.shape_cast %216 : vector<8x8x128xbf16> to vector<64x128xbf16>
    %c4_242 = arith.constant 4 : index
    %c0_243 = arith.constant 0 : index
    %c0_244 = arith.constant 0 : index
    %218 = vector.load %arg2[%c4_242, %c0_243, %c0_244] : memref<9x128x128xbf16, #tpu.memory_space<vmem>>, vector<1x128x128xbf16>
    %219 = vector.shape_cast %218 : vector<1x128x128xbf16> to vector<128x128xbf16>
    %cst_245 = arith.constant dense<0.000000e+00> : vector<64x128xf32>
    %220 = tpu.matmul %217, %219, %cst_245 {dimension_numbers = #tpu.dot_dimension_numbers<[1], [0], [0], [1], [0, 0, 1, 1], [], []>} : vector<64x128xbf16>, vector<128x128xbf16>, vector<64x128xf32> -> vector<64x128xf32>
    %221 = arith.addf %214, %220 : vector<64x128xf32>
    %c1_246 = arith.constant 1 : index
    %c1_247 = arith.constant 1 : index
    %c1_248 = arith.constant 1 : index
    %c0_249 = arith.constant 0 : index
    %222 = vector.load %arg1[%c1_246, %c1_247, %c1_248, %c0_249] : memref<4x9x9x128xbf16, #tpu.memory_space<vmem>>, vector<1x8x8x128xbf16>
    %223 = vector.shape_cast %222 : vector<1x8x8x128xbf16> to vector<8x8x128xbf16>
    %224 = vector.shape_cast %223 : vector<8x8x128xbf16> to vector<64x128xbf16>
    %c5_250 = arith.constant 5 : index
    %c0_251 = arith.constant 0 : index
    %c0_252 = arith.constant 0 : index
    %225 = vector.load %arg2[%c5_250, %c0_251, %c0_252] : memref<9x128x128xbf16, #tpu.memory_space<vmem>>, vector<1x128x128xbf16>
    %226 = vector.shape_cast %225 : vector<1x128x128xbf16> to vector<128x128xbf16>
    %cst_253 = arith.constant dense<0.000000e+00> : vector<64x128xf32>
    %227 = tpu.matmul %224, %226, %cst_253 {dimension_numbers = #tpu.dot_dimension_numbers<[1], [0], [0], [1], [0, 0, 1, 1], [], []>} : vector<64x128xbf16>, vector<128x128xbf16>, vector<64x128xf32> -> vector<64x128xf32>
    %228 = arith.addf %221, %227 : vector<64x128xf32>
    %c3_254 = arith.constant 3 : index
    %c1_255 = arith.constant 1 : index
    %c0_256 = arith.constant 0 : index
    %c0_257 = arith.constant 0 : index
    %229 = vector.load %arg1[%c3_254, %c1_255, %c0_256, %c0_257] : memref<4x9x9x128xbf16, #tpu.memory_space<vmem>>, vector<1x8x8x128xbf16>
    %230 = vector.shape_cast %229 : vector<1x8x8x128xbf16> to vector<8x8x128xbf16>
    %231 = vector.shape_cast %230 : vector<8x8x128xbf16> to vector<64x128xbf16>
    %c6_258 = arith.constant 6 : index
    %c0_259 = arith.constant 0 : index
    %c0_260 = arith.constant 0 : index
    %232 = vector.load %arg2[%c6_258, %c0_259, %c0_260] : memref<9x128x128xbf16, #tpu.memory_space<vmem>>, vector<1x128x128xbf16>
    %233 = vector.shape_cast %232 : vector<1x128x128xbf16> to vector<128x128xbf16>
    %cst_261 = arith.constant dense<0.000000e+00> : vector<64x128xf32>
    %234 = tpu.matmul %231, %233, %cst_261 {dimension_numbers = #tpu.dot_dimension_numbers<[1], [0], [0], [1], [0, 0, 1, 1], [], []>} : vector<64x128xbf16>, vector<128x128xbf16>, vector<64x128xf32> -> vector<64x128xf32>
    %235 = arith.addf %228, %234 : vector<64x128xf32>
    %c2_262 = arith.constant 2 : index
    %c1_263 = arith.constant 1 : index
    %c1_264 = arith.constant 1 : index
    %c0_265 = arith.constant 0 : index
    %236 = vector.load %arg1[%c2_262, %c1_263, %c1_264, %c0_265] : memref<4x9x9x128xbf16, #tpu.memory_space<vmem>>, vector<1x8x8x128xbf16>
    %237 = vector.shape_cast %236 : vector<1x8x8x128xbf16> to vector<8x8x128xbf16>
    %238 = vector.shape_cast %237 : vector<8x8x128xbf16> to vector<64x128xbf16>
    %c7_266 = arith.constant 7 : index
    %c0_267 = arith.constant 0 : index
    %c0_268 = arith.constant 0 : index
    %239 = vector.load %arg2[%c7_266, %c0_267, %c0_268] : memref<9x128x128xbf16, #tpu.memory_space<vmem>>, vector<1x128x128xbf16>
    %240 = vector.shape_cast %239 : vector<1x128x128xbf16> to vector<128x128xbf16>
    %cst_269 = arith.constant dense<0.000000e+00> : vector<64x128xf32>
    %241 = tpu.matmul %238, %240, %cst_269 {dimension_numbers = #tpu.dot_dimension_numbers<[1], [0], [0], [1], [0, 0, 1, 1], [], []>} : vector<64x128xbf16>, vector<128x128xbf16>, vector<64x128xf32> -> vector<64x128xf32>
    %242 = arith.addf %235, %241 : vector<64x128xf32>
    %c3_270 = arith.constant 3 : index
    %c1_271 = arith.constant 1 : index
    %c1_272 = arith.constant 1 : index
    %c0_273 = arith.constant 0 : index
    %243 = vector.load %arg1[%c3_270, %c1_271, %c1_272, %c0_273] : memref<4x9x9x128xbf16, #tpu.memory_space<vmem>>, vector<1x8x8x128xbf16>
    %244 = vector.shape_cast %243 : vector<1x8x8x128xbf16> to vector<8x8x128xbf16>
    %245 = vector.shape_cast %244 : vector<8x8x128xbf16> to vector<64x128xbf16>
    %c8_274 = arith.constant 8 : index
    %c0_275 = arith.constant 0 : index
    %c0_276 = arith.constant 0 : index
    %246 = vector.load %arg2[%c8_274, %c0_275, %c0_276] : memref<9x128x128xbf16, #tpu.memory_space<vmem>>, vector<1x128x128xbf16>
    %247 = vector.shape_cast %246 : vector<1x128x128xbf16> to vector<128x128xbf16>
    %cst_277 = arith.constant dense<0.000000e+00> : vector<64x128xf32>
    %248 = tpu.matmul %245, %247, %cst_277 {dimension_numbers = #tpu.dot_dimension_numbers<[1], [0], [0], [1], [0, 0, 1, 1], [], []>} : vector<64x128xbf16>, vector<128x128xbf16>, vector<64x128xf32> -> vector<64x128xf32>
    %249 = arith.addf %242, %248 : vector<64x128xf32>
    %250 = arith.maximumf %187, %249 : vector<64x128xf32>
    %c0_278 = arith.constant 0 : index
    %c0_279 = arith.constant 0 : index
    %251 = vector.load %arg3[%c0_278, %c0_279] : memref<1x128xf32, #tpu.memory_space<vmem>>, vector<1x128xf32>
    %252 = vector.broadcast %251 : vector<1x128xf32> to vector<64x128xf32>
    %253 = arith.addf %250, %252 : vector<64x128xf32>
    %254 = arith.truncf %253 : vector<64x128xf32> to vector<64x128xbf16>
    %c0_280 = arith.constant 0 : index
    %c0_281 = arith.constant 0 : index
    %c0_282 = arith.constant 0 : index
    %255 = vector.load %arg4[%c0_280, %c0_281, %c0_282] : memref<1x64x128xbf16, #tpu.memory_space<vmem>>, vector<1x64x128xbf16>
    %256 = vector.shape_cast %255 : vector<1x64x128xbf16> to vector<64x128xbf16>
    %257 = vector.shape_cast %254 : vector<64x128xbf16> to vector<1x64x128xbf16>
    tpu.vector_store %arg4[%c0_280, %c0_281, %c0_282], %257 {strides = array<i32>} : memref<1x64x128xbf16, #tpu.memory_space<vmem>>, vector<1x64x128xbf16>,
    return
  }
  func.func @transform_0(%arg0: i32) -> (i32, i32, i32, i32) {
    %c0_i32 = arith.constant 0 : i32
    %c0_i32_0 = arith.constant 0 : i32
    %c0_i32_1 = arith.constant 0 : i32
    %c0_i32_2 = arith.constant 0 : i32
    return %arg0, %c0_i32, %c0_i32_0, %c0_i32_1 : i32, i32, i32, i32
  }
  func.func @transform_1(%arg0: i32) -> (i32, i32, i32) {
    %c0_i32 = arith.constant 0 : i32
    %c0_i32_0 = arith.constant 0 : i32
    %c0_i32_1 = arith.constant 0 : i32
    %c0_i32_2 = arith.constant 0 : i32
    return %c0_i32, %c0_i32_0, %c0_i32_1 : i32, i32, i32
  }
  func.func @transform_2(%arg0: i32) -> (i32, i32) {
    %c0_i32 = arith.constant 0 : i32
    %c0_i32_0 = arith.constant 0 : i32
    %c0_i32_1 = arith.constant 0 : i32
    return %c0_i32, %c0_i32_0 : i32, i32
  }
  func.func @transform_3(%arg0: i32) -> (i32, i32, i32) {
    %c0_i32 = arith.constant 0 : i32
    %c0_i32_0 = arith.constant 0 : i32
    %c0_i32_1 = arith.constant 0 : i32
    return %arg0, %c0_i32, %c0_i32_0 : i32, i32, i32
  }
}

module attributes {stable_mosaic.version = 11 : i64} {
  func.func @kernel(%arg0: i32, %arg1: memref<4x5x9x128xbf16, #tpu.memory_space<vmem>>, %arg2: memref<9x128x128xbf16, #tpu.memory_space<vmem>>, %arg3: memref<1x128xf32, #tpu.memory_space<vmem>>, %arg4: memref<1x32x128xbf16, #tpu.memory_space<vmem>>) attributes {dimension_semantics = [#tpu.dimension_semantics<parallel>], iteration_bounds = array<i64: 2>, scalar_prefetch = 0 : i64, scratch_operands = 0 : i64, tpu.core_type = #tpu.core_type<tc>, window_params = [{transform_indices = @transform_0, window_bounds = array<i64: 4, 5, 9, 128>}, {pipeline_mode = #tpu.pipeline_mode<synchronous>, transform_indices = @transform_1, window_bounds = array<i64: 9, 128, 128>}, {pipeline_mode = #tpu.pipeline_mode<synchronous>, transform_indices = @transform_2, window_bounds = array<i64: 1, 128>}, {transform_indices = @transform_3, window_bounds = array<i64: 1, 32, 128>}]} {
    %c0 = arith.constant 0 : index
    %c0_0 = arith.constant 0 : index
    %c0_1 = arith.constant 0 : index
    %c0_2 = arith.constant 0 : index
    %0 = vector.load %arg1[%c0, %c0_0, %c0_1, %c0_2] : memref<4x5x9x128xbf16, #tpu.memory_space<vmem>>, vector<1x4x8x128xbf16>
    %1 = vector.shape_cast %0 : vector<1x4x8x128xbf16> to vector<4x8x128xbf16>
    %2 = vector.shape_cast %1 : vector<4x8x128xbf16> to vector<32x128xbf16>
    %c0_3 = arith.constant 0 : index
    %c0_4 = arith.constant 0 : index
    %c0_5 = arith.constant 0 : index
    %3 = vector.load %arg2[%c0_3, %c0_4, %c0_5] : memref<9x128x128xbf16, #tpu.memory_space<vmem>>, vector<1x128x128xbf16>
    %4 = vector.shape_cast %3 : vector<1x128x128xbf16> to vector<128x128xbf16>
    %cst = arith.constant dense<0.000000e+00> : vector<32x128xf32>
    %5 = tpu.matmul %2, %4, %cst {dimension_numbers = #tpu.dot_dimension_numbers<[1], [0], [0], [1], [0, 0, 1, 1], [], []>} : vector<32x128xbf16>, vector<128x128xbf16>, vector<32x128xf32> -> vector<32x128xf32>
    %c1 = arith.constant 1 : index
    %c0_6 = arith.constant 0 : index
    %c0_7 = arith.constant 0 : index
    %c0_8 = arith.constant 0 : index
    %6 = vector.load %arg1[%c1, %c0_6, %c0_7, %c0_8] : memref<4x5x9x128xbf16, #tpu.memory_space<vmem>>, vector<1x4x8x128xbf16>
    %7 = vector.shape_cast %6 : vector<1x4x8x128xbf16> to vector<4x8x128xbf16>
    %8 = vector.shape_cast %7 : vector<4x8x128xbf16> to vector<32x128xbf16>
    %c1_9 = arith.constant 1 : index
    %c0_10 = arith.constant 0 : index
    %c0_11 = arith.constant 0 : index
    %9 = vector.load %arg2[%c1_9, %c0_10, %c0_11] : memref<9x128x128xbf16, #tpu.memory_space<vmem>>, vector<1x128x128xbf16>
    %10 = vector.shape_cast %9 : vector<1x128x128xbf16> to vector<128x128xbf16>
    %cst_12 = arith.constant dense<0.000000e+00> : vector<32x128xf32>
    %11 = tpu.matmul %8, %10, %cst_12 {dimension_numbers = #tpu.dot_dimension_numbers<[1], [0], [0], [1], [0, 0, 1, 1], [], []>} : vector<32x128xbf16>, vector<128x128xbf16>, vector<32x128xf32> -> vector<32x128xf32>
    %12 = arith.addf %5, %11 : vector<32x128xf32>
    %c0_13 = arith.constant 0 : index
    %c0_14 = arith.constant 0 : index
    %c1_15 = arith.constant 1 : index
    %c0_16 = arith.constant 0 : index
    %13 = vector.load %arg1[%c0_13, %c0_14, %c1_15, %c0_16] : memref<4x5x9x128xbf16, #tpu.memory_space<vmem>>, vector<1x4x8x128xbf16>
    %14 = vector.shape_cast %13 : vector<1x4x8x128xbf16> to vector<4x8x128xbf16>
    %15 = vector.shape_cast %14 : vector<4x8x128xbf16> to vector<32x128xbf16>
    %c2 = arith.constant 2 : index
    %c0_17 = arith.constant 0 : index
    %c0_18 = arith.constant 0 : index
    %16 = vector.load %arg2[%c2, %c0_17, %c0_18] : memref<9x128x128xbf16, #tpu.memory_space<vmem>>, vector<1x128x128xbf16>
    %17 = vector.shape_cast %16 : vector<1x128x128xbf16> to vector<128x128xbf16>
    %cst_19 = arith.constant dense<0.000000e+00> : vector<32x128xf32>
    %18 = tpu.matmul %15, %17, %cst_19 {dimension_numbers = #tpu.dot_dimension_numbers<[1], [0], [0], [1], [0, 0, 1, 1], [], []>} : vector<32x128xbf16>, vector<128x128xbf16>, vector<32x128xf32> -> vector<32x128xf32>
    %19 = arith.addf %12, %18 : vector<32x128xf32>
    %c2_20 = arith.constant 2 : index
    %c0_21 = arith.constant 0 : index
    %c0_22 = arith.constant 0 : index
    %c0_23 = arith.constant 0 : index
    %20 = vector.load %arg1[%c2_20, %c0_21, %c0_22, %c0_23] : memref<4x5x9x128xbf16, #tpu.memory_space<vmem>>, vector<1x4x8x128xbf16>
    %21 = vector.shape_cast %20 : vector<1x4x8x128xbf16> to vector<4x8x128xbf16>
    %22 = vector.shape_cast %21 : vector<4x8x128xbf16> to vector<32x128xbf16>
    %c3 = arith.constant 3 : index
    %c0_24 = arith.constant 0 : index
    %c0_25 = arith.constant 0 : index
    %23 = vector.load %arg2[%c3, %c0_24, %c0_25] : memref<9x128x128xbf16, #tpu.memory_space<vmem>>, vector<1x128x128xbf16>
    %24 = vector.shape_cast %23 : vector<1x128x128xbf16> to vector<128x128xbf16>
    %cst_26 = arith.constant dense<0.000000e+00> : vector<32x128xf32>
    %25 = tpu.matmul %22, %24, %cst_26 {dimension_numbers = #tpu.dot_dimension_numbers<[1], [0], [0], [1], [0, 0, 1, 1], [], []>} : vector<32x128xbf16>, vector<128x128xbf16>, vector<32x128xf32> -> vector<32x128xf32>
    %26 = arith.addf %19, %25 : vector<32x128xf32>
    %c3_27 = arith.constant 3 : index
    %c0_28 = arith.constant 0 : index
    %c0_29 = arith.constant 0 : index
    %c0_30 = arith.constant 0 : index
    %27 = vector.load %arg1[%c3_27, %c0_28, %c0_29, %c0_30] : memref<4x5x9x128xbf16, #tpu.memory_space<vmem>>, vector<1x4x8x128xbf16>
    %28 = vector.shape_cast %27 : vector<1x4x8x128xbf16> to vector<4x8x128xbf16>
    %29 = vector.shape_cast %28 : vector<4x8x128xbf16> to vector<32x128xbf16>
    %c4 = arith.constant 4 : index
    %c0_31 = arith.constant 0 : index
    %c0_32 = arith.constant 0 : index
    %30 = vector.load %arg2[%c4, %c0_31, %c0_32] : memref<9x128x128xbf16, #tpu.memory_space<vmem>>, vector<1x128x128xbf16>
    %31 = vector.shape_cast %30 : vector<1x128x128xbf16> to vector<128x128xbf16>
    %cst_33 = arith.constant dense<0.000000e+00> : vector<32x128xf32>
    %32 = tpu.matmul %29, %31, %cst_33 {dimension_numbers = #tpu.dot_dimension_numbers<[1], [0], [0], [1], [0, 0, 1, 1], [], []>} : vector<32x128xbf16>, vector<128x128xbf16>, vector<32x128xf32> -> vector<32x128xf32>
    %33 = arith.addf %26, %32 : vector<32x128xf32>
    %c2_34 = arith.constant 2 : index
    %c0_35 = arith.constant 0 : index
    %c1_36 = arith.constant 1 : index
    %c0_37 = arith.constant 0 : index
    %34 = vector.load %arg1[%c2_34, %c0_35, %c1_36, %c0_37] : memref<4x5x9x128xbf16, #tpu.memory_space<vmem>>, vector<1x4x8x128xbf16>
    %35 = vector.shape_cast %34 : vector<1x4x8x128xbf16> to vector<4x8x128xbf16>
    %36 = vector.shape_cast %35 : vector<4x8x128xbf16> to vector<32x128xbf16>
    %c5 = arith.constant 5 : index
    %c0_38 = arith.constant 0 : index
    %c0_39 = arith.constant 0 : index
    %37 = vector.load %arg2[%c5, %c0_38, %c0_39] : memref<9x128x128xbf16, #tpu.memory_space<vmem>>, vector<1x128x128xbf16>
    %38 = vector.shape_cast %37 : vector<1x128x128xbf16> to vector<128x128xbf16>
    %cst_40 = arith.constant dense<0.000000e+00> : vector<32x128xf32>
    %39 = tpu.matmul %36, %38, %cst_40 {dimension_numbers = #tpu.dot_dimension_numbers<[1], [0], [0], [1], [0, 0, 1, 1], [], []>} : vector<32x128xbf16>, vector<128x128xbf16>, vector<32x128xf32> -> vector<32x128xf32>
    %40 = arith.addf %33, %39 : vector<32x128xf32>
    %c0_41 = arith.constant 0 : index
    %c1_42 = arith.constant 1 : index
    %c0_43 = arith.constant 0 : index
    %c0_44 = arith.constant 0 : index
    %41 = vector.load %arg1[%c0_41, %c1_42, %c0_43, %c0_44] : memref<4x5x9x128xbf16, #tpu.memory_space<vmem>>, vector<1x4x8x128xbf16>
    %42 = vector.shape_cast %41 : vector<1x4x8x128xbf16> to vector<4x8x128xbf16>
    %43 = vector.shape_cast %42 : vector<4x8x128xbf16> to vector<32x128xbf16>
    %c6 = arith.constant 6 : index
    %c0_45 = arith.constant 0 : index
    %c0_46 = arith.constant 0 : index
    %44 = vector.load %arg2[%c6, %c0_45, %c0_46] : memref<9x128x128xbf16, #tpu.memory_space<vmem>>, vector<1x128x128xbf16>
    %45 = vector.shape_cast %44 : vector<1x128x128xbf16> to vector<128x128xbf16>
    %cst_47 = arith.constant dense<0.000000e+00> : vector<32x128xf32>
    %46 = tpu.matmul %43, %45, %cst_47 {dimension_numbers = #tpu.dot_dimension_numbers<[1], [0], [0], [1], [0, 0, 1, 1], [], []>} : vector<32x128xbf16>, vector<128x128xbf16>, vector<32x128xf32> -> vector<32x128xf32>
    %47 = arith.addf %40, %46 : vector<32x128xf32>
    %c1_48 = arith.constant 1 : index
    %c1_49 = arith.constant 1 : index
    %c0_50 = arith.constant 0 : index
    %c0_51 = arith.constant 0 : index
    %48 = vector.load %arg1[%c1_48, %c1_49, %c0_50, %c0_51] : memref<4x5x9x128xbf16, #tpu.memory_space<vmem>>, vector<1x4x8x128xbf16>
    %49 = vector.shape_cast %48 : vector<1x4x8x128xbf16> to vector<4x8x128xbf16>
    %50 = vector.shape_cast %49 : vector<4x8x128xbf16> to vector<32x128xbf16>
    %c7 = arith.constant 7 : index
    %c0_52 = arith.constant 0 : index
    %c0_53 = arith.constant 0 : index
    %51 = vector.load %arg2[%c7, %c0_52, %c0_53] : memref<9x128x128xbf16, #tpu.memory_space<vmem>>, vector<1x128x128xbf16>
    %52 = vector.shape_cast %51 : vector<1x128x128xbf16> to vector<128x128xbf16>
    %cst_54 = arith.constant dense<0.000000e+00> : vector<32x128xf32>
    %53 = tpu.matmul %50, %52, %cst_54 {dimension_numbers = #tpu.dot_dimension_numbers<[1], [0], [0], [1], [0, 0, 1, 1], [], []>} : vector<32x128xbf16>, vector<128x128xbf16>, vector<32x128xf32> -> vector<32x128xf32>
    %54 = arith.addf %47, %53 : vector<32x128xf32>
    %c0_55 = arith.constant 0 : index
    %c1_56 = arith.constant 1 : index
    %c1_57 = arith.constant 1 : index
    %c0_58 = arith.constant 0 : index
    %55 = vector.load %arg1[%c0_55, %c1_56, %c1_57, %c0_58] : memref<4x5x9x128xbf16, #tpu.memory_space<vmem>>, vector<1x4x8x128xbf16>
    %56 = vector.shape_cast %55 : vector<1x4x8x128xbf16> to vector<4x8x128xbf16>
    %57 = vector.shape_cast %56 : vector<4x8x128xbf16> to vector<32x128xbf16>
    %c8 = arith.constant 8 : index
    %c0_59 = arith.constant 0 : index
    %c0_60 = arith.constant 0 : index
    %58 = vector.load %arg2[%c8, %c0_59, %c0_60] : memref<9x128x128xbf16, #tpu.memory_space<vmem>>, vector<1x128x128xbf16>
    %59 = vector.shape_cast %58 : vector<1x128x128xbf16> to vector<128x128xbf16>
    %cst_61 = arith.constant dense<0.000000e+00> : vector<32x128xf32>
    %60 = tpu.matmul %57, %59, %cst_61 {dimension_numbers = #tpu.dot_dimension_numbers<[1], [0], [0], [1], [0, 0, 1, 1], [], []>} : vector<32x128xbf16>, vector<128x128xbf16>, vector<32x128xf32> -> vector<32x128xf32>
    %61 = arith.addf %54, %60 : vector<32x128xf32>
    %c1_62 = arith.constant 1 : index
    %c0_63 = arith.constant 0 : index
    %c0_64 = arith.constant 0 : index
    %c0_65 = arith.constant 0 : index
    %62 = vector.load %arg1[%c1_62, %c0_63, %c0_64, %c0_65] : memref<4x5x9x128xbf16, #tpu.memory_space<vmem>>, vector<1x4x8x128xbf16>
    %63 = vector.shape_cast %62 : vector<1x4x8x128xbf16> to vector<4x8x128xbf16>
    %64 = vector.shape_cast %63 : vector<4x8x128xbf16> to vector<32x128xbf16>
    %c0_66 = arith.constant 0 : index
    %c0_67 = arith.constant 0 : index
    %c0_68 = arith.constant 0 : index
    %65 = vector.load %arg2[%c0_66, %c0_67, %c0_68] : memref<9x128x128xbf16, #tpu.memory_space<vmem>>, vector<1x128x128xbf16>
    %66 = vector.shape_cast %65 : vector<1x128x128xbf16> to vector<128x128xbf16>
    %cst_69 = arith.constant dense<0.000000e+00> : vector<32x128xf32>
    %67 = tpu.matmul %64, %66, %cst_69 {dimension_numbers = #tpu.dot_dimension_numbers<[1], [0], [0], [1], [0, 0, 1, 1], [], []>} : vector<32x128xbf16>, vector<128x128xbf16>, vector<32x128xf32> -> vector<32x128xf32>
    %c0_70 = arith.constant 0 : index
    %c0_71 = arith.constant 0 : index
    %c1_72 = arith.constant 1 : index
    %c0_73 = arith.constant 0 : index
    %68 = vector.load %arg1[%c0_70, %c0_71, %c1_72, %c0_73] : memref<4x5x9x128xbf16, #tpu.memory_space<vmem>>, vector<1x4x8x128xbf16>
    %69 = vector.shape_cast %68 : vector<1x4x8x128xbf16> to vector<4x8x128xbf16>
    %70 = vector.shape_cast %69 : vector<4x8x128xbf16> to vector<32x128xbf16>
    %c1_74 = arith.constant 1 : index
    %c0_75 = arith.constant 0 : index
    %c0_76 = arith.constant 0 : index
    %71 = vector.load %arg2[%c1_74, %c0_75, %c0_76] : memref<9x128x128xbf16, #tpu.memory_space<vmem>>, vector<1x128x128xbf16>
    %72 = vector.shape_cast %71 : vector<1x128x128xbf16> to vector<128x128xbf16>
    %cst_77 = arith.constant dense<0.000000e+00> : vector<32x128xf32>
    %73 = tpu.matmul %70, %72, %cst_77 {dimension_numbers = #tpu.dot_dimension_numbers<[1], [0], [0], [1], [0, 0, 1, 1], [], []>} : vector<32x128xbf16>, vector<128x128xbf16>, vector<32x128xf32> -> vector<32x128xf32>
    %74 = arith.addf %67, %73 : vector<32x128xf32>
    %c1_78 = arith.constant 1 : index
    %c0_79 = arith.constant 0 : index
    %c1_80 = arith.constant 1 : index
    %c0_81 = arith.constant 0 : index
    %75 = vector.load %arg1[%c1_78, %c0_79, %c1_80, %c0_81] : memref<4x5x9x128xbf16, #tpu.memory_space<vmem>>, vector<1x4x8x128xbf16>
    %76 = vector.shape_cast %75 : vector<1x4x8x128xbf16> to vector<4x8x128xbf16>
    %77 = vector.shape_cast %76 : vector<4x8x128xbf16> to vector<32x128xbf16>
    %c2_82 = arith.constant 2 : index
    %c0_83 = arith.constant 0 : index
    %c0_84 = arith.constant 0 : index
    %78 = vector.load %arg2[%c2_82, %c0_83, %c0_84] : memref<9x128x128xbf16, #tpu.memory_space<vmem>>, vector<1x128x128xbf16>
    %79 = vector.shape_cast %78 : vector<1x128x128xbf16> to vector<128x128xbf16>
    %cst_85 = arith.constant dense<0.000000e+00> : vector<32x128xf32>
    %80 = tpu.matmul %77, %79, %cst_85 {dimension_numbers = #tpu.dot_dimension_numbers<[1], [0], [0], [1], [0, 0, 1, 1], [], []>} : vector<32x128xbf16>, vector<128x128xbf16>, vector<32x128xf32> -> vector<32x128xf32>
    %81 = arith.addf %74, %80 : vector<32x128xf32>
    %c3_86 = arith.constant 3 : index
    %c0_87 = arith.constant 0 : index
    %c0_88 = arith.constant 0 : index
    %c0_89 = arith.constant 0 : index
    %82 = vector.load %arg1[%c3_86, %c0_87, %c0_88, %c0_89] : memref<4x5x9x128xbf16, #tpu.memory_space<vmem>>, vector<1x4x8x128xbf16>
    %83 = vector.shape_cast %82 : vector<1x4x8x128xbf16> to vector<4x8x128xbf16>
    %84 = vector.shape_cast %83 : vector<4x8x128xbf16> to vector<32x128xbf16>
    %c3_90 = arith.constant 3 : index
    %c0_91 = arith.constant 0 : index
    %c0_92 = arith.constant 0 : index
    %85 = vector.load %arg2[%c3_90, %c0_91, %c0_92] : memref<9x128x128xbf16, #tpu.memory_space<vmem>>, vector<1x128x128xbf16>
    %86 = vector.shape_cast %85 : vector<1x128x128xbf16> to vector<128x128xbf16>
    %cst_93 = arith.constant dense<0.000000e+00> : vector<32x128xf32>
    %87 = tpu.matmul %84, %86, %cst_93 {dimension_numbers = #tpu.dot_dimension_numbers<[1], [0], [0], [1], [0, 0, 1, 1], [], []>} : vector<32x128xbf16>, vector<128x128xbf16>, vector<32x128xf32> -> vector<32x128xf32>
    %88 = arith.addf %81, %87 : vector<32x128xf32>
    %c2_94 = arith.constant 2 : index
    %c0_95 = arith.constant 0 : index
    %c1_96 = arith.constant 1 : index
    %c0_97 = arith.constant 0 : index
    %89 = vector.load %arg1[%c2_94, %c0_95, %c1_96, %c0_97] : memref<4x5x9x128xbf16, #tpu.memory_space<vmem>>, vector<1x4x8x128xbf16>
    %90 = vector.shape_cast %89 : vector<1x4x8x128xbf16> to vector<4x8x128xbf16>
    %91 = vector.shape_cast %90 : vector<4x8x128xbf16> to vector<32x128xbf16>
    %c4_98 = arith.constant 4 : index
    %c0_99 = arith.constant 0 : index
    %c0_100 = arith.constant 0 : index
    %92 = vector.load %arg2[%c4_98, %c0_99, %c0_100] : memref<9x128x128xbf16, #tpu.memory_space<vmem>>, vector<1x128x128xbf16>
    %93 = vector.shape_cast %92 : vector<1x128x128xbf16> to vector<128x128xbf16>
    %cst_101 = arith.constant dense<0.000000e+00> : vector<32x128xf32>
    %94 = tpu.matmul %91, %93, %cst_101 {dimension_numbers = #tpu.dot_dimension_numbers<[1], [0], [0], [1], [0, 0, 1, 1], [], []>} : vector<32x128xbf16>, vector<128x128xbf16>, vector<32x128xf32> -> vector<32x128xf32>
    %95 = arith.addf %88, %94 : vector<32x128xf32>
    %c3_102 = arith.constant 3 : index
    %c0_103 = arith.constant 0 : index
    %c1_104 = arith.constant 1 : index
    %c0_105 = arith.constant 0 : index
    %96 = vector.load %arg1[%c3_102, %c0_103, %c1_104, %c0_105] : memref<4x5x9x128xbf16, #tpu.memory_space<vmem>>, vector<1x4x8x128xbf16>
    %97 = vector.shape_cast %96 : vector<1x4x8x128xbf16> to vector<4x8x128xbf16>
    %98 = vector.shape_cast %97 : vector<4x8x128xbf16> to vector<32x128xbf16>
    %c5_106 = arith.constant 5 : index
    %c0_107 = arith.constant 0 : index
    %c0_108 = arith.constant 0 : index
    %99 = vector.load %arg2[%c5_106, %c0_107, %c0_108] : memref<9x128x128xbf16, #tpu.memory_space<vmem>>, vector<1x128x128xbf16>
    %100 = vector.shape_cast %99 : vector<1x128x128xbf16> to vector<128x128xbf16>
    %cst_109 = arith.constant dense<0.000000e+00> : vector<32x128xf32>
    %101 = tpu.matmul %98, %100, %cst_109 {dimension_numbers = #tpu.dot_dimension_numbers<[1], [0], [0], [1], [0, 0, 1, 1], [], []>} : vector<32x128xbf16>, vector<128x128xbf16>, vector<32x128xf32> -> vector<32x128xf32>
    %102 = arith.addf %95, %101 : vector<32x128xf32>
    %c1_110 = arith.constant 1 : index
    %c1_111 = arith.constant 1 : index
    %c0_112 = arith.constant 0 : index
    %c0_113 = arith.constant 0 : index
    %103 = vector.load %arg1[%c1_110, %c1_111, %c0_112, %c0_113] : memref<4x5x9x128xbf16, #tpu.memory_space<vmem>>, vector<1x4x8x128xbf16>
    %104 = vector.shape_cast %103 : vector<1x4x8x128xbf16> to vector<4x8x128xbf16>
    %105 = vector.shape_cast %104 : vector<4x8x128xbf16> to vector<32x128xbf16>
    %c6_114 = arith.constant 6 : index
    %c0_115 = arith.constant 0 : index
    %c0_116 = arith.constant 0 : index
    %106 = vector.load %arg2[%c6_114, %c0_115, %c0_116] : memref<9x128x128xbf16, #tpu.memory_space<vmem>>, vector<1x128x128xbf16>
    %107 = vector.shape_cast %106 : vector<1x128x128xbf16> to vector<128x128xbf16>
    %cst_117 = arith.constant dense<0.000000e+00> : vector<32x128xf32>
    %108 = tpu.matmul %105, %107, %cst_117 {dimension_numbers = #tpu.dot_dimension_numbers<[1], [0], [0], [1], [0, 0, 1, 1], [], []>} : vector<32x128xbf16>, vector<128x128xbf16>, vector<32x128xf32> -> vector<32x128xf32>
    %109 = arith.addf %102, %108 : vector<32x128xf32>
    %c0_118 = arith.constant 0 : index
    %c1_119 = arith.constant 1 : index
    %c1_120 = arith.constant 1 : index
    %c0_121 = arith.constant 0 : index
    %110 = vector.load %arg1[%c0_118, %c1_119, %c1_120, %c0_121] : memref<4x5x9x128xbf16, #tpu.memory_space<vmem>>, vector<1x4x8x128xbf16>
    %111 = vector.shape_cast %110 : vector<1x4x8x128xbf16> to vector<4x8x128xbf16>
    %112 = vector.shape_cast %111 : vector<4x8x128xbf16> to vector<32x128xbf16>
    %c7_122 = arith.constant 7 : index
    %c0_123 = arith.constant 0 : index
    %c0_124 = arith.constant 0 : index
    %113 = vector.load %arg2[%c7_122, %c0_123, %c0_124] : memref<9x128x128xbf16, #tpu.memory_space<vmem>>, vector<1x128x128xbf16>
    %114 = vector.shape_cast %113 : vector<1x128x128xbf16> to vector<128x128xbf16>
    %cst_125 = arith.constant dense<0.000000e+00> : vector<32x128xf32>
    %115 = tpu.matmul %112, %114, %cst_125 {dimension_numbers = #tpu.dot_dimension_numbers<[1], [0], [0], [1], [0, 0, 1, 1], [], []>} : vector<32x128xbf16>, vector<128x128xbf16>, vector<32x128xf32> -> vector<32x128xf32>
    %116 = arith.addf %109, %115 : vector<32x128xf32>
    %c1_126 = arith.constant 1 : index
    %c1_127 = arith.constant 1 : index
    %c1_128 = arith.constant 1 : index
    %c0_129 = arith.constant 0 : index
    %117 = vector.load %arg1[%c1_126, %c1_127, %c1_128, %c0_129] : memref<4x5x9x128xbf16, #tpu.memory_space<vmem>>, vector<1x4x8x128xbf16>
    %118 = vector.shape_cast %117 : vector<1x4x8x128xbf16> to vector<4x8x128xbf16>
    %119 = vector.shape_cast %118 : vector<4x8x128xbf16> to vector<32x128xbf16>
    %c8_130 = arith.constant 8 : index
    %c0_131 = arith.constant 0 : index
    %c0_132 = arith.constant 0 : index
    %120 = vector.load %arg2[%c8_130, %c0_131, %c0_132] : memref<9x128x128xbf16, #tpu.memory_space<vmem>>, vector<1x128x128xbf16>
    %121 = vector.shape_cast %120 : vector<1x128x128xbf16> to vector<128x128xbf16>
    %cst_133 = arith.constant dense<0.000000e+00> : vector<32x128xf32>
    %122 = tpu.matmul %119, %121, %cst_133 {dimension_numbers = #tpu.dot_dimension_numbers<[1], [0], [0], [1], [0, 0, 1, 1], [], []>} : vector<32x128xbf16>, vector<128x128xbf16>, vector<32x128xf32> -> vector<32x128xf32>
    %123 = arith.addf %116, %122 : vector<32x128xf32>
    %124 = arith.maximumf %61, %123 : vector<32x128xf32>
    %c2_134 = arith.constant 2 : index
    %c0_135 = arith.constant 0 : index
    %c0_136 = arith.constant 0 : index
    %c0_137 = arith.constant 0 : index
    %125 = vector.load %arg1[%c2_134, %c0_135, %c0_136, %c0_137] : memref<4x5x9x128xbf16, #tpu.memory_space<vmem>>, vector<1x4x8x128xbf16>
    %126 = vector.shape_cast %125 : vector<1x4x8x128xbf16> to vector<4x8x128xbf16>
    %127 = vector.shape_cast %126 : vector<4x8x128xbf16> to vector<32x128xbf16>
    %c0_138 = arith.constant 0 : index
    %c0_139 = arith.constant 0 : index
    %c0_140 = arith.constant 0 : index
    %128 = vector.load %arg2[%c0_138, %c0_139, %c0_140] : memref<9x128x128xbf16, #tpu.memory_space<vmem>>, vector<1x128x128xbf16>
    %129 = vector.shape_cast %128 : vector<1x128x128xbf16> to vector<128x128xbf16>
    %cst_141 = arith.constant dense<0.000000e+00> : vector<32x128xf32>
    %130 = tpu.matmul %127, %129, %cst_141 {dimension_numbers = #tpu.dot_dimension_numbers<[1], [0], [0], [1], [0, 0, 1, 1], [], []>} : vector<32x128xbf16>, vector<128x128xbf16>, vector<32x128xf32> -> vector<32x128xf32>
    %c3_142 = arith.constant 3 : index
    %c0_143 = arith.constant 0 : index
    %c0_144 = arith.constant 0 : index
    %c0_145 = arith.constant 0 : index
    %131 = vector.load %arg1[%c3_142, %c0_143, %c0_144, %c0_145] : memref<4x5x9x128xbf16, #tpu.memory_space<vmem>>, vector<1x4x8x128xbf16>
    %132 = vector.shape_cast %131 : vector<1x4x8x128xbf16> to vector<4x8x128xbf16>
    %133 = vector.shape_cast %132 : vector<4x8x128xbf16> to vector<32x128xbf16>
    %c1_146 = arith.constant 1 : index
    %c0_147 = arith.constant 0 : index
    %c0_148 = arith.constant 0 : index
    %134 = vector.load %arg2[%c1_146, %c0_147, %c0_148] : memref<9x128x128xbf16, #tpu.memory_space<vmem>>, vector<1x128x128xbf16>
    %135 = vector.shape_cast %134 : vector<1x128x128xbf16> to vector<128x128xbf16>
    %cst_149 = arith.constant dense<0.000000e+00> : vector<32x128xf32>
    %136 = tpu.matmul %133, %135, %cst_149 {dimension_numbers = #tpu.dot_dimension_numbers<[1], [0], [0], [1], [0, 0, 1, 1], [], []>} : vector<32x128xbf16>, vector<128x128xbf16>, vector<32x128xf32> -> vector<32x128xf32>
    %137 = arith.addf %130, %136 : vector<32x128xf32>
    %c2_150 = arith.constant 2 : index
    %c0_151 = arith.constant 0 : index
    %c1_152 = arith.constant 1 : index
    %c0_153 = arith.constant 0 : index
    %138 = vector.load %arg1[%c2_150, %c0_151, %c1_152, %c0_153] : memref<4x5x9x128xbf16, #tpu.memory_space<vmem>>, vector<1x4x8x128xbf16>
    %139 = vector.shape_cast %138 : vector<1x4x8x128xbf16> to vector<4x8x128xbf16>
    %140 = vector.shape_cast %139 : vector<4x8x128xbf16> to vector<32x128xbf16>
    %c2_154 = arith.constant 2 : index
    %c0_155 = arith.constant 0 : index
    %c0_156 = arith.constant 0 : index
    %141 = vector.load %arg2[%c2_154, %c0_155, %c0_156] : memref<9x128x128xbf16, #tpu.memory_space<vmem>>, vector<1x128x128xbf16>
    %142 = vector.shape_cast %141 : vector<1x128x128xbf16> to vector<128x128xbf16>
    %cst_157 = arith.constant dense<0.000000e+00> : vector<32x128xf32>
    %143 = tpu.matmul %140, %142, %cst_157 {dimension_numbers = #tpu.dot_dimension_numbers<[1], [0], [0], [1], [0, 0, 1, 1], [], []>} : vector<32x128xbf16>, vector<128x128xbf16>, vector<32x128xf32> -> vector<32x128xf32>
    %144 = arith.addf %137, %143 : vector<32x128xf32>
    %c0_158 = arith.constant 0 : index
    %c1_159 = arith.constant 1 : index
    %c0_160 = arith.constant 0 : index
    %c0_161 = arith.constant 0 : index
    %145 = vector.load %arg1[%c0_158, %c1_159, %c0_160, %c0_161] : memref<4x5x9x128xbf16, #tpu.memory_space<vmem>>, vector<1x4x8x128xbf16>
    %146 = vector.shape_cast %145 : vector<1x4x8x128xbf16> to vector<4x8x128xbf16>
    %147 = vector.shape_cast %146 : vector<4x8x128xbf16> to vector<32x128xbf16>
    %c3_162 = arith.constant 3 : index
    %c0_163 = arith.constant 0 : index
    %c0_164 = arith.constant 0 : index
    %148 = vector.load %arg2[%c3_162, %c0_163, %c0_164] : memref<9x128x128xbf16, #tpu.memory_space<vmem>>, vector<1x128x128xbf16>
    %149 = vector.shape_cast %148 : vector<1x128x128xbf16> to vector<128x128xbf16>
    %cst_165 = arith.constant dense<0.000000e+00> : vector<32x128xf32>
    %150 = tpu.matmul %147, %149, %cst_165 {dimension_numbers = #tpu.dot_dimension_numbers<[1], [0], [0], [1], [0, 0, 1, 1], [], []>} : vector<32x128xbf16>, vector<128x128xbf16>, vector<32x128xf32> -> vector<32x128xf32>
    %151 = arith.addf %144, %150 : vector<32x128xf32>
    %c1_166 = arith.constant 1 : index
    %c1_167 = arith.constant 1 : index
    %c0_168 = arith.constant 0 : index
    %c0_169 = arith.constant 0 : index
    %152 = vector.load %arg1[%c1_166, %c1_167, %c0_168, %c0_169] : memref<4x5x9x128xbf16, #tpu.memory_space<vmem>>, vector<1x4x8x128xbf16>
    %153 = vector.shape_cast %152 : vector<1x4x8x128xbf16> to vector<4x8x128xbf16>
    %154 = vector.shape_cast %153 : vector<4x8x128xbf16> to vector<32x128xbf16>
    %c4_170 = arith.constant 4 : index
    %c0_171 = arith.constant 0 : index
    %c0_172 = arith.constant 0 : index
    %155 = vector.load %arg2[%c4_170, %c0_171, %c0_172] : memref<9x128x128xbf16, #tpu.memory_space<vmem>>, vector<1x128x128xbf16>
    %156 = vector.shape_cast %155 : vector<1x128x128xbf16> to vector<128x128xbf16>
    %cst_173 = arith.constant dense<0.000000e+00> : vector<32x128xf32>
    %157 = tpu.matmul %154, %156, %cst_173 {dimension_numbers = #tpu.dot_dimension_numbers<[1], [0], [0], [1], [0, 0, 1, 1], [], []>} : vector<32x128xbf16>, vector<128x128xbf16>, vector<32x128xf32> -> vector<32x128xf32>
    %158 = arith.addf %151, %157 : vector<32x128xf32>
    %c0_174 = arith.constant 0 : index
    %c1_175 = arith.constant 1 : index
    %c1_176 = arith.constant 1 : index
    %c0_177 = arith.constant 0 : index
    %159 = vector.load %arg1[%c0_174, %c1_175, %c1_176, %c0_177] : memref<4x5x9x128xbf16, #tpu.memory_space<vmem>>, vector<1x4x8x128xbf16>
    %160 = vector.shape_cast %159 : vector<1x4x8x128xbf16> to vector<4x8x128xbf16>
    %161 = vector.shape_cast %160 : vector<4x8x128xbf16> to vector<32x128xbf16>
    %c5_178 = arith.constant 5 : index
    %c0_179 = arith.constant 0 : index
    %c0_180 = arith.constant 0 : index
    %162 = vector.load %arg2[%c5_178, %c0_179, %c0_180] : memref<9x128x128xbf16, #tpu.memory_space<vmem>>, vector<1x128x128xbf16>
    %163 = vector.shape_cast %162 : vector<1x128x128xbf16> to vector<128x128xbf16>
    %cst_181 = arith.constant dense<0.000000e+00> : vector<32x128xf32>
    %164 = tpu.matmul %161, %163, %cst_181 {dimension_numbers = #tpu.dot_dimension_numbers<[1], [0], [0], [1], [0, 0, 1, 1], [], []>} : vector<32x128xbf16>, vector<128x128xbf16>, vector<32x128xf32> -> vector<32x128xf32>
    %165 = arith.addf %158, %164 : vector<32x128xf32>
    %c2_182 = arith.constant 2 : index
    %c1_183 = arith.constant 1 : index
    %c0_184 = arith.constant 0 : index
    %c0_185 = arith.constant 0 : index
    %166 = vector.load %arg1[%c2_182, %c1_183, %c0_184, %c0_185] : memref<4x5x9x128xbf16, #tpu.memory_space<vmem>>, vector<1x4x8x128xbf16>
    %167 = vector.shape_cast %166 : vector<1x4x8x128xbf16> to vector<4x8x128xbf16>
    %168 = vector.shape_cast %167 : vector<4x8x128xbf16> to vector<32x128xbf16>
    %c6_186 = arith.constant 6 : index
    %c0_187 = arith.constant 0 : index
    %c0_188 = arith.constant 0 : index
    %169 = vector.load %arg2[%c6_186, %c0_187, %c0_188] : memref<9x128x128xbf16, #tpu.memory_space<vmem>>, vector<1x128x128xbf16>
    %170 = vector.shape_cast %169 : vector<1x128x128xbf16> to vector<128x128xbf16>
    %cst_189 = arith.constant dense<0.000000e+00> : vector<32x128xf32>
    %171 = tpu.matmul %168, %170, %cst_189 {dimension_numbers = #tpu.dot_dimension_numbers<[1], [0], [0], [1], [0, 0, 1, 1], [], []>} : vector<32x128xbf16>, vector<128x128xbf16>, vector<32x128xf32> -> vector<32x128xf32>
    %172 = arith.addf %165, %171 : vector<32x128xf32>
    %c3_190 = arith.constant 3 : index
    %c1_191 = arith.constant 1 : index
    %c0_192 = arith.constant 0 : index
    %c0_193 = arith.constant 0 : index
    %173 = vector.load %arg1[%c3_190, %c1_191, %c0_192, %c0_193] : memref<4x5x9x128xbf16, #tpu.memory_space<vmem>>, vector<1x4x8x128xbf16>
    %174 = vector.shape_cast %173 : vector<1x4x8x128xbf16> to vector<4x8x128xbf16>
    %175 = vector.shape_cast %174 : vector<4x8x128xbf16> to vector<32x128xbf16>
    %c7_194 = arith.constant 7 : index
    %c0_195 = arith.constant 0 : index
    %c0_196 = arith.constant 0 : index
    %176 = vector.load %arg2[%c7_194, %c0_195, %c0_196] : memref<9x128x128xbf16, #tpu.memory_space<vmem>>, vector<1x128x128xbf16>
    %177 = vector.shape_cast %176 : vector<1x128x128xbf16> to vector<128x128xbf16>
    %cst_197 = arith.constant dense<0.000000e+00> : vector<32x128xf32>
    %178 = tpu.matmul %175, %177, %cst_197 {dimension_numbers = #tpu.dot_dimension_numbers<[1], [0], [0], [1], [0, 0, 1, 1], [], []>} : vector<32x128xbf16>, vector<128x128xbf16>, vector<32x128xf32> -> vector<32x128xf32>
    %179 = arith.addf %172, %178 : vector<32x128xf32>
    %c2_198 = arith.constant 2 : index
    %c1_199 = arith.constant 1 : index
    %c1_200 = arith.constant 1 : index
    %c0_201 = arith.constant 0 : index
    %180 = vector.load %arg1[%c2_198, %c1_199, %c1_200, %c0_201] : memref<4x5x9x128xbf16, #tpu.memory_space<vmem>>, vector<1x4x8x128xbf16>
    %181 = vector.shape_cast %180 : vector<1x4x8x128xbf16> to vector<4x8x128xbf16>
    %182 = vector.shape_cast %181 : vector<4x8x128xbf16> to vector<32x128xbf16>
    %c8_202 = arith.constant 8 : index
    %c0_203 = arith.constant 0 : index
    %c0_204 = arith.constant 0 : index
    %183 = vector.load %arg2[%c8_202, %c0_203, %c0_204] : memref<9x128x128xbf16, #tpu.memory_space<vmem>>, vector<1x128x128xbf16>
    %184 = vector.shape_cast %183 : vector<1x128x128xbf16> to vector<128x128xbf16>
    %cst_205 = arith.constant dense<0.000000e+00> : vector<32x128xf32>
    %185 = tpu.matmul %182, %184, %cst_205 {dimension_numbers = #tpu.dot_dimension_numbers<[1], [0], [0], [1], [0, 0, 1, 1], [], []>} : vector<32x128xbf16>, vector<128x128xbf16>, vector<32x128xf32> -> vector<32x128xf32>
    %186 = arith.addf %179, %185 : vector<32x128xf32>
    %187 = arith.maximumf %124, %186 : vector<32x128xf32>
    %c3_206 = arith.constant 3 : index
    %c0_207 = arith.constant 0 : index
    %c0_208 = arith.constant 0 : index
    %c0_209 = arith.constant 0 : index
    %188 = vector.load %arg1[%c3_206, %c0_207, %c0_208, %c0_209] : memref<4x5x9x128xbf16, #tpu.memory_space<vmem>>, vector<1x4x8x128xbf16>
    %189 = vector.shape_cast %188 : vector<1x4x8x128xbf16> to vector<4x8x128xbf16>
    %190 = vector.shape_cast %189 : vector<4x8x128xbf16> to vector<32x128xbf16>
    %c0_210 = arith.constant 0 : index
    %c0_211 = arith.constant 0 : index
    %c0_212 = arith.constant 0 : index
    %191 = vector.load %arg2[%c0_210, %c0_211, %c0_212] : memref<9x128x128xbf16, #tpu.memory_space<vmem>>, vector<1x128x128xbf16>
    %192 = vector.shape_cast %191 : vector<1x128x128xbf16> to vector<128x128xbf16>
    %cst_213 = arith.constant dense<0.000000e+00> : vector<32x128xf32>
    %193 = tpu.matmul %190, %192, %cst_213 {dimension_numbers = #tpu.dot_dimension_numbers<[1], [0], [0], [1], [0, 0, 1, 1], [], []>} : vector<32x128xbf16>, vector<128x128xbf16>, vector<32x128xf32> -> vector<32x128xf32>
    %c2_214 = arith.constant 2 : index
    %c0_215 = arith.constant 0 : index
    %c1_216 = arith.constant 1 : index
    %c0_217 = arith.constant 0 : index
    %194 = vector.load %arg1[%c2_214, %c0_215, %c1_216, %c0_217] : memref<4x5x9x128xbf16, #tpu.memory_space<vmem>>, vector<1x4x8x128xbf16>
    %195 = vector.shape_cast %194 : vector<1x4x8x128xbf16> to vector<4x8x128xbf16>
    %196 = vector.shape_cast %195 : vector<4x8x128xbf16> to vector<32x128xbf16>
    %c1_218 = arith.constant 1 : index
    %c0_219 = arith.constant 0 : index
    %c0_220 = arith.constant 0 : index
    %197 = vector.load %arg2[%c1_218, %c0_219, %c0_220] : memref<9x128x128xbf16, #tpu.memory_space<vmem>>, vector<1x128x128xbf16>
    %198 = vector.shape_cast %197 : vector<1x128x128xbf16> to vector<128x128xbf16>
    %cst_221 = arith.constant dense<0.000000e+00> : vector<32x128xf32>
    %199 = tpu.matmul %196, %198, %cst_221 {dimension_numbers = #tpu.dot_dimension_numbers<[1], [0], [0], [1], [0, 0, 1, 1], [], []>} : vector<32x128xbf16>, vector<128x128xbf16>, vector<32x128xf32> -> vector<32x128xf32>
    %200 = arith.addf %193, %199 : vector<32x128xf32>
    %c3_222 = arith.constant 3 : index
    %c0_223 = arith.constant 0 : index
    %c1_224 = arith.constant 1 : index
    %c0_225 = arith.constant 0 : index
    %201 = vector.load %arg1[%c3_222, %c0_223, %c1_224, %c0_225] : memref<4x5x9x128xbf16, #tpu.memory_space<vmem>>, vector<1x4x8x128xbf16>
    %202 = vector.shape_cast %201 : vector<1x4x8x128xbf16> to vector<4x8x128xbf16>
    %203 = vector.shape_cast %202 : vector<4x8x128xbf16> to vector<32x128xbf16>
    %c2_226 = arith.constant 2 : index
    %c0_227 = arith.constant 0 : index
    %c0_228 = arith.constant 0 : index
    %204 = vector.load %arg2[%c2_226, %c0_227, %c0_228] : memref<9x128x128xbf16, #tpu.memory_space<vmem>>, vector<1x128x128xbf16>
    %205 = vector.shape_cast %204 : vector<1x128x128xbf16> to vector<128x128xbf16>
    %cst_229 = arith.constant dense<0.000000e+00> : vector<32x128xf32>
    %206 = tpu.matmul %203, %205, %cst_229 {dimension_numbers = #tpu.dot_dimension_numbers<[1], [0], [0], [1], [0, 0, 1, 1], [], []>} : vector<32x128xbf16>, vector<128x128xbf16>, vector<32x128xf32> -> vector<32x128xf32>
    %207 = arith.addf %200, %206 : vector<32x128xf32>
    %c1_230 = arith.constant 1 : index
    %c1_231 = arith.constant 1 : index
    %c0_232 = arith.constant 0 : index
    %c0_233 = arith.constant 0 : index
    %208 = vector.load %arg1[%c1_230, %c1_231, %c0_232, %c0_233] : memref<4x5x9x128xbf16, #tpu.memory_space<vmem>>, vector<1x4x8x128xbf16>
    %209 = vector.shape_cast %208 : vector<1x4x8x128xbf16> to vector<4x8x128xbf16>
    %210 = vector.shape_cast %209 : vector<4x8x128xbf16> to vector<32x128xbf16>
    %c3_234 = arith.constant 3 : index
    %c0_235 = arith.constant 0 : index
    %c0_236 = arith.constant 0 : index
    %211 = vector.load %arg2[%c3_234, %c0_235, %c0_236] : memref<9x128x128xbf16, #tpu.memory_space<vmem>>, vector<1x128x128xbf16>
    %212 = vector.shape_cast %211 : vector<1x128x128xbf16> to vector<128x128xbf16>
    %cst_237 = arith.constant dense<0.000000e+00> : vector<32x128xf32>
    %213 = tpu.matmul %210, %212, %cst_237 {dimension_numbers = #tpu.dot_dimension_numbers<[1], [0], [0], [1], [0, 0, 1, 1], [], []>} : vector<32x128xbf16>, vector<128x128xbf16>, vector<32x128xf32> -> vector<32x128xf32>
    %214 = arith.addf %207, %213 : vector<32x128xf32>
    %c0_238 = arith.constant 0 : index
    %c1_239 = arith.constant 1 : index
    %c1_240 = arith.constant 1 : index
    %c0_241 = arith.constant 0 : index
    %215 = vector.load %arg1[%c0_238, %c1_239, %c1_240, %c0_241] : memref<4x5x9x128xbf16, #tpu.memory_space<vmem>>, vector<1x4x8x128xbf16>
    %216 = vector.shape_cast %215 : vector<1x4x8x128xbf16> to vector<4x8x128xbf16>
    %217 = vector.shape_cast %216 : vector<4x8x128xbf16> to vector<32x128xbf16>
    %c4_242 = arith.constant 4 : index
    %c0_243 = arith.constant 0 : index
    %c0_244 = arith.constant 0 : index
    %218 = vector.load %arg2[%c4_242, %c0_243, %c0_244] : memref<9x128x128xbf16, #tpu.memory_space<vmem>>, vector<1x128x128xbf16>
    %219 = vector.shape_cast %218 : vector<1x128x128xbf16> to vector<128x128xbf16>
    %cst_245 = arith.constant dense<0.000000e+00> : vector<32x128xf32>
    %220 = tpu.matmul %217, %219, %cst_245 {dimension_numbers = #tpu.dot_dimension_numbers<[1], [0], [0], [1], [0, 0, 1, 1], [], []>} : vector<32x128xbf16>, vector<128x128xbf16>, vector<32x128xf32> -> vector<32x128xf32>
    %221 = arith.addf %214, %220 : vector<32x128xf32>
    %c1_246 = arith.constant 1 : index
    %c1_247 = arith.constant 1 : index
    %c1_248 = arith.constant 1 : index
    %c0_249 = arith.constant 0 : index
    %222 = vector.load %arg1[%c1_246, %c1_247, %c1_248, %c0_249] : memref<4x5x9x128xbf16, #tpu.memory_space<vmem>>, vector<1x4x8x128xbf16>
    %223 = vector.shape_cast %222 : vector<1x4x8x128xbf16> to vector<4x8x128xbf16>
    %224 = vector.shape_cast %223 : vector<4x8x128xbf16> to vector<32x128xbf16>
    %c5_250 = arith.constant 5 : index
    %c0_251 = arith.constant 0 : index
    %c0_252 = arith.constant 0 : index
    %225 = vector.load %arg2[%c5_250, %c0_251, %c0_252] : memref<9x128x128xbf16, #tpu.memory_space<vmem>>, vector<1x128x128xbf16>
    %226 = vector.shape_cast %225 : vector<1x128x128xbf16> to vector<128x128xbf16>
    %cst_253 = arith.constant dense<0.000000e+00> : vector<32x128xf32>
    %227 = tpu.matmul %224, %226, %cst_253 {dimension_numbers = #tpu.dot_dimension_numbers<[1], [0], [0], [1], [0, 0, 1, 1], [], []>} : vector<32x128xbf16>, vector<128x128xbf16>, vector<32x128xf32> -> vector<32x128xf32>
    %228 = arith.addf %221, %227 : vector<32x128xf32>
    %c3_254 = arith.constant 3 : index
    %c1_255 = arith.constant 1 : index
    %c0_256 = arith.constant 0 : index
    %c0_257 = arith.constant 0 : index
    %229 = vector.load %arg1[%c3_254, %c1_255, %c0_256, %c0_257] : memref<4x5x9x128xbf16, #tpu.memory_space<vmem>>, vector<1x4x8x128xbf16>
    %230 = vector.shape_cast %229 : vector<1x4x8x128xbf16> to vector<4x8x128xbf16>
    %231 = vector.shape_cast %230 : vector<4x8x128xbf16> to vector<32x128xbf16>
    %c6_258 = arith.constant 6 : index
    %c0_259 = arith.constant 0 : index
    %c0_260 = arith.constant 0 : index
    %232 = vector.load %arg2[%c6_258, %c0_259, %c0_260] : memref<9x128x128xbf16, #tpu.memory_space<vmem>>, vector<1x128x128xbf16>
    %233 = vector.shape_cast %232 : vector<1x128x128xbf16> to vector<128x128xbf16>
    %cst_261 = arith.constant dense<0.000000e+00> : vector<32x128xf32>
    %234 = tpu.matmul %231, %233, %cst_261 {dimension_numbers = #tpu.dot_dimension_numbers<[1], [0], [0], [1], [0, 0, 1, 1], [], []>} : vector<32x128xbf16>, vector<128x128xbf16>, vector<32x128xf32> -> vector<32x128xf32>
    %235 = arith.addf %228, %234 : vector<32x128xf32>
    %c2_262 = arith.constant 2 : index
    %c1_263 = arith.constant 1 : index
    %c1_264 = arith.constant 1 : index
    %c0_265 = arith.constant 0 : index
    %236 = vector.load %arg1[%c2_262, %c1_263, %c1_264, %c0_265] : memref<4x5x9x128xbf16, #tpu.memory_space<vmem>>, vector<1x4x8x128xbf16>
    %237 = vector.shape_cast %236 : vector<1x4x8x128xbf16> to vector<4x8x128xbf16>
    %238 = vector.shape_cast %237 : vector<4x8x128xbf16> to vector<32x128xbf16>
    %c7_266 = arith.constant 7 : index
    %c0_267 = arith.constant 0 : index
    %c0_268 = arith.constant 0 : index
    %239 = vector.load %arg2[%c7_266, %c0_267, %c0_268] : memref<9x128x128xbf16, #tpu.memory_space<vmem>>, vector<1x128x128xbf16>
    %240 = vector.shape_cast %239 : vector<1x128x128xbf16> to vector<128x128xbf16>
    %cst_269 = arith.constant dense<0.000000e+00> : vector<32x128xf32>
    %241 = tpu.matmul %238, %240, %cst_269 {dimension_numbers = #tpu.dot_dimension_numbers<[1], [0], [0], [1], [0, 0, 1, 1], [], []>} : vector<32x128xbf16>, vector<128x128xbf16>, vector<32x128xf32> -> vector<32x128xf32>
    %242 = arith.addf %235, %241 : vector<32x128xf32>
    %c3_270 = arith.constant 3 : index
    %c1_271 = arith.constant 1 : index
    %c1_272 = arith.constant 1 : index
    %c0_273 = arith.constant 0 : index
    %243 = vector.load %arg1[%c3_270, %c1_271, %c1_272, %c0_273] : memref<4x5x9x128xbf16, #tpu.memory_space<vmem>>, vector<1x4x8x128xbf16>
    %244 = vector.shape_cast %243 : vector<1x4x8x128xbf16> to vector<4x8x128xbf16>
    %245 = vector.shape_cast %244 : vector<4x8x128xbf16> to vector<32x128xbf16>
    %c8_274 = arith.constant 8 : index
    %c0_275 = arith.constant 0 : index
    %c0_276 = arith.constant 0 : index
    %246 = vector.load %arg2[%c8_274, %c0_275, %c0_276] : memref<9x128x128xbf16, #tpu.memory_space<vmem>>, vector<1x128x128xbf16>
    %247 = vector.shape_cast %246 : vector<1x128x128xbf16> to vector<128x128xbf16>
    %cst_277 = arith.constant dense<0.000000e+00> : vector<32x128xf32>
    %248 = tpu.matmul %245, %247, %cst_277 {dimension_numbers = #tpu.dot_dimension_numbers<[1], [0], [0], [1], [0, 0, 1, 1], [], []>} : vector<32x128xbf16>, vector<128x128xbf16>, vector<32x128xf32> -> vector<32x128xf32>
    %249 = arith.addf %242, %248 : vector<32x128xf32>
    %250 = arith.maximumf %187, %249 : vector<32x128xf32>
    %c0_278 = arith.constant 0 : index
    %c0_279 = arith.constant 0 : index
    %251 = vector.load %arg3[%c0_278, %c0_279] : memref<1x128xf32, #tpu.memory_space<vmem>>, vector<1x128xf32>
    %252 = vector.broadcast %251 : vector<1x128xf32> to vector<32x128xf32>
    %253 = arith.addf %250, %252 : vector<32x128xf32>
    %254 = arith.truncf %253 : vector<32x128xf32> to vector<32x128xbf16>
    %c0_280 = arith.constant 0 : index
    %c0_281 = arith.constant 0 : index
    %c0_282 = arith.constant 0 : index
    %255 = vector.load %arg4[%c0_280, %c0_281, %c0_282] : memref<1x32x128xbf16, #tpu.memory_space<vmem>>, vector<1x32x128xbf16>
    %256 = vector.shape_cast %255 : vector<1x32x128xbf16> to vector<32x128xbf16>
    %257 = vector.shape_cast %254 : vector<32x128xbf16> to vector<1x32x128xbf16>
    tpu.vector_store %arg4[%c0_280, %c0_281, %c0_282], %257 {strides = array<i32>} : memref<1x32x128xbf16, #tpu.memory_space<vmem>>, vector<1x32x128xbf16>,
    return
  }
  func.func @transform_0(%arg0: i32) -> (i32, i32, i32, i32) {
    %c0_i32 = arith.constant 0 : i32
    %c0_i32_0 = arith.constant 0 : i32
    %c0_i32_1 = arith.constant 0 : i32
    %c0_i32_2 = arith.constant 0 : i32
    return %arg0, %c0_i32, %c0_i32_0, %c0_i32_1 : i32, i32, i32, i32
  }
  func.func @transform_1(%arg0: i32) -> (i32, i32, i32) {
    %c0_i32 = arith.constant 0 : i32
    %c0_i32_0 = arith.constant 0 : i32
    %c0_i32_1 = arith.constant 0 : i32
    %c0_i32_2 = arith.constant 0 : i32
    return %c0_i32, %c0_i32_0, %c0_i32_1 : i32, i32, i32
  }
  func.func @transform_2(%arg0: i32) -> (i32, i32) {
    %c0_i32 = arith.constant 0 : i32
    %c0_i32_0 = arith.constant 0 : i32
    %c0_i32_1 = arith.constant 0 : i32
    return %c0_i32, %c0_i32_0 : i32, i32
  }
  func.func @transform_3(%arg0: i32) -> (i32, i32, i32) {
    %c0_i32 = arith.constant 0 : i32
    %c0_i32_0 = arith.constant 0 : i32
    %c0_i32_1 = arith.constant 0 : i32
    return %arg0, %c0_i32, %c0_i32_0 : i32, i32, i32
  }
}

module attributes {stable_mosaic.version = 11 : i64} {
  func.func @kernel(%arg0: i32, %arg1: memref<8x2048xbf16, #tpu.memory_space<vmem>>, %arg2: memref<2048x128xbf16, #tpu.memory_space<vmem>>, %arg3: memref<1x128xf32, #tpu.memory_space<vmem>>, %arg4: memref<128x128xbf16, #tpu.memory_space<vmem>>, %arg5: memref<1x128xf32, #tpu.memory_space<vmem>>, %arg6: memref<128x128xbf16, #tpu.memory_space<vmem>>, %arg7: memref<1x128xf32, #tpu.memory_space<vmem>>, %arg8: memref<8x128xf32, #tpu.memory_space<vmem>>) attributes {dimension_semantics = [#tpu.dimension_semantics<parallel>], iteration_bounds = array<i64: 1>, scalar_prefetch = 0 : i64, scratch_operands = 0 : i64, tpu.core_type = #tpu.core_type<tc>, window_params = [{transform_indices = @transform_0, window_bounds = array<i64: 8, 2048>}, {pipeline_mode = #tpu.pipeline_mode<synchronous>, transform_indices = @transform_1, window_bounds = array<i64: 2048, 128>}, {pipeline_mode = #tpu.pipeline_mode<synchronous>, transform_indices = @transform_2, window_bounds = array<i64: 1, 128>}, {pipeline_mode = #tpu.pipeline_mode<synchronous>, transform_indices = @transform_3, window_bounds = array<i64: 128, 128>}, {pipeline_mode = #tpu.pipeline_mode<synchronous>, transform_indices = @transform_4, window_bounds = array<i64: 1, 128>}, {pipeline_mode = #tpu.pipeline_mode<synchronous>, transform_indices = @transform_5, window_bounds = array<i64: 128, 128>}, {pipeline_mode = #tpu.pipeline_mode<synchronous>, transform_indices = @transform_6, window_bounds = array<i64: 1, 128>}, {transform_indices = @transform_7, window_bounds = array<i64: 8, 128>}]} {
    %c0 = arith.constant 0 : index
    %c0_0 = arith.constant 0 : index
    %0 = vector.load %arg1[%c0, %c0_0] : memref<8x2048xbf16, #tpu.memory_space<vmem>>, vector<8x2048xbf16>
    %c0_1 = arith.constant 0 : index
    %c0_2 = arith.constant 0 : index
    %1 = vector.load %arg2[%c0_1, %c0_2] : memref<2048x128xbf16, #tpu.memory_space<vmem>>, vector<2048x128xbf16>
    %cst = arith.constant dense<0.000000e+00> : vector<8x128xf32>
    %2 = tpu.matmul %0, %1, %cst {dimension_numbers = #tpu.dot_dimension_numbers<[1], [0], [0], [1], [0, 0, 1, 1], [], []>} : vector<8x2048xbf16>, vector<2048x128xbf16>, vector<8x128xf32> -> vector<8x128xf32>
    %c0_3 = arith.constant 0 : index
    %c0_4 = arith.constant 0 : index
    %3 = vector.load %arg3[%c0_3, %c0_4] : memref<1x128xf32, #tpu.memory_space<vmem>>, vector<1x128xf32>
    %4 = vector.broadcast %3 : vector<1x128xf32> to vector<8x128xf32>
    %5 = arith.addf %2, %4 : vector<8x128xf32>
    %cst_5 = arith.constant 0.000000e+00 : f32
    %6 = vector.broadcast %cst_5 : f32 to vector<8x128xf32>
    %7 = arith.maximumf %5, %6 : vector<8x128xf32>
    %8 = arith.truncf %7 : vector<8x128xf32> to vector<8x128xbf16>
    %c0_6 = arith.constant 0 : index
    %c0_7 = arith.constant 0 : index
    %9 = vector.load %arg4[%c0_6, %c0_7] : memref<128x128xbf16, #tpu.memory_space<vmem>>, vector<128x128xbf16>
    %cst_8 = arith.constant dense<0.000000e+00> : vector<8x128xf32>
    %10 = tpu.matmul %8, %9, %cst_8 {dimension_numbers = #tpu.dot_dimension_numbers<[1], [0], [0], [1], [0, 0, 1, 1], [], []>} : vector<8x128xbf16>, vector<128x128xbf16>, vector<8x128xf32> -> vector<8x128xf32>
    %c0_9 = arith.constant 0 : index
    %c0_10 = arith.constant 0 : index
    %11 = vector.load %arg5[%c0_9, %c0_10] : memref<1x128xf32, #tpu.memory_space<vmem>>, vector<1x128xf32>
    %12 = vector.broadcast %11 : vector<1x128xf32> to vector<8x128xf32>
    %13 = arith.addf %10, %12 : vector<8x128xf32>
    %cst_11 = arith.constant 0.000000e+00 : f32
    %14 = vector.broadcast %cst_11 : f32 to vector<8x128xf32>
    %15 = arith.maximumf %13, %14 : vector<8x128xf32>
    %16 = arith.truncf %15 : vector<8x128xf32> to vector<8x128xbf16>
    %c0_12 = arith.constant 0 : index
    %c0_13 = arith.constant 0 : index
    %17 = vector.load %arg6[%c0_12, %c0_13] : memref<128x128xbf16, #tpu.memory_space<vmem>>, vector<128x128xbf16>
    %cst_14 = arith.constant dense<0.000000e+00> : vector<8x128xf32>
    %18 = tpu.matmul %16, %17, %cst_14 {dimension_numbers = #tpu.dot_dimension_numbers<[1], [0], [0], [1], [0, 0, 1, 1], [], []>} : vector<8x128xbf16>, vector<128x128xbf16>, vector<8x128xf32> -> vector<8x128xf32>
    %c0_15 = arith.constant 0 : index
    %c0_16 = arith.constant 0 : index
    %19 = vector.load %arg7[%c0_15, %c0_16] : memref<1x128xf32, #tpu.memory_space<vmem>>, vector<1x128xf32>
    %20 = vector.broadcast %19 : vector<1x128xf32> to vector<8x128xf32>
    %21 = arith.addf %18, %20 : vector<8x128xf32>
    %c0_17 = arith.constant 0 : index
    %c0_18 = arith.constant 0 : index
    %22 = vector.load %arg8[%c0_17, %c0_18] : memref<8x128xf32, #tpu.memory_space<vmem>>, vector<8x128xf32>
    tpu.vector_store %arg8[%c0_17, %c0_18], %21 {strides = array<i32>} : memref<8x128xf32, #tpu.memory_space<vmem>>, vector<8x128xf32>,
    return
  }
  func.func @transform_0(%arg0: i32) -> (i32, i32) {
    %c0_i32 = arith.constant 0 : i32
    %c0_i32_0 = arith.constant 0 : i32
    return %arg0, %c0_i32 : i32, i32
  }
  func.func @transform_1(%arg0: i32) -> (i32, i32) {
    %c0_i32 = arith.constant 0 : i32
    %c0_i32_0 = arith.constant 0 : i32
    %c0_i32_1 = arith.constant 0 : i32
    return %c0_i32, %c0_i32_0 : i32, i32
  }
  func.func @transform_2(%arg0: i32) -> (i32, i32) {
    %c0_i32 = arith.constant 0 : i32
    %c0_i32_0 = arith.constant 0 : i32
    %c0_i32_1 = arith.constant 0 : i32
    return %c0_i32, %c0_i32_0 : i32, i32
  }
  func.func @transform_3(%arg0: i32) -> (i32, i32) {
    %c0_i32 = arith.constant 0 : i32
    %c0_i32_0 = arith.constant 0 : i32
    %c0_i32_1 = arith.constant 0 : i32
    return %c0_i32, %c0_i32_0 : i32, i32
  }
  func.func @transform_4(%arg0: i32) -> (i32, i32) {
    %c0_i32 = arith.constant 0 : i32
    %c0_i32_0 = arith.constant 0 : i32
    %c0_i32_1 = arith.constant 0 : i32
    return %c0_i32, %c0_i32_0 : i32, i32
  }
  func.func @transform_5(%arg0: i32) -> (i32, i32) {
    %c0_i32 = arith.constant 0 : i32
    %c0_i32_0 = arith.constant 0 : i32
    %c0_i32_1 = arith.constant 0 : i32
    return %c0_i32, %c0_i32_0 : i32, i32
  }
  func.func @transform_6(%arg0: i32) -> (i32, i32) {
    %c0_i32 = arith.constant 0 : i32
    %c0_i32_0 = arith.constant 0 : i32
    %c0_i32_1 = arith.constant 0 : i32
    return %c0_i32, %c0_i32_0 : i32, i32
  }
  func.func @transform_7(%arg0: i32) -> (i32, i32) {
    %c0_i32 = arith.constant 0 : i32
    %c0_i32_0 = arith.constant 0 : i32
    return %arg0, %c0_i32 : i32, i32
  }
}

</mosaic_0001>

<bundles_post_ra>
// kernel: cnn_forward.5
= control target key start
LH: loop header
LB: loop body
LE: loop exit
PB: predicated region body
PF: predicated region fallthrough
CT: control target
= control target key end

     0   :  { %s7134_s12 = smov 0   ;;  %s8170_s0 = inlined_call_operand.vmem [shape: bf16[8,9,9,128], index: 0, kind: input, shape index: {}]   ;;  %s8171_s1 = inlined_call_operand.vmem [shape: bf16[9,128,128], index: 1, kind: input, shape index: {}]   ;;  %s8172_s2 = inlined_call_operand.vmem [shape: f32[1,128], index: 2, kind: input, shape index: {}]   ;;  %s8173_s3 = inlined_call_operand.vmem [shape: bf16[2,64,128], index: 3, kind: output, shape index: {}]  }
   0x1 LB: > { %s7140_s13 = sadd.s32 4294967295, %s7112_s12   ;;  %p4881_p0 = scmp.ge.s32.totalorder %s7112_s12, 1  ;;  %s7112_s12 = sphi %s7134_s12, %s13_s12  }
   0x2   : > { %p139_p1 = scmp.lt.s32.totalorder %s7112_s12, 3 }
   0x4   : > { %p140_p2 = pnand %p4881_p0, %p139_p1 }
   0x5   : > { %v6922_v0 = vld [vmem:[%s8171_s1 + $0x40] sm:$0xff] (!%p140_p2)   ;;  %s4882_s16 = sshll.u32 (!%p140_p2), %s7140_s13, 2  ;;  %v6923_v1 = vld [vmem:[%s8171_s1 + $0x48] sm:$0xff] (!%p140_p2)   ;;  %v6924_v2 = vld [vmem:[%s8171_s1 + $0x50] sm:$0xff] (!%p140_p2)   ;;  %vm517_vm0 = vsmask.f32 (!%p140_p2), 3328 }
   0x6   : > { %143 = sbr.rel (%p140_p2) target bundleno = 814 (0x32e), region = 32  ;;  %p165_p3 = scmp.lt.s32.totalorder (!%p140_p2), %s4882_s16, 7  ;;  %5793 = vmatprep.subr.bf16.mxu0 (!%p140_p2), %v6922_v0  ;;  %6009 = vmatprep.subr.bf16.mxu1 (!%p140_p2), %v6922_v0  ;;  %v6925_v3 = vld [vmem:[%s8171_s1 + $0x58] sm:$0xff] (!%p140_p2)   ;;  %v6926_v8 = vld [vmem:[%s8171_s1 + $0x60] sm:$0xff] (!%p140_p2)   ;;  %vm518_vm1 = vsmask.f32 (!%p140_p2), 7440 }
   0x7   : > { %5794 = vmatpush3.bf16.msra.mxu0 (!%p140_p2), %v6922_v0  ;;  %6010 = vmatpush3.bf16.msra.mxu1 (!%p140_p2), %v6922_v0  ;;  %v6927_v24 = vld [vmem:[%s8171_s1 + $0x68] sm:$0xff] (!%p140_p2)   ;;  %vm7182_vm2 = vmor (!%p140_p2), %vm517_vm0, %vm518_vm1  ;;  %v6928_v39 = vld [vmem:[%s8171_s1 + $0x70] sm:$0xff] (!%p140_p2)   ;;  %p171_p4 = scmp.lt.s32.totalorder (!%p140_p2), %s7140_s13, 1 }
   0x8   : > { %5795 = vmatprep.subr.bf16.mxu0 (!%p140_p2), %v6923_v1  ;;  %6011 = vmatprep.subr.bf16.mxu1 (!%p140_p2), %v6923_v1  ;;  %v6929_v52 = vld [vmem:[%s8171_s1 + $0x78] sm:$0xff] (!%p140_p2)   ;;  %v6931_v55 = vld [vmem:[%s8171_s1] sm:$0xff] (!%p140_p2)  }
   0xb   : > { %5796 = vmatpush3.bf16.msra.mxu0 (!%p140_p2), %v6923_v1  ;;  %6012 = vmatpush3.bf16.msra.mxu1 (!%p140_p2), %v6923_v1 }
   0xc   : > { %5797 = vmatprep.subr.bf16.mxu0 (!%p140_p2), %v6924_v2  ;;  %6013 = vmatprep.subr.bf16.mxu1 (!%p140_p2), %v6924_v2 }
   0xd   : > { %s8177_s16 = smov (!%p165_p3, %s4882_s16), 7  ;;  %s8179_s13 = smov (!%p171_p4, %s7140_s13), 1 }
   0xe   : > { %s6913_s21 = smul.u32 72, %s8177_s16  ;;  %s5329_s19 = sshll.u32 %s8179_s13, 5 }
   0xf   : > { %5798 = vmatpush3.bf16.msra.mxu0 %v6924_v2  ;;  %6014 = vmatpush3.bf16.msra.mxu1 %v6924_v2  ;;  %s175_s22 = scalar_lea.vmem %s8173_s3, %s5329_s19 }
  0x10   : > { %s7160_s26 = scalar_lea.vmem %s8170_s0, %s6913_s21  ;;  %5799 = vmatprep.subr.bf16.mxu0 %v6925_v3  ;;  %6015 = vmatprep.subr.bf16.mxu1 %v6925_v3 }
  0x11   : > { %v7163_v4 = vld [vmem:[%s7160_s26 + $0x48] ss:$8 sps:$4 sm:$0xff]   ;;  %v501_v5 = vld [vmem:[%s7160_s26] sm:$0xf]  ;;  %v502_v6 = vld [vmem:[%s7160_s26 + $0x4] sm:$0x1] }
  0x12   : > { %5809 = vmatprep.mubr.bf16.mxu0 %v7163_v4  ;;  %v503_v7 = vld [vmem:[%s7160_s26 + $0x8] sm:$0xf]  ;;  %v504_v9 = vld [vmem:[%s7160_s26 + $0xc] sm:$0x1]  ;;  %v521_v10 = vshrl.u32 %v501_v5, 16  ;;  %v524_v11 = vshll.u32 %v501_v5, 16 }
  0x13   : > { %v530_v12 = vshll.u32 %v502_v6, 16  ;;  %v535_v13 = vshrl.u32 %v503_v7, 16  ;;  %v538_v14 = vshll.u32 %v503_v7, 16  ;;  %v544_v15 = vshll.u32 %v504_v9, 16  ;;  %v505_v19 = vld [vmem:[%s7160_s26 + $0x10] sm:$0xf]  ;;  %5800 = vmatpush3.bf16.msra.mxu0 %v6925_v3  ;;  %6016 = vmatpush3.bf16.msra.mxu1 %v6925_v3 }
  0x14   : > { %v523_v16 = vrot.slane %v521_v10, 4  ;;  %v526_v17 = vrot.slane %v524_v11, 5  ;;  %v506_v22 = vld [vmem:[%s7160_s26 + $0x14] sm:$0x1]  ;;  %v507_v23 = vld [vmem:[%s7160_s26 + $0x18] sm:$0xf]  ;;  %5801 = vmatprep.subr.bf16.mxu0 %v6926_v8  ;;  %6017 = vmatprep.subr.bf16.mxu1 %v6926_v8 }
  0x15   : > { %v537_v18 = vrot.slane %v535_v13, 4  ;;  %v532_v20 = vrot.slane %v530_v12, 5  ;;  %v540_v21 = vrot.slane %v538_v14, 5  ;;  %v546_v26 = vrot.slane %v544_v15, 5  ;;  %v508_v27 = vld [vmem:[%s7160_s26 + $0x1c] sm:$0x1] }
  0x16   : > { %v527_v25 = vor.u32 %v526_v17, %v523_v16  ;;  %v549_v28 = vshrl.u32 %v505_v19, 16  ;;  %v552_v29 = vshll.u32 %v505_v19, 16  ;;  %v558_v32 = vshll.u32 %v506_v22, 16  ;;  %v509_v53 = vld [vmem:[%s7160_s26 + $0x20] sm:$0xf]  ;;  %v6933_v16 = vld [vmem:[%s8171_s1 + $0x8] sm:$0xff]  }
  0x17   : > { %v541_v31 = vor.u32 %v540_v21, %v537_v18  ;;  %v563_v33 = vshrl.u32 %v507_v23, 16  ;;  %v566_v34 = vshll.u32 %v507_v23, 16  ;;  %v572_v38 = vshll.u32 %v508_v27, 16  ;;  %5802 = vmatpush3.bf16.msra.mxu0 %v6926_v8  ;;  %6018 = vmatpush3.bf16.msra.mxu1 %v6926_v8  ;;  %v510_v54 = vld [vmem:[%s7160_s26 + $0x24] sm:$0x1] }
  0x18   : > { %v528_v35 = vrot.slane %v527_v25, 4  ;;  %v551_v36 = vrot.slane %v549_v28, 4  ;;  %v554_v37 = vrot.slane %v552_v29, 5  ;;  %5803 = vmatprep.subr.bf16.mxu0 %v6927_v24  ;;  %6019 = vmatprep.subr.bf16.mxu1 %v6927_v24  ;;  %v560_v46 = vrot.slane %v558_v32, 5  ;;  %v511_v58 = vld [vmem:[%s7160_s26 + $0x28] sm:$0xf] }
  0x19   : > { %v542_v40 = vrot.slane %v541_v31, 4  ;;  %v565_v41 = vrot.slane %v563_v33, 4  ;;  %v568_v42 = vrot.slane %v566_v34, 5  ;;  %v574_v50 = vrot.slane %v572_v38, 5  ;;  %v512_v59 = vld [vmem:[%s7160_s26 + $0x2c] sm:$0x1] }
  0x1a   : > { %v533_v43 = vsel %vm7182_vm2, %v528_v35, %v532_v20  ;;  %v555_v44 = vor.u32 %v554_v37, %v551_v36  ;;  %v577_v60 = vshrl.u32 %v509_v53, 16  ;;  %v580_v61 = vshll.u32 %v509_v53, 16  ;;  %v7211_v2 = vld [vmem:[%s7160_s26 + $0x58] ss:$8 sps:$4 sm:$0xff]   ;;  %v513_v10 = vld [vmem:[%s7160_s26 + $0x30] sm:$0xf] }
  0x1b   : > { %v547_v45 = vsel %vm7182_vm2, %v542_v40, %v546_v26  ;;  %v569_v47 = vor.u32 %v568_v42, %v565_v41  ;;  %5804 = vmatpush3.bf16.msra.mxu0 %v6927_v24  ;;  %6020 = vmatpush3.bf16.msra.mxu1 %v6927_v24  ;;  %v586_v62 = vshll.u32 %v510_v54, 16  ;;  %v591_v63 = vshrl.u32 %v511_v58, 16  ;;  %v514_v13 = vld [vmem:[%s7160_s26 + $0x34] sm:$0x1]  ;;  %v515_v14 = vld [vmem:[%s7160_s26 + $0x38] sm:$0xf] }
  0x1c   : > { %v7193_v48 = vcombine.low %v533_v43, %v547_v45  ;;  %v556_v49 = vrot.slane %v555_v44, 4  ;;  %5805 = vmatprep.subr.bf16.mxu0 %v6928_v39  ;;  %6021 = vmatprep.subr.bf16.mxu1 %v6928_v39  ;;  %v594_v0 = vshll.u32 %v511_v58, 16  ;;  %v600_v1 = vshll.u32 %v512_v59, 16  ;;  %v516_v15 = vld [vmem:[%s7160_s26 + $0x3c] sm:$0x1]  ;;  %v6934_v36 = vld [vmem:[%s8171_s1 + $0x10] sm:$0xff]  }
  0x1d   : > { %v570_v51 = vrot.slane %v569_v47, 4  ;;  %v579_v3 = vrot.slane %v577_v60, 4  ;;  %v582_v5 = vrot.slane %v580_v61, 5  ;;  %v588_v6 = vrot.slane %v586_v62, 5  ;;  %v7223_v17 = vld [vmem:[%s7160_s26 + $0x68] ss:$8 sps:$4 sm:$0xff]  }
  0x1e   : > { %6025 = vmatprep.mubr.bf16.mxu1 %v7193_v48  ;;  %v561_v56 = vsel %vm7182_vm2, %v556_v49, %v560_v46  ;;  %v593_v7 = vrot.slane %v591_v63, 4  ;;  %v596_v8 = vrot.slane %v594_v0, 5  ;;  %v602_v9 = vrot.slane %v600_v1, 5  ;;  %v7237_v38 = vld [vmem:[%s7160_s26 + $0x78] ss:$8 sps:$4 sm:$0xff]  }
  0x1f   : > { %v575_v57 = vsel %vm7182_vm2, %v570_v51, %v574_v50  ;;  %5806 = vmatpush3.bf16.msra.mxu0 %v6928_v39  ;;  %6022 = vmatpush3.bf16.msra.mxu1 %v6928_v39  ;;  %v583_v12 = vor.u32 %v582_v5, %v579_v3  ;;  %v605_v19 = vshrl.u32 %v513_v10, 16  ;;  %v608_v20 = vshll.u32 %v513_v10, 16  ;;  %v6935_v44 = vld [vmem:[%s8171_s1 + $0x18] sm:$0xff]   ;;  %v6942_v47 = vld [vmem:[%s7160_s26] ss:$8 sps:$4 sm:$0xff]  }
  0x20   : > { %5807 = vmatprep.subr.bf16.mxu0 %v6929_v52  ;;  %6023 = vmatprep.subr.bf16.mxu1 %v6929_v52  ;;  %v7214_v11 = vcombine.low %v561_v56, %v575_v57  ;;  %v597_v18 = vor.u32 %v596_v8, %v593_v7  ;;  %v614_v21 = vshll.u32 %v514_v13, 16  ;;  %v619_v23 = vshrl.u32 %v515_v14, 16  ;;  %v6936_v49 = vld [vmem:[%s8171_s1 + $0x20] sm:$0xff]   ;;  %v6937_v50 = vld [vmem:[%s8171_s1 + $0x28] sm:$0xff]   ;;  %v6941_v57 = vld [vmem:[%s8171_s1 + $0x38] sm:$0xff]  }
  0x21   : > { %v584_v22 = vrot.slane %v583_v12, 4  ;;  %v622_v24 = vshll.u32 %v515_v14, 16  ;;  %v628_v25 = vshll.u32 %v516_v15, 16  ;;  %v607_v27 = vrot.slane %v605_v19, 4  ;;  %v5194_v51 = vld [vmem:[%s7160_s26 + $0x48] sm:$0xf] }
  0x22   : > { %v598_v26 = vrot.slane %v597_v18, 4  ;;  %v610_v28 = vrot.slane %v608_v20, 5  ;;  %v621_v31 = vrot.slane %v619_v23, 4  ;;  %v616_v35 = vrot.slane %v614_v21, 5  ;;  %v5195_v58 = vld [vmem:[%s7160_s26 + $0x4c] sm:$0x1] }
  0x23   : > { %5808 = vmatpush3.bf16.msra.mxu0 %v6929_v52  ;;  %6024 = vmatpush3.bf16.msra.mxu1 %v6929_v52  ;;  %v589_v29 = vsel %vm7182_vm2, %v584_v22, %v588_v6  ;;  %v624_v32 = vrot.slane %v622_v24, 5  ;;  %v630_v40 = vrot.slane %v628_v25, 5  ;;  %v5196_v52 = vld [vmem:[%s7160_s26 + $0x50] sm:$0xf]  ;;  %v2181_v53 = vshrl.u32 %v5194_v51, 16  ;;  %v6943_v0 = vld [vmem:[%s8171_s1 + $0x80] sm:$0xff]  }
  0x24   : > { %5817 = vmatprep.subr.bf16.mxu0 %v6931_v55  ;;  %6033 = vmatprep.subr.bf16.mxu1 %v6931_v55  ;;  %v603_v33 = vsel %vm7182_vm2, %v598_v26, %v602_v9  ;;  %v611_v34 = vor.u32 %v610_v28, %v607_v27  ;;  %v2184_v54 = vshll.u32 %v5194_v51, 16  ;;  %v2198_v56 = vshll.u32 %v5196_v52, 16  ;;  %v5197_v59 = vld [vmem:[%s7160_s26 + $0x54] sm:$0x1]  ;;  %v6944_v5 = vld [vmem:[%s7160_s26 + $0x10] ss:$8 sps:$4 sm:$0xff]  }
  0x25   : > { %v7234_v37 = vcombine.low %v589_v29, %v603_v33  ;;  %v625_v39 = vor.u32 %v624_v32, %v621_v31  ;;  %v2183_v60 = vrot.slane %v2181_v53, 4  ;;  %v2190_v1 = vshll.u32 %v5195_v58, 16  ;;  %v6945_v8 = vld [vmem:[%s8171_s1 + $0x88] sm:$0xff]   ;;  %v5198_v10 = vld [vmem:[%s7160_s26 + $0x58] sm:$0xf]  ;;  %v6946_v20 = vld [vmem:[%s8171_s1 + $0x90] sm:$0xff]  }
  0x26   : > { %5810 = vmatmul.mubr.bf16.vlgmr.msra.gmra.mrb[0].mxu0 %v7211_v2  ;;  %6026 = vmatmul.mubr.bf16.vlgmr.msra.gmra.mrb[0].mxu1 %v7214_v11  ;;  %v612_v41 = vrot.slane %v611_v34, 4  ;;  %v2186_v61 = vrot.slane %v2184_v54, 5  ;;  %v2200_v63 = vrot.slane %v2198_v56, 5  ;;  %v2204_v3 = vshll.u32 %v5197_v59, 16  ;;  %v6950_v9 = vld [vmem:[%s7160_s26 + $0x20] ss:$8 sps:$4 sm:$0xff]  }
  0x27   : > { %5818 = vmatpush3.bf16.msra.mxu0 %v6931_v55  ;;  %6034 = vmatpush3.bf16.msra.mxu1 %v6931_v55  ;;  %v626_v42 = vrot.slane %v625_v39, 4  ;;  %v2195_v55 = vshrl.u32 %v5196_v52, 16  ;;  %v7280_v12 = vld [vmem:[%s7160_s26 + $0x5c] sm:$0x1]  ;;  %v2192_v13 = vrot.slane %v2190_v1, 5  ;;  %v2209_v19 = vshrl.u32 %v5198_v10, 16 }
  0x28   : > { %5819 = vmatprep.subr.bf16.mxu0 %v6933_v16  ;;  %6035 = vmatprep.subr.bf16.mxu1 %v6933_v16  ;;  %v617_v43 = vsel %vm7182_vm2, %v612_v41, %v616_v35  ;;  %v2187_v6 = vor.u32 %v2186_v61, %v2183_v60  ;;  %v2206_v14 = vrot.slane %v2204_v3, 5  ;;  %v5200_v15 = vld [vmem:[%s7160_s26 + $0x60] sm:$0xf]  ;;  %v6952_v21 = vld [vmem:[%s7160_s26 + $0x30] ss:$8 sps:$4 sm:$0xff]   ;;  %v2212_v23 = vshll.u32 %v5198_v10, 16 }
  0x29   : > { %5813 = vmatprep.mubr.bf16.mxu0 %v7223_v17  ;;  %6029 = vmatprep.mubr.bf16.mxu1 %v7234_v37  ;;  %v631_v45 = vsel %vm7182_vm2, %v626_v42, %v630_v40  ;;  %v2197_v62 = vrot.slane %v2195_v55, 4  ;;  %v5201_v22 = vld [vmem:[%s7160_s26 + $0x64] sm:$0x1]  ;;  %v2223_v24 = vshrl.u32 %v5200_v15, 16  ;;  %v6947_v25 = vld [vmem:[%s8171_s1 + $0x98] sm:$0xff]   ;;  %v2211_v29 = vrot.slane %v2209_v19, 4 }
  0x2a   : > { %v7248_v46 = vcombine.low %v617_v43, %v631_v45  ;;  %v5202_v28 = vld [vmem:[%s7160_s26 + $0x68] sm:$0xf]  ;;  %v2226_v31 = vshll.u32 %v5200_v15, 16  ;;  %v2232_v32 = vshll.u32 %v5201_v22, 16  ;;  %v5204_v35 = vld [vmem:[%s7160_s26 + $0x70] sm:$0xf] }
  0x2b   : > { %5820 = vmatpush3.bf16.msra.mxu0 %v6933_v16  ;;  %6036 = vmatpush3.bf16.msra.mxu1 %v6933_v16  ;;  %v2201_v7 = vor.u32 %v2200_v63, %v2197_v62  ;;  %v2188_v16 = vrot.slane %v2187_v6, 4  ;;  %v2225_v34 = vrot.slane %v2223_v24, 4  ;;  %v6948_v39 = vld [vmem:[%s8171_s1 + $0xa0] sm:$0xff]   ;;  %v5206_v40 = vld [vmem:[%s7160_s26 + $0x78] sm:$0xf]  ;;  %v2240_v42 = vshll.u32 %v5202_v28, 16 }
  0x2c   : > { %5821 = vmatprep.subr.bf16.mxu0 %v6934_v36  ;;  %6037 = vmatprep.subr.bf16.mxu1 %v6934_v36  ;;  %v2228_v41 = vrot.slane %v2226_v31, 5  ;;  %v6949_v43 = vld [vmem:[%s8171_s1 + $0xa8] sm:$0xff]   ;;  %v2254_v45 = vshll.u32 %v5204_v35, 16  ;;  %v5208_v51 = vld [vmem:[%s7160_s26 + $0x80] sm:$0xf]  ;;  %v2268_v53 = vshll.u32 %v5206_v40, 16 }
  0x2d   : > { %v2202_v18 = vrot.slane %v2201_v7, 4  ;;  %v2193_v26 = vsel %vm7182_vm2, %v2188_v16, %v2192_v13  ;;  %v2279_v56 = vshrl.u32 %v5208_v51, 16  ;;  %v6951_v58 = vld [vmem:[%s8171_s1 + $0xb0] sm:$0xff]   ;;  %v2234_v60 = vrot.slane %v2232_v32, 5  ;;  %v5209_v6 = vld [vmem:[%s7160_s26 + $0x84] sm:$0x1] }
  0x2e   : > { %5814 = vmatmul.mubr.bf16.gmra.mrb[4].mxu0 %v7237_v38  ;;  %6030 = vmatmul.mubr.bf16.gmra.mrb[4].mxu1 %v7248_v46  ;;  %v2256_v55 = vrot.slane %v2254_v45, 5 }
  0x2f   : > { %5822 = vmatpush3.bf16.msra.mxu0 %v6934_v36  ;;  %6038 = vmatpush3.bf16.msra.mxu1 %v6934_v36  ;;  %v2207_v27 = vsel %vm7182_vm2, %v2202_v18, %v2206_v14  ;;  %v2237_v36 = vshrl.u32 %v5202_v28, 16 }
  0x30   : > { %5823 = vmatprep.subr.bf16.mxu0 %v6935_v44  ;;  %6039 = vmatprep.subr.bf16.mxu1 %v6935_v44  ;;  %v5210_v33 = vcombine.low %v2193_v26, %v2207_v27 }
  0x31   : > { %5833 = vmatprep.mubr.bf16.mxu0 %v6942_v47  ;;  %6049 = vmatprep.mubr.bf16.mxu1 %v7163_v4  ;;  %v6939_v4 = vld [vmem:[%s8171_s1 + $0x30] sm:$0xff]   ;;  %v2265_v47 = vshrl.u32 %v5206_v40, 16  ;;  %v7348_v40 = vld [vmem:[%s7160_s26 + $0xd8] ss:$8 sps:$4 sm:$0xff]  }
  0x33   : > { %5824 = vmatpush3.bf16.msra.mxu0 %v6935_v44  ;;  %6040 = vmatpush3.bf16.msra.mxu1 %v6935_v44  ;;  %v2251_v44 = vshrl.u32 %v5204_v35, 16  ;;  %v2267_v7 = vrot.slane %v2265_v47, 4  ;;  %v6956_v35 = vld [vmem:[%s8171_s1 + $0xd0] sm:$0xff]  }
  0x34   : > { %5825 = vmatprep.subr.bf16.mxu0 %v6936_v49  ;;  %6041 = vmatprep.subr.bf16.mxu1 %v6936_v49 }
  0x35   : > { %v2253_v54 = vrot.slane %v2251_v44, 4 }
  0x37   : > { %5826 = vmatpush3.bf16.msra.mxu0 %v6936_v49  ;;  %6042 = vmatpush3.bf16.msra.mxu1 %v6936_v49  ;;  %v5203_v49 = vld [vmem:[%s7160_s26 + $0x6c] sm:$0x1]  ;;  %v2257_v3 = vor.u32 %v2256_v55, %v2253_v54  ;;  %v6963_v54 = vld [vmem:[%s8171_s1 + $0x100] sm:$0xff]  }
  0x38   : > { %5827 = vmatprep.subr.bf16.mxu0 %v6937_v50  ;;  %6043 = vmatprep.subr.bf16.mxu1 %v6937_v50  ;;  %v2246_v63 = vshll.u32 %v5203_v49, 16  ;;  %v6961_v49 = vld [vmem:[%s8171_s1 + $0xf8] sm:$0xff]  }
  0x39   : > { %v2258_v19 = vrot.slane %v2257_v3, 4 }
  0x3a   : > { %v2248_v15 = vrot.slane %v2246_v63, 5  ;;  %v7380_v63 = vld [vmem:[%s7160_s26 + $0xf8] ss:$8 sps:$4 sm:$0xff]  }
  0x3b   : > { %5828 = vmatpush3.bf16.msra.mxu0 %v6937_v50  ;;  %6044 = vmatpush3.bf16.msra.mxu1 %v6937_v50  ;;  %v5205_v50 = vld [vmem:[%s7160_s26 + $0x74] sm:$0x1] }
  0x3c   : > { %5829 = vmatprep.subr.bf16.mxu0 %v6939_v4  ;;  %6045 = vmatprep.subr.bf16.mxu1 %v6939_v4 }
  0x3f   : > { %5830 = vmatpush3.bf16.msra.mxu0 %v6939_v4  ;;  %6046 = vmatpush3.bf16.msra.mxu1 %v6939_v4  ;;  %v2242_v4 = vrot.slane %v2240_v42, 5  ;;  %v5036_v42 = vld [vmem:[%s7160_s26 + $0x98] sm:$0xf] }
  0x40   : > { %5831 = vmatprep.subr.bf16.mxu0 %v6941_v57  ;;  %6047 = vmatprep.subr.bf16.mxu1 %v6941_v57  ;;  %v1162_v47 = vshll.u32 %v5036_v42, 16 }
  0x43   : > { %5832 = vmatpush3.bf16.msra.mxu0 %v6941_v57  ;;  %6048 = vmatpush3.bf16.msra.mxu1 %v6941_v57  ;;  %v2282_v57 = vshll.u32 %v5208_v51, 16  ;;  %v5037_v51 = vld [vmem:[%s7160_s26 + $0x9c] sm:$0x1] }
  0x44   : > { %5841 = vmatprep.subr.bf16.mxu0 %v6943_v0  ;;  %6057 = vmatprep.subr.bf16.mxu1 %v6943_v0 }
  0x45   : > { %v2284_v10 = vrot.slane %v2282_v57, 5  ;;  %v6965_v57 = vld [vmem:[%s7160_s26 + $0xa0] ss:$8 sps:$4 sm:$0xff]  }
  0x46   : > { %5834 = vmatmul.mubr.bf16.vlgmr.msra.gmra.mrb[0].mxu0 %v6944_v5  ;;  %6050 = vmatmul.mubr.bf16.vlgmr.msra.gmra.mrb[0].mxu1 %v7211_v2  ;;  %v2218_v2 = vshll.u32 %v7280_v12, 16  ;;  %v5207_v5 = vld [vmem:[%s7160_s26 + $0x7c] sm:$0x1] }
  0x47   : > { %5842 = vmatpush3.bf16.msra.mxu0 %v6943_v0  ;;  %6058 = vmatpush3.bf16.msra.mxu1 %v6943_v0  ;;  %v2260_v0 = vshll.u32 %v5205_v50, 16  ;;  %v6953_v12 = vld [vmem:[%s8171_s1 + $0xb8] sm:$0xff]   ;;  %v5035_v50 = vld [vmem:[%s7160_s26 + $0x94] sm:$0x1] }
  0x48   : > { %5843 = vmatprep.subr.bf16.mxu0 %v6945_v8  ;;  %6059 = vmatprep.subr.bf16.mxu1 %v6945_v8  ;;  %v2220_v59 = vrot.slane %v2218_v2, 5  ;;  %v6954_v2 = vld [vmem:[%s8171_s1 + $0xc0] sm:$0xff]   ;;  %v1154_v55 = vshll.u32 %v5035_v50, 16  ;;  %v6973_v50 = vld [vmem:[%s8171_s1 + $0x130] sm:$0xff]  }
  0x49   : > { %5837 = vmatprep.mubr.bf16.mxu0 %v6950_v9  ;;  %6053 = vmatprep.mubr.bf16.mxu1 %v7223_v17  ;;  %v2214_v17 = vrot.slane %v2212_v23, 5  ;;  %v2281_v9 = vrot.slane %v2279_v56, 4  ;;  %v2262_v16 = vrot.slane %v2260_v0, 5  ;;  %v1168_v56 = vshll.u32 %v5037_v51, 16  ;;  %v5038_v0 = vld [vmem:[%s7160_s26 + $0xa0] sm:$0xf] }
  0x4a   : > { %v1156_v3 = vrot.slane %v1154_v55, 5 }
  0x4b   : > { %5844 = vmatpush3.bf16.msra.mxu0 %v6945_v8  ;;  %6060 = vmatpush3.bf16.msra.mxu1 %v6945_v8  ;;  %v2215_v52 = vor.u32 %v2214_v17, %v2211_v29  ;;  %v2270_v8 = vrot.slane %v2268_v53, 5  ;;  %v2285_v23 = vor.u32 %v2284_v10, %v2281_v9  ;;  %v2263_v26 = vsel %vm7182_vm2, %v2258_v19, %v2262_v16  ;;  %v6955_v17 = vld [vmem:[%s8171_s1 + $0xc8] sm:$0xff]  }
  0x4c   : > { %5845 = vmatprep.subr.bf16.mxu0 %v6946_v20  ;;  %6061 = vmatprep.subr.bf16.mxu1 %v6946_v20  ;;  %v1164_v53 = vrot.slane %v1162_v47, 5  ;;  %v1173_v9 = vshrl.u32 %v5038_v0, 16  ;;  %v1176_v10 = vshll.u32 %v5038_v0, 16  ;;  %v7394_v16 = vld [vmem:[%s7160_s26 + $0x108] ss:$8 sps:$4 sm:$0xff]  }
  0x4d   : > { %v2216_v61 = vrot.slane %v2215_v52, 4  ;;  %v2271_v22 = vor.u32 %v2270_v8, %v2267_v7  ;;  %v2286_v31 = vrot.slane %v2285_v23, 4 }
  0x4e   : > { %5838 = vmatmul.mubr.bf16.gmra.mrb[4].mxu0 %v6952_v21  ;;  %6054 = vmatmul.mubr.bf16.gmra.mrb[4].mxu1 %v7237_v38  ;;  %v2239_v38 = vrot.slane %v2237_v36, 4  ;;  %v2288_v21 = vshll.u32 %v5209_v6, 16  ;;  %v6957_v36 = vld [vmem:[%s8171_s1 + $0xd8] sm:$0xff]   ;;  %v6968_v6 = vld [vmem:[%s8171_s1 + $0x110] sm:$0xff]  }
  0x4f   : > { %5846 = vmatpush3.bf16.msra.mxu0 %v6946_v20  ;;  %6062 = vmatpush3.bf16.msra.mxu1 %v6946_v20  ;;  %v2221_v13 = vsel %vm7182_vm2, %v2216_v61, %v2220_v59  ;;  %v2274_v20 = vshll.u32 %v5207_v5, 16  ;;  %v2272_v29 = vrot.slane %v2271_v22, 4  ;;  %v6967_v59 = vld [vmem:[%s8171_s1 + $0x108] sm:$0xff]   ;;  %v1170_v5 = vrot.slane %v1168_v56, 5  ;;  %v5042_v22 = vld [vmem:[%s7160_s26 + $0xb0] sm:$0xf] }
  0x50   : > { %5847 = vmatprep.subr.bf16.mxu0 %v6947_v25  ;;  %6063 = vmatprep.subr.bf16.mxu1 %v6947_v25  ;;  %v2243_v1 = vor.u32 %v2242_v4, %v2239_v38  ;;  %v2290_v28 = vrot.slane %v2288_v21, 5  ;;  %v1159_v38 = vshrl.u32 %v5036_v42, 16  ;;  %v1178_v21 = vrot.slane %v1176_v10, 5 }
  0x51   : > { %5857 = vmatprep.mubr.bf16.mxu0 %v7193_v48  ;;  %6073 = vmatprep.mubr.bf16.mxu1 %v5210_v33  ;;  %v2229_v48 = vor.u32 %v2228_v41, %v2225_v34  ;;  %v2276_v27 = vrot.slane %v2274_v20, 5  ;;  %v5034_v41 = vld [vmem:[%s7160_s26 + $0x90] sm:$0xf]  ;;  %v1175_v20 = vrot.slane %v1173_v9, 4 }
  0x52   : > { %v2244_v18 = vrot.slane %v2243_v1, 4  ;;  %v2291_v34 = vsel %vm7182_vm2, %v2286_v31, %v2290_v28  ;;  %v1145_v44 = vshrl.u32 %v5034_v41, 16  ;;  %v1148_v45 = vshll.u32 %v5034_v41, 16  ;;  %v5040_v1 = vld [vmem:[%s7160_s26 + $0xa8] sm:$0xf] }
  0x53   : > { %5848 = vmatpush3.bf16.msra.mxu0 %v6947_v25  ;;  %6064 = vmatpush3.bf16.msra.mxu1 %v6947_v25  ;;  %v2230_v62 = vrot.slane %v2229_v48, 4  ;;  %v2277_v33 = vsel %vm7182_vm2, %v2272_v29, %v2276_v27  ;;  %v1161_v4 = vrot.slane %v1159_v38, 4  ;;  %v6970_v27 = vld [vmem:[%s8171_s1 + $0x120] sm:$0xff]   ;;  %v5044_v28 = vld [vmem:[%s7160_s26 + $0xb8] sm:$0xf]  ;;  %v6971_v41 = vld [vmem:[%s8171_s1 + $0x128] sm:$0xff]  }
  0x54   : > { %5849 = vmatprep.subr.bf16.mxu0 %v6948_v39  ;;  %6065 = vmatprep.subr.bf16.mxu1 %v6948_v39  ;;  %v2249_v25 = vsel %vm7182_vm2, %v2244_v18, %v2248_v15  ;;  %v1147_v52 = vrot.slane %v1145_v44, 4  ;;  %v1150_v48 = vrot.slane %v1148_v45, 5  ;;  %v6969_v15 = vld [vmem:[%s8171_s1 + $0x118] sm:$0xff]   ;;  %v5043_v29 = vld [vmem:[%s7160_s26 + $0xb4] sm:$0x1] }
  0x55   : > { %v2235_v14 = vsel %vm7182_vm2, %v2230_v62, %v2234_v60  ;;  %v5212_v32 = vcombine.low %v2249_v25, %v2263_v26  ;;  %v1165_v61 = vor.u32 %v1164_v53, %v1161_v4  ;;  %v6972_v62 = vld [vmem:[%s7160_s26 + $0xb0] ss:$8 sps:$4 sm:$0xff]   ;;  %v5045_v31 = vld [vmem:[%s7160_s26 + $0xbc] sm:$0x1] }
  0x56   : > { %v5211_v24 = vcombine.low %v2221_v13, %v2235_v14  ;;  %v1151_v60 = vor.u32 %v1150_v48, %v1147_v52  ;;  %v1190_v13 = vshll.u32 %v5040_v1, 16  ;;  %v6975_v14 = vld [vmem:[%s7160_s26 + $0xc0] ss:$8 sps:$4 sm:$0xff]   ;;  %v5214_v53 = vld [vmem:[%s7160_s26 + $0xd8] sm:$0xf] }
  0x57   : > { %5850 = vmatpush3.bf16.msra.mxu0 %v6948_v39  ;;  %6066 = vmatpush3.bf16.msra.mxu1 %v6948_v39  ;;  %v6962_v39 = vld [vmem:[%s7160_s26 + $0x90] ss:$8 sps:$4 sm:$0xff]   ;;  %v1166_v8 = vrot.slane %v1165_v61, 4 }
  0x58   : > { %5851 = vmatprep.subr.bf16.mxu0 %v6949_v43  ;;  %6067 = vmatprep.subr.bf16.mxu1 %v6949_v43  ;;  %v1152_v7 = vrot.slane %v1151_v60, 4  ;;  %v1192_v26 = vrot.slane %v1190_v13, 5 }
  0x59   : > { %v1171_v19 = vsel %vm7182_vm2, %v1166_v8, %v1170_v5  ;;  %v2544_v5 = vshrl.u32 %v5214_v53, 16 }
  0x5a   : > { %v1157_v18 = vsel %vm7182_vm2, %v1152_v7, %v1156_v3  ;;  %v5047_v3 = vld [vmem:[%s7160_s26 + $0xc4] sm:$0x1] }
  0x5b   : > { %5852 = vmatpush3.bf16.msra.mxu0 %v6949_v43  ;;  %6068 = vmatpush3.bf16.msra.mxu1 %v6949_v43  ;;  %v6960_v43 = vld [vmem:[%s8171_s1 + $0xf0] sm:$0xff]   ;;  %v7401_v23 = vcombine.low %v1157_v18, %v1171_v19  ;;  %v2546_v19 = vrot.slane %v2544_v5, 4 }
  0x5c   : > { %5853 = vmatprep.subr.bf16.mxu0 %v6951_v58  ;;  %6069 = vmatprep.subr.bf16.mxu1 %v6951_v58 }
  0x5f   : > { %5854 = vmatpush3.bf16.msra.mxu0 %v6951_v58  ;;  %6070 = vmatpush3.bf16.msra.mxu1 %v6951_v58  ;;  %v7373_v58 = vld [vmem:[%s7160_s26 + $0xe8] ss:$8 sps:$4 sm:$0xff]  }
  0x60   : > { %5855 = vmatprep.subr.bf16.mxu0 %v6953_v12  ;;  %6071 = vmatprep.subr.bf16.mxu1 %v6953_v12 }
  0x63   : > { %5856 = vmatpush3.bf16.msra.mxu0 %v6953_v12  ;;  %6072 = vmatpush3.bf16.msra.mxu1 %v6953_v12  ;;  %v1187_v12 = vshrl.u32 %v5040_v1, 16  ;;  %v6977_v1 = vld [vmem:[%s8171_s1 + $0x138] sm:$0xff]  }
  0x64   : > { %5865 = vmatprep.subr.bf16.mxu0 %v6954_v2  ;;  %6081 = vmatprep.subr.bf16.mxu1 %v6954_v2 }
  0x65   : > { %v1189_v25 = vrot.slane %v1187_v12, 4  ;;  %v5049_v12 = vld [vmem:[%s7160_s26 + $0xcc] sm:$0x1] }
  0x66   : > { %5858 = vmatmul.mubr.bf16.vlgmr.msra.gmra.mrb[0].mxu0 %v7214_v11  ;;  %6074 = vmatmul.mubr.bf16.vlgmr.msra.gmra.mrb[0].mxu1 %v5211_v24  ;;  %v5213_v11 = vcombine.low %v2277_v33, %v2291_v34  ;;  %v5041_v24 = vld [vmem:[%s7160_s26 + $0xac] sm:$0x1]  ;;  %v5046_v33 = vld [vmem:[%s7160_s26 + $0xc0] sm:$0xf]  ;;  %v1215_v34 = vshrl.u32 %v5044_v28, 16 }
  0x67   : > { %5866 = vmatpush3.bf16.msra.mxu0 %v6954_v2  ;;  %6082 = vmatpush3.bf16.msra.mxu1 %v6954_v2  ;;  %v5039_v2 = vld [vmem:[%s7160_s26 + $0xa4] sm:$0x1]  ;;  %v1229_v44 = vshrl.u32 %v5046_v33, 16 }
  0x68   : > { %5867 = vmatprep.subr.bf16.mxu0 %v6955_v17  ;;  %6083 = vmatprep.subr.bf16.mxu1 %v6955_v17  ;;  %v1217_v38 = vrot.slane %v1215_v34, 4 }
  0x69   : > { %5861 = vmatprep.mubr.bf16.mxu0 %v7234_v37  ;;  %6077 = vmatprep.mubr.bf16.mxu1 %v5212_v32  ;;  %v6958_v37 = vld [vmem:[%s8171_s1 + $0xe0] sm:$0xff]   ;;  %v1204_v32 = vshll.u32 %v5042_v22, 16 }
  0x6b   : > { %5868 = vmatpush3.bf16.msra.mxu0 %v6955_v17  ;;  %6084 = vmatpush3.bf16.msra.mxu1 %v6955_v17  ;;  %v1201_v17 = vshrl.u32 %v5042_v22, 16  ;;  %v1206_v45 = vrot.slane %v1204_v32, 5 }
  0x6c   : > { %5869 = vmatprep.subr.bf16.mxu0 %v6956_v35  ;;  %6085 = vmatprep.subr.bf16.mxu1 %v6956_v35 }
  0x6d   : > { %v1203_v42 = vrot.slane %v1201_v17, 4 }
  0x6e   : > { %5862 = vmatmul.mubr.bf16.gmra.mrb[4].mxu0 %v7248_v46  ;;  %6078 = vmatmul.mubr.bf16.gmra.mrb[4].mxu1 %v5213_v11  ;;  %v6959_v46 = vld [vmem:[%s8171_s1 + $0xe8] sm:$0xff]   ;;  %v1182_v11 = vshll.u32 %v5039_v2, 16 }
  0x6f   : > { %5870 = vmatpush3.bf16.msra.mxu0 %v6956_v35  ;;  %6086 = vmatpush3.bf16.msra.mxu1 %v6956_v35  ;;  %v1218_v35 = vshll.u32 %v5044_v28, 16  ;;  %v1207_v60 = vor.u32 %v1206_v45, %v1203_v42  ;;  %v5217_v28 = vld [vmem:[%s7160_s26 + $0xe4] sm:$0x1] }
  0x70   : > { %5871 = vmatprep.subr.bf16.mxu0 %v6957_v36  ;;  %6087 = vmatprep.subr.bf16.mxu1 %v6957_v36  ;;  %v1184_v51 = vrot.slane %v1182_v11, 5  ;;  %v2567_v11 = vshll.u32 %v5217_v28, 16 }
  0x71   : > { %5881 = vmatprep.mubr.bf16.mxu0 %v6962_v39  ;;  %6097 = vmatprep.mubr.bf16.mxu1 %v7348_v40  ;;  %v1179_v39 = vor.u32 %v1178_v21, %v1175_v20  ;;  %v1220_v47 = vrot.slane %v1218_v35, 5 }
  0x72   : > { %v2569_v45 = vrot.slane %v2567_v11, 5 }
  0x73   : > { %5872 = vmatpush3.bf16.msra.mxu0 %v6957_v36  ;;  %6088 = vmatpush3.bf16.msra.mxu1 %v6957_v36  ;;  %v1196_v36 = vshll.u32 %v5041_v24, 16  ;;  %v1180_v55 = vrot.slane %v1179_v39, 4  ;;  %v1221_v61 = vor.u32 %v1220_v47, %v1217_v38  ;;  %v1238_v24 = vshll.u32 %v5047_v3, 16 }
  0x74   : > { %5873 = vmatprep.subr.bf16.mxu0 %v6958_v37  ;;  %6089 = vmatprep.subr.bf16.mxu1 %v6958_v37 }
  0x75   : > { %v1198_v52 = vrot.slane %v1196_v36, 5  ;;  %v1185_v13 = vsel %vm7182_vm2, %v1180_v55, %v1184_v51  ;;  %v1222_v18 = vrot.slane %v1221_v61, 4  ;;  %v1240_v39 = vrot.slane %v1238_v24, 5  ;;  %v5224_v61 = vld [vmem:[%s7160_s26 + $0x100] sm:$0xf] }
  0x77   : > { %5874 = vmatpush3.bf16.msra.mxu0 %v6958_v37  ;;  %6090 = vmatpush3.bf16.msra.mxu1 %v6958_v37  ;;  %v1193_v37 = vor.u32 %v1192_v26, %v1189_v25  ;;  %v1252_v26 = vshll.u32 %v5049_v12, 16  ;;  %v2617_v12 = vshll.u32 %v5224_v61, 16 }
  0x78   : > { %5875 = vmatprep.subr.bf16.mxu0 %v6959_v46  ;;  %6091 = vmatprep.subr.bf16.mxu1 %v6959_v46 }
  0x79   : > { %v1194_v56 = vrot.slane %v1193_v37, 4  ;;  %v2619_v24 = vrot.slane %v2617_v12, 5  ;;  %v6990_v12 = vld [vmem:[%s8171_s1 + $0x1a0] sm:$0xff]  }
  0x7b   : > { %5876 = vmatpush3.bf16.msra.mxu0 %v6959_v46  ;;  %6092 = vmatpush3.bf16.msra.mxu1 %v6959_v46  ;;  %v5048_v46 = vld [vmem:[%s7160_s26 + $0xc8] sm:$0xf] }
  0x7c   : > { %5877 = vmatprep.subr.bf16.mxu0 %v6960_v43  ;;  %6093 = vmatprep.subr.bf16.mxu1 %v6960_v43  ;;  %v1243_v48 = vshrl.u32 %v5048_v46, 16  ;;  %v1246_v4 = vshll.u32 %v5048_v46, 16  ;;  %v1254_v46 = vrot.slane %v1252_v26, 5 }
  0x7e   : > { %v1245_v9 = vrot.slane %v1243_v48, 4  ;;  %v1248_v10 = vrot.slane %v1246_v4, 5  ;;  %v5220_v48 = vld [vmem:[%s7160_s26 + $0xf0] sm:$0xf] }
  0x7f   : > { %5878 = vmatpush3.bf16.msra.mxu0 %v6960_v43  ;;  %6094 = vmatpush3.bf16.msra.mxu1 %v6960_v43  ;;  %v1224_v43 = vshll.u32 %v5045_v31, 16  ;;  %v2586_v55 = vshrl.u32 %v5220_v48, 16 }
  0x80   : > { %5879 = vmatprep.subr.bf16.mxu0 %v6961_v49  ;;  %6095 = vmatprep.subr.bf16.mxu1 %v6961_v49  ;;  %v1249_v25 = vor.u32 %v1248_v10, %v1245_v9  ;;  %v2614_v10 = vshrl.u32 %v5224_v61, 16 }
  0x82   : > { %v1250_v37 = vrot.slane %v1249_v25, 4 }
  0x83   : > { %5880 = vmatpush3.bf16.msra.mxu0 %v6961_v49  ;;  %6096 = vmatpush3.bf16.msra.mxu1 %v6961_v49  ;;  %v1232_v49 = vshll.u32 %v5046_v33, 16 }
  0x84   : > { %5889 = vmatprep.subr.bf16.mxu0 %v6963_v54  ;;  %6105 = vmatprep.subr.bf16.mxu1 %v6963_v54  ;;  %v1255_v47 = vsel %vm7182_vm2, %v1250_v37, %v1254_v46 }
  0x85   : > { %v1234_v0 = vrot.slane %v1232_v49, 5  ;;  %v5218_v49 = vld [vmem:[%s7160_s26 + $0xe8] sm:$0xf] }
  0x86   : > { %5882 = vmatmul.mubr.bf16.vlgmr.msra.gmra.mrb[0].mxu0 %v6965_v57  ;;  %6098 = vmatmul.mubr.bf16.vlgmr.msra.gmra.mrb[0].mxu1 %v7373_v58  ;;  %v2572_v4 = vshrl.u32 %v5218_v49, 16 }
  0x87   : > { %5890 = vmatpush3.bf16.msra.mxu0 %v6963_v54  ;;  %6106 = vmatpush3.bf16.msra.mxu1 %v6963_v54  ;;  %v5216_v54 = vld [vmem:[%s7160_s26 + $0xe0] sm:$0xf] }
  0x88   : > { %5891 = vmatprep.subr.bf16.mxu0 %v6967_v59  ;;  %6107 = vmatprep.subr.bf16.mxu1 %v6967_v59  ;;  %v2558_v7 = vshrl.u32 %v5216_v54, 16  ;;  %v2561_v8 = vshll.u32 %v5216_v54, 16 }
  0x89   : > { %5885 = vmatprep.mubr.bf16.mxu0 %v6972_v62  ;;  %6101 = vmatprep.mubr.bf16.mxu1 %v7380_v63  ;;  %v1231_v62 = vrot.slane %v1229_v44, 4 }
  0x8a   : > { %v2560_v21 = vrot.slane %v2558_v7, 4  ;;  %v2563_v22 = vrot.slane %v2561_v8, 5  ;;  %v6983_v7 = vld [vmem:[%s8171_s1 + $0x168] sm:$0xff]  }
  0x8b   : > { %5892 = vmatpush3.bf16.msra.mxu0 %v6967_v59  ;;  %6108 = vmatpush3.bf16.msra.mxu1 %v6967_v59  ;;  %v1226_v59 = vrot.slane %v1224_v43, 5  ;;  %v1235_v2 = vor.u32 %v1234_v0, %v1231_v62  ;;  %v6982_v62 = vld [vmem:[%s8171_s1 + $0x160] sm:$0xff]   ;;  %v2574_v0 = vrot.slane %v2572_v4, 4 }
  0x8c   : > { %5893 = vmatprep.subr.bf16.mxu0 %v6968_v6  ;;  %6109 = vmatprep.subr.bf16.mxu1 %v6968_v6  ;;  %v2564_v35 = vor.u32 %v2563_v22, %v2560_v21 }
  0x8d   : > { %v1227_v32 = vsel %vm7182_vm2, %v1222_v18, %v1226_v59  ;;  %v1236_v36 = vrot.slane %v1235_v2, 4  ;;  %v5219_v59 = vld [vmem:[%s7160_s26 + $0xec] sm:$0x1]  ;;  %v5225_v18 = vld [vmem:[%s7160_s26 + $0x104] sm:$0x1]  ;;  %v2616_v2 = vrot.slane %v2614_v10, 4 }
  0x8e   : > { %5886 = vmatmul.mubr.bf16.gmra.mrb[4].mxu0 %v6975_v14  ;;  %6102 = vmatmul.mubr.bf16.gmra.mrb[4].mxu1 %v7394_v16  ;;  %v1199_v14 = vsel %vm7182_vm2, %v1194_v56, %v1198_v52  ;;  %v2565_v44 = vrot.slane %v2564_v35, 4  ;;  %v2589_v56 = vshll.u32 %v5220_v48, 16  ;;  %v2581_v8 = vshll.u32 %v5219_v59, 16  ;;  %v7537_v10 = vld [vmem:[%s7160_s26 + $0x50] ss:$8 sps:$4 sm:$0xff]  }
  0x8f   : > { %5894 = vmatpush3.bf16.msra.mxu0 %v6968_v6  ;;  %6110 = vmatpush3.bf16.msra.mxu1 %v6968_v6  ;;  %v2547_v6 = vshll.u32 %v5214_v53, 16  ;;  %v7438_v31 = vcombine.low %v1185_v13, %v1199_v14  ;;  %v1241_v38 = vsel %vm7182_vm2, %v1236_v36, %v1240_v39  ;;  %v2575_v53 = vshll.u32 %v5218_v49, 16  ;;  %v5226_v13 = vld [vmem:[%s7160_s26 + $0x108] sm:$0xf]  ;;  %v6985_v36 = vld [vmem:[%s8171_s1 + $0x178] sm:$0xff]  }
  0x90   : > { %5895 = vmatprep.subr.bf16.mxu0 %v6969_v15  ;;  %6111 = vmatprep.subr.bf16.mxu1 %v6969_v15  ;;  %v2570_v52 = vsel %vm7182_vm2, %v2565_v44, %v2569_v45  ;;  %v2591_v3 = vrot.slane %v2589_v56, 5  ;;  %v2628_v25 = vshrl.u32 %v5226_v13, 16  ;;  %v2631_v26 = vshll.u32 %v5226_v13, 16  ;;  %v5227_v44 = vld [vmem:[%s7160_s26 + $0x10c] sm:$0x1] }
  0x91   : > { %5905 = vmatprep.mubr.bf16.mxu0 %v7348_v40  ;;  %6121 = vmatprep.mubr.bf16.mxu1 %v7401_v23  ;;  %v1210_v40 = vshll.u32 %v5043_v29, 16  ;;  %v2549_v20 = vrot.slane %v2547_v6, 5  ;;  %v6978_v29 = vld [vmem:[%s8171_s1 + $0x140] sm:$0xff]   ;;  %v2623_v11 = vshll.u32 %v5225_v18, 16  ;;  %v2620_v37 = vor.u32 %v2619_v24, %v2616_v2  ;;  %v5229_v45 = vld [vmem:[%s7160_s26 + $0x114] sm:$0x1] }
  0x92   : > { %v2630_v46 = vrot.slane %v2628_v25, 4  ;;  %v6991_v13 = vld [vmem:[%s8171_s1 + $0x1a8] sm:$0xff]   ;;  %v6992_v18 = vld [vmem:[%s8171_s1 + $0x1b0] sm:$0xff]   ;;  %v6993_v2 = vld [vmem:[%s8171_s1 + $0x1b8] sm:$0xff]  }
  0x93   : > { %5896 = vmatpush3.bf16.msra.mxu0 %v6969_v15  ;;  %6112 = vmatpush3.bf16.msra.mxu1 %v6969_v15  ;;  %v1212_v57 = vrot.slane %v1210_v40, 5  ;;  %v1208_v15 = vrot.slane %v1207_v60, 4  ;;  %v2550_v33 = vor.u32 %v2549_v20, %v2546_v19  ;;  %v5221_v60 = vld [vmem:[%s7160_s26 + $0xf4] sm:$0x1]  ;;  %v5228_v19 = vld [vmem:[%s7160_s26 + $0x110] sm:$0xf] }
  0x94   : > { %5897 = vmatprep.subr.bf16.mxu0 %v6970_v27  ;;  %6113 = vmatprep.subr.bf16.mxu1 %v6970_v27  ;;  %v2595_v9 = vshll.u32 %v5221_v60, 16  ;;  %v2642_v28 = vshrl.u32 %v5228_v19, 16 }
  0x95   : > { %v1213_v17 = vsel %vm7182_vm2, %v1208_v15, %v1212_v57  ;;  %v2551_v40 = vrot.slane %v2550_v33, 4  ;;  %v5222_v57 = vld [vmem:[%s7160_s26 + $0xf8] sm:$0xf]  ;;  %v5223_v15 = vld [vmem:[%s7160_s26 + $0xfc] sm:$0x1] }
  0x96   : > { %v7447_v42 = vcombine.low %v1213_v17, %v1227_v32  ;;  %v2600_v5 = vshrl.u32 %v5222_v57, 16  ;;  %v2603_v6 = vshll.u32 %v5222_v57, 16  ;;  %v2583_v32 = vrot.slane %v2581_v8, 5  ;;  %v6989_v8 = vld [vmem:[%s8171_s1 + $0x198] sm:$0xff]  }
  0x97   : > { %5898 = vmatpush3.bf16.msra.mxu0 %v6970_v27  ;;  %6114 = vmatpush3.bf16.msra.mxu1 %v6970_v27  ;;  %v5215_v27 = vld [vmem:[%s7160_s26 + $0xdc] sm:$0x1]  ;;  %v2609_v35 = vshll.u32 %v5223_v15, 16  ;;  %v5152_v15 = vld [vmem:[%s7160_s26 + $0x10] sm:$0xf] }
  0x98   : > { %5899 = vmatprep.subr.bf16.mxu0 %v6971_v41  ;;  %6115 = vmatprep.subr.bf16.mxu1 %v6971_v41  ;;  %v2553_v34 = vshll.u32 %v5215_v27, 16  ;;  %v2602_v21 = vrot.slane %v2600_v5, 4  ;;  %v2605_v22 = vrot.slane %v2603_v6, 5  ;;  %v6984_v27 = vld [vmem:[%s8171_s1 + $0x170] sm:$0xff]  }
  0x99   : > { %v6988_v6 = vld [vmem:[%s8171_s1 + $0x190] sm:$0xff]  }
  0x9a   : > { %v2555_v43 = vrot.slane %v2553_v34, 5  ;;  %v2597_v34 = vrot.slane %v2595_v9, 5  ;;  %v2606_v39 = vor.u32 %v2605_v22, %v2602_v21  ;;  %v7534_v9 = vld [vmem:[%s7160_s26 + $0x8] ss:$8 sps:$4 sm:$0xff]   ;;  %v1783_v21 = vshrl.u32 %v5152_v15, 16 }
  0x9b   : > { %5900 = vmatpush3.bf16.msra.mxu0 %v6971_v41  ;;  %6116 = vmatpush3.bf16.msra.mxu1 %v6971_v41  ;;  %v6979_v41 = vld [vmem:[%s8171_s1 + $0x148] sm:$0xff]   ;;  %v1786_v22 = vshll.u32 %v5152_v15, 16  ;;  %v5162_v15 = vld [vmem:[%s7160_s26 + $0x38] sm:$0xf] }
  0x9c   : > { %5901 = vmatprep.subr.bf16.mxu0 %v6973_v50  ;;  %6117 = vmatprep.subr.bf16.mxu1 %v6973_v50  ;;  %v2556_v51 = vsel %vm7182_vm2, %v2551_v40, %v2555_v43  ;;  %v2644_v40 = vrot.slane %v2642_v28, 4  ;;  %v2607_v49 = vrot.slane %v2606_v39, 4  ;;  %v5151_v28 = vld [vmem:[%s7160_s26 + $0xc] sm:$0x1] }
  0x9d   : > { %v7471_v54 = vcombine.low %v2556_v51, %v2570_v52  ;;  %v2621_v51 = vrot.slane %v2620_v37, 4  ;;  %v2625_v52 = vrot.slane %v2623_v11, 5  ;;  %v6999_v39 = vld [vmem:[%s8171_s1 + $0x1c8] sm:$0xff]  }
  0x9e   : > { %v7572_v37 = vld [vmem:[%s7160_s26 + $0x28] ss:$8 sps:$4 sm:$0xff]  }
  0x9f   : > { %5902 = vmatpush3.bf16.msra.mxu0 %v6973_v50  ;;  %6118 = vmatpush3.bf16.msra.mxu1 %v6973_v50  ;;  %v7461_v50 = vcombine.low %v1241_v38, %v1255_v47  ;;  %v2611_v47 = vrot.slane %v2609_v35, 5  ;;  %v2626_v59 = vsel %vm7182_vm2, %v2621_v51, %v2625_v52  ;;  %v1778_v35 = vshll.u32 %v5151_v28, 16  ;;  %v5159_v28 = vld [vmem:[%s7160_s26 + $0x2c] sm:$0x1] }
  0xa0   : > { %5903 = vmatprep.subr.bf16.mxu0 %v6977_v1  ;;  %6119 = vmatprep.subr.bf16.mxu1 %v6977_v1 }
  0xa1   : > { %v2612_v57 = vsel %vm7182_vm2, %v2607_v49, %v2611_v47  ;;  %v5156_v47 = vld [vmem:[%s7160_s26 + $0x20] sm:$0xf] }
  0xa2   : > { %v7590_v49 = vld [vmem:[%s7160_s26 + $0x80] ss:$8 sps:$4 sm:$0xff]  }
  0xa3   : > { %5904 = vmatpush3.bf16.msra.mxu0 %v6977_v1  ;;  %6120 = vmatpush3.bf16.msra.mxu1 %v6977_v1  ;;  %v2577_v1 = vrot.slane %v2575_v53, 5  ;;  %v2651_v53 = vshll.u32 %v5229_v45, 16  ;;  %v7000_v45 = vld [vmem:[%s8171_s1 + $0x1d0] sm:$0xff]  }
  0xa4   : > { %5913 = vmatprep.subr.bf16.mxu0 %v6978_v29  ;;  %6129 = vmatprep.subr.bf16.mxu1 %v6978_v29 }
  0xa5   : > { %v2578_v14 = vor.u32 %v2577_v1, %v2574_v0  ;;  %v2653_v0 = vrot.slane %v2651_v53, 5  ;;  %v6987_v1 = vld [vmem:[%s8171_s1 + $0x188] sm:$0xff]   ;;  %v1811_v53 = vshrl.u32 %v5156_v47, 16 }
  0xa6   : > { %5906 = vmatmul.mubr.bf16.vlgmr.msra.gmra.mrb[0].mxu0 %v7373_v58  ;;  %6122 = vmatmul.mubr.bf16.vlgmr.msra.gmra.mrb[0].mxu1 %v7438_v31  ;;  %v6980_v58 = vld [vmem:[%s8171_s1 + $0x150] sm:$0xff]  }
  0xa7   : > { %5914 = vmatpush3.bf16.msra.mxu0 %v6978_v29  ;;  %6130 = vmatpush3.bf16.msra.mxu1 %v6978_v29  ;;  %v2645_v29 = vshll.u32 %v5228_v19, 16  ;;  %v2579_v17 = vrot.slane %v2578_v14, 4  ;;  %v5150_v14 = vld [vmem:[%s7160_s26 + $0x8] sm:$0xf] }
  0xa8   : > { %5915 = vmatprep.subr.bf16.mxu0 %v6979_v41  ;;  %6131 = vmatprep.subr.bf16.mxu1 %v6979_v41  ;;  %v1769_v19 = vshrl.u32 %v5150_v14, 16 }
  0xa9   : > { %5909 = vmatprep.mubr.bf16.mxu0 %v7380_v63  ;;  %6125 = vmatprep.mubr.bf16.mxu1 %v7447_v42  ;;  %v6981_v63 = vld [vmem:[%s8171_s1 + $0x158] sm:$0xff]   ;;  %v2647_v43 = vrot.slane %v2645_v29, 5  ;;  %v2584_v38 = vsel %vm7182_vm2, %v2579_v17, %v2583_v32  ;;  %v5153_v29 = vld [vmem:[%s7160_s26 + $0x14] sm:$0x1]  ;;  %v6995_v17 = vld [vmem:[%s8171_s1 + $0x1c0] sm:$0xff]  }
  0xaa   : > { %v1771_v24 = vrot.slane %v1769_v19, 4  ;;  %v7563_v32 = vld [vmem:[%s7160_s26 + $0x18] ss:$8 sps:$4 sm:$0xff]  }
  0xab   : > { %5916 = vmatpush3.bf16.msra.mxu0 %v6979_v41  ;;  %6132 = vmatpush3.bf16.msra.mxu1 %v6979_v41  ;;  %v2633_v41 = vrot.slane %v2631_v26, 5  ;;  %v2648_v4 = vor.u32 %v2647_v43, %v2644_v40  ;;  %v1785_v26 = vrot.slane %v1783_v21, 4  ;;  %v1780_v40 = vrot.slane %v1778_v35, 5 }
  0xac   : > { %5917 = vmatprep.subr.bf16.mxu0 %v6980_v58  ;;  %6133 = vmatprep.subr.bf16.mxu1 %v6980_v58 }
  0xad   : > { %v2634_v48 = vor.u32 %v2633_v41, %v2630_v46  ;;  %v7575_v46 = vld [vmem:[%s7160_s26 + $0x70] ss:$8 sps:$4 sm:$0xff]  }
  0xae   : > { %5910 = vmatmul.mubr.bf16.gmra.mrb[4].mxu0 %v7394_v16  ;;  %6126 = vmatmul.mubr.bf16.gmra.mrb[4].mxu1 %v7461_v50  ;;  %v2588_v16 = vrot.slane %v2586_v55, 4  ;;  %v6986_v55 = vld [vmem:[%s8171_s1 + $0x180] sm:$0xff]  }
  0xaf   : > { %5918 = vmatpush3.bf16.msra.mxu0 %v6980_v58  ;;  %6134 = vmatpush3.bf16.msra.mxu1 %v6980_v58  ;;  %v2635_v60 = vrot.slane %v2634_v48, 4  ;;  %v7001_v48 = vld [vmem:[%s8171_s1 + $0x1d8] sm:$0xff]  }
  0xb0   : > { %5919 = vmatprep.subr.bf16.mxu0 %v6981_v63  ;;  %6135 = vmatprep.subr.bf16.mxu1 %v6981_v63  ;;  %v2592_v20 = vor.u32 %v2591_v3, %v2588_v16  ;;  %v7515_v16 = vcombine.low %v2612_v57, %v2626_v59  ;;  %v5158_v59 = vld [vmem:[%s7160_s26 + $0x28] sm:$0xf] }
  0xb1   : > { %5929 = vmatprep.mubr.bf16.mxu0 %v7401_v23  ;;  %6145 = vmatprep.mubr.bf16.mxu1 %v7471_v54 }
  0xb2   : > { %v2593_v33 = vrot.slane %v2592_v20, 4  ;;  %v1772_v20 = vshll.u32 %v5150_v14, 16 }
  0xb3   : > { %5920 = vmatpush3.bf16.msra.mxu0 %v6981_v63  ;;  %6136 = vmatpush3.bf16.msra.mxu1 %v6981_v63  ;;  %v2637_v63 = vshll.u32 %v5227_v44, 16 }
  0xb4   : > { %5921 = vmatprep.subr.bf16.mxu0 %v6982_v62  ;;  %6137 = vmatprep.subr.bf16.mxu1 %v6982_v62  ;;  %v2598_v58 = vsel %vm7182_vm2, %v2593_v33, %v2597_v34  ;;  %v1774_v25 = vrot.slane %v1772_v20, 5  ;;  %v7566_v33 = vld [vmem:[%s7160_s26 + $0x60] ss:$8 sps:$4 sm:$0xff]  }
  0xb5   : > { %v7506_v56 = vcombine.low %v2584_v38, %v2598_v58  ;;  %v2639_v61 = vrot.slane %v2637_v63, 5  ;;  %v5154_v38 = vld [vmem:[%s7160_s26 + $0x18] sm:$0xf] }
  0xb6   : > { %v1775_v34 = vor.u32 %v1774_v25, %v1771_v24  ;;  %v7587_v58 = vld [vmem:[%s7160_s26 + $0x38] ss:$8 sps:$4 sm:$0xff]   ;;  %v1797_v63 = vshrl.u32 %v5154_v38, 16 }
  0xb7   : > { %5922 = vmatpush3.bf16.msra.mxu0 %v6982_v62  ;;  %6138 = vmatpush3.bf16.msra.mxu1 %v6982_v62  ;;  %v2649_v62 = vrot.slane %v2648_v4, 4  ;;  %v2640_v3 = vsel %vm7182_vm2, %v2635_v60, %v2639_v61  ;;  %v1800_v4 = vshll.u32 %v5154_v38, 16  ;;  %v5160_v60 = vld [vmem:[%s7160_s26 + $0x30] sm:$0xf]  ;;  %v7002_v61 = vld [vmem:[%s8171_s1 + $0x1e0] sm:$0xff]  }
  0xb8   : > { %5923 = vmatprep.subr.bf16.mxu0 %v6983_v7  ;;  %6139 = vmatprep.subr.bf16.mxu1 %v6983_v7  ;;  %v1776_v41 = vrot.slane %v1775_v34, 4  ;;  %v1842_v14 = vshll.u32 %v5160_v60, 16  ;;  %v1856_v34 = vshll.u32 %v5162_v15, 16 }
  0xb9   : > { %v2654_v5 = vsel %vm7182_vm2, %v2649_v62, %v2653_v0  ;;  %v5155_v62 = vld [vmem:[%s7160_s26 + $0x1c] sm:$0x1]  ;;  %v1799_v0 = vrot.slane %v1797_v63, 4 }
  0xba   : > { %v1781_v51 = vsel %vm7182_vm2, %v1776_v41, %v1780_v40  ;;  %v1806_v20 = vshll.u32 %v5155_v62, 16  ;;  %v7005_v41 = vld [vmem:[%s8171_s1 + $0x1f0] sm:$0xff]   ;;  %v7009_v62 = vld [vmem:[%s8171_s1 + $0x1f8] sm:$0xff]  }
  0xbb   : > { %5924 = vmatpush3.bf16.msra.mxu0 %v6983_v7  ;;  %6140 = vmatpush3.bf16.msra.mxu1 %v6983_v7  ;;  %v7528_v7 = vcombine.low %v2640_v3, %v2654_v5  ;;  %v1813_v3 = vrot.slane %v1811_v53, 4 }
  0xbc   : > { %5925 = vmatprep.subr.bf16.mxu0 %v6984_v27  ;;  %6141 = vmatprep.subr.bf16.mxu1 %v6984_v27 }
  0xbf   : > { %5926 = vmatpush3.bf16.msra.mxu0 %v6984_v27  ;;  %6142 = vmatpush3.bf16.msra.mxu1 %v6984_v27  ;;  %v1788_v27 = vrot.slane %v1786_v22, 5 }
  0xc0   : > { %5927 = vmatprep.subr.bf16.mxu0 %v6985_v36  ;;  %6143 = vmatprep.subr.bf16.mxu1 %v6985_v36 }
  0xc1   : > { %v1789_v11 = vor.u32 %v1788_v27, %v1785_v26  ;;  %v1844_v27 = vrot.slane %v1842_v14, 5 }
  0xc3   : > { %5928 = vmatpush3.bf16.msra.mxu0 %v6985_v36  ;;  %6144 = vmatpush3.bf16.msra.mxu1 %v6985_v36  ;;  %v1792_v36 = vshll.u32 %v5153_v29, 16  ;;  %v1790_v43 = vrot.slane %v1789_v11, 4  ;;  %v5161_v29 = vld [vmem:[%s7160_s26 + $0x34] sm:$0x1] }
  0xc4   : > { %5937 = vmatprep.subr.bf16.mxu0 %v6986_v55  ;;  %6153 = vmatprep.subr.bf16.mxu1 %v6986_v55 }
  0xc5   : > { %v1794_v44 = vrot.slane %v1792_v36, 5  ;;  %v5234_v36 = vld [vmem:[%s7160_s26 + $0x50] sm:$0xf] }
  0xc6   : > { %5930 = vmatmul.mubr.bf16.vlgmr.msra.gmra.mrb[0].mxu0 %v7438_v31  ;;  %6146 = vmatmul.mubr.bf16.vlgmr.msra.gmra.mrb[0].mxu1 %v7506_v56  ;;  %v2910_v63 = vshll.u32 %v5234_v36, 16 }
  0xc7   : > { %5938 = vmatpush3.bf16.msra.mxu0 %v6986_v55  ;;  %6154 = vmatpush3.bf16.msra.mxu1 %v6986_v55  ;;  %v1795_v52 = vsel %vm7182_vm2, %v1790_v43, %v1794_v44  ;;  %v1814_v55 = vshll.u32 %v5156_v47, 16  ;;  %v1808_v43 = vrot.slane %v1806_v20, 5  ;;  %v1834_v47 = vshll.u32 %v5159_v28, 16 }
  0xc8   : > { %5939 = vmatprep.subr.bf16.mxu0 %v6987_v1  ;;  %6155 = vmatprep.subr.bf16.mxu1 %v6987_v1  ;;  %v7599_v57 = vcombine.low %v1781_v51, %v1795_v52  ;;  %v1848_v52 = vshll.u32 %v5161_v29, 16 }
  0xc9   : > { %5933 = vmatprep.mubr.bf16.mxu0 %v7447_v42  ;;  %6149 = vmatprep.mubr.bf16.mxu1 %v7515_v16  ;;  %v1816_v5 = vrot.slane %v1814_v55, 5 }
  0xcb   : > { %5940 = vmatpush3.bf16.msra.mxu0 %v6987_v1  ;;  %6156 = vmatpush3.bf16.msra.mxu1 %v6987_v1  ;;  %v1802_v1 = vrot.slane %v1800_v4, 5  ;;  %v1817_v21 = vor.u32 %v1816_v5, %v1813_v3  ;;  %v5163_v3 = vld [vmem:[%s7160_s26 + $0x3c] sm:$0x1]  ;;  %v5165_v5 = vld [vmem:[%s7160_s26 + $0x44] sm:$0x1] }
  0xcc   : > { %5941 = vmatprep.subr.bf16.mxu0 %v6988_v6  ;;  %6157 = vmatprep.subr.bf16.mxu1 %v6988_v6 }
  0xcd   : > { %v1803_v19 = vor.u32 %v1802_v1, %v1799_v0  ;;  %v1818_v44 = vrot.slane %v1817_v21, 4  ;;  %v1862_v21 = vshll.u32 %v5163_v3, 16 }
  0xce   : > { %5934 = vmatmul.mubr.bf16.gmra.mrb[4].mxu0 %v7461_v50  ;;  %6150 = vmatmul.mubr.bf16.gmra.mrb[4].mxu1 %v7528_v7 }
  0xcf   : > { %5942 = vmatpush3.bf16.msra.mxu0 %v6988_v6  ;;  %6158 = vmatpush3.bf16.msra.mxu1 %v6988_v6  ;;  %v5157_v6 = vld [vmem:[%s7160_s26 + $0x24] sm:$0x1]  ;;  %v1804_v40 = vrot.slane %v1803_v19, 4 }
  0xd0   : > { %5943 = vmatprep.subr.bf16.mxu0 %v6989_v8  ;;  %6159 = vmatprep.subr.bf16.mxu1 %v6989_v8  ;;  %v1820_v22 = vshll.u32 %v5157_v6, 16 }
  0xd1   : > { %5953 = vmatprep.mubr.bf16.mxu0 %v7534_v9  ;;  %6169 = vmatprep.mubr.bf16.mxu1 %v7537_v10  ;;  %v1809_v0 = vsel %vm7182_vm2, %v1804_v40, %v1808_v43  ;;  %v7011_v43 = vld [vmem:[%s8171_s1 + $0x208] sm:$0xff]  }
  0xd3   : > { %5944 = vmatpush3.bf16.msra.mxu0 %v6989_v8  ;;  %6160 = vmatpush3.bf16.msra.mxu1 %v6989_v8  ;;  %v1825_v8 = vshrl.u32 %v5158_v59, 16 }
  0xd4   : > { %5945 = vmatprep.subr.bf16.mxu0 %v6990_v12  ;;  %6161 = vmatprep.subr.bf16.mxu1 %v6990_v12 }
  0xd5   : > { %v1827_v24 = vrot.slane %v1825_v8, 4  ;;  %v1836_v8 = vrot.slane %v1834_v47, 5 }
  0xd7   : > { %5946 = vmatpush3.bf16.msra.mxu0 %v6990_v12  ;;  %6162 = vmatpush3.bf16.msra.mxu1 %v6990_v12  ;;  %v1828_v12 = vshll.u32 %v5158_v59, 16  ;;  %v1858_v59 = vrot.slane %v1856_v34, 5 }
  0xd8   : > { %5947 = vmatprep.subr.bf16.mxu0 %v6991_v13  ;;  %6163 = vmatprep.subr.bf16.mxu1 %v6991_v13 }
  0xd9   : > { %v1830_v25 = vrot.slane %v1828_v12, 5 }
  0xdb   : > { %5948 = vmatpush3.bf16.msra.mxu0 %v6991_v13  ;;  %6164 = vmatpush3.bf16.msra.mxu1 %v6991_v13  ;;  %v1839_v13 = vshrl.u32 %v5160_v60, 16  ;;  %v1831_v38 = vor.u32 %v1830_v25, %v1827_v24  ;;  %v5235_v24 = vld [vmem:[%s7160_s26 + $0x54] sm:$0x1]  ;;  %v5237_v25 = vld [vmem:[%s7160_s26 + $0x5c] sm:$0x1] }
  0xdc   : > { %5949 = vmatprep.subr.bf16.mxu0 %v6992_v18  ;;  %6165 = vmatprep.subr.bf16.mxu1 %v6992_v18  ;;  %v2916_v34 = vshll.u32 %v5235_v24, 16 }
  0xdd   : > { %v1841_v26 = vrot.slane %v1839_v13, 4  ;;  %v1832_v6 = vrot.slane %v1831_v38, 4  ;;  %v1850_v13 = vrot.slane %v1848_v52, 5 }
  0xde   : > { %v2918_v38 = vrot.slane %v2916_v34, 5 }
  0xdf   : > { %5950 = vmatpush3.bf16.msra.mxu0 %v6992_v18  ;;  %6166 = vmatpush3.bf16.msra.mxu1 %v6992_v18  ;;  %v7003_v18 = vld [vmem:[%s8171_s1 + $0x1e8] sm:$0xff]   ;;  %v1845_v51 = vor.u32 %v1844_v27, %v1841_v26  ;;  %v7010_v26 = vld [vmem:[%s8171_s1 + $0x200] sm:$0xff]   ;;  %v1837_v28 = vsel %vm7182_vm2, %v1832_v6, %v1836_v8  ;;  %v5242_v6 = vld [vmem:[%s7160_s26 + $0x70] sm:$0xf] }
  0xe0   : > { %5951 = vmatprep.subr.bf16.mxu0 %v6993_v2  ;;  %6167 = vmatprep.subr.bf16.mxu1 %v6993_v2  ;;  %v5244_v8 = vld [vmem:[%s7160_s26 + $0x78] sm:$0xf] }
  0xe1   : > { %v1846_v12 = vrot.slane %v1845_v51, 4  ;;  %v2980_v24 = vshll.u32 %v5244_v8, 16 }
  0xe3   : > { %5952 = vmatpush3.bf16.msra.mxu0 %v6993_v2  ;;  %6168 = vmatpush3.bf16.msra.mxu1 %v6993_v2  ;;  %v5164_v2 = vld [vmem:[%s7160_s26 + $0x40] sm:$0xf]  ;;  %v1851_v29 = vsel %vm7182_vm2, %v1846_v12, %v1850_v13  ;;  %v5239_v13 = vld [vmem:[%s7160_s26 + $0x64] sm:$0x1] }
  0xe4   : > { %5961 = vmatprep.subr.bf16.mxu0 %v6995_v17  ;;  %6177 = vmatprep.subr.bf16.mxu1 %v6995_v17  ;;  %v1867_v35 = vshrl.u32 %v5164_v2, 16  ;;  %v1870_v11 = vshll.u32 %v5164_v2, 16  ;;  %v1876_v2 = vshll.u32 %v5165_v5, 16  ;;  %v7014_v12 = vld [vmem:[%s8171_s1 + $0x220] sm:$0xff]  }
  0xe6   : > { %5954 = vmatmul.mubr.bf16.vlgmr.msra.gmra.mrb[0].mxu0 %v7563_v32  ;;  %6170 = vmatmul.mubr.bf16.vlgmr.msra.gmra.mrb[0].mxu1 %v7566_v33  ;;  %v1869_v60 = vrot.slane %v1867_v35, 4  ;;  %v1878_v40 = vrot.slane %v1876_v2, 5  ;;  %v2977_v2 = vshrl.u32 %v5244_v8, 16  ;;  %v7017_v8 = vld [vmem:[%s8171_s1 + $0x238] sm:$0xff]  }
  0xe7   : > { %5962 = vmatpush3.bf16.msra.mxu0 %v6995_v17  ;;  %6178 = vmatpush3.bf16.msra.mxu1 %v6995_v17  ;;  %v1853_v17 = vshrl.u32 %v5162_v15, 16  ;;  %v2912_v15 = vrot.slane %v2910_v63, 5  ;;  %v7012_v63 = vld [vmem:[%s8171_s1 + $0x210] sm:$0xff]  }
  0xe8   : > { %5963 = vmatprep.subr.bf16.mxu0 %v6999_v39  ;;  %6179 = vmatprep.subr.bf16.mxu1 %v6999_v39 }
  0xe9   : > { %5957 = vmatprep.mubr.bf16.mxu0 %v7572_v37  ;;  %6173 = vmatprep.mubr.bf16.mxu1 %v7575_v46  ;;  %v1855_v55 = vrot.slane %v1853_v17, 4 }
  0xeb   : > { %5964 = vmatpush3.bf16.msra.mxu0 %v6999_v39  ;;  %6180 = vmatpush3.bf16.msra.mxu1 %v6999_v39  ;;  %v5236_v39 = vld [vmem:[%s7160_s26 + $0x58] sm:$0xf]  ;;  %v1859_v20 = vor.u32 %v1858_v59, %v1855_v55  ;;  %v5238_v59 = vld [vmem:[%s7160_s26 + $0x60] sm:$0xf] }
  0xec   : > { %5965 = vmatprep.subr.bf16.mxu0 %v7000_v45  ;;  %6181 = vmatprep.subr.bf16.mxu1 %v7000_v45  ;;  %v2921_v4 = vshrl.u32 %v5236_v39, 16  ;;  %v2924_v53 = vshll.u32 %v5236_v39, 16  ;;  %v1864_v39 = vrot.slane %v1862_v21, 5 }
  0xee   : > { %5958 = vmatmul.mubr.bf16.gmra.mrb[4].mxu0 %v7587_v58  ;;  %6174 = vmatmul.mubr.bf16.gmra.mrb[4].mxu1 %v7590_v49  ;;  %v2926_v19 = vrot.slane %v2924_v53, 5 }
  0xef   : > { %5966 = vmatpush3.bf16.msra.mxu0 %v7000_v45  ;;  %6182 = vmatpush3.bf16.msra.mxu1 %v7000_v45  ;;  %v1822_v45 = vrot.slane %v1820_v22, 5 }
  0xf0   : > { %5967 = vmatprep.subr.bf16.mxu0 %v7001_v48  ;;  %6183 = vmatprep.subr.bf16.mxu1 %v7001_v48 }
  0xf1   : > { %5977 = vmatprep.mubr.bf16.mxu0 %v7537_v10  ;;  %6193 = vmatprep.mubr.bf16.mxu1 %v7599_v57  ;;  %v1823_v1 = vsel %vm7182_vm2, %v1818_v44, %v1822_v45  ;;  %v7647_v44 = vcombine.low %v1837_v28, %v1851_v29  ;;  %v5248_v28 = vld [vmem:[%s7160_s26 + $0x88] sm:$0xf] }
  0xf2   : > { %v7638_v27 = vcombine.low %v1809_v0, %v1823_v1  ;;  %v2935_v0 = vshrl.u32 %v5238_v59, 16  ;;  %v2938_v1 = vshll.u32 %v5238_v59, 16 }
  0xf3   : > { %5968 = vmatpush3.bf16.msra.mxu0 %v7001_v48  ;;  %6184 = vmatpush3.bf16.msra.mxu1 %v7001_v48  ;;  %v2907_v48 = vshrl.u32 %v5234_v36, 16  ;;  %v1860_v36 = vrot.slane %v1859_v20, 4  ;;  %v5241_v20 = vld [vmem:[%s7160_s26 + $0x6c] sm:$0x1] }
  0xf4   : > { %5969 = vmatprep.subr.bf16.mxu0 %v7002_v61  ;;  %6185 = vmatprep.subr.bf16.mxu1 %v7002_v61  ;;  %v2958_v34 = vshll.u32 %v5241_v20, 16 }
  0xf5   : > { %v2909_v14 = vrot.slane %v2907_v48, 4  ;;  %v1865_v52 = vsel %vm7182_vm2, %v1860_v36, %v1864_v39  ;;  %v5243_v36 = vld [vmem:[%s7160_s26 + $0x74] sm:$0x1] }
  0xf7   : > { %5970 = vmatpush3.bf16.msra.mxu0 %v7002_v61  ;;  %6186 = vmatpush3.bf16.msra.mxu1 %v7002_v61  ;;  %v1872_v61 = vrot.slane %v1870_v11, 5  ;;  %v2913_v17 = vor.u32 %v2912_v15, %v2909_v14  ;;  %v2930_v11 = vshll.u32 %v5237_v25, 16  ;;  %v2937_v14 = vrot.slane %v2935_v0, 4  ;;  %v7015_v25 = vld [vmem:[%s8171_s1 + $0x228] sm:$0xff]  }
  0xf8   : > { %5971 = vmatprep.subr.bf16.mxu0 %v7003_v18  ;;  %6187 = vmatprep.subr.bf16.mxu1 %v7003_v18  ;;  %v2940_v15 = vrot.slane %v2938_v1, 5 }
  0xf9   : > { %v1873_v22 = vor.u32 %v1872_v61, %v1869_v60  ;;  %v2914_v45 = vrot.slane %v2913_v17, 4  ;;  %v2932_v51 = vrot.slane %v2930_v11, 5  ;;  %v5240_v60 = vld [vmem:[%s7160_s26 + $0x68] sm:$0xf]  ;;  %v7013_v61 = vld [vmem:[%s8171_s1 + $0x218] sm:$0xff]   ;;  %v2944_v17 = vshll.u32 %v5239_v13, 16 }
  0xfa   : > { %v2949_v3 = vshrl.u32 %v5240_v60, 16  ;;  %v2952_v5 = vshll.u32 %v5240_v60, 16  ;;  %v2941_v29 = vor.u32 %v2940_v15, %v2937_v14  ;;  %v5249_v13 = vld [vmem:[%s7160_s26 + $0x8c] sm:$0x1] }
  0xfb   : > { %5972 = vmatpush3.bf16.msra.mxu0 %v7003_v18  ;;  %6188 = vmatpush3.bf16.msra.mxu1 %v7003_v18  ;;  %v2923_v18 = vrot.slane %v2921_v4, 4  ;;  %v2919_v53 = vsel %vm7182_vm2, %v2914_v45, %v2918_v38 }
  0xfc   : > { %5973 = vmatprep.subr.bf16.mxu0 %v7005_v41  ;;  %6189 = vmatprep.subr.bf16.mxu1 %v7005_v41  ;;  %v2954_v21 = vrot.slane %v2952_v5, 5 }
  0xfd   : > { %v2927_v35 = vor.u32 %v2926_v19, %v2923_v18  ;;  %v2951_v18 = vrot.slane %v2949_v3, 4  ;;  %v2963_v19 = vshrl.u32 %v5242_v6, 16 }
  0xff   : > { %5974 = vmatpush3.bf16.msra.mxu0 %v7005_v41  ;;  %6190 = vmatpush3.bf16.msra.mxu1 %v7005_v41  ;;  %v1874_v41 = vrot.slane %v1873_v22, 4  ;;  %v2928_v47 = vrot.slane %v2927_v35, 4  ;;  %v2966_v22 = vshll.u32 %v5242_v6, 16  ;;  %v2965_v35 = vrot.slane %v2963_v19, 4 }
 0x100   : > { %5975 = vmatprep.subr.bf16.mxu0 %v7009_v62  ;;  %6191 = vmatprep.subr.bf16.mxu1 %v7009_v62  ;;  %v2955_v11 = vor.u32 %v2954_v21, %v2951_v18 }
 0x101   : > { %v1879_v48 = vsel %vm7182_vm2, %v1874_v41, %v1878_v40  ;;  %v2933_v55 = vsel %vm7182_vm2, %v2928_v47, %v2932_v51  ;;  %v2968_v39 = vrot.slane %v2966_v22, 5  ;;  %v2979_v41 = vrot.slane %v2977_v2, 4 }
 0x102   : > { %v7660_v4 = vcombine.low %v1865_v52, %v1879_v48  ;;  %v2982_v40 = vrot.slane %v2980_v24, 5  ;;  %v3005_v47 = vshrl.u32 %v5248_v28, 16  ;;  %v3008_v51 = vshll.u32 %v5248_v28, 16  ;;  %v7016_v52 = vld [vmem:[%s8171_s1 + $0x230] sm:$0xff]  }
 0x103   : > { %5976 = vmatpush3.bf16.msra.mxu0 %v7009_v62  ;;  %6192 = vmatpush3.bf16.msra.mxu1 %v7009_v62  ;;  %v7671_v62 = vcombine.low %v2919_v53, %v2933_v55  ;;  %v2942_v48 = vrot.slane %v2941_v29, 4  ;;  %v2960_v53 = vrot.slane %v2958_v34, 5  ;;  %v2972_v55 = vshll.u32 %v5243_v36, 16  ;;  %v7026_v36 = vld [vmem:[%s8171_s1 + $0x40] sm:$0xff]  }
 0x104   : > { %5985 = vmatprep.subr.bf16.mxu0 %v7010_v26  ;;  %6201 = vmatprep.subr.bf16.mxu1 %v7010_v26  ;;  %v2956_v59 = vrot.slane %v2955_v11, 4  ;;  %v2969_v60 = vor.u32 %v2968_v39, %v2965_v35  ;;  %v3007_v5 = vrot.slane %v3005_v47, 4  ;;  %v3010_v6 = vrot.slane %v3008_v51, 5  ;;  %v7029_v47 = vld [vmem:[%s8171_s1 + $0x58] sm:$0xff]  }
 0x105   : > { %v2974_v15 = vrot.slane %v2972_v55, 5  ;;  %v7030_v51 = vld [vmem:[%s7160_s26 + $0xd8] ss:$8 sps:$4 sm:$0xff]  }
 0x106   : > { %5978 = vmatmul.mubr.bf16.vlgmr.msra.gmra.mrb[0].mxu0 %v7566_v33  ;;  %6194 = vmatmul.mubr.bf16.vlgmr.msra.gmra.mrb[0].mxu1 %v7638_v27  ;;  %v2961_v18 = vsel %vm7182_vm2, %v2956_v59, %v2960_v53  ;;  %v2970_v19 = vrot.slane %v2969_v60, 4  ;;  %v3011_v24 = vor.u32 %v3010_v6, %v3007_v5  ;;  %v7034_v53 = vld [vmem:[%s8171_s1 + $0x78] sm:$0xff]   ;;  %v7035_v55 = vld [vmem:[%s8171_s1] sm:$0xff]   ;;  %v7036_v59 = vld [vmem:[%s7160_s26 + $0xe8] ss:$8 sps:$4 sm:$0xff]  }
 0x107   : > { %5986 = vmatpush3.bf16.msra.mxu0 %v7010_v26  ;;  %6202 = vmatpush3.bf16.msra.mxu1 %v7010_v26  ;;  %v5246_v26 = vld [vmem:[%s7160_s26 + $0x80] sm:$0xf]  ;;  %v7037_v60 = vld [vmem:[%s8171_s1 + $0x8] sm:$0xff]   ;;  %v7042_v5 = vld [vmem:[%s7160_s26 + $0x90] ss:$8 sps:$4 sm:$0xff]  }
 0x108   : > { %5987 = vmatprep.subr.bf16.mxu0 %v7011_v43  ;;  %6203 = vmatprep.subr.bf16.mxu1 %v7011_v43  ;;  %v2991_v45 = vshrl.u32 %v5246_v26, 16  ;;  %v2994_v38 = vshll.u32 %v5246_v26, 16  ;;  %v2975_v28 = vsel %vm7182_vm2, %v2970_v19, %v2974_v15  ;;  %v3012_v35 = vrot.slane %v3011_v24, 4  ;;  %v7043_v6 = vld [vmem:[%s8171_s1 + $0x20] sm:$0xff]   ;;  %v7050_v19 = vld [vmem:[%s7160_s26 + $0xb0] ss:$8 sps:$4 sm:$0xff]  }
 0x109   : > { %5981 = vmatprep.mubr.bf16.mxu0 %v7575_v46  ;;  %6197 = vmatprep.mubr.bf16.mxu1 %v7647_v44  ;;  %v7048_v15 = vld [vmem:[%s7160_s26 + $0xa0] ss:$8 sps:$4 sm:$0xff]  }
 0x10a   : > { %v2993_v1 = vrot.slane %v2991_v45, 4  ;;  %v2996_v3 = vrot.slane %v2994_v38, 5  ;;  %v7028_v38 = vld [vmem:[%s8171_s1 + $0x50] sm:$0xff]   ;;  %v7055_v24 = vld [vmem:[%s8171_s1 + $0xa8] sm:$0xff]  }
 0x10b   : > { %5988 = vmatpush3.bf16.msra.mxu0 %v7011_v43  ;;  %6204 = vmatpush3.bf16.msra.mxu1 %v7011_v43  ;;  %v5245_v43 = vld [vmem:[%s7160_s26 + $0x7c] sm:$0x1] }
 0x10c   : > { %5989 = vmatprep.subr.bf16.mxu0 %v7012_v63  ;;  %6205 = vmatprep.subr.bf16.mxu1 %v7012_v63  ;;  %v2986_v0 = vshll.u32 %v5245_v43, 16  ;;  %v2997_v22 = vor.u32 %v2996_v3, %v2993_v1  ;;  %v7027_v43 = vld [vmem:[%s8171_s1 + $0x48] sm:$0xff]   ;;  %v7041_v3 = vld [vmem:[%s8171_s1 + $0x18] sm:$0xff]  }
 0x10d   : > { %v7040_v1 = vld [vmem:[%s7160_s26 + $0x108] ss:$8 sps:$4 sm:$0xff]  }
 0x10e   : > { %5982 = vmatmul.mubr.bf16.gmra.mrb[4].mxu0 %v7590_v49  ;;  %6198 = vmatmul.mubr.bf16.gmra.mrb[4].mxu1 %v7660_v4  ;;  %v2988_v21 = vrot.slane %v2986_v0, 5  ;;  %v7039_v0 = vld [vmem:[%s8171_s1 + $0x10] sm:$0xff]  }
 0x10f   : > { %5990 = vmatpush3.bf16.msra.mxu0 %v7012_v63  ;;  %6206 = vmatpush3.bf16.msra.mxu1 %v7012_v63  ;;  %v2946_v63 = vrot.slane %v2944_v17, 5  ;;  %v2998_v17 = vrot.slane %v2997_v22, 4  ;;  %v7053_v22 = vld [vmem:[%s8171_s1 + $0x98] sm:$0xff]  }
 0x110   : > { %5991 = vmatprep.subr.bf16.mxu0 %v7013_v61  ;;  %6207 = vmatprep.subr.bf16.mxu1 %v7013_v61 }
 0x111   : > { %6001 = vmatprep.mubr.bf16.mxu0 %v7599_v57  ;;  %6217 = vmatprep.mubr.bf16.mxu1 %v7671_v62  ;;  %v2947_v14 = vsel %vm7182_vm2, %v2942_v48, %v2946_v63  ;;  %v7032_v48 = vld [vmem:[%s8171_s1 + $0x68] sm:$0xff]   ;;  %v7033_v63 = vld [vmem:[%s8171_s1 + $0x70] sm:$0xff]  }
 0x112   : > { %v7703_v26 = vcombine.low %v2947_v14, %v2961_v18  ;;  %v7047_v14 = vld [vmem:[%s8171_s1 + $0x80] sm:$0xff]   ;;  %v7049_v18 = vld [vmem:[%s8171_s1 + $0x88] sm:$0xff]  }
 0x113   : > { %5992 = vmatpush3.bf16.msra.mxu0 %v7013_v61  ;;  %6208 = vmatpush3.bf16.msra.mxu1 %v7013_v61  ;;  %v2983_v61 = vor.u32 %v2982_v40, %v2979_v41 }
 0x114   : > { %5993 = vmatprep.subr.bf16.mxu0 %v7014_v12  ;;  %6209 = vmatprep.subr.bf16.mxu1 %v7014_v12 }
 0x115   : > { %v2984_v20 = vrot.slane %v2983_v61, 4  ;;  %v7038_v61 = vld [vmem:[%s7160_s26 + $0xf8] ss:$8 sps:$4 sm:$0xff]  }
 0x117   : > { %5994 = vmatpush3.bf16.msra.mxu0 %v7014_v12  ;;  %6210 = vmatpush3.bf16.msra.mxu1 %v7014_v12  ;;  %v5247_v12 = vld [vmem:[%s7160_s26 + $0x84] sm:$0x1]  ;;  %v2989_v29 = vsel %vm7182_vm2, %v2984_v20, %v2988_v21  ;;  %v7051_v20 = vld [vmem:[%s8171_s1 + $0x90] sm:$0xff]   ;;  %v7052_v21 = vld [vmem:[%s7160_s26 + $0xc0] ss:$8 sps:$4 sm:$0xff]  }
 0x118   : > { %5995 = vmatprep.subr.bf16.mxu0 %v7015_v25  ;;  %6211 = vmatprep.subr.bf16.mxu1 %v7015_v25  ;;  %v3000_v2 = vshll.u32 %v5247_v12, 16  ;;  %v7712_v39 = vcombine.low %v2975_v28, %v2989_v29  ;;  %v7045_v12 = vld [vmem:[%s8171_s1 + $0x30] sm:$0xff]   ;;  %v7059_v28 = vld [vmem:[%s8171_s1 + $0xc8] sm:$0xff]  }
 0x119   : > { %v7067_v29 = vld [vmem:[%s8171_s1 + $0x108] sm:$0xff]  }
 0x11a   : > { %v3002_v34 = vrot.slane %v3000_v2, 5  ;;  %v7054_v2 = vld [vmem:[%s8171_s1 + $0xa0] sm:$0xff]  }
 0x11b   : > { %5996 = vmatpush3.bf16.msra.mxu0 %v7015_v25  ;;  %6212 = vmatpush3.bf16.msra.mxu1 %v7015_v25  ;;  %v3014_v25 = vshll.u32 %v5249_v13, 16  ;;  %v7046_v13 = vld [vmem:[%s8171_s1 + $0x38] sm:$0xff]  }
 0x11c   : > { %5997 = vmatprep.subr.bf16.mxu0 %v7016_v52  ;;  %6213 = vmatprep.subr.bf16.mxu1 %v7016_v52  ;;  %v3003_v41 = vsel %vm7182_vm2, %v2998_v17, %v3002_v34  ;;  %v7071_v17 = vld [vmem:[%s8171_s1 + $0x128] sm:$0xff]   ;;  %v7073_v34 = vld [vmem:[%s8171_s1 + $0x138] sm:$0xff]  }
 0x11d   : > { %v3016_v11 = vrot.slane %v3014_v25, 5  ;;  %v7058_v25 = vld [vmem:[%s8171_s1 + $0xc0] sm:$0xff]  }
 0x11f   : > { %5998 = vmatpush3.bf16.msra.mxu0 %v7016_v52  ;;  %6214 = vmatpush3.bf16.msra.mxu1 %v7016_v52  ;;  %v3017_v40 = vsel %vm7182_vm2, %v3012_v35, %v3016_v11  ;;  %v7031_v52 = vld [vmem:[%s8171_s1 + $0x60] sm:$0xff]   ;;  %v7075_v11 = vld [vmem:[%s8171_s1 + $0x148] sm:$0xff]  }
 0x120   : > { %5999 = vmatprep.subr.bf16.mxu0 %v7017_v8  ;;  %6215 = vmatprep.subr.bf16.mxu1 %v7017_v8  ;;  %v7725_v45 = vcombine.low %v3003_v41, %v3017_v40  ;;  %v7074_v35 = vld [vmem:[%s8171_s1 + $0x140] sm:$0xff]   ;;  %v7083_v40 = vld [vmem:[%s8171_s1 + $0x188] sm:$0xff]  }
 0x121   : > { %v7082_v41 = vld [vmem:[%s8171_s1 + $0x180] sm:$0xff]  }
 0x123   : > { %6000 = vmatpush3.bf16.msra.mxu0 %v7017_v8  ;;  %6216 = vmatpush3.bf16.msra.mxu1 %v7017_v8  ;;  %v7044_v8 = vld [vmem:[%s8171_s1 + $0x28] sm:$0xff]  }
 0x124   : > { %6225 = vmatprep.subr.bf16.mxu0 %v7026_v36  ;;  %6441 = vmatprep.subr.bf16.mxu1 %v7026_v36 }
 0x126   : > { %6002 = vmatmul.mubr.bf16.vlgmr.msra.gmra.mrb[0].mxu0 %v7638_v27  ;;  %6218 = vmatmul.mubr.bf16.vlgmr.msra.gmra.mrb[0].mxu1 %v7703_v26 }
 0x127   : > { %6226 = vmatpush3.bf16.msra.mxu0 %v7026_v36  ;;  %6442 = vmatpush3.bf16.msra.mxu1 %v7026_v36  ;;  %v7079_v36 = vld [vmem:[%s8171_s1 + $0x168] sm:$0xff]  }
 0x128   : > { %6227 = vmatprep.subr.bf16.mxu0 %v7027_v43  ;;  %6443 = vmatprep.subr.bf16.mxu1 %v7027_v43 }
 0x129   : > { %6005 = vmatprep.mubr.bf16.mxu0 %v7647_v44  ;;  %6221 = vmatprep.mubr.bf16.mxu1 %v7712_v39 }
 0x12b   : > { %6228 = vmatpush3.bf16.msra.mxu0 %v7027_v43  ;;  %6444 = vmatpush3.bf16.msra.mxu1 %v7027_v43  ;;  %v7920_v43 = vld [vmem:[%s7160_s26 + $0xe0] ss:$8 sps:$4 sm:$0xff]  }
 0x12c   : > { %6229 = vmatprep.subr.bf16.mxu0 %v7028_v38  ;;  %6445 = vmatprep.subr.bf16.mxu1 %v7028_v38 }
 0x12e   : > { %6006 = vmatmul.mubr.bf16.gmra.mrb[4].mxu0 %v7660_v4  ;;  %6222 = vmatmul.mubr.bf16.gmra.mrb[4].mxu1 %v7725_v45 }
 0x12f   : > { %6230 = vmatpush3.bf16.msra.mxu0 %v7028_v38  ;;  %6446 = vmatpush3.bf16.msra.mxu1 %v7028_v38  ;;  %v7087_v38 = vld [vmem:[%s8171_s1 + $0x1a8] sm:$0xff]  }
 0x130   : > { %6231 = vmatprep.subr.bf16.mxu0 %v7029_v47  ;;  %6447 = vmatprep.subr.bf16.mxu1 %v7029_v47 }
 0x131   : > { %6241 = vmatprep.mubr.bf16.mxu0 %v7030_v51  ;;  %6457 = vmatprep.mubr.bf16.mxu1 %v7401_v23 }
 0x133   : > { %6232 = vmatpush3.bf16.msra.mxu0 %v7029_v47  ;;  %6448 = vmatpush3.bf16.msra.mxu1 %v7029_v47 }
 0x134   : > { %6233 = vmatprep.subr.bf16.mxu0 %v7031_v52  ;;  %6449 = vmatprep.subr.bf16.mxu1 %v7031_v52 }
 0x137   : > { %6234 = vmatpush3.bf16.msra.mxu0 %v7031_v52  ;;  %6450 = vmatpush3.bf16.msra.mxu1 %v7031_v52 }
 0x138   : > { %6235 = vmatprep.subr.bf16.mxu0 %v7032_v48  ;;  %6451 = vmatprep.subr.bf16.mxu1 %v7032_v48 }
 0x13b   : > { %6236 = vmatpush3.bf16.msra.mxu0 %v7032_v48  ;;  %6452 = vmatpush3.bf16.msra.mxu1 %v7032_v48 }
 0x13c   : > { %6237 = vmatprep.subr.bf16.mxu0 %v7033_v63  ;;  %6453 = vmatprep.subr.bf16.mxu1 %v7033_v63 }
 0x13f   : > { %6238 = vmatpush3.bf16.msra.mxu0 %v7033_v63  ;;  %6454 = vmatpush3.bf16.msra.mxu1 %v7033_v63 }
 0x140   : > { %6239 = vmatprep.subr.bf16.mxu0 %v7034_v53  ;;  %6455 = vmatprep.subr.bf16.mxu1 %v7034_v53 }
 0x143   : > { %6240 = vmatpush3.bf16.msra.mxu0 %v7034_v53  ;;  %6456 = vmatpush3.bf16.msra.mxu1 %v7034_v53 }
 0x144   : > { %6249 = vmatprep.subr.bf16.mxu0 %v7035_v55  ;;  %6465 = vmatprep.subr.bf16.mxu1 %v7035_v55 }
 0x146   : > { %6242 = vmatmul.mubr.bf16.vlgmr.msra.gmra.mrb[8].mxu0 %v7036_v59  ;;  %6458 = vmatmul.mubr.bf16.vlgmr.msra.gmra.mrb[8].mxu1 %v7438_v31 }
 0x147   : > { %6250 = vmatpush3.bf16.msra.mxu0 %v7035_v55  ;;  %6466 = vmatpush3.bf16.msra.mxu1 %v7035_v55 }
 0x148   : > { %6251 = vmatprep.subr.bf16.mxu0 %v7037_v60  ;;  %6467 = vmatprep.subr.bf16.mxu1 %v7037_v60 }
 0x149   : > { %6245 = vmatprep.mubr.bf16.mxu0 %v7038_v61  ;;  %6461 = vmatprep.mubr.bf16.mxu1 %v7447_v42 }
 0x14b   : > { %6252 = vmatpush3.bf16.msra.mxu0 %v7037_v60  ;;  %6468 = vmatpush3.bf16.msra.mxu1 %v7037_v60 }
 0x14c   : > { %6253 = vmatprep.subr.bf16.mxu0 %v7039_v0  ;;  %6469 = vmatprep.subr.bf16.mxu1 %v7039_v0 }
 0x14e   : > { %6246 = vmatmul.mubr.bf16.gmra.mrb[12].mxu0 %v7040_v1  ;;  %6462 = vmatmul.mubr.bf16.gmra.mrb[12].mxu1 %v7461_v50 }
 0x14f   : > { %6254 = vmatpush3.bf16.msra.mxu0 %v7039_v0  ;;  %6470 = vmatpush3.bf16.msra.mxu1 %v7039_v0 }
 0x150   : > { %6255 = vmatprep.subr.bf16.mxu0 %v7041_v3  ;;  %6471 = vmatprep.subr.bf16.mxu1 %v7041_v3 }
 0x151   : > { %6265 = vmatprep.mubr.bf16.mxu0 %v7042_v5  ;;  %6481 = vmatprep.mubr.bf16.mxu1 %v7030_v51 }
 0x153   : > { %6256 = vmatpush3.bf16.msra.mxu0 %v7041_v3  ;;  %6472 = vmatpush3.bf16.msra.mxu1 %v7041_v3 }
 0x154   : > { %6257 = vmatprep.subr.bf16.mxu0 %v7043_v6  ;;  %6473 = vmatprep.subr.bf16.mxu1 %v7043_v6 }
 0x157   : > { %6258 = vmatpush3.bf16.msra.mxu0 %v7043_v6  ;;  %6474 = vmatpush3.bf16.msra.mxu1 %v7043_v6 }
 0x158   : > { %6259 = vmatprep.subr.bf16.mxu0 %v7044_v8  ;;  %6475 = vmatprep.subr.bf16.mxu1 %v7044_v8 }
 0x15b   : > { %6260 = vmatpush3.bf16.msra.mxu0 %v7044_v8  ;;  %6476 = vmatpush3.bf16.msra.mxu1 %v7044_v8  ;;  %v7088_v8 = vld [vmem:[%s8171_s1 + $0x1b0] sm:$0xff]  }
 0x15c   : > { %6261 = vmatprep.subr.bf16.mxu0 %v7045_v12  ;;  %6477 = vmatprep.subr.bf16.mxu1 %v7045_v12 }
 0x15f   : > { %6262 = vmatpush3.bf16.msra.mxu0 %v7045_v12  ;;  %6478 = vmatpush3.bf16.msra.mxu1 %v7045_v12 }
 0x160   : > { %6263 = vmatprep.subr.bf16.mxu0 %v7046_v13  ;;  %6479 = vmatprep.subr.bf16.mxu1 %v7046_v13 }
 0x163   : > { %6264 = vmatpush3.bf16.msra.mxu0 %v7046_v13  ;;  %6480 = vmatpush3.bf16.msra.mxu1 %v7046_v13 }
 0x164   : > { %6273 = vmatprep.subr.bf16.mxu0 %v7047_v14  ;;  %6489 = vmatprep.subr.bf16.mxu1 %v7047_v14 }
 0x166   : > { %6266 = vmatmul.mubr.bf16.vlgmr.msra.gmra.mrb[8].mxu0 %v7048_v15  ;;  %6482 = vmatmul.mubr.bf16.vlgmr.msra.gmra.mrb[8].mxu1 %v7036_v59 }
 0x167   : > { %6274 = vmatpush3.bf16.msra.mxu0 %v7047_v14  ;;  %6490 = vmatpush3.bf16.msra.mxu1 %v7047_v14 }
 0x168   : > { %6275 = vmatprep.subr.bf16.mxu0 %v7049_v18  ;;  %6491 = vmatprep.subr.bf16.mxu1 %v7049_v18 }
 0x169   : > { %6269 = vmatprep.mubr.bf16.mxu0 %v7050_v19  ;;  %6485 = vmatprep.mubr.bf16.mxu1 %v7038_v61  ;;  %v5279_v19 = vld [vmem:[%s7160_s26 + $0x9c] sm:$0x1] }
 0x16b   : > { %6276 = vmatpush3.bf16.msra.mxu0 %v7049_v18  ;;  %6492 = vmatpush3.bf16.msra.mxu1 %v7049_v18 }
 0x16c   : > { %6277 = vmatprep.subr.bf16.mxu0 %v7051_v20  ;;  %6493 = vmatprep.subr.bf16.mxu1 %v7051_v20 }
 0x16e   : > { %6270 = vmatmul.mubr.bf16.gmra.mrb[12].mxu0 %v7052_v21  ;;  %6486 = vmatmul.mubr.bf16.gmra.mrb[12].mxu1 %v7040_v1  ;;  %v7089_v21 = vld [vmem:[%s8171_s1 + $0x1b8] sm:$0xff]  }
 0x16f   : > { %6278 = vmatpush3.bf16.msra.mxu0 %v7051_v20  ;;  %6494 = vmatpush3.bf16.msra.mxu1 %v7051_v20  ;;  %v5281_v20 = vld [vmem:[%s7160_s26 + $0xa4] sm:$0x1] }
 0x170   : > { %6279 = vmatprep.subr.bf16.mxu0 %v7053_v22  ;;  %6495 = vmatprep.subr.bf16.mxu1 %v7053_v22 }
 0x171   : > { %6289 = vmatprep.mubr.bf16.mxu0 %v7401_v23  ;;  %6505 = vmatprep.mubr.bf16.mxu1 %v7471_v54  ;;  %v7056_v23 = vld [vmem:[%s8171_s1 + $0xb0] sm:$0xff]   ;;  %v7057_v54 = vld [vmem:[%s8171_s1 + $0xb8] sm:$0xff]  }
 0x173   : > { %6280 = vmatpush3.bf16.msra.mxu0 %v7053_v22  ;;  %6496 = vmatpush3.bf16.msra.mxu1 %v7053_v22 }
 0x174   : > { %6281 = vmatprep.subr.bf16.mxu0 %v7054_v2  ;;  %6497 = vmatprep.subr.bf16.mxu1 %v7054_v2 }
 0x177   : > { %6282 = vmatpush3.bf16.msra.mxu0 %v7054_v2  ;;  %6498 = vmatpush3.bf16.msra.mxu1 %v7054_v2 }
 0x178   : > { %6283 = vmatprep.subr.bf16.mxu0 %v7055_v24  ;;  %6499 = vmatprep.subr.bf16.mxu1 %v7055_v24 }
 0x17b   : > { %6284 = vmatpush3.bf16.msra.mxu0 %v7055_v24  ;;  %6500 = vmatpush3.bf16.msra.mxu1 %v7055_v24  ;;  %v7020_v24 = vld [vmem:[%s7160_s26 + $0xa8] ss:$8 sps:$4 sm:$0xff]  }
 0x17c   : > { %6285 = vmatprep.subr.bf16.mxu0 %v7056_v23  ;;  %6501 = vmatprep.subr.bf16.mxu1 %v7056_v23 }
 0x17f   : > { %6286 = vmatpush3.bf16.msra.mxu0 %v7056_v23  ;;  %6502 = vmatpush3.bf16.msra.mxu1 %v7056_v23 }
 0x180   : > { %6287 = vmatprep.subr.bf16.mxu0 %v7057_v54  ;;  %6503 = vmatprep.subr.bf16.mxu1 %v7057_v54 }
 0x183   : > { %6288 = vmatpush3.bf16.msra.mxu0 %v7057_v54  ;;  %6504 = vmatpush3.bf16.msra.mxu1 %v7057_v54 }
 0x184   : > { %6297 = vmatprep.subr.bf16.mxu0 %v7058_v25  ;;  %6513 = vmatprep.subr.bf16.mxu1 %v7058_v25 }
 0x186   : > { %6290 = vmatmul.mubr.bf16.vlgmr.msra.gmra.mrb[8].mxu0 %v7438_v31  ;;  %6506 = vmatmul.mubr.bf16.vlgmr.msra.gmra.mrb[8].mxu1 %v7506_v56  ;;  %v7060_v31 = vld [vmem:[%s8171_s1 + $0xd0] sm:$0xff]   ;;  %v7063_v56 = vld [vmem:[%s8171_s1 + $0xe8] sm:$0xff]  }
 0x187   : > { %6298 = vmatpush3.bf16.msra.mxu0 %v7058_v25  ;;  %6514 = vmatpush3.bf16.msra.mxu1 %v7058_v25 }
 0x188   : > { %6299 = vmatprep.subr.bf16.mxu0 %v7059_v28  ;;  %6515 = vmatprep.subr.bf16.mxu1 %v7059_v28 }
 0x189   : > { %6293 = vmatprep.mubr.bf16.mxu0 %v7447_v42  ;;  %6509 = vmatprep.mubr.bf16.mxu1 %v7515_v16  ;;  %v7061_v42 = vld [vmem:[%s8171_s1 + $0xd8] sm:$0xff]   ;;  %v7064_v16 = vld [vmem:[%s8171_s1 + $0xf0] sm:$0xff]  }
 0x18b   : > { %6300 = vmatpush3.bf16.msra.mxu0 %v7059_v28  ;;  %6516 = vmatpush3.bf16.msra.mxu1 %v7059_v28 }
 0x18c   : > { %6301 = vmatprep.subr.bf16.mxu0 %v7060_v31  ;;  %6517 = vmatprep.subr.bf16.mxu1 %v7060_v31 }
 0x18e   : > { %6294 = vmatmul.mubr.bf16.gmra.mrb[12].mxu0 %v7461_v50  ;;  %6510 = vmatmul.mubr.bf16.gmra.mrb[12].mxu1 %v7528_v7  ;;  %v7062_v50 = vld [vmem:[%s8171_s1 + $0xe0] sm:$0xff]   ;;  %v7065_v7 = vld [vmem:[%s8171_s1 + $0xf8] sm:$0xff]  }
 0x18f   : > { %6302 = vmatpush3.bf16.msra.mxu0 %v7060_v31  ;;  %6518 = vmatpush3.bf16.msra.mxu1 %v7060_v31  ;;  %v7980_v31 = vld [vmem:[%s7160_s26 + $0xf0] ss:$8 sps:$4 sm:$0xff]  }
 0x190   : > { %6303 = vmatprep.subr.bf16.mxu0 %v7061_v42  ;;  %6519 = vmatprep.subr.bf16.mxu1 %v7061_v42 }
 0x191   : > { %6313 = vmatprep.mubr.bf16.mxu0 %v7534_v9  ;;  %6529 = vmatprep.mubr.bf16.mxu1 %v7537_v10  ;;  %v7066_v9 = vld [vmem:[%s8171_s1 + $0x100] sm:$0xff]  }
 0x193   : > { %6304 = vmatpush3.bf16.msra.mxu0 %v7061_v42  ;;  %6520 = vmatpush3.bf16.msra.mxu1 %v7061_v42  ;;  %v3775_v42 = vshll.u32 %v5279_v19, 16 }
 0x194   : > { %6305 = vmatprep.subr.bf16.mxu0 %v7062_v50  ;;  %6521 = vmatprep.subr.bf16.mxu1 %v7062_v50 }
 0x197   : > { %6306 = vmatpush3.bf16.msra.mxu0 %v7062_v50  ;;  %6522 = vmatpush3.bf16.msra.mxu1 %v7062_v50 }
 0x198   : > { %6307 = vmatprep.subr.bf16.mxu0 %v7063_v56  ;;  %6523 = vmatprep.subr.bf16.mxu1 %v7063_v56 }
 0x19b   : > { %6308 = vmatpush3.bf16.msra.mxu0 %v7063_v56  ;;  %6524 = vmatpush3.bf16.msra.mxu1 %v7063_v56  ;;  %v3789_v56 = vshll.u32 %v5281_v20, 16 }
 0x19c   : > { %6309 = vmatprep.subr.bf16.mxu0 %v7064_v16  ;;  %6525 = vmatprep.subr.bf16.mxu1 %v7064_v16 }
 0x19f   : > { %6310 = vmatpush3.bf16.msra.mxu0 %v7064_v16  ;;  %6526 = vmatpush3.bf16.msra.mxu1 %v7064_v16 }
 0x1a0   : > { %6311 = vmatprep.subr.bf16.mxu0 %v7065_v7  ;;  %6527 = vmatprep.subr.bf16.mxu1 %v7065_v7 }
 0x1a3   : > { %6312 = vmatpush3.bf16.msra.mxu0 %v7065_v7  ;;  %6528 = vmatpush3.bf16.msra.mxu1 %v7065_v7 }
 0x1a4   : > { %6321 = vmatprep.subr.bf16.mxu0 %v7066_v9  ;;  %6537 = vmatprep.subr.bf16.mxu1 %v7066_v9 }
 0x1a6   : > { %6314 = vmatmul.mubr.bf16.vlgmr.msra.gmra.mrb[8].mxu0 %v7563_v32  ;;  %6530 = vmatmul.mubr.bf16.vlgmr.msra.gmra.mrb[8].mxu1 %v7566_v33  ;;  %v7068_v32 = vld [vmem:[%s8171_s1 + $0x110] sm:$0xff]  }
 0x1a7   : > { %6322 = vmatpush3.bf16.msra.mxu0 %v7066_v9  ;;  %6538 = vmatpush3.bf16.msra.mxu1 %v7066_v9 }
 0x1a8   : > { %6323 = vmatprep.subr.bf16.mxu0 %v7067_v29  ;;  %6539 = vmatprep.subr.bf16.mxu1 %v7067_v29 }
 0x1a9   : > { %6317 = vmatprep.mubr.bf16.mxu0 %v7572_v37  ;;  %6533 = vmatprep.mubr.bf16.mxu1 %v7575_v46  ;;  %v7069_v37 = vld [vmem:[%s8171_s1 + $0x118] sm:$0xff]  }
 0x1ab   : > { %6324 = vmatpush3.bf16.msra.mxu0 %v7067_v29  ;;  %6540 = vmatpush3.bf16.msra.mxu1 %v7067_v29 }
 0x1ac   : > { %6325 = vmatprep.subr.bf16.mxu0 %v7068_v32  ;;  %6541 = vmatprep.subr.bf16.mxu1 %v7068_v32 }
 0x1ae   : > { %6318 = vmatmul.mubr.bf16.gmra.mrb[12].mxu0 %v7587_v58  ;;  %6534 = vmatmul.mubr.bf16.gmra.mrb[12].mxu1 %v7590_v49  ;;  %v7070_v58 = vld [vmem:[%s8171_s1 + $0x120] sm:$0xff]  }
 0x1af   : > { %6326 = vmatpush3.bf16.msra.mxu0 %v7068_v32  ;;  %6542 = vmatpush3.bf16.msra.mxu1 %v7068_v32 }
 0x1b0   : > { %6327 = vmatprep.subr.bf16.mxu0 %v7069_v37  ;;  %6543 = vmatprep.subr.bf16.mxu1 %v7069_v37 }
 0x1b1   : > { %6337 = vmatprep.mubr.bf16.mxu0 %v7537_v10  ;;  %6553 = vmatprep.mubr.bf16.mxu1 %v7599_v57  ;;  %v7072_v10 = vld [vmem:[%s8171_s1 + $0x130] sm:$0xff]  }
 0x1b3   : > { %6328 = vmatpush3.bf16.msra.mxu0 %v7069_v37  ;;  %6544 = vmatpush3.bf16.msra.mxu1 %v7069_v37 }
 0x1b4   : > { %6329 = vmatprep.subr.bf16.mxu0 %v7070_v58  ;;  %6545 = vmatprep.subr.bf16.mxu1 %v7070_v58 }
 0x1b7   : > { %6330 = vmatpush3.bf16.msra.mxu0 %v7070_v58  ;;  %6546 = vmatpush3.bf16.msra.mxu1 %v7070_v58  ;;  %v7090_v58 = vld [vmem:[%s8171_s1 + $0x1c0] sm:$0xff]  }
 0x1b8   : > { %6331 = vmatprep.subr.bf16.mxu0 %v7071_v17  ;;  %6547 = vmatprep.subr.bf16.mxu1 %v7071_v17 }
 0x1bb   : > { %6332 = vmatpush3.bf16.msra.mxu0 %v7071_v17  ;;  %6548 = vmatpush3.bf16.msra.mxu1 %v7071_v17 }
 0x1bc   : > { %6333 = vmatprep.subr.bf16.mxu0 %v7072_v10  ;;  %6549 = vmatprep.subr.bf16.mxu1 %v7072_v10 }
 0x1bf   : > { %6334 = vmatpush3.bf16.msra.mxu0 %v7072_v10  ;;  %6550 = vmatpush3.bf16.msra.mxu1 %v7072_v10  ;;  %v7022_v10 = vld [vmem:[%s7160_s26 + $0xb8] ss:$8 sps:$4 sm:$0xff]  }
 0x1c0   : > { %6335 = vmatprep.subr.bf16.mxu0 %v7073_v34  ;;  %6551 = vmatprep.subr.bf16.mxu1 %v7073_v34 }
 0x1c3   : > { %6336 = vmatpush3.bf16.msra.mxu0 %v7073_v34  ;;  %6552 = vmatpush3.bf16.msra.mxu1 %v7073_v34  ;;  %v8001_v34 = vld [vmem:[%s7160_s26 + $0x100] ss:$8 sps:$4 sm:$0xff]  }
 0x1c4   : > { %6345 = vmatprep.subr.bf16.mxu0 %v7074_v35  ;;  %6561 = vmatprep.subr.bf16.mxu1 %v7074_v35 }
 0x1c6   : > { %6338 = vmatmul.mubr.bf16.vlgmr.msra.gmra.mrb[8].mxu0 %v7566_v33  ;;  %6554 = vmatmul.mubr.bf16.vlgmr.msra.gmra.mrb[8].mxu1 %v7638_v27  ;;  %v7076_v33 = vld [vmem:[%s8171_s1 + $0x150] sm:$0xff]  }
 0x1c7   : > { %6346 = vmatpush3.bf16.msra.mxu0 %v7074_v35  ;;  %6562 = vmatpush3.bf16.msra.mxu1 %v7074_v35 }
 0x1c8   : > { %6347 = vmatprep.subr.bf16.mxu0 %v7075_v11  ;;  %6563 = vmatprep.subr.bf16.mxu1 %v7075_v11 }
 0x1c9   : > { %6341 = vmatprep.mubr.bf16.mxu0 %v7575_v46  ;;  %6557 = vmatprep.mubr.bf16.mxu1 %v7647_v44  ;;  %v7077_v46 = vld [vmem:[%s8171_s1 + $0x158] sm:$0xff]  }
 0x1cb   : > { %6348 = vmatpush3.bf16.msra.mxu0 %v7075_v11  ;;  %6564 = vmatpush3.bf16.msra.mxu1 %v7075_v11  ;;  %v3777_v11 = vrot.slane %v3775_v42, 5  ;;  %v7094_v42 = vld [vmem:[%s8171_s1 + $0x1e0] sm:$0xff]  }
 0x1cc   : > { %6349 = vmatprep.subr.bf16.mxu0 %v7076_v33  ;;  %6565 = vmatprep.subr.bf16.mxu1 %v7076_v33 }
 0x1ce   : > { %6342 = vmatmul.mubr.bf16.gmra.mrb[12].mxu0 %v7590_v49  ;;  %6558 = vmatmul.mubr.bf16.gmra.mrb[12].mxu1 %v7660_v4  ;;  %v7078_v49 = vld [vmem:[%s8171_s1 + $0x160] sm:$0xff]  }
 0x1cf   : > { %6350 = vmatpush3.bf16.msra.mxu0 %v7076_v33  ;;  %6566 = vmatpush3.bf16.msra.mxu1 %v7076_v33 }
 0x1d0   : > { %6351 = vmatprep.subr.bf16.mxu0 %v7077_v46  ;;  %6567 = vmatprep.subr.bf16.mxu1 %v7077_v46 }
 0x1d1   : > { %6361 = vmatprep.mubr.bf16.mxu0 %v7599_v57  ;;  %6577 = vmatprep.mubr.bf16.mxu1 %v7671_v62  ;;  %v7080_v57 = vld [vmem:[%s8171_s1 + $0x170] sm:$0xff]   ;;  %v7081_v62 = vld [vmem:[%s8171_s1 + $0x178] sm:$0xff]  }
 0x1d3   : > { %6352 = vmatpush3.bf16.msra.mxu0 %v7077_v46  ;;  %6568 = vmatpush3.bf16.msra.mxu1 %v7077_v46  ;;  %v3791_v46 = vrot.slane %v3789_v56, 5 }
 0x1d4   : > { %6353 = vmatprep.subr.bf16.mxu0 %v7078_v49  ;;  %6569 = vmatprep.subr.bf16.mxu1 %v7078_v49 }
 0x1d7   : > { %6354 = vmatpush3.bf16.msra.mxu0 %v7078_v49  ;;  %6570 = vmatpush3.bf16.msra.mxu1 %v7078_v49  ;;  %v7091_v49 = vld [vmem:[%s8171_s1 + $0x1c8] sm:$0xff]  }
 0x1d8   : > { %6355 = vmatprep.subr.bf16.mxu0 %v7079_v36  ;;  %6571 = vmatprep.subr.bf16.mxu1 %v7079_v36 }
 0x1db   : > { %6356 = vmatpush3.bf16.msra.mxu0 %v7079_v36  ;;  %6572 = vmatpush3.bf16.msra.mxu1 %v7079_v36  ;;  %v5282_v36 = vld [vmem:[%s7160_s26 + $0xa8] sm:$0xf] }
 0x1dc   : > { %6357 = vmatprep.subr.bf16.mxu0 %v7080_v57  ;;  %6573 = vmatprep.subr.bf16.mxu1 %v7080_v57 }
 0x1df   : > { %6358 = vmatpush3.bf16.msra.mxu0 %v7080_v57  ;;  %6574 = vmatpush3.bf16.msra.mxu1 %v7080_v57  ;;  %v5284_v57 = vld [vmem:[%s7160_s26 + $0xb0] sm:$0xf] }
 0x1e0   : > { %6359 = vmatprep.subr.bf16.mxu0 %v7081_v62  ;;  %6575 = vmatprep.subr.bf16.mxu1 %v7081_v62 }
 0x1e3   : > { %6360 = vmatpush3.bf16.msra.mxu0 %v7081_v62  ;;  %6576 = vmatpush3.bf16.msra.mxu1 %v7081_v62  ;;  %v7024_v62 = vld [vmem:[%s7160_s26 + $0xc8] ss:$8 sps:$4 sm:$0xff]  }
 0x1e4   : > { %6369 = vmatprep.subr.bf16.mxu0 %v7082_v41  ;;  %6585 = vmatprep.subr.bf16.mxu1 %v7082_v41 }
 0x1e6   : > { %6362 = vmatmul.mubr.bf16.vlgmr.msra.gmra.mrb[8].mxu0 %v7638_v27  ;;  %6578 = vmatmul.mubr.bf16.vlgmr.msra.gmra.mrb[8].mxu1 %v7703_v26  ;;  %v7084_v27 = vld [vmem:[%s8171_s1 + $0x190] sm:$0xff]   ;;  %v7018_v26 = vld [vmem:[%s7160_s26 + $0x98] ss:$8 sps:$4 sm:$0xff]  }
 0x1e7   : > { %6370 = vmatpush3.bf16.msra.mxu0 %v7082_v41  ;;  %6586 = vmatpush3.bf16.msra.mxu1 %v7082_v41  ;;  %v8012_v41 = vld [vmem:[%s7160_s26 + $0x110] ss:$8 sps:$4 sm:$0xff]  }
 0x1e8   : > { %6371 = vmatprep.subr.bf16.mxu0 %v7083_v40  ;;  %6587 = vmatprep.subr.bf16.mxu1 %v7083_v40 }
 0x1e9   : > { %6365 = vmatprep.mubr.bf16.mxu0 %v7647_v44  ;;  %6581 = vmatprep.mubr.bf16.mxu1 %v7712_v39  ;;  %v7085_v44 = vld [vmem:[%s8171_s1 + $0x198] sm:$0xff]  }
 0x1ea   : > { %v5278_v39 = vld [vmem:[%s7160_s26 + $0x98] sm:$0xf] }
 0x1eb   : > { %6372 = vmatpush3.bf16.msra.mxu0 %v7083_v40  ;;  %6588 = vmatpush3.bf16.msra.mxu1 %v7083_v40  ;;  %v3766_v52 = vshrl.u32 %v5278_v39, 16  ;;  %v3769_v48 = vshll.u32 %v5278_v39, 16  ;;  %v3808_v39 = vshrl.u32 %v5284_v57, 16 }
 0x1ec   : > { %6373 = vmatprep.subr.bf16.mxu0 %v7084_v27  ;;  %6589 = vmatprep.subr.bf16.mxu1 %v7084_v27 }
 0x1ed   : > { %v3768_v13 = vrot.slane %v3766_v52, 4  ;;  %v3771_v14 = vrot.slane %v3769_v48, 5  ;;  %v5286_v52 = vld [vmem:[%s7160_s26 + $0xb8] sm:$0xf]  ;;  %v5288_v48 = vld [vmem:[%s7160_s26 + $0xc0] sm:$0xf] }
 0x1ee   : > { %6366 = vmatmul.mubr.bf16.gmra.mrb[12].mxu0 %v7660_v4  ;;  %6582 = vmatmul.mubr.bf16.gmra.mrb[12].mxu1 %v7725_v45  ;;  %v7086_v4 = vld [vmem:[%s8171_s1 + $0x1a0] sm:$0xff]   ;;  %v3822_v19 = vshrl.u32 %v5286_v52, 16  ;;  %v3825_v20 = vshll.u32 %v5286_v52, 16 }
 0x1ef   : > { %6374 = vmatpush3.bf16.msra.mxu0 %v7084_v27  ;;  %6590 = vmatpush3.bf16.msra.mxu1 %v7084_v27  ;;  %v5280_v45 = vld [vmem:[%s7160_s26 + $0xa0] sm:$0xf]  ;;  %v3772_v23 = vor.u32 %v3771_v14, %v3768_v13  ;;  %v3810_v14 = vrot.slane %v3808_v39, 4 }
 0x1f0   : > { %6375 = vmatprep.subr.bf16.mxu0 %v7085_v44  ;;  %6591 = vmatprep.subr.bf16.mxu1 %v7085_v44  ;;  %v3780_v59 = vshrl.u32 %v5280_v45, 16  ;;  %v3783_v60 = vshll.u32 %v5280_v45, 16  ;;  %v3811_v45 = vshll.u32 %v5284_v57, 16 }
 0x1f1   : > { %6385 = vmatprep.mubr.bf16.mxu0 %v7018_v26  ;;  %6601 = vmatprep.mubr.bf16.mxu1 %v7920_v43  ;;  %v3773_v35 = vrot.slane %v3772_v23, 4  ;;  %v7092_v26 = vld [vmem:[%s8171_s1 + $0x1d0] sm:$0xff]   ;;  %v5290_v23 = vld [vmem:[%s7160_s26 + $0xc8] sm:$0xf] }
 0x1f2   : > { %v3782_v15 = vrot.slane %v3780_v59, 4  ;;  %v3785_v18 = vrot.slane %v3783_v60, 5  ;;  %v7093_v59 = vld [vmem:[%s8171_s1 + $0x1d8] sm:$0xff]   ;;  %v5283_v60 = vld [vmem:[%s7160_s26 + $0xac] sm:$0x1]  ;;  %v3850_v57 = vshrl.u32 %v5290_v23, 16 }
 0x1f3   : > { %6376 = vmatpush3.bf16.msra.mxu0 %v7085_v44  ;;  %6592 = vmatpush3.bf16.msra.mxu1 %v7085_v44  ;;  %v3778_v40 = vsel %vm7182_vm2, %v3773_v35, %v3777_v11  ;;  %v3794_v44 = vshrl.u32 %v5282_v36, 16  ;;  %v3824_v35 = vrot.slane %v3822_v19, 4  ;;  %v3827_v11 = vrot.slane %v3825_v20, 5 }
 0x1f4   : > { %6377 = vmatprep.subr.bf16.mxu0 %v7086_v4  ;;  %6593 = vmatprep.subr.bf16.mxu1 %v7086_v4  ;;  %v3786_v50 = vor.u32 %v3785_v18, %v3782_v15  ;;  %v3813_v15 = vrot.slane %v3811_v45, 5  ;;  %v5285_v18 = vld [vmem:[%s7160_s26 + $0xb4] sm:$0x1]  ;;  %v3852_v20 = vrot.slane %v3850_v57, 4 }
 0x1f6   : > { %v3787_v33 = vrot.slane %v3786_v50, 4  ;;  %v3803_v50 = vshll.u32 %v5283_v60, 16  ;;  %v3814_v56 = vor.u32 %v3813_v15, %v3810_v14 }
 0x1f7   : > { %6378 = vmatpush3.bf16.msra.mxu0 %v7086_v4  ;;  %6594 = vmatpush3.bf16.msra.mxu1 %v7086_v4  ;;  %v3797_v4 = vshll.u32 %v5282_v36, 16  ;;  %v5289_v36 = vld [vmem:[%s7160_s26 + $0xc4] sm:$0x1] }
 0x1f8   : > { %6379 = vmatprep.subr.bf16.mxu0 %v7087_v38  ;;  %6595 = vmatprep.subr.bf16.mxu1 %v7087_v38  ;;  %v3792_v27 = vsel %vm7182_vm2, %v3787_v33, %v3791_v46  ;;  %v3805_v45 = vrot.slane %v3803_v50, 5  ;;  %v3815_v52 = vrot.slane %v3814_v56, 4  ;;  %v5291_v56 = vld [vmem:[%s7160_s26 + $0xcc] sm:$0x1] }
 0x1f9   : > { %v7936_v47 = vpop.f32.mrb[0].mxu0  ;;  %v7938_v51 = vpop.f32.mrb[0].mxu1  ;;  %v3799_v13 = vrot.slane %v3797_v4, 5  ;;  %v7095_v4 = vld [vmem:[%s8171_s1 + $0x1e8] sm:$0xff]  }
 0x1fa   : > { %v3109_v63 = vmax.f32 %v7936_v47, %v7938_v51  ;;  %v7942_v53 = vpop.f32.mrb[1].mxu0  ;;  %v7944_v55 = vpop.f32.mrb[1].mxu1  ;;  %v5318_v47 = vld [vmem:[%s8172_s2] ss:$0 sm:$0xff] }
 0x1fb   : > { %v3107_v61 = vmax.f32 %v7942_v53, %v7944_v55  ;;  %v7948_v0 = vpop.f32.mrb[2].mxu0  ;;  %v7950_v1 = vpop.f32.mrb[2].mxu1  ;;  %6380 = vmatpush3.bf16.msra.mxu0 %v7087_v38  ;;  %6596 = vmatpush3.bf16.msra.mxu1 %v7087_v38  ;;  %v8021_v38 = vcombine.low %v3778_v40, %v3792_v27 }
 0x1fc   : > { %v3110_v3 = vmax.f32 %v7948_v0, %v7950_v1  ;;  %v7954_v5 = vpop.f32.mrb[3].mxu0  ;;  %v7956_v6 = vpop.f32.mrb[3].mxu1  ;;  %6381 = vmatprep.subr.bf16.mxu0 %v7088_v8  ;;  %6597 = vmatprep.subr.bf16.mxu1 %v7088_v8 }
 0x1fd   : > { %v3108_v12 = vmax.f32 %v7954_v5, %v7956_v6 }
 0x1ff   : > { %6382 = vmatpush3.bf16.msra.mxu0 %v7088_v8  ;;  %6598 = vmatpush3.bf16.msra.mxu1 %v7088_v8  ;;  %v3796_v8 = vrot.slane %v3794_v44, 4  ;;  %v5300_v44 = vld [vmem:[%s7160_s26 + $0xe8] sm:$0xf] }
 0x200   : > { %6383 = vmatprep.subr.bf16.mxu0 %v7089_v21  ;;  %6599 = vmatprep.subr.bf16.mxu1 %v7089_v21  ;;  %v4576_v19 = vshll.u32 %v5300_v44, 16 }
 0x201   : > { %v7968_v22 = vpop.f32.mrb[4].mxu0  ;;  %v7970_v2 = vpop.f32.mrb[4].mxu1 }
 0x202   : > { %v3113_v54 = vmax.f32 %v7968_v22, %v7970_v2  ;;  %v7975_v25 = vpop.f32.mrb[5].mxu0  ;;  %v7977_v28 = vpop.f32.mrb[5].mxu1  ;;  %v4578_v57 = vrot.slane %v4576_v19, 5 }
 0x203   : > { %v3111_v16 = vmax.f32 %v7975_v25, %v7977_v28  ;;  %v7984_v7 = vpop.f32.mrb[6].mxu0  ;;  %v7986_v9 = vpop.f32.mrb[6].mxu1  ;;  %6384 = vmatpush3.bf16.msra.mxu0 %v7089_v21  ;;  %6600 = vmatpush3.bf16.msra.mxu1 %v7089_v21  ;;  %v3836_v21 = vshrl.u32 %v5288_v48, 16 }
 0x204   : > { %v3114_v29 = vmax.f32 %v7984_v7, %v7986_v9  ;;  %v7990_v32 = vpop.f32.mrb[7].mxu0  ;;  %v7992_v37 = vpop.f32.mrb[7].mxu1  ;;  %6393 = vmatprep.subr.bf16.mxu0 %v7090_v58  ;;  %6609 = vmatprep.subr.bf16.mxu1 %v7090_v58 }
 0x205   : > { %v3112_v17 = vmax.f32 %v7990_v32, %v7992_v37  ;;  %v3838_v33 = vrot.slane %v3836_v21, 4 }
 0x206   : > { %6386 = vmatmul.mubr.bf16.vlgmr.msra.gmra.mrb[8].mxu0 %v7020_v24  ;;  %6602 = vmatmul.mubr.bf16.vlgmr.msra.gmra.mrb[8].mxu1 %v7980_v31  ;;  %v3839_v24 = vshll.u32 %v5288_v48, 16 }
 0x207   : > { %6394 = vmatpush3.bf16.msra.mxu0 %v7090_v58  ;;  %6610 = vmatpush3.bf16.msra.mxu1 %v7090_v58  ;;  %v3817_v58 = vshll.u32 %v5285_v18, 16  ;;  %v4573_v18 = vshrl.u32 %v5300_v44, 16  ;;  %v5299_v44 = vld [vmem:[%s7160_s26 + $0xe4] sm:$0x1] }
 0x208   : > { %6395 = vmatprep.subr.bf16.mxu0 %v7091_v49  ;;  %6611 = vmatprep.subr.bf16.mxu1 %v7091_v49  ;;  %v3841_v46 = vrot.slane %v3839_v24, 5 }
 0x209   : > { %6389 = vmatprep.mubr.bf16.mxu0 %v7022_v10  ;;  %6605 = vmatprep.mubr.bf16.mxu1 %v8001_v34  ;;  %v5292_v10 = vld [vmem:[%s7160_s26 + $0xd0] sm:$0xf]  ;;  %v3819_v48 = vrot.slane %v3817_v58, 5  ;;  %v5293_v58 = vld [vmem:[%s7160_s26 + $0xd4] sm:$0x1] }
 0x20a   : > { %v3864_v40 = vshrl.u32 %v5292_v10, 16  ;;  %v3867_v27 = vshll.u32 %v5292_v10, 16 }
 0x20b   : > { %6396 = vmatpush3.bf16.msra.mxu0 %v7091_v49  ;;  %6612 = vmatpush3.bf16.msra.mxu1 %v7091_v49  ;;  %v5287_v49 = vld [vmem:[%s7160_s26 + $0xbc] sm:$0x1]  ;;  %v3820_v50 = vsel %vm7182_vm2, %v3815_v52, %v3819_v48 }
 0x20c   : > { %6397 = vmatprep.subr.bf16.mxu0 %v7092_v26  ;;  %6613 = vmatprep.subr.bf16.mxu1 %v7092_v26  ;;  %v3831_v60 = vshll.u32 %v5287_v49, 16  ;;  %v3866_v24 = vrot.slane %v3864_v40, 4  ;;  %v3859_v40 = vshll.u32 %v5291_v56, 16 }
 0x20e   : > { %6390 = vmatmul.mubr.bf16.gmra.mrb[12].mxu0 %v7024_v62  ;;  %6606 = vmatmul.mubr.bf16.gmra.mrb[12].mxu1 %v8012_v41  ;;  %v3853_v62 = vshll.u32 %v5290_v23, 16  ;;  %v3869_v23 = vrot.slane %v3867_v27, 5 }
 0x20f   : > { %6398 = vmatpush3.bf16.msra.mxu0 %v7092_v26  ;;  %6614 = vmatpush3.bf16.msra.mxu1 %v7092_v26  ;;  %v5298_v26 = vld [vmem:[%s7160_s26 + $0xe0] sm:$0xf] }
 0x210   : > { %6399 = vmatprep.subr.bf16.mxu0 %v7093_v59  ;;  %6615 = vmatprep.subr.bf16.mxu1 %v7093_v59  ;;  %v4559_v14 = vshrl.u32 %v5298_v26, 16  ;;  %v4562_v15 = vshll.u32 %v5298_v26, 16  ;;  %v3855_v21 = vrot.slane %v3853_v62, 5  ;;  %v3870_v27 = vor.u32 %v3869_v23, %v3866_v24 }
 0x211   : > { %6409 = vmatprep.mubr.bf16.mxu0 %v7920_v43  ;;  %6625 = vmatprep.mubr.bf16.mxu1 %v8021_v38  ;;  %v3800_v43 = vor.u32 %v3799_v13, %v3796_v8  ;;  %v3842_v8 = vor.u32 %v3841_v46, %v3838_v33  ;;  %v3845_v13 = vshll.u32 %v5289_v36, 16  ;;  %v4575_v36 = vrot.slane %v4573_v18, 4 }
 0x212   : > { %v4561_v46 = vrot.slane %v4559_v14, 4  ;;  %v4564_v49 = vrot.slane %v4562_v15, 5  ;;  %v3856_v62 = vor.u32 %v3855_v21, %v3852_v20  ;;  %v3873_v26 = vshll.u32 %v5293_v58, 16  ;;  %v7098_v20 = vld [vmem:[%s8171_s1 + $0x200] sm:$0xff]  }
 0x213   : > { %6400 = vmatpush3.bf16.msra.mxu0 %v7093_v59  ;;  %6616 = vmatpush3.bf16.msra.mxu1 %v7093_v59  ;;  %v3801_v39 = vrot.slane %v3800_v43, 4  ;;  %v3828_v59 = vor.u32 %v3827_v11, %v3824_v35  ;;  %v3833_v35 = vrot.slane %v3831_v60, 5  ;;  %v3843_v11 = vrot.slane %v3842_v8, 4 }
 0x214   : > { %6401 = vmatprep.subr.bf16.mxu0 %v7094_v42  ;;  %6617 = vmatprep.subr.bf16.mxu1 %v7094_v42  ;;  %v3847_v33 = vrot.slane %v3845_v13, 5  ;;  %v4568_v60 = vshll.u32 %v5299_v44, 16  ;;  %v4579_v8 = vor.u32 %v4578_v57, %v4575_v36  ;;  %v3857_v14 = vrot.slane %v3856_v62, 4  ;;  %v5308_v36 = vld [vmem:[%s7160_s26 + $0x108] sm:$0xf] }
 0x215   : > { %v3806_v43 = vsel %vm7182_vm2, %v3801_v39, %v3805_v45  ;;  %v3829_v10 = vrot.slane %v3828_v59, 4  ;;  %v7097_v39 = vld [vmem:[%s8171_s1 + $0x1f8] sm:$0xff]   ;;  %v4565_v59 = vor.u32 %v4564_v49, %v4561_v46  ;;  %v3861_v15 = vrot.slane %v3859_v40, 5  ;;  %v7100_v46 = vld [vmem:[%s8171_s1 + $0x210] sm:$0xff]   ;;  %v5306_v49 = vld [vmem:[%s7160_s26 + $0x100] sm:$0xf] }
 0x216   : > { %v8059_v45 = vcombine.low %v3806_v43, %v3820_v50  ;;  %v3848_v48 = vsel %vm7182_vm2, %v3843_v11, %v3847_v33  ;;  %v3871_v18 = vrot.slane %v3870_v27, 4  ;;  %v3875_v19 = vrot.slane %v3873_v26, 5  ;;  %v5302_v11 = vld [vmem:[%s7160_s26 + $0xf0] sm:$0xf]  ;;  %v5304_v33 = vld [vmem:[%s7160_s26 + $0xf8] sm:$0xf] }
 0x217   : > { %6402 = vmatpush3.bf16.msra.mxu0 %v7094_v42  ;;  %6618 = vmatpush3.bf16.msra.mxu1 %v7094_v42  ;;  %v7096_v42 = vld [vmem:[%s8171_s1 + $0x1f0] sm:$0xff]   ;;  %v3834_v52 = vsel %vm7182_vm2, %v3829_v10, %v3833_v35  ;;  %v4566_v24 = vrot.slane %v4565_v59, 4  ;;  %v4570_v23 = vrot.slane %v4568_v60, 5  ;;  %v3862_v50 = vsel %vm7182_vm2, %v3857_v14, %v3861_v15  ;;  %v7101_v26 = vld [vmem:[%s8171_s1 + $0x218] sm:$0xff]   ;;  %v7102_v15 = vld [vmem:[%s8171_s1 + $0x220] sm:$0xff]  }
 0x218   : > { %6403 = vmatprep.subr.bf16.mxu0 %v7095_v4  ;;  %6619 = vmatprep.subr.bf16.mxu1 %v7095_v4  ;;  %v8068_v21 = vcombine.low %v3834_v52, %v3848_v48  ;;  %v3876_v56 = vsel %vm7182_vm2, %v3871_v18, %v3875_v19  ;;  %v4587_v57 = vshrl.u32 %v5302_v11, 16  ;;  %v4590_v62 = vshll.u32 %v5302_v11, 16  ;;  %v5310_v14 = vld [vmem:[%s7160_s26 + $0x110] sm:$0xf] }
 0x219   : > { %v8081_v58 = vcombine.low %v3862_v50, %v3876_v56  ;;  %v4571_v10 = vsel %vm7182_vm2, %v4566_v24, %v4570_v23  ;;  %v4601_v40 = vshrl.u32 %v5304_v33, 16  ;;  %v4604_v27 = vshll.u32 %v5304_v33, 16  ;;  %v5312_v24 = vld [vmem:[%s7160_s26 + $0x118] sm:$0xf]  ;;  %v5307_v23 = vld [vmem:[%s7160_s26 + $0x104] sm:$0x1] }
 0x21a   : > { %v4615_v44 = vshrl.u32 %v5306_v49, 16  ;;  %v4589_v52 = vrot.slane %v4587_v57, 4  ;;  %v4592_v48 = vrot.slane %v4590_v62, 5  ;;  %v4657_v11 = vshrl.u32 %v5312_v24, 16 }
 0x21b   : > { %6404 = vmatpush3.bf16.msra.mxu0 %v7095_v4  ;;  %6620 = vmatpush3.bf16.msra.mxu1 %v7095_v4  ;;  %v5301_v4 = vld [vmem:[%s7160_s26 + $0xec] sm:$0x1]  ;;  %v4603_v59 = vrot.slane %v4601_v40, 4  ;;  %v4606_v60 = vrot.slane %v4604_v27, 5  ;;  %v4660_v33 = vshll.u32 %v5312_v24, 16 }
 0x21c   : > { %6405 = vmatprep.subr.bf16.mxu0 %v7096_v42  ;;  %6621 = vmatprep.subr.bf16.mxu1 %v7096_v42  ;;  %v4582_v13 = vshll.u32 %v5301_v4, 16  ;;  %v4618_v4 = vshll.u32 %v5306_v49, 16  ;;  %v4624_v49 = vshll.u32 %v5307_v23, 16  ;;  %v7105_v23 = vld [vmem:[%s8171_s1 + $0x238] sm:$0xff]  }
 0x21d   : > { %v4607_v56 = vor.u32 %v4606_v60, %v4603_v59 }
 0x21e   : > { %v4584_v43 = vrot.slane %v4582_v13, 5  ;;  %v5305_v13 = vld [vmem:[%s7160_s26 + $0xfc] sm:$0x1]  ;;  %v4620_v18 = vrot.slane %v4618_v4, 5  ;;  %v4626_v60 = vrot.slane %v4624_v49, 5 }
 0x21f   : > { %6406 = vmatpush3.bf16.msra.mxu0 %v7096_v42  ;;  %6622 = vmatpush3.bf16.msra.mxu1 %v7096_v42  ;;  %v4580_v42 = vrot.slane %v4579_v8, 4  ;;  %v5303_v8 = vld [vmem:[%s7160_s26 + $0xf4] sm:$0x1]  ;;  %v4608_v27 = vrot.slane %v4607_v56, 4 }
 0x220   : > { %6407 = vmatprep.subr.bf16.mxu0 %v7097_v39  ;;  %6623 = vmatprep.subr.bf16.mxu1 %v7097_v39  ;;  %v4596_v50 = vshll.u32 %v5303_v8, 16 }
 0x221   : > { %v4585_v35 = vsel %vm7182_vm2, %v4580_v42, %v4584_v43  ;;  %v5309_v42 = vld [vmem:[%s7160_s26 + $0x10c] sm:$0x1]  ;;  %v4593_v43 = vor.u32 %v4592_v48, %v4589_v52  ;;  %v4662_v52 = vrot.slane %v4660_v33, 5  ;;  %v7104_v48 = vld [vmem:[%s8171_s1 + $0x230] sm:$0xff]  }
 0x222   : > { %v4638_v57 = vshll.u32 %v5309_v42, 16  ;;  %v4598_v40 = vrot.slane %v4596_v50, 5 }
 0x223   : > { %6408 = vmatpush3.bf16.msra.mxu0 %v7097_v39  ;;  %6624 = vmatpush3.bf16.msra.mxu1 %v7097_v39  ;;  %v4632_v39 = vshll.u32 %v5308_v36, 16  ;;  %v4594_v62 = vrot.slane %v4593_v43, 4 }
 0x224   : > { %6417 = vmatprep.subr.bf16.mxu0 %v7098_v20  ;;  %6633 = vmatprep.subr.bf16.mxu1 %v7098_v20 }
 0x226   : > { %6410 = vmatmul.mubr.bf16.vlgmr.msra.gmra.mrb[8].mxu0 %v7980_v31  ;;  %6626 = vmatmul.mubr.bf16.vlgmr.msra.gmra.mrb[8].mxu1 %v8059_v45  ;;  %v7099_v31 = vld [vmem:[%s8171_s1 + $0x208] sm:$0xff]  }
 0x227   : > { %6418 = vmatpush3.bf16.msra.mxu0 %v7098_v20  ;;  %6634 = vmatpush3.bf16.msra.mxu1 %v7098_v20  ;;  %v4634_v20 = vrot.slane %v4632_v39, 5  ;;  %v4659_v39 = vrot.slane %v4657_v11, 4 }
 0x228   : > { %6419 = vmatprep.subr.bf16.mxu0 %v7099_v31  ;;  %6635 = vmatprep.subr.bf16.mxu1 %v7099_v31 }
 0x229   : > { %6413 = vmatprep.mubr.bf16.mxu0 %v8001_v34  ;;  %6629 = vmatprep.mubr.bf16.mxu1 %v8068_v21  ;;  %v5314_v34 = vcombine.low %v4571_v10, %v4585_v35  ;;  %v4643_v10 = vshrl.u32 %v5310_v14, 16  ;;  %v4646_v35 = vshll.u32 %v5310_v14, 16  ;;  %v5313_v14 = vld [vmem:[%s7160_s26 + $0x11c] sm:$0x1] }
 0x22a   : > { %v4666_v24 = vshll.u32 %v5313_v14, 16 }
 0x22b   : > { %6420 = vmatpush3.bf16.msra.mxu0 %v7099_v31  ;;  %6636 = vmatpush3.bf16.msra.mxu1 %v7099_v31  ;;  %v4610_v31 = vshll.u32 %v5305_v13, 16  ;;  %v4645_v4 = vrot.slane %v4643_v10, 4  ;;  %v4640_v13 = vrot.slane %v4638_v57, 5 }
 0x22c   : > { %6421 = vmatprep.subr.bf16.mxu0 %v7100_v46  ;;  %6637 = vmatprep.subr.bf16.mxu1 %v7100_v46  ;;  %v4668_v11 = vrot.slane %v4666_v24, 5 }
 0x22e   : > { %6414 = vmatmul.mubr.bf16.gmra.mrb[12].mxu0 %v8012_v41  ;;  %6630 = vmatmul.mubr.bf16.gmra.mrb[12].mxu1 %v8081_v58  ;;  %v4629_v41 = vshrl.u32 %v5308_v36, 16 }
 0x22f   : > { %6422 = vmatpush3.bf16.msra.mxu0 %v7100_v46  ;;  %6638 = vmatpush3.bf16.msra.mxu1 %v7100_v46  ;;  %v7103_v46 = vld [vmem:[%s8171_s1 + $0x228] sm:$0xff]  }
 0x230   : > { %6423 = vmatprep.subr.bf16.mxu0 %v7101_v26  ;;  %6639 = vmatprep.subr.bf16.mxu1 %v7101_v26  ;;  %v4631_v19 = vrot.slane %v4629_v41, 4  ;;  %v4648_v41 = vrot.slane %v4646_v35, 5 }
 0x231   : > { %6433 = vmatprep.mubr.bf16.mxu0 %v8021_v38  ;;  %6649 = vmatprep.mubr.bf16.mxu1 %v5314_v34  ;;  %v4617_v38 = vrot.slane %v4615_v44, 4  ;;  %v5311_v44 = vld [vmem:[%s7160_s26 + $0x114] sm:$0x1] }
 0x232   : > { %v4635_v36 = vor.u32 %v4634_v20, %v4631_v19  ;;  %v4649_v19 = vor.u32 %v4648_v41, %v4645_v4  ;;  %v4663_v20 = vor.u32 %v4662_v52, %v4659_v39 }
 0x233   : > { %6424 = vmatpush3.bf16.msra.mxu0 %v7101_v26  ;;  %6640 = vmatpush3.bf16.msra.mxu1 %v7101_v26  ;;  %v4621_v34 = vor.u32 %v4620_v18, %v4617_v38  ;;  %v4612_v26 = vrot.slane %v4610_v31, 5  ;;  %v4652_v38 = vshll.u32 %v5311_v44, 16 }
 0x234   : > { %6425 = vmatprep.subr.bf16.mxu0 %v7102_v15  ;;  %6641 = vmatprep.subr.bf16.mxu1 %v7102_v15  ;;  %v4636_v8 = vrot.slane %v4635_v36, 4  ;;  %v4650_v10 = vrot.slane %v4649_v19, 4  ;;  %v4664_v35 = vrot.slane %v4663_v20, 4 }
 0x235   : > { %v4622_v59 = vrot.slane %v4621_v34, 4  ;;  %v4613_v18 = vsel %vm7182_vm2, %v4608_v27, %v4612_v26  ;;  %v4654_v56 = vrot.slane %v4652_v38, 5 }
 0x236   : > { %v4641_v43 = vsel %vm7182_vm2, %v4636_v8, %v4640_v13 }
 0x237   : > { %6426 = vmatpush3.bf16.msra.mxu0 %v7102_v15  ;;  %6642 = vmatpush3.bf16.msra.mxu1 %v7102_v15  ;;  %v4599_v15 = vsel %vm7182_vm2, %v4594_v62, %v4598_v40  ;;  %v4627_v42 = vsel %vm7182_vm2, %v4622_v59, %v4626_v60  ;;  %v4655_v33 = vsel %vm7182_vm2, %v4650_v10, %v4654_v56 }
 0x238   : > { %6427 = vmatprep.subr.bf16.mxu0 %v7103_v46  ;;  %6643 = vmatprep.subr.bf16.mxu1 %v7103_v46  ;;  %v5315_v50 = vcombine.low %v4599_v15, %v4613_v18  ;;  %v5316_v31 = vcombine.low %v4627_v42, %v4641_v43 }
 0x23b   : > { %6428 = vmatpush3.bf16.msra.mxu0 %v7103_v46  ;;  %6644 = vmatpush3.bf16.msra.mxu1 %v7103_v46  ;;  %v4669_v46 = vsel %vm7182_vm2, %v4664_v35, %v4668_v11 }
 0x23c   : > { %6429 = vmatprep.subr.bf16.mxu0 %v7104_v48  ;;  %6645 = vmatprep.subr.bf16.mxu1 %v7104_v48  ;;  %v5317_v34 = vcombine.low %v4655_v33, %v4669_v46 }
 0x23f   : > { %6430 = vmatpush3.bf16.msra.mxu0 %v7104_v48  ;;  %6646 = vmatpush3.bf16.msra.mxu1 %v7104_v48 }
 0x240   : > { %6431 = vmatprep.subr.bf16.mxu0 %v7105_v23  ;;  %6647 = vmatprep.subr.bf16.mxu1 %v7105_v23 }
 0x243   : > { %6432 = vmatpush3.bf16.msra.mxu0 %v7105_v23  ;;  %6648 = vmatpush3.bf16.msra.mxu1 %v7105_v23 }
 0x246   : > { %6434 = vmatmul.mubr.bf16.vlgmr.msra.gmra.mrb[8].mxu0 %v8059_v45  ;;  %6650 = vmatmul.mubr.bf16.vlgmr.msra.gmra.mrb[8].mxu1 %v5315_v50 }
 0x247   : > { %6437 = vmatprep.mubr.bf16.mxu0 %v8068_v21  ;;  %6653 = vmatprep.mubr.bf16.mxu1 %v5316_v31 }
 0x24e   : > { %6438 = vmatmul.mubr.bf16.gmra.mrb[12].mxu0 %v8081_v58  ;;  %6654 = vmatmul.mubr.bf16.gmra.mrb[12].mxu1 %v5317_v34 }
 0x319   : > { %v6435_v49 = vpop.f32.mrb[8].mxu0  ;;  %v6651_v36 = vpop.f32.mrb[8].mxu1 }
 0x31a   : > { %v3968_v45 = vmax.f32 %v3109_v63, %v6435_v49  ;;  %v3927_v57 = vpop.f32.mrb[9].mxu0  ;;  %v4720_v21 = vpop.f32.mrb[9].mxu1 }
 0x31b   : > { %v3966_v62 = vmax.f32 %v3107_v61, %v3927_v57  ;;  %v6436_v30 = vpop.f32.mrb[10].mxu0  ;;  %v6652_v40 = vpop.f32.mrb[10].mxu1 }
 0x31c   : > { %v4761_v27 = vmax.f32 %v3968_v45, %v6651_v36  ;;  %v3969_v58 = vmax.f32 %v3110_v3, %v6436_v30  ;;  %v3930_v26 = vpop.f32.mrb[11].mxu0  ;;  %v4723_v44 = vpop.f32.mrb[11].mxu1 }
 0x31d   : > { %v4759_v51 = vmax.f32 %v3966_v62, %v4720_v21  ;;  %v3967_v63 = vmax.f32 %v3108_v12, %v3930_v26 }
 0x31e   : > { %v4762_v53 = vmax.f32 %v3969_v58, %v6652_v40  ;;  %v4776_v61 = vadd.f32 %v5318_v47, %v4761_v27 }
 0x31f   : > { %v4760_v55 = vmax.f32 %v3967_v63, %v4723_v44  ;;  %v4774_v41 = vadd.f32 %v5318_v47, %v4759_v51 }
 0x320   : > { %v4777_v4 = vadd.f32 %v5318_v47, %v4762_v53 }
 0x321   : > { %v4775_v0 = vadd.f32 %v5318_v47, %v4760_v55  ;;  %v6439_v1 = vpop.f32.mrb[12].mxu0  ;;  %v6655_v3 = vpop.f32.mrb[12].mxu1 }
 0x322   : > { %v5346_v39 = vpack.c.bf16 %v4777_v4, %v4776_v61  ;;  %v3972_v52 = vmax.f32 %v3113_v54, %v6439_v1  ;;  %v3943_v5 = vpop.f32.mrb[13].mxu0  ;;  %v4736_v6 = vpop.f32.mrb[13].mxu1 }
 0x323   : > { %v5341_v12 = vpack.c.bf16 %v4775_v0, %v4774_v41  ;;  %v3970_v48 = vmax.f32 %v3111_v16, %v3943_v5  ;;  %v6440_v59 = vpop.f32.mrb[14].mxu0  ;;  %v6656_v60 = vpop.f32.mrb[14].mxu1 }
 0x324   : > { %5358 = vst [vmem:[%s175_s22 + $0x8] sm:$0xff] %v5346_v39   ;;  %v4765_v8 = vmax.f32 %v3972_v52, %v6655_v3  ;;  %v3973_v13 = vmax.f32 %v3114_v29, %v6440_v59  ;;  %v3946_v14 = vpop.f32.mrb[15].mxu0  ;;  %v4739_v15 = vpop.f32.mrb[15].mxu1 }
 0x325   : > { %5342 = vst [vmem:[%s175_s22] sm:$0xff] %v5341_v12   ;;  %v4763_v22 = vmax.f32 %v3970_v48, %v4736_v6  ;;  %v3971_v2 = vmax.f32 %v3112_v17, %v3946_v14 }
 0x326   : > { %v4766_v54 = vmax.f32 %v3973_v13, %v6656_v60  ;;  %v4780_v25 = vadd.f32 %v5318_v47, %v4765_v8 }
 0x327   : > { %v4764_v38 = vmax.f32 %v3971_v2, %v4739_v15  ;;  %v4778_v16 = vadd.f32 %v5318_v47, %v4763_v22 }
 0x328   : > { %v4781_v28 = vadd.f32 %v5318_v47, %v4766_v54 }
 0x329   : > { %v4779_v18 = vadd.f32 %v5318_v47, %v4764_v38 }
 0x32a   : > { %v5356_v19 = vpack.c.bf16 %v4781_v28, %v4780_v25 }
 0x32b   : > { %v5351_v20 = vpack.c.bf16 %v4779_v18, %v4778_v16 }
 0x32c   : > { %5360 = vst [vmem:[%s175_s22 + $0x18] sm:$0xff] %v5356_v19  }
 0x32d   : > { %5359 = vst [vmem:[%s175_s22 + $0x10] sm:$0xff] %v5351_v20  }
 0x32e PF: > { %s13_s12 = sadd.s32 1, %s7112_s12  }
 0x32f   : > { %p10_p5 = scmp.ge.s32.totalorder %s13_s12, 4  }
 0x331   :  { %12 = sbr.rel (!%p10_p5) target bundleno = 1 (0x1), region = 77 }

// kernel: cnn_forward.4
= control target key start
LH: loop header
LB: loop body
LE: loop exit
PB: predicated region body
PF: predicated region fallthrough
CT: control target
= control target key end

     0   :  { %s6561_s12 = smov 0   ;;  %s8334_s0 = inlined_call_operand.vmem [shape: bf16[2,18,18,4], index: 0, kind: input, shape index: {}]   ;;  %s8335_s1 = inlined_call_operand.vmem [shape: bf16[9,4,128], index: 1, kind: input, shape index: {}]   ;;  %s8336_s2 = inlined_call_operand.vmem [shape: f32[1,128], index: 2, kind: input, shape index: {}]   ;;  %s8337_s3 = inlined_call_operand.vmem [shape: bf16[2,256,128], index: 3, kind: output, shape index: {}]  }
   0x1 LB: > { %s4985_s13 = sadd.s32 4294967295, %s6539_s12   ;;  %p4989_p0 = scmp.ge.s32.totalorder %s6539_s12, 1  ;;  %s6539_s12 = sphi %s6561_s12, %s13_s12  }
   0x2   : > { %p137_p1 = scmp.lt.s32.totalorder %s6539_s12, 3 }
   0x4   : > { %p138_p2 = pnand %p4989_p0, %p137_p1 }
   0x6   : > { %141 = sbr.rel (%p138_p2) target bundleno = 587 (0x24b), region = 32 }
   0xd   : > { %v4993_v0 = vld [vmem:[%s8335_s1 + $0x2] sm:$0x3]  ;;  %vm707_vm0 = vcmask 1041408   ;;  %v5220_v1 = vld [vmem:[%s8335_s1 + $0x8] sm:$0x3]  ;;  %p161_p3 = scmp.lt.s32.totalorder %s4985_s13, 1 }
   0xe   : > { %6409 = vmatprep.subr.msk.bf16.mxu1 %vm707_vm0, %v4993_v0  ;;  %6413 = vmatprep.subr.msk.bf16.mxu0 %vm707_vm0, %v5220_v1  ;;  %v709_v2 = vsel %vm707_vm0, %v4993_v0, 0  ;;  %v6579_v3 = vsel %vm707_vm0, %v5220_v1, 0  ;;  %v204_v4 = vld [vmem:[%s8335_s1] sm:$0x3]  ;;  %v5285_v5 = vld [vmem:[%s8335_s1 + $0xa] sm:$0x3] }
   0xf   : > { %8351 = vst [vmem:[#allocation2_spill] sm:$0xff] %v6579_v3  ;;  %5846 = vmatpush3.bf16.msra.mxu1 %v709_v2  ;;  %5982 = vmatpush3.bf16.msra.mxu0 %v6579_v3  ;;  %s8406_s13 = smov (!%p161_p3, %s4985_s13), 1  ;;  %vm221_vm1 = vsmask.f32 3328  ;;  %vm222_vm2 = vsmask.f32 7440 }
  0x10   : > { %6410 = vmatprep.subr.msk.bf16.mxu1 %vm707_vm0, %v204_v4  ;;  %6415 = vmatprep.subr.msk.bf16.mxu0 %vm707_vm0, %v5285_v5  ;;  %s6419_s22 = smul.u32 216, %s8406_s13  ;;  %vm658_vm3 = vcmask 31744   ;;  %v6609_v17 = vsel %vm707_vm0, %v204_v4, 0  ;;  %v6615_v26 = vld [vmem:[%s8335_s1 + $0xc] sm:$0x3]  ;;  %vm6622_vm4 = vmor %vm221_vm1, %vm222_vm2  ;;  %v6628_v37 = vsel %vm707_vm0, %v5285_v5, 0 }
  0x11   : > { %v6632_v41 = vsel %vm707_vm0, %v6615_v26, 0  ;;  %vm1212_vm5 = vcmask 1042432   ;;  %vm1213_vm6 = vcmask 1046532   ;;  %s5564_s17 = sshll.u32 %s8406_s13, 7 }
  0x12   : > { %s6596_s25 = scalar_lea.vmem %s8334_s0, %s6419_s22  ;;  %vm6848_vm7 = vmor %vm1212_vm5, %vm1213_vm6  ;;  %s8284_s20 = scalar_lea.vmem %s8337_s3, %s5564_s17 }
  0x13   : > { %v172_v6 = vld [vmem:[%s6596_s25] sm:$0xf]  ;;  %v173_v7 = vld [vmem:[%s6596_s25 + $0x4] sm:$0xf]  ;;  %v205_v8 = vld [vmem:[%s6596_s25 + $0x8] sm:$0x1] }
  0x14   : > { %v225_v9 = vshrl.u32 %v172_v6, 16  ;;  %v228_v10 = vshll.u32 %v172_v6, 16  ;;  %v234_v11 = vshll.u32 %v173_v7, 16  ;;  %v238_v12 = vshrl.u32 %v173_v7, 16  ;;  %v5172_v13 = vld [vmem:[%s6596_s25 + $0xc] sm:$0xf] }
  0x15   : > { %v244_v14 = vshll.u32 %v205_v8, 16  ;;  %v6603_v15 = vld [vmem:[%s6596_s25 + $0x10] sm:$0xf]  ;;  %v6606_v16 = vld [vmem:[%s6596_s25 + $0x14] sm:$0x1]  ;;  %v2029_v23 = vshrl.u32 %v5172_v13, 16 }
  0x16   : > { %v227_v18 = vrot.slane %v225_v9, 4  ;;  %v230_v19 = vrot.slane %v228_v10, 5  ;;  %v236_v20 = vrot.slane %v234_v11, 5  ;;  %v240_v21 = vrot.slane %v238_v12, 4  ;;  %v174_v31 = vld [vmem:[%s6596_s25 + $0xc] sm:$0xf] }
  0x17   : > { %v246_v22 = vrot.slane %v244_v14, 5  ;;  %v2032_v24 = vshll.u32 %v5172_v13, 16  ;;  %v2038_v25 = vshll.u32 %v6603_v15, 16  ;;  %v2042_v29 = vshrl.u32 %v6603_v15, 16  ;;  %v175_v36 = vld [vmem:[%s6596_s25 + $0x10] sm:$0xf] }
  0x18   : > { %v231_v27 = vor.u32 %v230_v19, %v227_v18  ;;  %v241_v28 = vor.u32 %v240_v21, %v236_v20  ;;  %v2048_v30 = vshll.u32 %v6606_v16, 16  ;;  %v2031_v33 = vrot.slane %v2029_v23, 4  ;;  %v206_v44 = vld [vmem:[%s6596_s25 + $0x14] sm:$0x1]  ;;  %v5175_v55 = vld [vmem:[%s6596_s25 + $0x18] sm:$0xf] }
  0x19   : > { %v2034_v34 = vrot.slane %v2032_v24, 5  ;;  %v2040_v35 = vrot.slane %v2038_v25, 5  ;;  %v2044_v40 = vrot.slane %v2042_v29, 4  ;;  %v249_v45 = vshrl.u32 %v174_v31, 16  ;;  %v6641_v60 = vld [vmem:[%s6596_s25 + $0x1c] sm:$0xf] }
  0x1a   : > { %v232_v38 = vrot.slane %v231_v27, 4  ;;  %v242_v39 = vrot.slane %v241_v28, 4  ;;  %v2050_v43 = vrot.slane %v2048_v30, 5  ;;  %v252_v46 = vshll.u32 %v174_v31, 16  ;;  %v6649_v1 = vld [vmem:[%s6596_s25 + $0x20] sm:$0x1] }
  0x1b   : > { %v2035_v42 = vor.u32 %v2034_v34, %v2031_v33  ;;  %v2045_v49 = vor.u32 %v2044_v40, %v2040_v35  ;;  %v258_v50 = vshll.u32 %v175_v36, 16  ;;  %v251_v53 = vrot.slane %v249_v45, 4  ;;  %v176_v18 = vld [vmem:[%s6596_s25 + $0x18] sm:$0xf]  ;;  %v177_v23 = vld [vmem:[%s6596_s25 + $0x1c] sm:$0xf] }
  0x1c   : > { %v237_v47 = vsel %vm6622_vm4, %v232_v38, %v236_v20  ;;  %v247_v48 = vsel %vm6622_vm4, %v242_v39, %v246_v22  ;;  %v254_v54 = vrot.slane %v252_v46, 5  ;;  %v262_v58 = vshrl.u32 %v175_v36, 16  ;;  %v207_v31 = vld [vmem:[%s6596_s25 + $0x20] sm:$0x1]  ;;  %v5178_v40 = vld [vmem:[%s6596_s25 + $0x24] sm:$0xf] }
  0x1d   : > { %v4994_v51 = vcombine.low %v237_v47, %v247_v48  ;;  %v2036_v52 = vrot.slane %v2035_v42, 4  ;;  %v2046_v56 = vrot.slane %v2045_v49, 4  ;;  %v260_v57 = vrot.slane %v258_v50, 5  ;;  %v6672_v46 = vld [vmem:[%s6596_s25 + $0x28] sm:$0xf] }
  0x1e   : > { %v268_v59 = vshll.u32 %v206_v44, 16  ;;  %v2772_v62 = vrot.slane %v6603_v15, 5  ;;  %v2775_v63 = vrot.slane %v6606_v16, 5  ;;  %v255_v0 = vor.u32 %v254_v54, %v251_v53  ;;  %v6681_v54 = vld [vmem:[%s6596_s25 + $0x2c] sm:$0x1] }
  0x1f   : > { %5847 = vmatprep.mubr.msk.bf16.mxu1 %vm658_vm3, %v4994_v51  ;;  %v2041_v61 = vsel %vm6622_vm4, %v2036_v52, %v2040_v35  ;;  %v2051_v2 = vsel %vm6622_vm4, %v2046_v56, %v2050_v43  ;;  %v264_v4 = vrot.slane %v262_v58, 4  ;;  %v2053_v6 = vshrl.u32 %v5175_v55, 16  ;;  %v5074_v51 = vld [vmem:[%s8335_s1 + $0x4] sm:$0x3]  ;;  %v6881_v16 = vld [vmem:[%s6596_s25 + $0x7c] sm:$0xf] }
  0x20   : > { %v270_v5 = vrot.slane %v268_v59, 5  ;;  %v5221_v7 = vcombine.low %v2041_v61, %v2051_v2  ;;  %v256_v8 = vrot.slane %v255_v0, 4  ;;  %v2056_v9 = vshll.u32 %v5175_v55, 16  ;;  %v178_v0 = vld [vmem:[%s6596_s25 + $0x24] sm:$0xf] }
  0x21   : > { %v2062_v10 = vshll.u32 %v6641_v60, 16  ;;  %v265_v11 = vor.u32 %v264_v4, %v260_v57  ;;  %v2055_v12 = vrot.slane %v2053_v6, 4  ;;  %v2066_v13 = vshrl.u32 %v6641_v60, 16 }
  0x22   : > { %v2072_v14 = vshll.u32 %v6649_v1, 16  ;;  %5983 = vmatprep.mubr.msk.bf16.mxu0 %vm658_vm3, %v5221_v7  ;;  %v261_v19 = vsel %vm6622_vm4, %v256_v8, %v260_v57  ;;  %v2058_v20 = vrot.slane %v2056_v9, 5  ;;  %v2779_v22 = vrot.slane %v6641_v60, 5  ;;  %v179_v7 = vld [vmem:[%s6596_s25 + $0x28] sm:$0xf] }
  0x23   : > { %v2064_v21 = vrot.slane %v2062_v10, 5  ;;  %v266_v24 = vrot.slane %v265_v11, 4  ;;  %v2068_v25 = vrot.slane %v2066_v13, 4  ;;  %v2782_v28 = vrot.slane %v6649_v1, 5  ;;  %v208_v13 = vld [vmem:[%s6596_s25 + $0x2c] sm:$0x1] }
  0x24   : > { %v2074_v27 = vrot.slane %v2072_v14, 5  ;;  %v2059_v29 = vor.u32 %v2058_v20, %v2055_v12  ;;  %v6665_v30 = vrot.slane %v2779_v22, 4  ;;  %v273_v33 = vshrl.u32 %v176_v18, 16 }
  0x25   : > { %v276_v34 = vshll.u32 %v176_v18, 16  ;;  %v271_v35 = vsel %vm6622_vm4, %v266_v24, %v270_v5  ;;  %v2069_v36 = vor.u32 %v2068_v25, %v2064_v21  ;;  %v282_v38 = vshll.u32 %v177_v23, 16  ;;  %v5181_v24 = vld [vmem:[%s6596_s25 + $0x30] sm:$0xf] }
  0x26   : > { %v286_v39 = vshrl.u32 %v177_v23, 16  ;;  %v4995_v42 = vcombine.low %v261_v19, %v271_v35  ;;  %v2060_v43 = vrot.slane %v2059_v29, 4  ;;  %v275_v44 = vrot.slane %v273_v33, 4  ;;  %v6701_v33 = vld [vmem:[%s6596_s25 + $0x34] sm:$0xf] }
  0x27   : > { %v278_v45 = vrot.slane %v276_v34, 5  ;;  %v2070_v47 = vrot.slane %v2069_v36, 4  ;;  %v284_v48 = vrot.slane %v282_v38, 5  ;;  %v292_v50 = vshll.u32 %v207_v31, 16 }
  0x28   : > { %v288_v49 = vrot.slane %v286_v39, 4  ;;  %5848 = vmatmul.mubr.msk.bf16.vlgmr.msra.gmra.mrb[0].mxu1 %vm658_vm3, %v4995_v42  ;;  %v2065_v52 = vsel %vm6622_vm4, %v2060_v43, %v2064_v21  ;;  %v2077_v55 = vshrl.u32 %v5178_v40, 16  ;;  %v2080_v56 = vshll.u32 %v5178_v40, 16  ;;  %v6709_v40 = vld [vmem:[%s6596_s25 + $0x38] sm:$0x1] }
  0x29   : > { %v279_v53 = vor.u32 %v278_v45, %v275_v44  ;;  %5880 = vmatpush3.bf16.msra.mxu1 %v6609_v17  ;;  %v2075_v57 = vsel %vm6622_vm4, %v2070_v47, %v2074_v27  ;;  %v294_v59 = vrot.slane %v292_v50, 5  ;;  %v2086_v61 = vshll.u32 %v6672_v46, 16 }
  0x2a   : > { %v289_v58 = vor.u32 %v288_v49, %v284_v48  ;;  %v5222_v2 = vcombine.low %v2065_v52, %v2075_v57  ;;  %v2079_v5 = vrot.slane %v2077_v55, 4  ;;  %v2082_v6 = vrot.slane %v2080_v56, 5  ;;  %6411 = vmatprep.subr.msk.bf16.mxu1 %vm707_vm0, %v5074_v51  ;;  %v180_v52 = vld [vmem:[%s6596_s25 + $0x30] sm:$0xf] }
  0x2b   : > { %v280_v4 = vrot.slane %v279_v53, 4  ;;  %v2088_v9 = vrot.slane %v2086_v61, 5  ;;  %v2090_v17 = vshrl.u32 %v6672_v46, 16  ;;  %v2096_v10 = vshll.u32 %v6681_v54, 16 }
  0x2c   : > { %v290_v8 = vrot.slane %v289_v58, 4  ;;  %5984 = vmatmul.mubr.msk.bf16.vlgmr.msra.gmra.mrb[0].mxu0 %vm658_vm3, %v5222_v2  ;;  %v2083_v12 = vor.u32 %v2082_v6, %v2079_v5  ;;  %v297_v14 = vshrl.u32 %v178_v0, 16  ;;  %v300_v18 = vshll.u32 %v178_v0, 16  ;;  %v181_v58 = vld [vmem:[%s6596_s25 + $0x34] sm:$0xf] }
  0x2d   : > { %v285_v11 = vsel %vm6622_vm4, %v280_v4, %v284_v48  ;;  %6016 = vmatpush3.bf16.msra.mxu0 %v6628_v37  ;;  %v2092_v20 = vrot.slane %v2090_v17, 4  ;;  %v2098_v21 = vrot.slane %v2096_v10, 5  ;;  %v306_v23 = vshll.u32 %v179_v7, 16  ;;  %v209_v4 = vld [vmem:[%s6596_s25 + $0x38] sm:$0x1] }
  0x2e   : > { %v295_v19 = vsel %vm6622_vm4, %v290_v8, %v294_v59  ;;  %v2084_v27 = vrot.slane %v2083_v12, 4  ;;  %v299_v29 = vrot.slane %v297_v14, 4  ;;  %v302_v31 = vrot.slane %v300_v18, 5  ;;  %6416 = vmatprep.subr.msk.bf16.mxu0 %vm707_vm0, %v6615_v26  ;;  %v5184_v12 = vld [vmem:[%s6596_s25 + $0x3c] sm:$0xf] }
  0x2f   : > { %v4996_v25 = vcombine.low %v285_v11, %v295_v19  ;;  %v2093_v34 = vor.u32 %v2092_v20, %v2088_v9  ;;  %v308_v35 = vrot.slane %v306_v23, 5  ;;  %v310_v37 = vshrl.u32 %v179_v7, 16  ;;  %v6726_v20 = vld [vmem:[%s6596_s25 + $0x40] sm:$0xf] }
  0x30   : > { %v316_v36 = vshll.u32 %v208_v13, 16  ;;  %v2089_v38 = vsel %vm6622_vm4, %v2084_v27, %v2088_v9  ;;  %v303_v39 = vor.u32 %v302_v31, %v299_v29  ;;  %v2101_v42 = vshrl.u32 %v5181_v24, 16 }
  0x31   : > { %5851 = vmatprep.mubr.msk.bf16.mxu1 %vm658_vm3, %v4996_v25  ;;  %v2104_v43 = vshll.u32 %v5181_v24, 16  ;;  %v2094_v44 = vrot.slane %v2093_v34, 4  ;;  %v312_v45 = vrot.slane %v310_v37, 4  ;;  %v2110_v26 = vshll.u32 %v6701_v33, 16  ;;  %v6731_v34 = vld [vmem:[%s6596_s25 + $0x44] sm:$0x1] }
  0x32   : > { %v318_v47 = vrot.slane %v316_v36, 5  ;;  %v304_v48 = vrot.slane %v303_v39, 4  ;;  %v2103_v49 = vrot.slane %v2101_v42, 4  ;;  %v2114_v51 = vshrl.u32 %v6701_v33, 16  ;;  %v182_v42 = vld [vmem:[%s6596_s25 + $0x3c] sm:$0xf] }
  0x33   : > { %v2106_v50 = vrot.slane %v2104_v43, 5  ;;  %v2099_v53 = vsel %vm6622_vm4, %v2094_v44, %v2098_v21  ;;  %v313_v55 = vor.u32 %v312_v45, %v308_v35  ;;  %v2112_v56 = vrot.slane %v2110_v26, 5  ;;  %v183_v26 = vld [vmem:[%s6596_s25 + $0x40] sm:$0xf] }
  0x34   : > { %v2120_v57 = vshll.u32 %v6709_v40, 16  ;;  %v5223_v59 = vcombine.low %v2089_v38, %v2099_v53  ;;  %v309_v61 = vsel %vm6622_vm4, %v304_v48, %v308_v35  ;;  %v2116_v2 = vrot.slane %v2114_v51, 4 }
  0x35   : > { %v2107_v0 = vor.u32 %v2106_v50, %v2103_v49  ;;  %v314_v5 = vrot.slane %v313_v55, 4  ;;  %v321_v7 = vshrl.u32 %v180_v52, 16  ;;  %v324_v8 = vshll.u32 %v180_v52, 16 }
  0x36   : > { %v2122_v6 = vrot.slane %v2120_v57, 5  ;;  %5987 = vmatprep.mubr.msk.bf16.mxu0 %vm658_vm3, %v5223_v59  ;;  %v2117_v17 = vor.u32 %v2116_v2, %v2112_v56  ;;  %v330_v10 = vshll.u32 %v181_v58, 16  ;;  %v334_v11 = vshrl.u32 %v181_v58, 16  ;;  %v5187_v2 = vld [vmem:[%s6596_s25 + $0x48] sm:$0xf] }
  0x37   : > { %v2108_v9 = vrot.slane %v2107_v0, 4  ;;  %v319_v13 = vsel %vm6622_vm4, %v314_v5, %v318_v47  ;;  %v323_v14 = vrot.slane %v321_v7, 4  ;;  %v326_v18 = vrot.slane %v324_v8, 5  ;;  %v6749_v8 = vld [vmem:[%s6596_s25 + $0x4c] sm:$0xf] }
  0x38   : > { %v340_v19 = vshll.u32 %v209_v4, 16  ;;  %v4997_v21 = vcombine.low %v309_v61, %v319_v13  ;;  %v2118_v24 = vrot.slane %v2117_v17, 4  ;;  %v332_v25 = vrot.slane %v330_v10, 5  ;;  %v210_v61 = vld [vmem:[%s6596_s25 + $0x44] sm:$0x1] }
  0x39   : > { %v2113_v23 = vsel %vm6622_vm4, %v2108_v9, %v2112_v56  ;;  %v327_v27 = vor.u32 %v326_v18, %v323_v14  ;;  %v336_v29 = vrot.slane %v334_v11, 4  ;;  %v2125_v35 = vshrl.u32 %v5184_v12, 16 }
  0x3a   : > { %v342_v31 = vrot.slane %v340_v19, 5  ;;  %5852 = vmatmul.mubr.msk.bf16.gmra.mrb[4].mxu1 %vm658_vm3, %v4997_v21  ;;  %v2123_v37 = vsel %vm6622_vm4, %v2118_v24, %v2122_v6  ;;  %v2128_v36 = vshll.u32 %v5184_v12, 16  ;;  %v2134_v38 = vshll.u32 %v6726_v20, 16 }
  0x3b   : > { %v2138_v39 = vshrl.u32 %v6726_v20, 16  ;;  %v5224_v43 = vcombine.low %v2113_v23, %v2123_v37  ;;  %v328_v44 = vrot.slane %v327_v27, 4  ;;  %v337_v45 = vor.u32 %v336_v29, %v332_v25  ;;  %v6757_v23 = vld [vmem:[%s6596_s25 + $0x50] sm:$0x1]  ;;  %v6761_v27 = vld [vmem:[%s6596_s25 + $0x48] sm:$0xf] }
  0x3c   : > { %v2127_v47 = vrot.slane %v2125_v35, 4  ;;  %v2130_v48 = vrot.slane %v2128_v36, 5  ;;  %v2136_v49 = vrot.slane %v2134_v38, 5  ;;  %v2144_v51 = vshll.u32 %v6731_v34, 16  ;;  %v6764_v36 = vld [vmem:[%s6596_s25 + $0x4c] sm:$0xf] }
  0x3d   : > { %v2140_v50 = vrot.slane %v2138_v39, 4  ;;  %5988 = vmatmul.mubr.msk.bf16.gmra.mrb[4].mxu0 %vm658_vm3, %v5224_v43  ;;  %v333_v52 = vsel %vm6622_vm4, %v328_v44, %v332_v25  ;;  %v338_v53 = vrot.slane %v337_v45, 4  ;;  %v345_v55 = vshrl.u32 %v182_v42, 16 }
  0x3e   : > { %v348_v56 = vshll.u32 %v182_v42, 16  ;;  %v2131_v57 = vor.u32 %v2130_v48, %v2127_v47  ;;  %v2146_v59 = vrot.slane %v2144_v51, 5  ;;  %v354_v0 = vshll.u32 %v183_v26, 16 }
  0x3f   : > { %v2141_v58 = vor.u32 %v2140_v50, %v2136_v49  ;;  %v343_v4 = vsel %vm6622_vm4, %v338_v53, %v342_v31  ;;  %v347_v5 = vrot.slane %v345_v55, 4  ;;  %v358_v7 = vshrl.u32 %v183_v26, 16  ;;  %v211_v26 = vld [vmem:[%s6596_s25 + $0x50] sm:$0x1]  ;;  %v5190_v53 = vld [vmem:[%s6596_s25 + $0x54] sm:$0xf] }
  0x40   : > { %v350_v6 = vrot.slane %v348_v56, 5  ;;  %v4998_v9 = vcombine.low %v333_v52, %v343_v4  ;;  %v2132_v17 = vrot.slane %v2131_v57, 4  ;;  %v356_v11 = vrot.slane %v354_v0, 5  ;;  %v6780_v4 = vld [vmem:[%s6596_s25 + $0x58] sm:$0xf] }
  0x41   : > { %v2142_v10 = vrot.slane %v2141_v58, 4  ;;  %v360_v13 = vrot.slane %v358_v7, 4  ;;  %v364_v14 = vshll.u32 %v210_v61, 16  ;;  %v2149_v18 = vshrl.u32 %v5187_v2, 16 }
  0x42   : > { %v351_v12 = vor.u32 %v350_v6, %v347_v5  ;;  %5855 = vmatprep.mubr.msk.bf16.mxu1 %vm658_vm3, %v4998_v9  ;;  %v2137_v19 = vsel %vm6622_vm4, %v2132_v17, %v2136_v49  ;;  %v2152_v24 = vshll.u32 %v5187_v2, 16  ;;  %v2158_v25 = vshll.u32 %v6749_v8, 16 }
  0x43   : > { %v2147_v21 = vsel %vm6622_vm4, %v2142_v10, %v2146_v59  ;;  %v361_v35 = vor.u32 %v360_v13, %v356_v11  ;;  %v366_v37 = vrot.slane %v364_v14, 5  ;;  %v2151_v38 = vrot.slane %v2149_v18, 4 }
  0x44   : > { %v5225_v29 = vcombine.low %v2137_v19, %v2147_v21  ;;  %v352_v31 = vrot.slane %v351_v12, 4  ;;  %v2154_v39 = vrot.slane %v2152_v24, 5  ;;  %v2160_v42 = vrot.slane %v2158_v25, 5  ;;  %v6786_v12 = vld [vmem:[%s6596_s25 + $0x5c] sm:$0x1] }
  0x45   : > { %v2162_v43 = vshrl.u32 %v6749_v8, 16  ;;  %v362_v45 = vrot.slane %v361_v35, 4  ;;  %v2168_v47 = vshll.u32 %v6757_v23, 16  ;;  %v369_v48 = vshrl.u32 %v6761_v27, 16  ;;  %v6790_v24 = vld [vmem:[%s6596_s25 + $0x54] sm:$0xf] }
  0x46   : > { %5991 = vmatprep.mubr.msk.bf16.mxu0 %vm658_vm3, %v5225_v29  ;;  %v357_v44 = vsel %vm6622_vm4, %v352_v31, %v356_v11  ;;  %v2155_v49 = vor.u32 %v2154_v39, %v2151_v38  ;;  %v372_v51 = vshll.u32 %v6761_v27, 16  ;;  %v378_v52 = vshll.u32 %v6764_v36, 16 }
  0x47   : > { %v2164_v50 = vrot.slane %v2162_v43, 4  ;;  %v367_v55 = vsel %vm6622_vm4, %v362_v45, %v366_v37  ;;  %v2170_v56 = vrot.slane %v2168_v47, 5  ;;  %v371_v57 = vrot.slane %v369_v48, 4  ;;  %v6796_v37 = vld [vmem:[%s6596_s25 + $0x58] sm:$0xf] }
  0x48   : > { %v382_v58 = vshrl.u32 %v6764_v36, 16  ;;  %v4999_v59 = vcombine.low %v357_v44, %v367_v55  ;;  %v2156_v61 = vrot.slane %v2155_v49, 4  ;;  %v374_v2 = vrot.slane %v372_v51, 5 }
  0x49   : > { %v2165_v0 = vor.u32 %v2164_v50, %v2160_v42  ;;  %v380_v5 = vrot.slane %v378_v52, 5  ;;  %v388_v7 = vshll.u32 %v211_v26, 16  ;;  %v2173_v9 = vshrl.u32 %v5190_v53, 16  ;;  %v212_v26 = vld [vmem:[%s6596_s25 + $0x5c] sm:$0x1] }
  0x4a   : > { %v384_v6 = vrot.slane %v382_v58, 4  ;;  %5856 = vmatmul.mubr.msk.bf16.gmra.mrb[8].mxu1 %vm658_vm3, %v4999_v59  ;;  %v2161_v17 = vsel %vm6622_vm4, %v2156_v61, %v2160_v42  ;;  %v375_v11 = vor.u32 %v374_v2, %v371_v57  ;;  %v2176_v13 = vshll.u32 %v5190_v53, 16  ;;  %v5193_v53 = vld [vmem:[%s6596_s25 + $0x60] sm:$0xf]  ;;  %v6810_v59 = vld [vmem:[%s6596_s25 + $0x64] sm:$0xf] }
  0x4b   : > { %v2166_v10 = vrot.slane %v2165_v0, 4  ;;  %v390_v18 = vrot.slane %v388_v7, 5  ;;  %v2175_v19 = vrot.slane %v2173_v9, 4  ;;  %v2182_v21 = vshll.u32 %v6780_v4, 16  ;;  %v6817_v9 = vld [vmem:[%s6596_s25 + $0x68] sm:$0x1] }
  0x4c   : > { %v385_v14 = vor.u32 %v384_v6, %v380_v5  ;;  %v376_v29 = vrot.slane %v375_v11, 4  ;;  %v2178_v31 = vrot.slane %v2176_v13, 5  ;;  %v2186_v35 = vshrl.u32 %v6780_v4, 16 }
  0x4d   : > { %v2171_v25 = vsel %vm6622_vm4, %v2166_v10, %v2170_v56  ;;  %v2184_v42 = vrot.slane %v2182_v21, 5  ;;  %v2192_v43 = vshll.u32 %v6786_v12, 16  ;;  %v393_v48 = vshrl.u32 %v6790_v24, 16 }
  0x4e   : > { %v5226_v38 = vcombine.low %v2161_v17, %v2171_v25  ;;  %v386_v39 = vrot.slane %v385_v14, 4  ;;  %v381_v44 = vsel %vm6622_vm4, %v376_v29, %v380_v5  ;;  %v2179_v45 = vor.u32 %v2178_v31, %v2175_v19  ;;  %v6821_v19 = vld [vmem:[%s6596_s25 + $0x60] sm:$0xf] }
  0x4f   : > { %v2188_v47 = vrot.slane %v2186_v35, 4  ;;  %v2194_v50 = vrot.slane %v2192_v43, 5  ;;  %v396_v51 = vshll.u32 %v6790_v24, 16  ;;  %v402_v52 = vshll.u32 %v6796_v37, 16  ;;  %v6827_v35 = vld [vmem:[%s6596_s25 + $0x64] sm:$0xf] }
  0x50   : > { %5992 = vmatmul.mubr.msk.bf16.gmra.mrb[8].mxu0 %vm658_vm3, %v5226_v38  ;;  %v391_v49 = vsel %vm6622_vm4, %v386_v39, %v390_v18  ;;  %v2180_v56 = vrot.slane %v2179_v45, 4  ;;  %v395_v58 = vrot.slane %v393_v48, 4  ;;  %v406_v2 = vshrl.u32 %v6796_v37, 16 }
  0x51   : > { %v5000_v55 = vcombine.low %v381_v44, %v391_v49  ;;  %v2189_v57 = vor.u32 %v2188_v47, %v2184_v42  ;;  %v398_v61 = vrot.slane %v396_v51, 5  ;;  %v404_v0 = vrot.slane %v402_v52, 5 }
  0x52   : > { %v412_v5 = vshll.u32 %v212_v26, 16  ;;  %v2185_v6 = vsel %vm6622_vm4, %v2180_v56, %v2184_v42  ;;  %v2197_v17 = vshrl.u32 %v5193_v53, 16  ;;  %v2200_v10 = vshll.u32 %v5193_v53, 16 }
  0x53   : > { %5859 = vmatprep.mubr.msk.bf16.mxu1 %vm658_vm3, %v5000_v55  ;;  %v2190_v7 = vrot.slane %v2189_v57, 4  ;;  %v399_v11 = vor.u32 %v398_v61, %v395_v58  ;;  %v408_v13 = vrot.slane %v406_v2, 4  ;;  %v2206_v18 = vshll.u32 %v6810_v59, 16  ;;  %v5253_v58 = vld [vmem:[%s6596_s25 + $0xc] sm:$0xe] }
  0x54   : > { %v414_v14 = vrot.slane %v412_v5, 5  ;;  %v2199_v25 = vrot.slane %v2197_v17, 4  ;;  %v2202_v29 = vrot.slane %v2200_v10, 5  ;;  %v2210_v31 = vshrl.u32 %v6810_v59, 16 }
  0x55   : > { %v2195_v21 = vsel %vm6622_vm4, %v2190_v7, %v2194_v50  ;;  %v400_v39 = vrot.slane %v399_v11, 4  ;;  %v409_v42 = vor.u32 %v408_v13, %v404_v0  ;;  %v2208_v43 = vrot.slane %v2206_v18, 5  ;;  %v213_v50 = vld [vmem:[%s6596_s25 + $0x68] sm:$0x1] }
  0x56   : > { %v5227_v38 = vcombine.low %v2185_v6, %v2195_v21  ;;  %v2203_v44 = vor.u32 %v2202_v29, %v2199_v25  ;;  %v2212_v45 = vrot.slane %v2210_v31, 4  ;;  %v2216_v47 = vshll.u32 %v6817_v9, 16  ;;  %v6855_v29 = vld [vmem:[%s6596_s25 + $0x70] sm:$0xf] }
  0x57   : > { %v417_v26 = vshrl.u32 %v6821_v19, 16  ;;  %v405_v48 = vsel %vm6622_vm4, %v400_v39, %v404_v0  ;;  %v410_v49 = vrot.slane %v409_v42, 4  ;;  %v420_v51 = vshll.u32 %v6821_v19, 16  ;;  %v6842_v0 = vld [vmem:[%s6596_s25 + $0x6c] sm:$0xf] }
  0x58   : > { %5995 = vmatprep.mubr.msk.bf16.mxu0 %vm658_vm3, %v5227_v38  ;;  %v426_v52 = vshll.u32 %v6827_v35, 16  ;;  %v2204_v53 = vrot.slane %v2203_v44, 4  ;;  %v2213_v55 = vor.u32 %v2212_v45, %v2208_v43  ;;  %v2218_v56 = vrot.slane %v2216_v47, 5 }
  0x59   : > { %v419_v57 = vrot.slane %v417_v26, 4  ;;  %v415_v61 = vsel %vm6622_vm4, %v410_v49, %v414_v14  ;;  %v422_v2 = vrot.slane %v420_v51, 5  ;;  %v430_v6 = vshrl.u32 %v6827_v35, 16  ;;  %v214_v26 = vld [vmem:[%s6596_s25 + $0x74] sm:$0x1] }
  0x5a   : > { %v428_v5 = vrot.slane %v426_v52, 5  ;;  %v5001_v7 = vcombine.low %v405_v48, %v415_v61  ;;  %v2209_v17 = vsel %vm6622_vm4, %v2204_v53, %v2208_v43  ;;  %v2214_v10 = vrot.slane %v2213_v55, 4  ;;  %v5254_v48 = vld [vmem:[%s6596_s25 + $0x18] sm:$0xe] }
  0x5b   : > { %v436_v11 = vshll.u32 %v213_v50, 16  ;;  %v423_v14 = vor.u32 %v422_v2, %v419_v57  ;;  %v432_v18 = vrot.slane %v430_v6, 4  ;;  %v5269_v21 = vrot.slane %v5253_v58, 9  ;;  %v6874_v53 = vld [vmem:[%s6596_s25 + $0x78] sm:$0xf] }
  0x5c   : > { %v2774_v25 = vrot.slane %v2772_v62, 4  ;;  %5860 = vmatmul.mubr.msk.bf16.gmra.mrb[12].mxu1 %vm658_vm3, %v5001_v7  ;;  %v2219_v31 = vsel %vm6622_vm4, %v2214_v10, %v2218_v56  ;;  %v441_v39 = vshrl.u32 %v6842_v0, 16  ;;  %v444_v42 = vshll.u32 %v6842_v0, 16  ;;  %v215_v57 = vld [vmem:[%s6596_s25 + $0x80] sm:$0x1] }
  0x5d   : > { %v438_v38 = vrot.slane %v436_v11, 5  ;;  %v5228_v43 = vcombine.low %v2209_v17, %v2219_v31  ;;  %v424_v44 = vrot.slane %v423_v14, 4  ;;  %v433_v45 = vor.u32 %v432_v18, %v428_v5  ;;  %v5255_v10 = vld [vmem:[%s6596_s25 + $0x24] sm:$0xe] }
  0x5e   : > { %v2773_v47 = vsel %vm6848_vm7, %v5269_v21, %v2772_v62  ;;  %v2776_v49 = vsel %vm6848_vm7, %v2774_v25, %v2775_v63  ;;  %v443_v50 = vrot.slane %v441_v39, 4  ;;  %v446_v51 = vrot.slane %v444_v42, 5  ;;  %v6900_v39 = vld [vmem:[%s6596_s25 + $0x84] sm:$0xf] }
  0x5f   : > { %v450_v52 = vshll.u32 %v6855_v29, 16  ;;  %5996 = vmatmul.mubr.msk.bf16.gmra.mrb[12].mxu0 %vm658_vm3, %v5228_v43  ;;  %v429_v15 = vsel %vm6622_vm4, %v424_v44, %v428_v5  ;;  %v434_v62 = vrot.slane %v433_v45, 4  ;;  %v5286_v55 = vcombine.low %v2773_v47, %v2776_v49  ;;  %v6908_v43 = vld [vmem:[%s6596_s25 + $0x88] sm:$0xf] }
  0x60   : > { %v454_v56 = vshrl.u32 %v6855_v29, 16  ;;  %v447_v63 = vor.u32 %v446_v51, %v443_v50  ;;  %v460_v61 = vshll.u32 %v214_v26, 16  ;;  %v5270_v2 = vrot.slane %v5254_v48, 9 }
  0x61   : > { %v452_v58 = vrot.slane %v450_v52, 5  ;;  %v439_v6 = vsel %vm6622_vm4, %v434_v62, %v438_v38  ;;  %6017 = vmatprep.mubr.msk.bf16.mxu0 %vm658_vm3, %v5286_v55  ;;  %v2783_v5 = vsel %vm6848_vm7, %v6665_v30, %v2782_v28  ;;  %v465_v17 = vshrl.u32 %v6874_v53, 16  ;;  %v216_v52 = vld [vmem:[%s6596_s25 + $0x8c] sm:$0x1] }
  0x62   : > { %v456_v7 = vrot.slane %v454_v56, 4  ;;  %v5002_v11 = vcombine.low %v429_v15, %v439_v6  ;;  %v448_v14 = vrot.slane %v447_v63, 4  ;;  %v462_v18 = vrot.slane %v460_v61, 5 }
  0x63   : > { %v2780_v21 = vsel %vm6848_vm7, %v5270_v2, %v2779_v22  ;;  %v467_v38 = vrot.slane %v465_v17, 4  ;;  %v468_v1 = vshll.u32 %v6874_v53, 16  ;;  %v474_v30 = vshll.u32 %v6881_v16, 16  ;;  %v6913_v22 = vld [vmem:[%s8335_s1 + $0xe] sm:$0x3] }
  0x64   : > { %v457_v25 = vor.u32 %v456_v7, %v452_v58  ;;  %v5287_v31 = vcombine.low %v2780_v21, %v2783_v5  ;;  %5863 = vmatprep.mubr.msk.bf16.mxu1 %vm658_vm3, %v5002_v11  ;;  %v453_v28 = vsel %vm6622_vm4, %v448_v14, %v452_v58  ;;  %v478_v60 = vshrl.u32 %v6881_v16, 16  ;;  %v6932_v5 = vld [vmem:[%s6596_s25 + $0x90] sm:$0xf] }
  0x65   : > { %v484_v42 = vshll.u32 %v215_v57, 16  ;;  %v470_v45 = vrot.slane %v468_v1, 5  ;;  %v5271_v47 = vrot.slane %v5255_v10, 9  ;;  %v2786_v26 = vrot.slane %v6672_v46, 5  ;;  %v5256_v57 = vld [vmem:[%s6596_s25 + $0x30] sm:$0xe] }
  0x66   : > { %v458_v44 = vrot.slane %v457_v25, 4  ;;  %v476_v48 = vrot.slane %v474_v30, 5  ;;  %v480_v49 = vrot.slane %v478_v60, 4  ;;  %v2789_v51 = vrot.slane %v6681_v54, 5  ;;  %v6944_v30 = vld [vmem:[%s6596_s25 + $0x94] sm:$0xf] }
  0x67   : > { %v486_v50 = vrot.slane %v484_v42, 5  ;;  %6018 = vmatmul.mubr.msk.bf16.vlgmr.msra.gmra.mrb[0].mxu0 %vm658_vm3, %v5287_v31  ;;  %v471_v62 = vor.u32 %v470_v45, %v467_v38  ;;  %v2787_v55 = vsel %vm6848_vm7, %v5271_v47, %v2786_v26  ;;  %v2788_v56 = vrot.slane %v2786_v26, 4  ;;  %v217_v60 = vld [vmem:[%s6596_s25 + $0x98] sm:$0x1]  ;;  %v5257_v26 = vld [vmem:[%s6596_s25 + $0x3c] sm:$0xe] }
  0x68   : > { %v463_v15 = vsel %vm6622_vm4, %v458_v44, %v462_v18  ;;  %6050 = vmatpush3.bf16.msra.mxu0 %v6632_v41  ;;  %v481_v46 = vor.u32 %v480_v49, %v476_v48  ;;  %v489_v58 = vshrl.u32 %v6900_v39, 16  ;;  %v492_v54 = vshll.u32 %v6900_v39, 16 }
  0x69   : > { %v5003_v63 = vcombine.low %v453_v28, %v463_v15  ;;  %v472_v61 = vrot.slane %v471_v62, 4  ;;  %v2790_v2 = vsel %vm6848_vm7, %v2788_v56, %v2789_v51  ;;  %v498_v6 = vshll.u32 %v6908_v43, 16  ;;  %6417 = vmatprep.subr.msk.bf16.mxu0 %vm707_vm0, %v6913_v22 }
  0x6a   : > { %v502_v7 = vshrl.u32 %v6908_v43, 16  ;;  %v482_v41 = vrot.slane %v481_v46, 4  ;;  %v5288_v17 = vcombine.low %v2787_v55, %v2790_v2  ;;  %v491_v10 = vrot.slane %v489_v58, 4  ;;  %v6964_v46 = vld [vmem:[%s6596_s25 + $0xa0] sm:$0xf] }
  0x6b   : > { %5864 = vmatmul.mubr.msk.bf16.gmra.mrb[16].mxu1 %vm658_vm3, %v5003_v63  ;;  %v494_v11 = vrot.slane %v492_v54, 5  ;;  %v477_v14 = vsel %vm6622_vm4, %v472_v61, %v476_v48  ;;  %v500_v18 = vrot.slane %v498_v6, 5  ;;  %v508_v25 = vshll.u32 %v216_v52, 16  ;;  %v6953_v52 = vld [vmem:[%s6596_s25 + $0x9c] sm:$0xf] }
  0x6c   : > { %v504_v21 = vrot.slane %v502_v7, 4  ;;  %v487_v31 = vsel %vm6622_vm4, %v482_v41, %v486_v50  ;;  %6021 = vmatprep.mubr.msk.bf16.mxu0 %vm658_vm3, %v5288_v17  ;;  %v5272_v1 = vrot.slane %v5256_v57, 9  ;;  %v2793_v28 = vrot.slane %v6701_v33, 5 }
  0x6d   : > { %v495_v38 = vor.u32 %v494_v11, %v491_v10  ;;  %v5004_v42 = vcombine.low %v477_v14, %v487_v31  ;;  %v510_v45 = vrot.slane %v508_v25, 5  ;;  %v2796_v47 = vrot.slane %v6709_v40, 5  ;;  %v218_v10 = vld [vmem:[%s6596_s25 + $0xa4] sm:$0x1]  ;;  %v5258_v11 = vld [vmem:[%s6596_s25 + $0x48] sm:$0xe] }
  0x6e   : > { %v505_v44 = vor.u32 %v504_v21, %v500_v18  ;;  %v2794_v49 = vsel %vm6848_vm7, %v5272_v1, %v2793_v28  ;;  %v2795_v50 = vrot.slane %v2793_v28, 4  ;;  %v513_v51 = vshrl.u32 %v6932_v5, 16 }
  0x6f   : > { %v496_v48 = vrot.slane %v495_v38, 4  ;;  %5867 = vmatprep.mubr.msk.bf16.mxu1 %vm658_vm3, %v5004_v42  ;;  %v516_v15 = vshll.u32 %v6932_v5, 16  ;;  %v522_v62 = vshll.u32 %v6944_v30, 16  ;;  %v526_v40 = vshrl.u32 %v6944_v30, 16 }
  0x70   : > { %v506_v33 = vrot.slane %v505_v44, 4  ;;  %v2797_v56 = vsel %vm6848_vm7, %v2795_v50, %v2796_v47  ;;  %v515_v57 = vrot.slane %v513_v51, 4  ;;  %v532_v63 = vshll.u32 %v217_v60, 16 }
  0x71   : > { %v501_v55 = vsel %vm6622_vm4, %v496_v48, %v500_v18  ;;  %v5289_v54 = vcombine.low %v2794_v49, %v2797_v56  ;;  %v518_v61 = vrot.slane %v516_v15, 5  ;;  %v524_v2 = vrot.slane %v522_v62, 5  ;;  %v6990_v56 = vld [vmem:[%s6596_s25 + $0xac] sm:$0xf] }
  0x72   : > { %v511_v58 = vsel %vm6622_vm4, %v506_v33, %v510_v45  ;;  %v528_v7 = vrot.slane %v526_v40, 4  ;;  %v534_v41 = vrot.slane %v532_v63, 5  ;;  %v5273_v17 = vrot.slane %v5257_v26, 9  ;;  %v6985_v33 = vld [vmem:[%s6596_s25 + $0xa8] sm:$0xf] }
  0x73   : > { %v5005_v6 = vcombine.low %v501_v55, %v511_v58  ;;  %6022 = vmatmul.mubr.msk.bf16.gmra.mrb[4].mxu0 %vm658_vm3, %v5289_v54  ;;  %v519_v14 = vor.u32 %v518_v61, %v515_v57  ;;  %v2800_v18 = vrot.slane %v6726_v20, 5  ;;  %v2803_v21 = vrot.slane %v6731_v34, 5  ;;  %v219_v61 = vld [vmem:[%s6596_s25 + $0xb0] sm:$0x1] }
  0x74   : > { %v537_v25 = vshrl.u32 %v6953_v52, 16  ;;  %v529_v31 = vor.u32 %v528_v7, %v524_v2  ;;  %v540_v38 = vshll.u32 %v6953_v52, 16  ;;  %v546_v1 = vshll.u32 %v6964_v46, 16 }
  0x75   : > { %5868 = vmatmul.mubr.msk.bf16.gmra.mrb[20].mxu1 %vm658_vm3, %v5005_v6  ;;  %v550_v28 = vshrl.u32 %v6964_v46, 16  ;;  %v520_v60 = vrot.slane %v519_v14, 4  ;;  %v2801_v42 = vsel %vm6848_vm7, %v5273_v17, %v2800_v18  ;;  %v2802_v20 = vrot.slane %v2800_v18, 4  ;;  %v7005_v14 = vld [vmem:[%s6596_s25 + $0xb4] sm:$0xf] }
  0x76   : > { %v539_v44 = vrot.slane %v537_v25, 4  ;;  %v530_v34 = vrot.slane %v529_v31, 4  ;;  %v542_v45 = vrot.slane %v540_v38, 5  ;;  %v548_v47 = vrot.slane %v546_v1, 5 }
  0x77   : > { %v552_v26 = vrot.slane %v550_v28, 4  ;;  %v525_v48 = vsel %vm6622_vm4, %v520_v60, %v524_v2  ;;  %v2804_v49 = vsel %vm6848_vm7, %v2802_v20, %v2803_v21  ;;  %v556_v50 = vshll.u32 %v218_v10, 16  ;;  %v5259_v2 = vld [vmem:[%s6596_s25 + $0x54] sm:$0xe] }
  0x78   : > { %v5274_v51 = vrot.slane %v5258_v11, 9  ;;  %v535_v15 = vsel %vm6622_vm4, %v530_v34, %v534_v41  ;;  %v5290_v62 = vcombine.low %v2801_v42, %v2804_v49  ;;  %v543_v40 = vor.u32 %v542_v45, %v539_v44  ;;  %v7014_v42 = vld [vmem:[%s6596_s25 + $0xb8] sm:$0xf]  ;;  %v220_v49 = vld [vmem:[%s6596_s25 + $0xbc] sm:$0x1] }
  0x79   : > { %v553_v55 = vor.u32 %v552_v26, %v548_v47  ;;  %v5006_v57 = vcombine.low %v525_v48, %v535_v15  ;;  %v558_v63 = vrot.slane %v556_v50, 5  ;;  %v2807_v58 = vrot.slane %v6749_v8, 5 }
  0x7a   : > { %v2810_v54 = vrot.slane %v6757_v23, 5  ;;  %6025 = vmatprep.mubr.msk.bf16.mxu0 %vm658_vm3, %v5290_v62  ;;  %v544_v6 = vrot.slane %v543_v40, 4  ;;  %v561_v41 = vshrl.u32 %v6985_v33, 16  ;;  %v564_v17 = vshll.u32 %v6985_v33, 16 }
  0x7b   : > { %v554_v7 = vrot.slane %v553_v55, 4  ;;  %5871 = vmatprep.mubr.msk.bf16.mxu1 %vm658_vm3, %v5006_v57  ;;  %v2808_v10 = vsel %vm6848_vm7, %v5274_v51, %v2807_v58  ;;  %v2809_v11 = vrot.slane %v2807_v58, 4  ;;  %v570_v8 = vshll.u32 %v6990_v56, 16  ;;  %v5260_v55 = vld [vmem:[%s6596_s25 + $0x60] sm:$0xe] }
  0x7c   : > { %v574_v23 = vshrl.u32 %v6990_v56, 16  ;;  %v549_v18 = vsel %vm6622_vm4, %v544_v6, %v548_v47  ;;  %v563_v25 = vrot.slane %v561_v41, 4  ;;  %v566_v31 = vrot.slane %v564_v17, 5  ;;  %v5261_v6 = vld [vmem:[%s6596_s25 + $0x6c] sm:$0xe] }
  0x7d   : > { %v559_v21 = vsel %vm6622_vm4, %v554_v7, %v558_v63  ;;  %v2811_v1 = vsel %vm6848_vm7, %v2809_v11, %v2810_v54  ;;  %v572_v28 = vrot.slane %v570_v8, 5  ;;  %v580_v34 = vshll.u32 %v219_v61, 16  ;;  %v5197_v11 = vld [vmem:[%s6596_s25 + $0x70] sm:$0xf]  ;;  %v5198_v8 = vld [vmem:[%s6596_s25 + $0x74] sm:$0x1] }
  0x7e   : > { %v5007_v38 = vcombine.low %v549_v18, %v559_v21  ;;  %v576_v60 = vrot.slane %v574_v23, 4  ;;  %v5291_v20 = vcombine.low %v2808_v10, %v2811_v1  ;;  %v567_v44 = vor.u32 %v566_v31, %v563_v25 }
  0x7f   : > { %v5275_v45 = vrot.slane %v5259_v2, 9  ;;  %v2814_v26 = vrot.slane %v6780_v4, 5  ;;  %v2817_v48 = vrot.slane %v6786_v12, 5  ;;  %v585_v50 = vshrl.u32 %v7005_v14, 16 }
  0x80   : > { %5872 = vmatmul.mubr.msk.bf16.gmra.mrb[24].mxu1 %vm658_vm3, %v5007_v38  ;;  %v577_v47 = vor.u32 %v576_v60, %v572_v28  ;;  %6026 = vmatmul.mubr.msk.bf16.gmra.mrb[8].mxu0 %vm658_vm3, %v5291_v20  ;;  %v568_v51 = vrot.slane %v567_v44, 4  ;;  %v582_v15 = vrot.slane %v580_v34, 5  ;;  %v588_v62 = vshll.u32 %v7005_v14, 16 }
  0x81   : > { %v594_v40 = vshll.u32 %v7014_v42, 16  ;;  %v2815_v4 = vsel %vm6848_vm7, %v5275_v45, %v2814_v26  ;;  %v2816_v12 = vrot.slane %v2814_v26, 4  ;;  %v587_v63 = vrot.slane %v585_v50, 4 }
  0x82   : > { %v578_v57 = vrot.slane %v577_v47, 4  ;;  %v573_v58 = vsel %vm6622_vm4, %v568_v51, %v572_v28  ;;  %v590_v54 = vrot.slane %v588_v62, 5  ;;  %v598_v2 = vshrl.u32 %v7014_v42, 16  ;;  %v5262_v47 = vld [vmem:[%s6596_s25 + $0x78] sm:$0xe] }
  0x83   : > { %v596_v61 = vrot.slane %v594_v40, 5  ;;  %v2818_v41 = vsel %vm6848_vm7, %v2816_v12, %v2817_v48  ;;  %v604_v17 = vshll.u32 %v220_v49, 16  ;;  %v5276_v10 = vrot.slane %v5260_v55, 9  ;;  %v6476_v51 = vld [vmem:[%s6596_s25] sm:$0xf] }
  0x84   : > { %v583_v7 = vsel %vm6622_vm4, %v578_v57, %v582_v15  ;;  %v5292_v18 = vcombine.low %v2815_v4, %v2818_v41  ;;  %v591_v21 = vor.u32 %v590_v54, %v587_v63  ;;  %v600_v25 = vrot.slane %v598_v2, 4  ;;  %v7052_v15 = vld [vmem:[%s6596_s25 + $0x4] sm:$0xf]  ;;  %v7056_v40 = vld [vmem:[%s6596_s25 + $0x7c] sm:$0xf] }
  0x85   : > { %v5008_v23 = vcombine.low %v573_v58, %v583_v7  ;;  %v606_v31 = vrot.slane %v604_v17, 5  ;;  %v2821_v38 = vrot.slane %v6810_v59, 5  ;;  %v2824_v1 = vrot.slane %v6817_v9, 5  ;;  %v7059_v55 = vld [vmem:[%s6596_s25 + $0x80] sm:$0x1] }
  0x86   : > { %v5277_v28 = vrot.slane %v5261_v6, 9  ;;  %6029 = vmatprep.mubr.msk.bf16.mxu0 %vm658_vm3, %v5292_v18  ;;  %v592_v60 = vrot.slane %v591_v21, 4  ;;  %v601_v20 = vor.u32 %v600_v25, %v596_v61  ;;  %v2828_v44 = vrot.slane %v5197_v11, 5  ;;  %v5203_v57 = vld [vmem:[%s6596_s25 + $0x88] sm:$0xf] }
  0x87   : > { %5875 = vmatprep.mubr.msk.bf16.mxu1 %vm658_vm3, %v5008_v23  ;;  %v2831_v34 = vrot.slane %v5198_v8, 5  ;;  %v2822_v45 = vsel %vm6848_vm7, %v5276_v10, %v2821_v38  ;;  %v2823_v59 = vrot.slane %v2821_v38, 4  ;;  %v5026_v62 = vcombine.low %v6476_v51, %v7052_v15  ;;  %v5204_v54 = vld [vmem:[%s6596_s25 + $0x8c] sm:$0x1]  ;;  %v5206_v17 = vld [vmem:[%s6596_s25 + $0x94] sm:$0xf] }
  0x88   : > { %v597_v9 = vsel %vm6622_vm4, %v592_v60, %v596_v61  ;;  %v602_v26 = vrot.slane %v601_v20, 4  ;;  %v2829_v48 = vsel %vm6848_vm7, %v5277_v28, %v2828_v44  ;;  %v2830_v49 = vrot.slane %v2828_v44, 4  ;;  %v5263_v61 = vld [vmem:[%s6596_s25 + $0x84] sm:$0xe]  ;;  %v5264_v23 = vld [vmem:[%s6596_s25 + $0x90] sm:$0xe] }
  0x89   : > { %v2825_v50 = vsel %vm6848_vm7, %v2823_v59, %v2824_v1  ;;  %v5278_v58 = vrot.slane %v5262_v47, 9  ;;  %v2835_v7 = vrot.slane %v7056_v40, 5  ;;  %v2838_v41 = vrot.slane %v7059_v55, 5  ;;  %v5207_v25 = vld [vmem:[%s6596_s25 + $0x98] sm:$0x1] }
  0x8a   : > { %v607_v4 = vsel %vm6622_vm4, %v602_v26, %v606_v31  ;;  %v5293_v12 = vcombine.low %v2822_v45, %v2825_v50  ;;  %v2832_v63 = vsel %vm6848_vm7, %v2830_v49, %v2831_v34  ;;  %v5279_v10 = vrot.slane %v5263_v61, 9  ;;  %v5209_v31 = vld [vmem:[%s6596_s25 + $0xa0] sm:$0xf]  ;;  %v5210_v60 = vld [vmem:[%s6596_s25 + $0xa4] sm:$0x1] }
  0x8b   : > { %v5009_v2 = vcombine.low %v597_v9, %v607_v4  ;;  %v5294_v6 = vcombine.low %v2829_v48, %v2832_v63  ;;  %v2842_v11 = vrot.slane %v5203_v57, 5  ;;  %v2845_v8 = vrot.slane %v5204_v54, 5  ;;  %v5265_v20 = vld [vmem:[%s6596_s25 + $0x9c] sm:$0xe]  ;;  %v6478_v44 = vld [vmem:[%s6596_s25 + $0xc] sm:$0xf] }
  0x8c   : > { %6030 = vmatmul.mubr.msk.bf16.gmra.mrb[12].mxu0 %vm658_vm3, %v5293_v12  ;;  %v2836_v18 = vsel %vm6848_vm7, %v5278_v58, %v2835_v7  ;;  %v2837_v21 = vrot.slane %v2835_v7, 4  ;;  %v2849_v28 = vrot.slane %v5206_v17, 5  ;;  %v7086_v34 = vld [vmem:[%s6596_s25 + $0x10] sm:$0xf]  ;;  %v6480_v47 = vld [vmem:[%s6596_s25 + $0x18] sm:$0xf] }
  0x8d   : > { %5876 = vmatmul.mubr.msk.bf16.gmra.mrb[28].mxu1 %vm658_vm3, %v5009_v2  ;;  %6033 = vmatprep.mubr.msk.bf16.mxu0 %vm658_vm3, %v5294_v6  ;;  %v2843_v38 = vsel %vm6848_vm7, %v5279_v10, %v2842_v11  ;;  %v2844_v1 = vrot.slane %v2842_v11, 4  ;;  %v5027_v45 = vcombine.low %v6478_v44, %v7086_v34  ;;  %v7093_v9 = vld [vmem:[%s6596_s25 + $0x1c] sm:$0xf]  ;;  %v5280_v48 = vrot.slane %v5264_v23, 9  ;;  %v5212_v57 = vld [vmem:[%s6596_s25 + $0xac] sm:$0xf] }
  0x8e   : > { %5881 = vmatprep.mubr.msk.bf16.mxu1 %vm658_vm3, %v5026_v62  ;;  %v2839_v59 = vsel %vm6848_vm7, %v2837_v21, %v2838_v41  ;;  %v5028_v26 = vcombine.low %v6480_v47, %v7093_v9  ;;  %v2851_v51 = vrot.slane %v2849_v28, 4  ;;  %v2852_v62 = vrot.slane %v5207_v25, 5  ;;  %v6482_v54 = vld [vmem:[%s8335_s1 + $0x4] sm:$0x3]  ;;  %v5215_v2 = vld [vmem:[%s6596_s25 + $0xb8] sm:$0xf] }
  0x8f   : > { %v5295_v49 = vcombine.low %v2836_v18, %v2839_v59  ;;  %v2846_v50 = vsel %vm6848_vm7, %v2844_v1, %v2845_v8  ;;  %v5281_v12 = vrot.slane %v5265_v20, 9  ;;  %v2856_v63 = vrot.slane %v5209_v31, 5  ;;  %v7108_v7 = vld [vmem:[%s8335_s1 + $0x6] sm:$0x3]  ;;  %v5213_v10 = vld [vmem:[%s6596_s25 + $0xb0] sm:$0x1] }
  0x90   : > { %v5296_v4 = vcombine.low %v2843_v38, %v2846_v50  ;;  %v2859_v58 = vrot.slane %v5210_v60, 5  ;;  %v1426_v61 = vsel %vm707_vm0, %v6482_v54, 0  ;;  %v2850_v41 = vsel %vm6848_vm7, %v5280_v48, %v2849_v28  ;;  %v5266_v11 = vld [vmem:[%s6596_s25 + $0xa8] sm:$0xe]  ;;  %v5216_v25 = vld [vmem:[%s6596_s25 + $0xbc] sm:$0x1] }
  0x91   : > { %v2858_v6 = vrot.slane %v2856_v63, 4  ;;  %v2853_v17 = vsel %vm6848_vm7, %v2851_v51, %v2852_v62  ;;  %v2863_v8 = vrot.slane %v5212_v57, 5  ;;  %v2857_v23 = vsel %vm6848_vm7, %v5281_v12, %v2856_v63  ;;  %v5267_v31 = vld [vmem:[%s6596_s25 + $0xb4] sm:$0xe]  ;;  %v6483_v38 = vld [vmem:[%s6596_s25 + $0x24] sm:$0xf] }
  0x92   : > { %v2870_v21 = vrot.slane %v5215_v2, 5  ;;  %v7129_v1 = vld [vmem:[%s6596_s25 + $0x28] sm:$0xf]  ;;  %v5297_v60 = vcombine.low %v2850_v41, %v2853_v17  ;;  %v5282_v44 = vrot.slane %v5266_v11, 9  ;;  %v2866_v59 = vrot.slane %v5213_v10, 5 }
  0x93   : > { %v2860_v18 = vsel %vm6848_vm7, %v2858_v6, %v2859_v58  ;;  %v5029_v28 = vcombine.low %v6483_v38, %v7129_v1  ;;  %v6485_v47 = vld [vmem:[%s6596_s25 + $0x30] sm:$0xf]  ;;  %v2873_v51 = vrot.slane %v5216_v25, 5  ;;  %v5218_v62 = vld [vmem:[%s6596_s25 + $0xc4] sm:$0xf]  ;;  %v2258_v25 = vshrl.u32 %v7056_v40, 16 }
  0x94   : > { %6034 = vmatmul.mubr.msk.bf16.gmra.mrb[16].mxu0 %vm658_vm3, %v5295_v49  ;;  %v5298_v20 = vcombine.low %v2857_v23, %v2860_v18  ;;  %v5283_v49 = vrot.slane %v5267_v31, 9  ;;  %v2872_v50 = vrot.slane %v2870_v21, 4  ;;  %v2864_v57 = vsel %vm6848_vm7, %v5282_v44, %v2863_v8  ;;  %v5268_v12 = vld [vmem:[%s6596_s25 + $0xc0] sm:$0xe]  ;;  %v6487_v41 = vld [vmem:[%s6596_s25 + $0x3c] sm:$0xf] }
  0x95   : > { %5882 = vmatmul.mubr.msk.bf16.vlgmr.msra.gmra.mrb[0].mxu1 %vm658_vm3, %v5027_v45  ;;  %6037 = vmatprep.mubr.msk.bf16.mxu0 %vm658_vm3, %v5296_v4  ;;  %v2865_v45 = vrot.slane %v2863_v8, 4  ;;  %v2877_v63 = vrot.slane %v5218_v62, 5  ;;  %v5284_v6 = vrot.slane %v5268_v12, 9  ;;  %v7154_v17 = vld [vmem:[%s6596_s25 + $0x40] sm:$0xf]  ;;  %v5032_v18 = vcombine.low %v6761_v27, %v6764_v36  ;;  %v6439_v62 = vld [vmem:[%s6596_s25 + $0x24] sm:$0xff]  }
  0x96   : > { %5914 = vmatpush3.bf16.msra.mxu1 %v1426_v61  ;;  %5885 = vmatprep.mubr.msk.bf16.mxu1 %vm658_vm3, %v5028_v26  ;;  %v7134_v26 = vld [vmem:[%s6596_s25 + $0x34] sm:$0xf]  ;;  %v2871_v58 = vsel %vm6848_vm7, %v5283_v49, %v2870_v21  ;;  %v2874_v54 = vsel %vm6848_vm7, %v2872_v50, %v2873_v51  ;;  %v5219_v61 = vld [vmem:[%s6596_s25 + $0xc8] sm:$0x1]  ;;  %v5031_v10 = vcombine.low %v6487_v41, %v7154_v17  ;;  %v2254_v21 = vshll.u32 %v7056_v40, 16 }
  0x97   : > { %6412 = vmatprep.subr.msk.bf16.mxu1 %vm707_vm0, %v7108_v7  ;;  %v5030_v48 = vcombine.low %v6485_v47, %v7134_v26  ;;  %v2867_v4 = vsel %vm6848_vm7, %v2865_v45, %v2866_v59  ;;  %v5300_v11 = vcombine.low %v2871_v58, %v2874_v54  ;;  %v2879_v8 = vrot.slane %v2877_v63, 4  ;;  %v1164_v45 = vld [vmem:[%s6596_s25] sm:$0xe]  ;;  %v1165_v59 = vld [vmem:[%s6596_s25 + $0xc] sm:$0xe] }
  0x98   : > { %v5299_v2 = vcombine.low %v2864_v57, %v2867_v4  ;;  %v2880_v23 = vrot.slane %v5219_v61, 5  ;;  %v2878_v31 = vsel %vm6848_vm7, %v5284_v6, %v2877_v63  ;;  %v7169_v27 = vrot.slane %v2254_v21, 5  ;;  %v1168_v41 = vld [vmem:[%s6596_s25 + $0x30] sm:$0xe] }
  0x99   : > { %v2260_v36 = vrot.slane %v2258_v25, 4  ;;  %v5034_v44 = vcombine.low %v6821_v19, %v6827_v35  ;;  %v2264_v47 = vshll.u32 %v7059_v55, 16  ;;  %v5058_v19 = vrot.slane %v1164_v45, 9 }
  0x9a   : > { %v2881_v38 = vsel %vm6848_vm7, %v2879_v8, %v2880_v23  ;;  %8356 = vst [vmem:[#allocation3_spill] sm:$0xff] %v7169_v27  ;;  %v5059_v35 = vrot.slane %v1165_v59, 9  ;;  %v1231_v4 = vrot.slane %v7093_v9, 5  ;;  %v1238_v12 = vrot.slane %v7129_v1, 5  ;;  %v1169_v8 = vld [vmem:[%s6596_s25 + $0x3c] sm:$0xe] }
  0x9b   : > { %v5301_v40 = vcombine.low %v2878_v31, %v2881_v38  ;;  %v2261_v49 = vor.u32 %v2260_v36, %v7169_v27  ;;  %v7189_v51 = vrot.slane %v2264_v47, 5  ;;  %v5035_v58 = vcombine.low %v6842_v0, %v6855_v29  ;;  %v1170_v31 = vld [vmem:[%s6596_s25 + $0x48] sm:$0xe]  ;;  %v6493_v59 = vld [vmem:[%s6596_s25 + $0x38] sm:$0x1] }
  0x9c   : > { %6038 = vmatmul.mubr.msk.bf16.gmra.mrb[20].mxu0 %vm658_vm3, %v5297_v60  ;;  %v5033_v60 = vcombine.low %v6790_v24, %v6796_v37  ;;  %v6490_v24 = vld [vmem:[%s6596_s25 + $0x14] sm:$0x1]  ;;  %v4066_v54 = vsel %vm707_vm0, %v6913_v22, 0  ;;  %v5036_v61 = vcombine.low %v6874_v53, %v6881_v16  ;;  %v5037_v6 = vcombine.low %v6900_v39, %v6908_v43  ;;  %v6491_v16 = vld [vmem:[%s6596_s25 + $0x20] sm:$0x1] }
  0x9d   : > { %5886 = vmatmul.mubr.msk.bf16.gmra.mrb[4].mxu1 %vm658_vm3, %v5029_v28  ;;  %6041 = vmatprep.mubr.msk.bf16.mxu0 %vm658_vm3, %v5298_v20  ;;  %v1224_v28 = vrot.slane %v7086_v34, 5  ;;  %v6437_v20 = vld [vmem:[%s6596_s25 + $0x18] sm:$0xff]   ;;  %v6489_v34 = vld [vmem:[%s6596_s25 + $0x8] sm:$0x1]  ;;  %v1227_v37 = vrot.slane %v6490_v24, 5  ;;  %8357 = vst [vmem:[#allocation4_spill] sm:$0xff] %v7189_v51  ;;  %v5038_v9 = vcombine.low %v6932_v5, %v6944_v30 }
  0x9e   : > { %5889 = vmatprep.mubr.msk.bf16.mxu1 %vm658_vm3, %v5030_v48  ;;  %v1217_v48 = vrot.slane %v7052_v15, 5  ;;  %v1220_v50 = vrot.slane %v6489_v34, 5  ;;  %v1166_v15 = vld [vmem:[%s6596_s25 + $0x18] sm:$0xe]  ;;  %v7194_v63 = vrot.slane %v2261_v49, 4  ;;  %v1234_v22 = vrot.slane %v6491_v16, 5 }
  0x9f   : > { %v1226_v55 = vrot.slane %v1224_v28, 4  ;;  %v5060_v1 = vrot.slane %v1166_v15, 9  ;;  %v7216_v29 = vsel %vm6848_vm7, %v5059_v35, %v1224_v28  ;;  %v1240_v25 = vrot.slane %v1238_v12, 4  ;;  %v5383_v24 = vld [vmem:[%s6596_s25 + $0x18] sm:$0xf] }
  0xa0   : > { %v1219_v57 = vrot.slane %v1217_v48, 4  ;;  %8358 = vst [vmem:[#allocation5_spill] sm:$0xff] %v7194_v63  ;;  %v7212_v0 = vsel %vm6848_vm7, %v5058_v19, %v1217_v48  ;;  %v1248_v47 = vrot.slane %v6493_v59, 5  ;;  %v7253_v49 = vsel %vm707_vm0, %v7108_v7, 0  ;;  %v5384_v7 = vld [vmem:[%s6596_s25 + $0x1c] sm:$0xf] }
  0xa1   : > { %v7220_v53 = vsel %vm6848_vm7, %v1226_v55, %v1227_v37  ;;  %v7257_v34 = vsel %vm6848_vm7, %v5060_v1, %v1231_v4  ;;  %v6443_v37 = vld [vmem:[%s6596_s25 + $0x3c] sm:$0xff]   ;;  %v5063_v35 = vrot.slane %v1169_v8, 9  ;;  %v6494_v55 = vld [vmem:[%s6596_s25 + $0x44] sm:$0x1]  ;;  %v3587_v8 = vshll.u32 %v5383_v24, 16 }
  0xa2   : > { %v7231_v23 = vsel %vm6848_vm7, %v1219_v57, %v1220_v50  ;;  %v1171_v50 = vld [vmem:[%s6596_s25 + $0x54] sm:$0xe]  ;;  %v1255_v15 = vrot.slane %v6494_v55, 5  ;;  %v5387_v39 = vld [vmem:[%s6596_s25 + $0x28] sm:$0xf] }
  0xa3   : > { %v6501_v5 = vld [vmem:[%s6596_s25 + $0x70] sm:$0xf] }
  0xa4   : > { %6042 = vmatmul.mubr.msk.bf16.gmra.mrb[24].mxu0 %vm658_vm3, %v5299_v2  ;;  %v1167_v2 = vld [vmem:[%s6596_s25 + $0x24] sm:$0xe]  ;;  %v1280_v30 = vrot.slane %v6501_v5, 5 }
  0xa5   : > { %5890 = vmatmul.mubr.msk.bf16.gmra.mrb[8].mxu1 %vm658_vm3, %v5031_v10  ;;  %6045 = vmatprep.mubr.msk.bf16.mxu0 %vm658_vm3, %v5300_v11  ;;  %v1245_v10 = vrot.slane %v7134_v26, 5  ;;  %v6441_v11 = vld [vmem:[%s6596_s25 + $0x30] sm:$0xff]   ;;  %v5061_v21 = vrot.slane %v1167_v2, 9 }
  0xa6   : > { %5893 = vmatprep.mubr.msk.bf16.mxu1 %vm658_vm3, %v5032_v18  ;;  %v7227_v26 = vld [vmem:[%s8335_s1 + $0x10] sm:$0x3]  ;;  %v1233_v18 = vrot.slane %v1231_v4, 4  ;;  %v1282_v48 = vrot.slane %v1280_v30, 4 }
  0xa7   : > { %v1247_v45 = vrot.slane %v1245_v10, 4  ;;  %v7264_v19 = vsel %vm6848_vm7, %v5061_v21, %v1238_v12  ;;  %v3597_v21 = vshrl.u32 %v5384_v7, 16 }
  0xa8   : > { %v7273_v4 = vsel %vm6848_vm7, %v1233_v18, %v1234_v22  ;;  %v3584_v22 = vshrl.u32 %v5383_v24, 16  ;;  %v3593_v18 = vshll.u32 %v5384_v7, 16  ;;  %v5386_v24 = vld [vmem:[%s6596_s25 + $0x24] sm:$0xf] }
  0xa9   : > { %v7286_v1 = vsel %vm6848_vm7, %v1247_v45, %v1248_v47 }
  0xaa   : > { %v3586_v43 = vrot.slane %v3584_v22, 4  ;;  %v7328_v7 = vrot.slane %v3593_v18, 5  ;;  %v3611_v22 = vshll.u32 %v5386_v24, 16  ;;  %v3621_v18 = vshrl.u32 %v5387_v39, 16 }
  0xac   : > { %6046 = vmatmul.mubr.msk.bf16.gmra.mrb[28].mxu0 %vm658_vm3, %v5301_v40  ;;  %v6492_v40 = vld [vmem:[%s6596_s25 + $0x2c] sm:$0x1]  ;;  %v3613_v27 = vrot.slane %v3611_v22, 5 }
  0xad   : > { %5894 = vmatmul.mubr.msk.bf16.gmra.mrb[12].mxu1 %vm658_vm3, %v5033_v60  ;;  %6051 = vmatprep.mubr.msk.bf16.mxu0 %vm658_vm3, %v6437_v20  ;;  %v1241_v28 = vrot.slane %v6492_v40, 5  ;;  %v1252_v60 = vrot.slane %v7154_v17, 5  ;;  %v6497_v40 = vld [vmem:[%s6596_s25 + $0x50] sm:$0x1]  ;;  %v6502_v17 = vld [vmem:[%s6596_s25 + $0x74] sm:$0x1] }
  0xae   : > { %5897 = vmatprep.mubr.msk.bf16.mxu1 %vm658_vm3, %v5034_v44  ;;  %v5062_v44 = vrot.slane %v1168_v41, 9  ;;  %v5065_v41 = vrot.slane %v1171_v50, 9  ;;  %v1172_v50 = vld [vmem:[%s6596_s25 + $0x60] sm:$0xe]  ;;  %v5388_v20 = vld [vmem:[%s6596_s25 + $0x2c] sm:$0x1] }
  0xaf   : > { %v1254_v12 = vrot.slane %v1252_v60, 4  ;;  %v7299_v45 = vsel %vm6848_vm7, %v5063_v35, %v1252_v60  ;;  %v6498_v35 = vld [vmem:[%s6596_s25 + $0x5c] sm:$0x1] }
  0xb0   : > { %v7282_v2 = vsel %vm6848_vm7, %v5062_v44, %v1245_v10  ;;  %v1269_v55 = vrot.slane %v6498_v35, 5  ;;  %v1173_v35 = vld [vmem:[%s6596_s25 + $0x6c] sm:$0xe] }
  0xb1   : > { %v7303_v59 = vsel %vm6848_vm7, %v1254_v12, %v1255_v15  ;;  %v6499_v15 = vld [vmem:[%s6596_s25 + $0x64] sm:$0xf]  ;;  %v3599_v12 = vrot.slane %v3597_v21, 4  ;;  %v5067_v5 = vrot.slane %v1173_v35, 9 }
  0xb2   : > { %v6449_v21 = vld [vmem:[%s6596_s25 + $0x60] sm:$0xff]  }
  0xb4   : > { %6052 = vmatmul.mubr.msk.bf16.vlgmr.msra.gmra.mrb[0].mxu0 %vm658_vm3, %v6439_v62  ;;  %v6495_v62 = vld [vmem:[%s6596_s25 + $0x4c] sm:$0xf] }
  0xb5   : > { %5898 = vmatmul.mubr.msk.bf16.gmra.mrb[16].mxu1 %vm658_vm3, %v5035_v58  ;;  %6084 = vmatpush3.bf16.msra.mxu0 %v4066_v54  ;;  %v1259_v57 = vrot.slane %v6495_v62, 5  ;;  %v7277_v58 = vsel %vm6848_vm7, %v1240_v25, %v1241_v28  ;;  %v5064_v54 = vrot.slane %v1170_v31, 9  ;;  %v1262_v28 = vrot.slane %v6497_v40, 5 }
  0xb6   : > { %5901 = vmatprep.mubr.msk.bf16.mxu1 %vm658_vm3, %v5036_v61  ;;  %6055 = vmatprep.mubr.msk.bf16.mxu0 %vm658_vm3, %v6441_v11  ;;  %v6445_v61 = vld [vmem:[%s6596_s25 + $0x48] sm:$0xff]   ;;  %v6496_v11 = vld [vmem:[%s6596_s25 + $0x58] sm:$0xf]  ;;  %v1273_v62 = vrot.slane %v6499_v15, 5  ;;  %v5390_v15 = vld [vmem:[%s6596_s25 + $0x34] sm:$0xf] }
  0xb7   : > { %6418 = vmatprep.subr.msk.bf16.mxu0 %vm707_vm0, %v7227_v26  ;;  %v1266_v16 = vrot.slane %v6496_v11, 5  ;;  %v1261_v31 = vrot.slane %v1259_v57, 4  ;;  %v7307_v47 = vsel %vm6848_vm7, %v5064_v54, %v1259_v57  ;;  %v5385_v57 = vld [vmem:[%s6596_s25 + $0x20] sm:$0x1]  ;;  %v5389_v54 = vld [vmem:[%s6596_s25 + $0x30] sm:$0xf] }
  0xb8   : > { %v5066_v11 = vrot.slane %v1172_v50, 9  ;;  %v3635_v50 = vshll.u32 %v5389_v54, 16  ;;  %v3603_v25 = vshll.u32 %v5385_v57, 16  ;;  %v3641_v36 = vshll.u32 %v5390_v15, 16 }
  0xb9   : > { %v7318_v60 = vsel %vm6848_vm7, %v5065_v41, %v1266_v16  ;;  %v7334_v41 = vsel %vm6848_vm7, %v1261_v31, %v1262_v28  ;;  %v1275_v31 = vrot.slane %v1273_v62, 4  ;;  %v3632_v28 = vshrl.u32 %v5389_v54, 16 }
  0xba   : > { %v7376_v35 = vrot.slane %v3641_v36, 5 }
  0xbc   : > { %6056 = vmatmul.mubr.msk.bf16.gmra.mrb[4].mxu0 %vm658_vm3, %v6443_v37  ;;  %v1268_v37 = vrot.slane %v1266_v16, 4  ;;  %v6500_v16 = vld [vmem:[%s6596_s25 + $0x68] sm:$0x1] }
  0xbd   : > { %5902 = vmatmul.mubr.msk.bf16.gmra.mrb[20].mxu1 %vm658_vm3, %v5037_v6  ;;  %6059 = vmatprep.mubr.msk.bf16.mxu0 %vm658_vm3, %v6445_v61  ;;  %v3589_v6 = vrot.slane %v3587_v8, 5  ;;  %v6447_v61 = vld [vmem:[%s6596_s25 + $0x54] sm:$0xff]   ;;  %v1276_v40 = vrot.slane %v6500_v16, 5  ;;  %v3617_v8 = vshll.u32 %v5387_v39, 16  ;;  %v3600_v16 = vor.u32 %v3599_v12, %v7328_v7 }
  0xbe   : > { %5905 = vmatprep.mubr.msk.bf16.mxu1 %vm658_vm3, %v5038_v9  ;;  %v3608_v9 = vshrl.u32 %v5386_v24, 16  ;;  %v7343_v44 = vsel %vm6848_vm7, %v1268_v37, %v1269_v55  ;;  %v1283_v24 = vrot.slane %v6502_v17, 5  ;;  %v3645_v39 = vshrl.u32 %v5390_v15, 16 }
  0xbf   : > { %v3590_v10 = vor.u32 %v3589_v6, %v3586_v43  ;;  %v7349_v37 = vrot.slane %v3617_v8, 5  ;;  %v3623_v55 = vrot.slane %v3621_v18, 4  ;;  %v8359_v43 = vcombine.low %v6953_v52, %v6964_v46  ;;  %v6503_v8 = vld [vmem:[%s6596_s25 + $0x7c] sm:$0xf]  ;;  %v7385_v18 = vld [vmem:[%s6596_s25 + $0x38] sm:$0x1] }
  0xc0   : > { %v3610_v38 = vrot.slane %v3608_v9, 4  ;;  %v7358_v17 = vsel %vm6848_vm7, %v5066_v11, %v1273_v62  ;;  %v7362_v57 = vsel %vm6848_vm7, %v1275_v31, %v1276_v40  ;;  %v3634_v6 = vrot.slane %v3632_v28, 4  ;;  %8361 = vst [vmem:[#allocation6_spill] sm:$0xff] %v7385_v18 }
  0xc1   : > { %v3637_v12 = vrot.slane %v3635_v50, 5  ;;  %v8360_v52 = vcombine.low %v6985_v33, %v6990_v56  ;;  %v3591_v46 = vrot.slane %v3590_v10, 4  ;;  %v3601_v54 = vrot.slane %v3600_v16, 4  ;;  %v6451_v33 = vld [vmem:[%s6596_s25 + $0x6c] sm:$0xff]   ;;  %v1175_v16 = vld [vmem:[%s6596_s25 + $0x84] sm:$0xe] }
  0xc2   : > { %v3627_v62 = vshll.u32 %v5388_v20, 16  ;;  %v7370_v11 = vsel %vm6848_vm7, %v5067_v5, %v1280_v30  ;;  %v7374_v40 = vsel %vm6848_vm7, %v1282_v48, %v1283_v24  ;;  %v3647_v9 = vrot.slane %v3645_v39, 4  ;;  %v6452_v48 = vld [vmem:[%s6596_s25 + $0x78] sm:$0xff]  }
  0xc3   : > { %v3614_v10 = vor.u32 %v3613_v27, %v3610_v38  ;;  %v3624_v20 = vor.u32 %v3623_v55, %v7349_v37  ;;  %v1287_v30 = vrot.slane %v6503_v8, 5  ;;  %v3638_v38 = vor.u32 %v3637_v12, %v3634_v6  ;;  %v5392_v5 = vld [vmem:[%s6596_s25 + $0x3c] sm:$0xf] }
  0xc4   : > { %6060 = vmatmul.mubr.msk.bf16.gmra.mrb[8].mxu0 %vm658_vm3, %v6447_v61  ;;  %v3605_v61 = vrot.slane %v3603_v25, 5  ;;  %v1174_v25 = vld [vmem:[%s6596_s25 + $0x78] sm:$0xe]  ;;  %v7401_v50 = vrot.slane %v3627_v62, 5  ;;  %v3648_v39 = vor.u32 %v3647_v9, %v7376_v35  ;;  %v3651_v55 = vshll.u32 %v7385_v18, 16 }
  0xc5   : > { %5906 = vmatmul.mubr.msk.bf16.gmra.mrb[24].mxu1 %vm658_vm3, %v8359_v43  ;;  %6063 = vmatprep.mubr.msk.bf16.mxu0 %vm658_vm3, %v6449_v21  ;;  %v3596_v21 = vsel %vm6622_vm4, %v3591_v46, %v7328_v7  ;;  %v5068_v24 = vrot.slane %v1174_v25, 9  ;;  %v6504_v43 = vld [vmem:[%s6596_s25 + $0x88] sm:$0xf]  ;;  %v7409_v7 = vld [vmem:[%s6596_s25 + $0x40] sm:$0xf]  ;;  %v3615_v12 = vrot.slane %v3614_v10, 4  ;;  %v8363_v62 = vcombine.low %v7005_v14, %v7014_v42 }
  0xc6   : > { %5909 = vmatprep.mubr.msk.bf16.mxu1 %vm658_vm3, %v8360_v52  ;;  %v3606_v31 = vsel %vm6622_vm4, %v3601_v54, %v3605_v61  ;;  %v1294_v6 = vrot.slane %v6504_v43, 5  ;;  %8362 = vst [vmem:[#allocation7_spill] sm:$0xff] %v7409_v7  ;;  %v3625_v52 = vrot.slane %v3624_v20, 4  ;;  %v1289_v46 = vrot.slane %v1287_v30, 4  ;;  %v6505_v54 = vld [vmem:[%s6596_s25 + $0x80] sm:$0x1] }
  0xc7   : > { %v1290_v61 = vrot.slane %v6505_v54, 5  ;;  %v3639_v9 = vrot.slane %v3638_v38, 4  ;;  %v5069_v25 = vrot.slane %v1175_v16, 9  ;;  %v3656_v8 = vshrl.u32 %v5392_v5, 16  ;;  %v6453_v10 = vld [vmem:[%s6596_s25 + $0x84] sm:$0xff]  }
  0xc8   : > { %v3659_v43 = vshll.u32 %v5392_v5, 16  ;;  %v7423_v20 = vcombine.low %v3596_v21, %v3606_v31  ;;  %v7427_v14 = vsel %vm707_vm0, %v7227_v26, 0  ;;  %v3669_v38 = vshrl.u32 %v7409_v7, 16  ;;  %v6454_v21 = vld [vmem:[%s6596_s25 + $0x90] sm:$0xff]   ;;  %v6510_v18 = vld [vmem:[%s6596_s25 + $0xa0] sm:$0xf] }
  0xc9   : > { %v3649_v16 = vrot.slane %v3648_v39, 4  ;;  %v3653_v5 = vrot.slane %v3651_v55, 5  ;;  %v1296_v54 = vrot.slane %v1294_v6, 4  ;;  %v3620_v31 = vsel %vm6622_vm4, %v3615_v12, %v7349_v37 }
  0xca   : > { %v3630_v26 = vsel %vm6622_vm4, %v3625_v52, %v7401_v50  ;;  %v7442_v39 = vsel %vm6848_vm7, %v5068_v24, %v1287_v30  ;;  %v7446_v55 = vsel %vm6848_vm7, %v1289_v46, %v1290_v61  ;;  %v3644_v37 = vsel %vm6622_vm4, %v3639_v9, %v7376_v35  ;;  %v5398_v30 = vld [vmem:[%s6596_s25 + $0x54] sm:$0xf]  ;;  %v7463_v24 = vld [vmem:[%s6596_s25 + $0x58] sm:$0xf]  ;;  %v7468_v61 = vld [vmem:[%s6596_s25 + $0x90] sm:$0xe] }
  0xcb   : > { %v7459_v12 = vsel %vm6848_vm7, %v5069_v25, %v1294_v6  ;;  %v3658_v50 = vrot.slane %v3656_v8, 4  ;;  %v3661_v52 = vrot.slane %v3659_v43, 5  ;;  %v3671_v46 = vrot.slane %v3669_v38, 4 }
  0xcc   : > { %6064 = vmatmul.mubr.msk.bf16.gmra.mrb[12].mxu0 %vm658_vm3, %v6451_v33  ;;  %v8364_v33 = vcombine.low %v7212_v0, %v7231_v23  ;;  %v6506_v0 = vld [vmem:[%s6596_s25 + $0x8c] sm:$0x1]  ;;  %v3654_v36 = vsel %vm6622_vm4, %v3649_v16, %v3653_v5  ;;  %v3704_v25 = vshrl.u32 %v5398_v30, 16  ;;  %v3707_v8 = vshll.u32 %v5398_v30, 16 }
  0xcd   : > { %5910 = vmatmul.mubr.msk.bf16.gmra.mrb[28].mxu1 %vm658_vm3, %v8363_v62  ;;  %6067 = vmatprep.mubr.msk.bf16.mxu0 %vm658_vm3, %v6452_v48  ;;  %v3665_v48 = vshll.u32 %v7409_v7, 16  ;;  %v1297_v23 = vrot.slane %v6506_v0, 5  ;;  %v5395_v62 = vld [vmem:[%s6596_s25 + $0x48] sm:$0xf]  ;;  %v7452_v0 = vld [vmem:[%s6596_s25 + $0x4c] sm:$0xf]  ;;  %v8366_v38 = vcombine.low %v7216_v29, %v7220_v53  ;;  %v7486_v16 = vcombine.low %v3620_v31, %v3630_v26 }
  0xce   : > { %5915 = vmatprep.mubr.msk.bf16.mxu1 %vm658_vm3, %v8364_v33  ;;  %v7449_v33 = vld [vmem:[%s6596_s25 + $0x44] sm:$0x1]  ;;  %v3680_v27 = vshrl.u32 %v5395_v62, 16  ;;  %v3683_v15 = vshll.u32 %v5395_v62, 16  ;;  %v3689_v6 = vshll.u32 %v7452_v0, 16  ;;  %v3693_v9 = vshrl.u32 %v7452_v0, 16 }
  0xcf   : > { %8365 = vst [vmem:[#allocation8_spill] sm:$0xff] %v7449_v33  ;;  %v7465_v28 = vrot.slane %v3665_v48, 5  ;;  %v7474_v35 = vsel %vm6848_vm7, %v1296_v54, %v1297_v23  ;;  %v3713_v43 = vshll.u32 %v7463_v24, 16  ;;  %v3717_v48 = vshrl.u32 %v7463_v24, 16  ;;  %v5401_v31 = vld [vmem:[%s6596_s25 + $0x60] sm:$0xf] }
  0xd0   : > { %v3675_v5 = vshll.u32 %v7449_v33, 16  ;;  %v5070_v54 = vrot.slane %v7468_v61, 9  ;;  %v8367_v23 = vcombine.low %v7257_v34, %v7273_v4  ;;  %v7497_v29 = vcombine.low %v3644_v37, %v3654_v36  ;;  %v6455_v26 = vld [vmem:[%s6596_s25 + $0x9c] sm:$0xff]   ;;  %v6456_v30 = vld [vmem:[%s6596_s25 + $0xa8] sm:$0xff]  }
  0xd1   : > { %v3662_v53 = vor.u32 %v3661_v52, %v3658_v50  ;;  %v3682_v62 = vrot.slane %v3680_v27, 4  ;;  %v7508_v34 = vrot.slane %v3689_v6, 5  ;;  %v3695_v4 = vrot.slane %v3693_v9, 4  ;;  %v6507_v36 = vld [vmem:[%s8335_s1 + $0x8] sm:$0x3] }
  0xd2   : > { %v3706_v27 = vrot.slane %v3704_v25, 4  ;;  %v3709_v37 = vrot.slane %v3707_v8, 5  ;;  %v7517_v50 = vrot.slane %v3713_v43, 5  ;;  %v3719_v52 = vrot.slane %v3717_v48, 4  ;;  %v6508_v6 = vld [vmem:[%s6596_s25 + $0x94] sm:$0xf] }
  0xd3   : > { %v7523_v9 = vld [vmem:[%s6596_s25 + $0x64] sm:$0xf]  ;;  %v3728_v61 = vshrl.u32 %v5401_v31, 16  ;;  %v7525_v22 = vrot.slane %v3662_v53, 4  ;;  %v1308_v25 = vrot.slane %v6510_v18, 5  ;;  %v3696_v43 = vor.u32 %v3695_v4, %v7508_v34 }
  0xd4   : > { %6068 = vmatmul.mubr.msk.bf16.gmra.mrb[16].mxu0 %vm658_vm3, %v6453_v10  ;;  %8368 = vst [vmem:[#allocation9_spill] sm:$0xff] %v7523_v9  ;;  %v3731_v10 = vshll.u32 %v5401_v31, 16  ;;  %v3710_v31 = vor.u32 %v3709_v37, %v3706_v27  ;;  %v3720_v53 = vor.u32 %v3719_v52, %v7517_v50  ;;  %v8369_v18 = vcombine.low %v7264_v19, %v7277_v58  ;;  %v6457_v37 = vld [vmem:[%s6596_s25 + $0xb4] sm:$0xff]  }
  0xd5   : > { %5916 = vmatmul.mubr.msk.bf16.vlgmr.msra.gmra.mrb[0].mxu1 %vm658_vm3, %v8366_v38  ;;  %6071 = vmatprep.mubr.msk.bf16.mxu0 %vm658_vm3, %v6454_v21  ;;  %v3685_v21 = vrot.slane %v3683_v15, 5  ;;  %v7506_v38 = vld [vmem:[%s6596_s25 + $0x50] sm:$0x1]  ;;  %v7515_v15 = vld [vmem:[%s6596_s25 + $0x5c] sm:$0x1]  ;;  %v8370_v27 = vcombine.low %v7282_v2, %v7286_v1  ;;  %v1310_v52 = vrot.slane %v1308_v25, 4 }
  0xd6   : > { %5948 = vmatpush3.bf16.msra.mxu1 %v7253_v49  ;;  %5919 = vmatprep.mubr.msk.bf16.mxu1 %vm658_vm3, %v8367_v23  ;;  %v3672_v49 = vor.u32 %v3671_v46, %v7465_v28  ;;  %v7519_v46 = vrot.slane %v3675_v5, 5  ;;  %v1301_v23 = vrot.slane %v6508_v6, 5  ;;  %v3699_v48 = vshll.u32 %v7506_v38, 16  ;;  %v1177_v5 = vld [vmem:[%s6596_s25 + $0x9c] sm:$0xe] }
  0xd7   : > { %6414 = vmatprep.subr.msk.bf16.mxu1 %vm707_vm0, %v6507_v36  ;;  %v6509_v36 = vld [vmem:[%s6596_s25 + $0x98] sm:$0x1]  ;;  %v3686_v7 = vor.u32 %v3685_v21, %v3682_v62  ;;  %v3723_v6 = vshll.u32 %v7515_v15, 16  ;;  %v3741_v62 = vshrl.u32 %v7523_v9, 16  ;;  %v3733_v4 = vrot.slane %v3731_v10, 5 }
  0xd8   : > { %v1304_v33 = vrot.slane %v6509_v36, 5  ;;  %v3673_v8 = vrot.slane %v3672_v49, 4  ;;  %v3737_v36 = vshll.u32 %v7523_v9, 16  ;;  %v7544_v21 = vsel %vm6848_vm7, %v5070_v54, %v1301_v23  ;;  %v7555_v2 = vld [vmem:[%s6596_s25 + $0x68] sm:$0x1] }
  0xd9   : > { %v3730_v49 = vrot.slane %v3728_v61, 4  ;;  %v3687_v19 = vrot.slane %v3686_v7, 4  ;;  %v5071_v58 = vrot.slane %v1177_v5, 9  ;;  %v3697_v3 = vrot.slane %v3696_v43, 4  ;;  %8371 = vst [vmem:[#allocation10_spill] sm:$0xff] %v7555_v2  ;;  %v6458_v5 = vld [vmem:[%s6596_s25 + $0xc0] sm:$0xff]  }
  0xda   : > { %v3701_v54 = vrot.slane %v3699_v48, 5  ;;  %v3725_v63 = vrot.slane %v3723_v6, 5  ;;  %v1315_v61 = vrot.slane %v6990_v56, 5  ;;  %v3711_v10 = vrot.slane %v3710_v31, 4  ;;  %v1179_v31 = vld [vmem:[%s6596_s25 + $0xb4] sm:$0xe] }
  0xdb   : > { %v3721_v51 = vrot.slane %v3720_v53, 4  ;;  %v7557_v1 = vrot.slane %v3737_v36, 5  ;;  %v3743_v7 = vrot.slane %v3741_v62, 4  ;;  %v3668_v43 = vsel %vm6622_vm4, %v7525_v22, %v7465_v28  ;;  %v6512_v62 = vld [vmem:[%s6596_s25 + $0xb0] sm:$0x1] }
  0xdc   : > { %6072 = vmatmul.mubr.msk.bf16.gmra.mrb[20].mxu0 %vm658_vm3, %v6455_v26  ;;  %v1303_v26 = vrot.slane %v1301_v23, 4  ;;  %v1178_v23 = vld [vmem:[%s6596_s25 + $0xa8] sm:$0xe]  ;;  %v3678_v48 = vsel %vm6622_vm4, %v3673_v8, %v7519_v46  ;;  %v3734_v6 = vor.u32 %v3733_v4, %v3730_v49  ;;  %v3692_v53 = vsel %vm6622_vm4, %v3687_v19, %v7508_v34  ;;  %v5404_v46 = vld [vmem:[%s6596_s25 + $0x6c] sm:$0xf] }
  0xdd   : > { %5920 = vmatmul.mubr.msk.bf16.gmra.mrb[4].mxu1 %vm658_vm3, %v8369_v18  ;;  %6075 = vmatprep.mubr.msk.bf16.mxu0 %vm658_vm3, %v6456_v30  ;;  %v6511_v18 = vld [vmem:[%s6596_s25 + $0xa4] sm:$0x1]  ;;  %v7577_v36 = vsel %vm6848_vm7, %v5071_v58, %v1308_v25  ;;  %v5072_v28 = vrot.slane %v1178_v23, 9  ;;  %v1317_v8 = vrot.slane %v1315_v61, 4  ;;  %v3747_v49 = vshll.u32 %v7555_v2, 16 }
  0xde   : > { %5923 = vmatprep.mubr.msk.bf16.mxu1 %vm658_vm3, %v8370_v27  ;;  %v1311_v30 = vrot.slane %v6511_v18, 5  ;;  %v7569_v56 = vsel %vm6848_vm7, %v1303_v26, %v1304_v33  ;;  %v3702_v33 = vsel %vm6622_vm4, %v3697_v3, %v3701_v54  ;;  %v1318_v26 = vrot.slane %v6512_v62, 5  ;;  %v5407_v18 = vld [vmem:[%s6596_s25 + $0x78] sm:$0xf]  ;;  %v7632_v54 = vld [vmem:[%s6596_s25 + $0xbc] sm:$0x1] }
  0xdf   : > { %v3716_v34 = vsel %vm6622_vm4, %v3711_v10, %v7517_v50  ;;  %v3726_v25 = vsel %vm6622_vm4, %v3721_v51, %v3725_v63  ;;  %v3744_v4 = vor.u32 %v3743_v7, %v7557_v1  ;;  %v5073_v27 = vrot.slane %v1179_v31, 9  ;;  %v7606_v51 = vld [vmem:[%s6596_s25 + $0x70] sm:$0xf]  ;;  %v7636_v10 = vld [vmem:[%s6596_s25 + $0x7c] sm:$0xf] }
  0xe0   : > { %v7581_v22 = vsel %vm6848_vm7, %v1310_v52, %v1311_v30  ;;  %v8373_v3 = vcombine.low %v7299_v45, %v7303_v59  ;;  %v7602_v19 = vrot.slane %v3734_v6, 4  ;;  %v1322_v50 = vrot.slane %v7014_v42, 5  ;;  %8374 = vst [vmem:[#allocation12_spill] sm:$0xff] %v7606_v51  ;;  %8376 = vst [vmem:[#allocation13_spill] sm:$0xff] %v7636_v10  ;;  %v5410_v7 = vld [vmem:[%s6596_s25 + $0x84] sm:$0xf] }
  0xe1   : > { %8372 = vst [vmem:[#allocation11_spill] sm:$0xff] %v7581_v22  ;;  %v3752_v63 = vshrl.u32 %v5404_v46, 16  ;;  %v8375_v45 = vcombine.low %v7307_v47, %v7334_v41  ;;  %v7614_v58 = vcombine.low %v3692_v53, %v3702_v33  ;;  %v7620_v42 = vsel %vm6848_vm7, %v5072_v28, %v1315_v61  ;;  %v6459_v61 = vld [vmem:[%s6596_s25 + $0xcc] sm:$0xff]   ;;  %v7648_v31 = vld [vmem:[%s6596_s25 + $0x88] sm:$0xf] }
  0xe2   : > { %v7623_v30 = vcombine.low %v3716_v34, %v3726_v25  ;;  %v7627_v47 = vsel %vm6848_vm7, %v1317_v8, %v1318_v26  ;;  %v7629_v41 = vrot.slane %v3747_v49, 5  ;;  %v3761_v6 = vshll.u32 %v7606_v51, 16  ;;  %8377 = vst [vmem:[#allocation14_spill] sm:$0xff] %v7648_v31  ;;  %v5413_v62 = vld [vmem:[%s6596_s25 + $0x90] sm:$0xf] }
  0xe3   : > { %v7654_v28 = vrot.slane %v1322_v50, 4  ;;  %v7656_v33 = vrot.slane %v3752_v63, 4  ;;  %v3765_v8 = vshrl.u32 %v7606_v51, 16  ;;  %v3776_v26 = vshrl.u32 %v5407_v18, 16  ;;  %v7663_v25 = vld [vmem:[%s6596_s25 + $0x94] sm:$0xf] }
  0xe4   : > { %6076 = vmatmul.mubr.msk.bf16.gmra.mrb[24].mxu0 %vm658_vm3, %v6457_v37  ;;  %v7600_v37 = vcombine.low %v3668_v43, %v3678_v48  ;;  %v7644_v43 = vsel %vm6848_vm7, %v5073_v27, %v1322_v50  ;;  %v3755_v48 = vshll.u32 %v5404_v46, 16  ;;  %v3779_v49 = vshll.u32 %v5407_v18, 16  ;;  %8378 = vst [vmem:[#allocation15_spill] sm:$0xff] %v7663_v25  ;;  %v7701_v2 = vld [vmem:[%s6596_s25 + $0x8c] sm:$0x1] }
  0xe5   : > { %5924 = vmatmul.mubr.msk.bf16.gmra.mrb[8].mxu1 %vm658_vm3, %v8373_v3  ;;  %6079 = vmatprep.mubr.msk.bf16.mxu0 %vm658_vm3, %v6458_v5  ;;  %v7640_v5 = vrot.slane %v3744_v4, 4  ;;  %v3785_v46 = vshll.u32 %v7636_v10, 16  ;;  %v3789_v34 = vshrl.u32 %v7636_v10, 16  ;;  %v3800_v4 = vshrl.u32 %v5410_v7, 16 }
  0xe6   : > { %5927 = vmatprep.mubr.msk.bf16.mxu1 %vm658_vm3, %v8375_v45  ;;  %v3803_v27 = vshll.u32 %v5410_v7, 16  ;;  %v3809_v3 = vshll.u32 %v7648_v31, 16  ;;  %v3813_v50 = vshrl.u32 %v7648_v31, 16  ;;  %v7673_v45 = vld [vmem:[%s6596_s25 + $0x74] sm:$0x1]  ;;  %v3757_v18 = vrot.slane %v3755_v48, 5 }
  0xe7   : > { %v3824_v52 = vshrl.u32 %v5413_v62, 16  ;;  %v3827_v53 = vshll.u32 %v5413_v62, 16  ;;  %v8379_v7 = vcombine.low %v7318_v60, %v7343_v44  ;;  %v3767_v59 = vrot.slane %v3765_v8, 4  ;;  %v5416_v48 = vld [vmem:[%s6596_s25 + $0x9c] sm:$0xf] }
  0xe8   : > { %v3833_v63 = vshll.u32 %v7663_v25, 16  ;;  %v3837_v23 = vshrl.u32 %v7663_v25, 16  ;;  %v8380_v62 = vcombine.low %v7358_v17, %v7362_v57  ;;  %v7691_v44 = vld [vmem:[%s6596_s25 + $0x80] sm:$0x1]  ;;  %v3778_v60 = vrot.slane %v3776_v26, 4 }
  0xe9   : > { %8381 = vst [vmem:[#allocation16_spill] sm:$0xff] %v7691_v44  ;;  %v3802_v31 = vrot.slane %v3800_v4, 4  ;;  %v3805_v8 = vrot.slane %v3803_v27, 5  ;;  %v7695_v10 = vrot.slane %v3809_v3, 5  ;;  %v3815_v51 = vrot.slane %v3813_v50, 4 }
  0xea   : > { %v7698_v25 = vld [vmem:[%s6596_s25 + $0xa0] sm:$0xf]  ;;  %v3826_v17 = vrot.slane %v3824_v52, 4  ;;  %v3829_v57 = vrot.slane %v3827_v53, 5  ;;  %v3851_v9 = vshll.u32 %v5416_v48, 16  ;;  %v3758_v26 = vor.u32 %v3757_v18, %v7656_v33 }
  0xeb   : > { %v3795_v27 = vshll.u32 %v7691_v44, 16  ;;  %v7710_v3 = vld [vmem:[%s6596_s25 + $0x98] sm:$0x1]  ;;  %v3857_v50 = vshll.u32 %v7698_v25, 16  ;;  %v3861_v52 = vshrl.u32 %v7698_v25, 16  ;;  %v3806_v22 = vor.u32 %v3805_v8, %v3802_v31 }
  0xec   : > { %6080 = vmatmul.mubr.msk.bf16.gmra.mrb[28].mxu0 %vm658_vm3, %v6459_v61  ;;  %v7681_v61 = vrot.slane %v3761_v6, 5  ;;  %v3791_v6 = vrot.slane %v3789_v34, 4  ;;  %v3839_v34 = vrot.slane %v3837_v23, 4  ;;  %v3819_v33 = vshll.u32 %v7701_v2, 16 }
  0xed   : > { %5928 = vmatmul.mubr.msk.bf16.gmra.mrb[12].mxu1 %vm658_vm3, %v8379_v7  ;;  %6085 = vmatprep.mubr.msk.bf16.mxu0 %vm658_vm3, %v7423_v20  ;;  %v3781_v7 = vrot.slane %v3779_v49, 5  ;;  %v7693_v20 = vrot.slane %v3785_v46, 5  ;;  %v3771_v49 = vshll.u32 %v7673_v45, 16  ;;  %v7705_v46 = vrot.slane %v3833_v63, 5 }
  0xee   : > { %5931 = vmatprep.mubr.msk.bf16.mxu1 %vm658_vm3, %v8380_v62  ;;  %v3848_v62 = vshrl.u32 %v5416_v48, 16  ;;  %v3768_v4 = vor.u32 %v3767_v59, %v7681_v61  ;;  %v3816_v23 = vor.u32 %v3815_v51, %v7695_v10  ;;  %v3830_v59 = vor.u32 %v3829_v57, %v3826_v17  ;;  %v7743_v57 = vld [vmem:[%s6596_s25 + $0xa4] sm:$0x1] }
  0xef   : > { %v3782_v53 = vor.u32 %v3781_v7, %v3778_v60  ;;  %v3792_v48 = vor.u32 %v3791_v6, %v7693_v20  ;;  %v3853_v18 = vrot.slane %v3851_v9, 5  ;;  %v8382_v44 = vcombine.low %v7370_v11, %v7374_v40 }
  0xf0   : > { %v3850_v63 = vrot.slane %v3848_v62, 4  ;;  %v8383_v31 = vrot.slane %v7632_v54, 5  ;;  %v3773_v51 = vrot.slane %v3771_v49, 5  ;;  %v3840_v60 = vor.u32 %v3839_v34, %v7705_v46  ;;  %v7746_v34 = vld [vmem:[%s6596_s25 + $0xac] sm:$0xf] }
  0xf1   : > { %v3843_v9 = vshll.u32 %v7710_v3, 16  ;;  %v8384_v11 = vcombine.low %v7442_v39, %v7446_v55  ;;  %v3759_v40 = vrot.slane %v3758_v26, 4  ;;  %v7739_v54 = vrot.slane %v3857_v50, 5 }
  0xf2   : > { %v3783_v7 = vrot.slane %v3782_v53, 4  ;;  %v3793_v6 = vrot.slane %v3792_v48, 4  ;;  %v3797_v8 = vrot.slane %v3795_v27, 5  ;;  %v3821_v17 = vrot.slane %v3819_v33, 5  ;;  %v7756_v48 = vld [vmem:[%s6596_s25 + $0xb0] sm:$0x1] }
  0xf3   : > { %v3807_v39 = vrot.slane %v3806_v22, 4  ;;  %v3817_v55 = vrot.slane %v3816_v23, 4  ;;  %v3831_v62 = vrot.slane %v3830_v59, 4  ;;  %v3854_v49 = vor.u32 %v3853_v18, %v3850_v63 }
  0xf4   : > { %6086 = vmatmul.mubr.msk.bf16.vlgmr.msra.gmra.mrb[0].mxu0 %vm658_vm3, %v7486_v16  ;;  %v7729_v16 = vsel %vm6848_vm7, %v7654_v28, %v8383_v31  ;;  %v3863_v28 = vrot.slane %v3861_v52, 4  ;;  %v3845_v26 = vrot.slane %v3843_v9, 5  ;;  %v3764_v52 = vsel %vm6622_vm4, %v3759_v40, %v7681_v61 }
  0xf5   : > { %5932 = vmatmul.mubr.msk.bf16.gmra.mrb[16].mxu1 %vm658_vm3, %v8382_v44  ;;  %6118 = vmatpush3.bf16.msra.mxu0 %v7427_v14  ;;  %v3769_v14 = vrot.slane %v3768_v4, 4  ;;  %v5419_v44 = vld [vmem:[%s6596_s25 + $0xa8] sm:$0xf]  ;;  %v3867_v22 = vshll.u32 %v7743_v57, 16  ;;  %v3788_v33 = vsel %vm6622_vm4, %v3783_v7, %v7693_v20  ;;  %v3798_v23 = vsel %vm6622_vm4, %v3793_v6, %v3797_v8 }
  0xf6   : > { %5935 = vmatprep.mubr.msk.bf16.mxu1 %vm658_vm3, %v8384_v11  ;;  %6089 = vmatprep.mubr.msk.bf16.mxu0 %vm658_vm3, %v7497_v29  ;;  %v3841_v29 = vrot.slane %v3840_v60, 4  ;;  %v3872_v4 = vshrl.u32 %v5419_v44, 16  ;;  %v3875_v50 = vshll.u32 %v5419_v44, 16  ;;  %v3864_v53 = vor.u32 %v3863_v28, %v7739_v54  ;;  %v5468_v11 = vld [vmem:[%s6596_s25 + $0x48] sm:$0xe] }
  0xf7   : > { %v3774_v27 = vsel %vm6622_vm4, %v3769_v14, %v3773_v51  ;;  %v3881_v59 = vshll.u32 %v7746_v34, 16  ;;  %v3885_v61 = vshrl.u32 %v7746_v34, 16  ;;  %v3812_v63 = vsel %vm6622_vm4, %v3807_v39, %v7695_v10  ;;  %v7821_v39 = vld [vmem:[%s6596_s25 + $0xb8] sm:$0xf] }
  0xf8   : > { %v3822_v18 = vsel %vm6622_vm4, %v3817_v55, %v3821_v17  ;;  %v3836_v20 = vsel %vm6622_vm4, %v3831_v62, %v7705_v46  ;;  %v3855_v31 = vrot.slane %v3854_v49, 4  ;;  %v8385_v51 = vcombine.low %v7459_v12, %v7474_v35 }
  0xf9   : > { %v3874_v10 = vrot.slane %v3872_v4, 4  ;;  %v3877_v60 = vrot.slane %v3875_v50, 5  ;;  %v3891_v9 = vshll.u32 %v7756_v48, 16  ;;  %v8386_v46 = vcombine.low %v7544_v21, %v7569_v56  ;;  %v5422_v21 = vld [vmem:[%s6596_s25 + $0xb4] sm:$0xf] }
  0xfa   : > { %v5089_v12 = vcombine.low %v7620_v42, %v7627_v47  ;;  %v8387_v35 = vsel %vm6622_vm4, %v7640_v5, %v7629_v41  ;;  %v3865_v14 = vrot.slane %v3864_v53, 4  ;;  %v3869_v28 = vrot.slane %v3867_v22, 5  ;;  %v5470_v4 = vld [vmem:[%s6596_s25 + $0x60] sm:$0xe]  ;;  %v5471_v53 = vld [vmem:[%s6596_s25 + $0x6c] sm:$0xe] }
  0xfb   : > { %v5090_v56 = vcombine.low %v7644_v43, %v7729_v16  ;;  %v7804_v44 = vcombine.low %v3764_v52, %v3774_v27  ;;  %v7806_v42 = vrot.slane %v3881_v59, 5  ;;  %v3887_v47 = vrot.slane %v3885_v61, 4  ;;  %v8396_v16 = vld [vmem:[#allocation4_spill] sm:$0xff] }
  0xfc   : > { %6090 = vmatmul.mubr.msk.bf16.gmra.mrb[4].mxu0 %vm658_vm3, %v7600_v37  ;;  %v3846_v37 = vsel %vm6622_vm4, %v3841_v29, %v3845_v26  ;;  %v7808_v41 = vcombine.low %v3788_v33, %v3798_v23  ;;  %v7810_v5 = vcombine.low %v3812_v63, %v3822_v18  ;;  %v3860_v6 = vsel %vm6622_vm4, %v3855_v31, %v7739_v54  ;;  %v8389_v23 = vld [vmem:[#allocation11_spill] sm:$0xff]  ;;  %v5425_v63 = vld [vmem:[%s6596_s25 + $0xc0] sm:$0xf]  ;;  %v8391_v18 = vld [vmem:[#allocation9_spill] sm:$0xff] }
  0xfd   : > { %5936 = vmatmul.mubr.msk.bf16.gmra.mrb[20].mxu1 %vm658_vm3, %v8385_v51  ;;  %6093 = vmatprep.mubr.msk.bf16.mxu0 %vm658_vm3, %v7614_v58  ;;  %v8388_v58 = vsel %vm6622_vm4, %v7602_v19, %v7557_v1  ;;  %v7812_v7 = vcombine.low %v3836_v20, %v3846_v37  ;;  %v5484_v1 = vrot.slane %v5468_v11, 9  ;;  %v5469_v19 = vld [vmem:[%s6596_s25 + $0x54] sm:$0xe]  ;;  %v3878_v8 = vor.u32 %v3877_v60, %v3874_v10  ;;  %v8392_v31 = vld [vmem:[#allocation10_spill] sm:$0xff] }
  0xfe   : > { %5939 = vmatprep.mubr.msk.bf16.mxu1 %vm658_vm3, %v8386_v46  ;;  %v5438_v40 = vcombine.low %v8388_v58, %v8387_v35  ;;  %v7818_v17 = vrot.slane %v3891_v9, 5  ;;  %v3896_v55 = vshrl.u32 %v5422_v21, 16  ;;  %v3870_v62 = vsel %vm6622_vm4, %v3865_v14, %v3869_v28  ;;  %v8393_v9 = vld [vmem:[#allocation12_spill] sm:$0xff]  ;;  %v7870_v35 = vld [vmem:[%s6596_s25 + $0xbc] sm:$0x1] }
  0xff   : > { %v3899_v49 = vshll.u32 %v5422_v21, 16  ;;  %v4355_v29 = vrot.slane %v7452_v0, 5  ;;  %v4358_v26 = vrot.slane %v7506_v38, 5  ;;  %v3888_v50 = vor.u32 %v3887_v47, %v7806_v42  ;;  %v7873_v58 = vld [vmem:[%s6596_s25 + $0xc4] sm:$0xf] }
 0x100   : > { %v5485_v52 = vrot.slane %v5469_v19, 9  ;;  %v4362_v54 = vrot.slane %v7463_v24, 5  ;;  %v4365_v27 = vrot.slane %v7515_v15, 5  ;;  %v3905_v22 = vshll.u32 %v7821_v39, 16  ;;  %v5472_v19 = vld [vmem:[%s6596_s25 + $0x78] sm:$0xe] }
 0x101   : > { %v3909_v33 = vshrl.u32 %v7821_v39, 16  ;;  %v7838_v0 = vsel %vm6848_vm7, %v5484_v1, %v4355_v29  ;;  %v4357_v38 = vrot.slane %v4355_v29, 4  ;;  %v8390_v59 = vcombine.low %v7577_v36, %v8389_v23  ;;  %v8394_v23 = vld [vmem:[#allocation13_spill] sm:$0xff] }
 0x102   : > { %v7845_v24 = vcombine.low %v3860_v6, %v3870_v62  ;;  %v7849_v15 = vsel %vm6848_vm7, %v5485_v52, %v4362_v54  ;;  %v5486_v61 = vrot.slane %v5470_v4, 9  ;;  %v4369_v20 = vrot.slane %v8391_v18, 5  ;;  %v6460_v6 = vld [vmem:[%s6596_s25 + $0xc] sm:$0xff]  }
 0x103   : > { %v7855_v36 = vsel %vm6848_vm7, %v4357_v38, %v4358_v26  ;;  %v4372_v51 = vrot.slane %v8392_v31, 5  ;;  %v5487_v37 = vrot.slane %v5471_v53, 9  ;;  %v4376_v11 = vrot.slane %v8393_v9, 5 }
 0x104   : > { %6094 = vmatmul.mubr.msk.bf16.gmra.mrb[8].mxu0 %vm658_vm3, %v7623_v30  ;;  %v4364_v30 = vrot.slane %v4362_v54, 4  ;;  %v5501_v10 = vcombine.low %v7838_v0, %v7855_v36  ;;  %v4379_v46 = vrot.slane %v7673_v45, 5  ;;  %v7879_v14 = vsel %vm6848_vm7, %v5486_v61, %v4369_v20 }
 0x105   : > { %5940 = vmatmul.mubr.msk.bf16.gmra.mrb[24].mxu1 %vm658_vm3, %v8390_v59  ;;  %6097 = vmatprep.mubr.msk.bf16.mxu0 %vm658_vm3, %v5438_v40  ;;  %v4371_v28 = vrot.slane %v4369_v20, 4  ;;  %v7881_v21 = vrot.slane %v3896_v55, 4  ;;  %v3920_v47 = vshrl.u32 %v5425_v63, 16  ;;  %v7885_v45 = vsel %vm6848_vm7, %v5487_v37, %v4376_v11  ;;  %v5199_v55 = vld [vmem:[%s6596_s25 + $0x78] sm:$0xf]  ;;  %v8395_v59 = vld [vmem:[#allocation16_spill] sm:$0xff] }
 0x106   : > { %5943 = vmatprep.mubr.msk.bf16.mxu1 %vm658_vm3, %v5089_v12  ;;  %v7863_v60 = vsel %vm6848_vm7, %v4364_v30, %v4365_v27  ;;  %v7867_v12 = vrot.slane %v3878_v8, 4  ;;  %v4378_v1 = vrot.slane %v4376_v11, 4  ;;  %v7889_v8 = vrot.slane %v3888_v50, 4 }
 0x107   : > { %v5502_v40 = vcombine.low %v7849_v15, %v7863_v60  ;;  %v7891_v62 = vrot.slane %v3899_v49, 5  ;;  %v3923_v29 = vshll.u32 %v5425_v63, 16  ;;  %v7895_v26 = vsel %vm6848_vm7, %v4371_v28, %v4372_v51  ;;  %v8398_v28 = vld [vmem:[#allocation14_spill] sm:$0xff] }
 0x108   : > { %v7898_v4 = vrot.slane %v3905_v22, 5  ;;  %v7900_v52 = vrot.slane %v3909_v33, 4  ;;  %v5503_v54 = vcombine.low %v7879_v14, %v7895_v26  ;;  %v7906_v27 = vsel %vm6848_vm7, %v4378_v1, %v4379_v46  ;;  %v5473_v33 = vld [vmem:[%s6596_s25 + $0x84] sm:$0xe]  ;;  %v6461_v1 = vld [vmem:[%s6596_s25 + $0x18] sm:$0xff]  }
 0x109   : > { %v3915_v49 = vshll.u32 %v7870_v35, 16  ;;  %v3929_v50 = vshll.u32 %v7873_v58, 16  ;;  %v5504_v53 = vcombine.low %v7885_v45, %v7906_v27  ;;  %v5488_v22 = vrot.slane %v5472_v19, 9  ;;  %v6523_v60 = vld [vmem:[%s6596_s25 + $0xa0] sm:$0xf] }
 0x10a   : > { %v3922_v38 = vrot.slane %v3920_v47, 4  ;;  %v4386_v30 = vrot.slane %v8395_v59, 5  ;;  %v2245_v61 = vshrl.u32 %v5199_v55, 16  ;;  %v3925_v63 = vrot.slane %v3923_v29, 5  ;;  %v5428_v29 = vld [vmem:[%s6596_s25 + $0xcc] sm:$0xf] }
 0x10b   : > { %v3933_v18 = vshrl.u32 %v7873_v58, 16  ;;  %v2248_v43 = vshll.u32 %v5199_v55, 16  ;;  %v5489_v37 = vrot.slane %v5473_v33, 9  ;;  %v3884_v9 = vsel %vm6622_vm4, %v7867_v12, %v7806_v42  ;;  %v7949_v55 = vld [vmem:[%s6596_s25 + $0xd0] sm:$0xf] }
 0x10c   : > { %6098 = vmatmul.mubr.msk.bf16.gmra.mrb[12].mxu0 %vm658_vm3, %v7804_v44  ;;  %v4383_v44 = vrot.slane %v8394_v23, 5  ;;  %v2247_v51 = vrot.slane %v2245_v61, 4  ;;  %v3902_v11 = vor.u32 %v7891_v62, %v7881_v21  ;;  %v4390_v47 = vrot.slane %v8398_v28, 5  ;;  %v6462_v21 = vld [vmem:[%s6596_s25 + $0x24] sm:$0xff]   ;;  %v6527_v27 = vld [vmem:[%s6596_s25 + $0xac] sm:$0xf] }
 0x10d   : > { %5944 = vmatmul.mubr.msk.bf16.gmra.mrb[28].mxu1 %vm658_vm3, %v5090_v56  ;;  %6101 = vmatprep.mubr.msk.bf16.mxu0 %vm658_vm3, %v7808_v41  ;;  %v8397_v56 = vld [vmem:[#allocation5_spill] sm:$0xff]  ;;  %v2250_v46 = vrot.slane %v2248_v43, 5  ;;  %v3894_v19 = vsel %vm6622_vm4, %v7889_v8, %v7818_v17  ;;  %v4393_v12 = vrot.slane %v7701_v2, 5  ;;  %v7957_v62 = vrot.slane %v3929_v50, 5  ;;  %v5474_v8 = vld [vmem:[%s6596_s25 + $0x90] sm:$0xe] }
 0x10e   : > { %5949 = vmatprep.mubr.msk.bf16.mxu1 %vm658_vm3, %v6460_v6  ;;  %v2267_v41 = vsel %vm6622_vm4, %v8397_v56, %v8396_v16  ;;  %v7931_v20 = vsel %vm6848_vm7, %v5488_v22, %v4383_v44  ;;  %v4385_v31 = vrot.slane %v4383_v44, 4  ;;  %v3912_v6 = vor.u32 %v7900_v52, %v7898_v4  ;;  %v7963_v52 = vld [vmem:[%s6596_s25 + $0xc8] sm:$0x1]  ;;  %v8400_v16 = vld [vmem:[#allocation2_spill] sm:$0xff] }
 0x10f   : > { %v3935_v22 = vrot.slane %v3933_v18, 4  ;;  %v2251_v17 = vor.u32 %v2250_v46, %v2247_v51  ;;  %v3917_v23 = vrot.slane %v3915_v49, 5  ;;  %v3926_v44 = vor.u32 %v3925_v63, %v3922_v38  ;;  %v8401_v51 = vld [vmem:[#allocation3_spill] sm:$0xff] }
 0x110   : > { %v7953_v42 = vsel %vm6848_vm7, %v4385_v31, %v4386_v30  ;;  %v7967_v59 = vsel %vm6848_vm7, %v5489_v37, %v4390_v47  ;;  %v4392_v30 = vrot.slane %v4390_v47, 4  ;;  %v3944_v2 = vshrl.u32 %v5428_v29, 16 }
 0x111   : > { %v5505_v33 = vcombine.low %v7931_v20, %v7953_v42  ;;  %v3947_v50 = vshll.u32 %v5428_v29, 16  ;;  %v3953_v61 = vshll.u32 %v7949_v55, 16  ;;  %v2252_v18 = vrot.slane %v2251_v17, 4  ;;  %v6463_v29 = vld [vmem:[%s6596_s25 + $0x30] sm:$0xff]  }
 0x112   : > { %v3957_v49 = vshrl.u32 %v7949_v55, 16  ;;  %v7978_v38 = vsel %vm6848_vm7, %v4392_v30, %v4393_v12  ;;  %v5490_v63 = vrot.slane %v5474_v8, 9  ;;  %v3936_v56 = vor.u32 %v3935_v22, %v7957_v62 }
 0x113   : > { %v3939_v31 = vshll.u32 %v7963_v52, 16  ;;  %v5506_v37 = vcombine.low %v7967_v59, %v7978_v38  ;;  %v5444_v46 = vcombine.low %v3884_v9, %v3894_v19  ;;  %v3903_v28 = vrot.slane %v3902_v11, 4  ;;  %v5475_v11 = vld [vmem:[%s6596_s25 + $0x9c] sm:$0xe] }
 0x114   : > { %6102 = vmatmul.mubr.msk.bf16.gmra.mrb[16].mxu0 %vm658_vm3, %v7810_v5  ;;  %v8399_v5 = vld [vmem:[#allocation15_spill] sm:$0xff]  ;;  %v3913_v47 = vrot.slane %v3912_v6, 4  ;;  %v3927_v12 = vrot.slane %v3926_v44, 4  ;;  %v4400_v8 = vrot.slane %v7710_v3, 5  ;;  %v3946_v30 = vrot.slane %v3944_v2, 4  ;;  %v6464_v19 = vld [vmem:[%s6596_s25 + $0x3c] sm:$0xff]  }
 0x115   : > { %5950 = vmatmul.mubr.msk.bf16.vlgmr.msra.gmra.mrb[0].mxu1 %vm658_vm3, %v6461_v1  ;;  %6105 = vmatprep.mubr.msk.bf16.mxu0 %vm658_vm3, %v7812_v7  ;;  %v4397_v43 = vrot.slane %v8399_v5, 5  ;;  %v2257_v7 = vsel %vm6622_vm4, %v2252_v18, %v8401_v51  ;;  %v3949_v18 = vrot.slane %v3947_v50, 5  ;;  %v8001_v5 = vrot.slane %v3953_v61, 5 }
 0x116   : > { %6152 = vmatpush3.bf16.msra.mxu1 %v8400_v16  ;;  %5953 = vmatprep.mubr.msk.bf16.mxu1 %vm658_vm3, %v6462_v21  ;;  %v7990_v1 = vcombine.low %v2257_v7, %v2267_v41  ;;  %v7994_v21 = vld [vmem:[%s6596_s25 + $0xd4] sm:$0x1]  ;;  %v3959_v9 = vrot.slane %v3957_v49, 4  ;;  %v3937_v41 = vrot.slane %v3936_v56, 4  ;;  %v3941_v6 = vrot.slane %v3939_v31, 5 }
 0x117   : > { %v7998_v22 = vsel %vm6848_vm7, %v5490_v63, %v4397_v43  ;;  %v4399_v17 = vrot.slane %v4397_v43, 4  ;;  %v3908_v63 = vsel %vm6622_vm4, %v3903_v28, %v7898_v4  ;;  %v3918_v2 = vsel %vm6622_vm4, %v3913_v47, %v3917_v23  ;;  %v6514_v16 = vld [vmem:[%s6596_s25 + $0x1c] sm:$0xf]  ;;  %v5476_v28 = vld [vmem:[%s6596_s25 + $0xa8] sm:$0xe] }
 0x118   : > { %v3963_v50 = vshll.u32 %v7994_v21, 16  ;;  %v5491_v61 = vrot.slane %v5475_v11, 9  ;;  %v4404_v49 = vrot.slane %v7698_v25, 5  ;;  %v3932_v4 = vsel %vm6622_vm4, %v3927_v12, %v7957_v62  ;;  %v5464_v62 = vld [vmem:[%s6596_s25 + $0x18] sm:$0xe]  ;;  %v6465_v47 = vld [vmem:[%s6596_s25 + $0x48] sm:$0xff]  }
 0x119   : > { %v8007_v44 = vsel %vm6848_vm7, %v4399_v17, %v4400_v8  ;;  %v3960_v43 = vor.u32 %v3959_v9, %v8001_v5  ;;  %v4407_v23 = vrot.slane %v7743_v57, 5  ;;  %v3942_v25 = vsel %vm6622_vm4, %v3937_v41, %v3941_v6  ;;  %v6515_v11 = vld [vmem:[%s6596_s25 + $0x20] sm:$0x1] }
 0x11a   : > { %v5507_v3 = vcombine.low %v7998_v22, %v8007_v44  ;;  %v4327_v56 = vrot.slane %v6514_v16, 5  ;;  %v8033_v31 = vsel %vm6848_vm7, %v5491_v61, %v4404_v49  ;;  %v4406_v51 = vrot.slane %v4404_v49, 4  ;;  %v5477_v49 = vld [vmem:[%s6596_s25 + $0xb4] sm:$0xe] }
 0x11b   : > { %v5445_v7 = vcombine.low %v3908_v63, %v3918_v2  ;;  %v3961_v17 = vrot.slane %v3960_v43, 4  ;;  %v5492_v41 = vrot.slane %v5476_v28, 9  ;;  %v4411_v6 = vrot.slane %v7746_v34, 5  ;;  %v5465_v2 = vld [vmem:[%s6596_s25 + $0x24] sm:$0xe] }
 0x11c   : > { %6106 = vmatmul.mubr.msk.bf16.gmra.mrb[20].mxu0 %vm658_vm3, %v7845_v24  ;;  %v3950_v24 = vor.u32 %v3949_v18, %v3946_v30  ;;  %v8038_v57 = vsel %vm6848_vm7, %v4406_v51, %v4407_v23  ;;  %v6466_v30 = vld [vmem:[%s6596_s25 + $0x54] sm:$0xff]   ;;  %v5480_v18 = vrot.slane %v5464_v62, 9  ;;  %v4329_v9 = vrot.slane %v4327_v56, 4  ;;  %v6518_v28 = vld [vmem:[%s6596_s25 + $0x2c] sm:$0x1] }
 0x11d   : > { %5954 = vmatmul.mubr.msk.bf16.gmra.mrb[4].mxu1 %vm658_vm3, %v6463_v29  ;;  %6109 = vmatprep.mubr.msk.bf16.mxu0 %vm658_vm3, %v5444_v46  ;;  %v3965_v46 = vrot.slane %v3963_v50, 5  ;;  %v5446_v29 = vcombine.low %v3932_v4, %v3942_v25  ;;  %v5508_v8 = vcombine.low %v8033_v31, %v8038_v57  ;;  %v4414_v63 = vrot.slane %v7756_v48, 5  ;;  %v6516_v50 = vld [vmem:[%s6596_s25 + $0x28] sm:$0xf]  ;;  %v5466_v25 = vld [vmem:[%s6596_s25 + $0x30] sm:$0xe] }
 0x11e   : > { %5957 = vmatprep.mubr.msk.bf16.mxu1 %vm658_vm3, %v6464_v19  ;;  %v3951_v12 = vrot.slane %v3950_v24, 4  ;;  %v4330_v19 = vrot.slane %v6515_v11, 5  ;;  %v4334_v61 = vrot.slane %v6516_v50, 5  ;;  %v8061_v48 = vsel %vm6848_vm7, %v5492_v41, %v4411_v6  ;;  %v6468_v11 = vld [vmem:[%s6596_s25 + $0x6c] sm:$0xff]   ;;  %v8402_v41 = vld [vmem:[#allocation6_spill] sm:$0xff] }
 0x11f   : > { %v3966_v34 = vsel %vm6622_vm4, %v3961_v17, %v3965_v46  ;;  %v4413_v24 = vrot.slane %v4411_v6, 4  ;;  %v4328_v43 = vsel %vm6848_vm7, %v5480_v18, %v4327_v56  ;;  %v5481_v51 = vrot.slane %v5465_v2, 9  ;;  %v5478_v50 = vld [vmem:[%s6596_s25 + $0xc0] sm:$0xe]  ;;  %v6532_v31 = vld [vmem:[%s6596_s25 + $0xc8] sm:$0x1] }
 0x120   : > { %v3956_v4 = vsel %vm6622_vm4, %v3951_v12, %v8001_v5  ;;  %v4331_v23 = vsel %vm6848_vm7, %v4329_v9, %v4330_v19  ;;  %v6517_v5 = vld [vmem:[%s6596_s25 + $0x34] sm:$0xf]  ;;  %v6467_v12 = vld [vmem:[%s6596_s25 + $0x60] sm:$0xff]   ;;  %v5482_v18 = vrot.slane %v5466_v25, 9  ;;  %v4421_v9 = vrot.slane %v7870_v35, 5 }
 0x121   : > { %v4341_v16 = vrot.slane %v6517_v5, 5  ;;  %v8072_v62 = vsel %vm6848_vm7, %v4413_v24, %v4414_v63  ;;  %v5447_v46 = vcombine.low %v3956_v4, %v3966_v34  ;;  %v5497_v17 = vcombine.low %v4328_v43, %v4331_v23  ;;  %v5467_v24 = vld [vmem:[%s6596_s25 + $0x3c] sm:$0xe] }
 0x122   : > { %v5509_v56 = vcombine.low %v8061_v48, %v8072_v62  ;;  %v4344_v6 = vrot.slane %v8402_v41, 5  ;;  %v4335_v35 = vsel %vm6848_vm7, %v5481_v51, %v4334_v61  ;;  %v5494_v5 = vrot.slane %v5478_v50, 9 }
 0x123   : > { %v4343_v19 = vrot.slane %v4341_v16, 4  ;;  %v4342_v23 = vsel %vm6848_vm7, %v5482_v18, %v4341_v16  ;;  %v4428_v51 = vrot.slane %v7963_v52, 5  ;;  %v2408_v57 = vshll.u32 %v6532_v31, 16 }
 0x124   : > { %6110 = vmatmul.mubr.msk.bf16.gmra.mrb[24].mxu0 %vm658_vm3, %v5445_v7  ;;  %v5493_v7 = vrot.slane %v5477_v49, 9 }
 0x125   : > { %5958 = vmatmul.mubr.msk.bf16.gmra.mrb[8].mxu1 %vm658_vm3, %v6465_v47  ;;  %6113 = vmatprep.mubr.msk.bf16.mxu0 %vm658_vm3, %v5446_v29  ;;  %v4337_v47 = vrot.slane %v6518_v28, 5  ;;  %v4418_v29 = vrot.slane %v7821_v39, 5  ;;  %v8403_v39 = vld [vmem:[#allocation7_spill] sm:$0xff]  ;;  %v4345_v25 = vsel %vm6848_vm7, %v4343_v19, %v4344_v6  ;;  %v5483_v28 = vrot.slane %v5467_v24, 9 }
 0x126   : > { %5961 = vmatprep.mubr.msk.bf16.mxu1 %vm658_vm3, %v6466_v30  ;;  %v4336_v30 = vrot.slane %v4334_v61, 4  ;;  %v4348_v49 = vrot.slane %v8403_v39, 5  ;;  %v4425_v61 = vrot.slane %v7873_v58, 5  ;;  %v6519_v39 = vld [vmem:[%s6596_s25 + $0x70] sm:$0xf]  ;;  %v4432_v24 = vrot.slane %v7949_v55, 5 }
 0x127   : > { %v8084_v63 = vsel %vm6848_vm7, %v5493_v7, %v4418_v29  ;;  %v4420_v2 = vrot.slane %v4418_v29, 4  ;;  %v5196_v7 = vld [vmem:[%s6596_s25 + $0x6c] sm:$0xf]  ;;  %v8404_v29 = vld [vmem:[#allocation8_spill] sm:$0xff] }
 0x128   : > { %v4338_v34 = vsel %vm6848_vm7, %v4336_v30, %v4337_v47  ;;  %v4350_v47 = vrot.slane %v4348_v49, 4  ;;  %v6469_v30 = vld [vmem:[%s6596_s25 + $0x78] sm:$0xff]   ;;  %v8115_v16 = vsel %vm6848_vm7, %v5494_v5, %v4425_v61  ;;  %v4427_v18 = vrot.slane %v4425_v61, 4 }
 0x129   : > { %v8091_v4 = vsel %vm6848_vm7, %v4420_v2, %v4421_v9  ;;  %v5499_v9 = vcombine.low %v4342_v23, %v4345_v25  ;;  %v2221_v19 = vshrl.u32 %v5196_v7, 16  ;;  %v2224_v41 = vshll.u32 %v5196_v7, 16 }
 0x12a   : > { %v5510_v43 = vcombine.low %v8084_v63, %v8091_v4  ;;  %v8120_v58 = vsel %vm6848_vm7, %v4427_v18, %v4428_v51  ;;  %v4349_v6 = vsel %vm6848_vm7, %v5483_v28, %v4348_v49  ;;  %v4435_v49 = vrot.slane %v7994_v21, 5  ;;  %v6471_v51 = vld [vmem:[%s6596_s25 + $0x90] sm:$0xff]   ;;  %v6472_v21 = vld [vmem:[%s6596_s25 + $0x9c] sm:$0xff]  }
 0x12b   : > { %v5511_v50 = vcombine.low %v8115_v16, %v8120_v58  ;;  %v2223_v23 = vrot.slane %v2221_v19, 4  ;;  %v2226_v25 = vrot.slane %v2224_v41, 5  ;;  %v4434_v7 = vrot.slane %v4432_v24, 4 }
 0x12c   : > { %6114 = vmatmul.mubr.msk.bf16.gmra.mrb[28].mxu0 %vm658_vm3, %v5447_v46  ;;  %v5498_v46 = vcombine.low %v4335_v35, %v4338_v34  ;;  %v2230_v35 = vshll.u32 %v6519_v39, 16  ;;  %v2234_v34 = vshrl.u32 %v6519_v39, 16 }
 0x12d   : > { %5962 = vmatmul.mubr.msk.bf16.gmra.mrb[12].mxu1 %vm658_vm3, %v6467_v12  ;;  %6119 = vmatprep.mubr.msk.bf16.mxu0 %vm658_vm3, %v5497_v17  ;;  %v4351_v12 = vrot.slane %v8404_v29, 5  ;;  %v5479_v17 = vld [vmem:[%s6596_s25 + $0xcc] sm:$0xe]  ;;  %v8142_v55 = vsel %vm6848_vm7, %v4434_v7, %v4435_v49 }
 0x12e   : > { %5965 = vmatprep.mubr.msk.bf16.mxu1 %vm658_vm3, %v6468_v11  ;;  %v6470_v11 = vld [vmem:[%s6596_s25 + $0x84] sm:$0xff]   ;;  %v5495_v52 = vrot.slane %v5479_v17, 9  ;;  %v2236_v28 = vrot.slane %v2234_v34, 4  ;;  %v6520_v17 = vld [vmem:[%s6596_s25 + $0x74] sm:$0x1] }
 0x12f   : > { %v4352_v2 = vsel %vm6848_vm7, %v4350_v47, %v4351_v12  ;;  %v5202_v47 = vld [vmem:[%s6596_s25 + $0x84] sm:$0xf]  ;;  %v2227_v12 = vor.u32 %v2226_v25, %v2223_v23  ;;  %v6474_v34 = vld [vmem:[%s6596_s25 + $0xb4] sm:$0xff]  }
 0x130   : > { %v8137_v5 = vsel %vm6848_vm7, %v5495_v52, %v4432_v24  ;;  %v5500_v61 = vcombine.low %v4349_v6, %v4352_v2  ;;  %v2272_v18 = vshll.u32 %v5202_v47, 16  ;;  %v5205_v6 = vld [vmem:[%s6596_s25 + $0x90] sm:$0xf]  ;;  %v6473_v2 = vld [vmem:[%s6596_s25 + $0xa8] sm:$0xff]  }
 0x131   : > { %v5512_v29 = vcombine.low %v8137_v5, %v8142_v55  ;;  %v2228_v52 = vrot.slane %v2227_v12, 4  ;;  %v2293_v23 = vshrl.u32 %v5205_v6, 16  ;;  %v2296_v25 = vshll.u32 %v5205_v6, 16 }
 0x132   : > { %v2326_v12 = vshll.u32 %v6523_v60, 16 }
 0x133   : > { %v2298_v14 = vrot.slane %v2296_v25, 5  ;;  %v6526_v25 = vld [vmem:[%s6596_s25 + $0xa4] sm:$0x1] }
 0x134   : > { %6120 = vmatmul.mubr.msk.bf16.vlgmr.msra.gmra.mrb[0].mxu0 %vm658_vm3, %v5498_v46  ;;  %v2232_v46 = vrot.slane %v2230_v35, 5  ;;  %v5208_v35 = vld [vmem:[%s6596_s25 + $0x9c] sm:$0xf]  ;;  %v8184_v6 = vrot.slane %v2326_v12, 5 }
 0x135   : > { %5966 = vmatmul.mubr.msk.bf16.gmra.mrb[16].mxu1 %vm658_vm3, %v6469_v30  ;;  %6123 = vmatprep.mubr.msk.bf16.mxu0 %vm658_vm3, %v5499_v9  ;;  %v2240_v30 = vshll.u32 %v6520_v17, 16  ;;  %v2269_v9 = vshrl.u32 %v5202_v47, 16  ;;  %v2320_v47 = vshll.u32 %v5208_v35, 16  ;;  %v6524_v17 = vld [vmem:[%s6596_s25 + $0x8c] sm:$0x1] }
 0x136   : > { %5969 = vmatprep.mubr.msk.bf16.mxu1 %vm658_vm3, %v6470_v11  ;;  %v2237_v13 = vor.u32 %v2236_v28, %v2232_v46  ;;  %v6521_v11 = vld [vmem:[%s6596_s25 + $0x88] sm:$0xf]  ;;  %v2233_v7 = vsel %vm6622_vm4, %v2228_v52, %v2232_v46 }
 0x137   : > { %v2278_v19 = vshll.u32 %v6521_v11, 16  ;;  %v2282_v41 = vshrl.u32 %v6521_v11, 16  ;;  %v2242_v0 = vrot.slane %v2240_v30, 5  ;;  %v2271_v36 = vrot.slane %v2269_v9, 4 }
 0x138   : > { %v2238_v39 = vrot.slane %v2237_v13, 4  ;;  %v2288_v30 = vshll.u32 %v6524_v17, 16  ;;  %v2295_v9 = vrot.slane %v2293_v23, 4  ;;  %v2322_v11 = vrot.slane %v2320_v47, 5 }
 0x139   : > { %v8161_v24 = vrot.slane %v2278_v19, 5  ;;  %v2284_v49 = vrot.slane %v2282_v41, 4  ;;  %v6475_v19 = vld [vmem:[%s6596_s25 + $0xc0] sm:$0xff]  }
 0x13a   : > { %v2243_v46 = vsel %vm6622_vm4, %v2238_v39, %v2242_v0  ;;  %v5211_v39 = vld [vmem:[%s6596_s25 + $0xa8] sm:$0xf] }
 0x13b   : > { %v2285_v13 = vor.u32 %v2284_v49, %v8161_v24  ;;  %v5229_v41 = vcombine.low %v2233_v7, %v2243_v46  ;;  %v2336_v7 = vshll.u32 %v6526_v25, 16  ;;  %v2344_v45 = vshll.u32 %v5211_v39, 16 }
 0x13c   : > { %6124 = vmatmul.mubr.msk.bf16.gmra.mrb[4].mxu0 %vm658_vm3, %v5500_v61  ;;  %v6522_v61 = vld [vmem:[%s6596_s25 + $0x94] sm:$0xf] }
 0x13d   : > { %5970 = vmatmul.mubr.msk.bf16.gmra.mrb[20].mxu1 %vm658_vm3, %v6471_v51  ;;  %6127 = vmatprep.mubr.msk.bf16.mxu0 %vm658_vm3, %v5501_v10  ;;  %v2274_v10 = vrot.slane %v2272_v18, 5  ;;  %v2302_v51 = vshll.u32 %v6522_v61, 16  ;;  %v2306_v28 = vshrl.u32 %v6522_v61, 16  ;;  %v2286_v0 = vrot.slane %v2285_v13, 4 }
 0x13e   : > { %5973 = vmatprep.mubr.msk.bf16.mxu1 %vm658_vm3, %v6472_v21  ;;  %v2317_v21 = vshrl.u32 %v5208_v35, 16  ;;  %v6525_v35 = vld [vmem:[%s6596_s25 + $0x98] sm:$0x1]  ;;  %v2341_v61 = vshrl.u32 %v5211_v39, 16  ;;  %v5217_v39 = vld [vmem:[%s6596_s25 + $0xc0] sm:$0xf] }
 0x13f   : > { %v2275_v15 = vor.u32 %v2274_v10, %v2271_v36  ;;  %v8181_v26 = vrot.slane %v2302_v51, 5  ;;  %v2290_v36 = vrot.slane %v2288_v30, 5  ;;  %v2299_v10 = vor.u32 %v2298_v14, %v2295_v9  ;;  %v5214_v51 = vld [vmem:[%s6596_s25 + $0xb4] sm:$0xf] }
 0x140   : > { %v2319_v18 = vrot.slane %v2317_v21, 4  ;;  %v2354_v21 = vshrl.u32 %v6527_v27, 16  ;;  %v2365_v20 = vshrl.u32 %v5214_v51, 16  ;;  %v2368_v42 = vshll.u32 %v5214_v51, 16 }
 0x141   : > { %v2276_v52 = vrot.slane %v2275_v15, 4  ;;  %v2291_v46 = vsel %vm6622_vm4, %v2286_v0, %v2290_v36  ;;  %v2300_v15 = vrot.slane %v2299_v10, 4  ;;  %v2338_v30 = vrot.slane %v2336_v7, 5 }
 0x142   : > { %v2323_v23 = vor.u32 %v2322_v11, %v2319_v18  ;;  %v2343_v9 = vrot.slane %v2341_v61, 4  ;;  %v2356_v11 = vrot.slane %v2354_v21, 4  ;;  %v6531_v61 = vld [vmem:[%s6596_s25 + $0xbc] sm:$0x1] }
 0x143   : > { %v2281_v47 = vsel %vm6622_vm4, %v2276_v52, %v8161_v24  ;;  %v2305_v0 = vsel %vm6622_vm4, %v2300_v15, %v8181_v26  ;;  %v2384_v22 = vshll.u32 %v6531_v61, 16 }
 0x144   : > { %6128 = vmatmul.mubr.msk.bf16.gmra.mrb[8].mxu0 %vm658_vm3, %v5502_v40  ;;  %v2330_v40 = vshrl.u32 %v6523_v60, 16  ;;  %v2324_v17 = vrot.slane %v2323_v23, 4  ;;  %v5231_v24 = vcombine.low %v2281_v47, %v2291_v46 }
 0x145   : > { %5974 = vmatmul.mubr.msk.bf16.gmra.mrb[24].mxu1 %vm658_vm3, %v6473_v2  ;;  %6131 = vmatprep.mubr.msk.bf16.mxu0 %vm658_vm3, %v5503_v54  ;;  %v2308_v54 = vrot.slane %v2306_v28, 4 }
 0x146   : > { %5977 = vmatprep.mubr.msk.bf16.mxu1 %vm658_vm3, %v6474_v34  ;;  %v2332_v2 = vrot.slane %v2330_v40, 4  ;;  %v2312_v34 = vshll.u32 %v6525_v35, 16  ;;  %v2329_v10 = vsel %vm6622_vm4, %v2324_v17, %v8184_v6  ;;  %v2410_v17 = vrot.slane %v2408_v57, 5 }
 0x147   : > { %v2309_v49 = vor.u32 %v2308_v54, %v8181_v26  ;;  %v2346_v54 = vrot.slane %v2344_v45, 5  ;;  %v6529_v26 = vld [vmem:[%s6596_s25 + $0xb0] sm:$0x1] }
 0x148   : > { %v2333_v28 = vor.u32 %v2332_v2, %v8184_v6  ;;  %v2314_v60 = vrot.slane %v2312_v34, 5  ;;  %v2360_v35 = vshll.u32 %v6529_v26, 16  ;;  %v2389_v34 = vshrl.u32 %v5217_v39, 16 }
 0x149   : > { %v2310_v13 = vrot.slane %v2309_v49, 4  ;;  %v2347_v38 = vor.u32 %v2346_v54, %v2343_v9  ;;  %v2392_v6 = vshll.u32 %v5217_v39, 16  ;;  %v6530_v49 = vld [vmem:[%s6596_s25 + $0xc4] sm:$0xf] }
 0x14a   : > { %v2334_v14 = vrot.slane %v2333_v28, 4  ;;  %v2398_v23 = vshll.u32 %v6530_v49, 16  ;;  %v2402_v25 = vshrl.u32 %v6530_v49, 16  ;;  %v2362_v45 = vrot.slane %v2360_v35, 5 }
 0x14b   : > { %v2315_v36 = vsel %vm6622_vm4, %v2310_v13, %v2314_v60  ;;  %v2348_v51 = vrot.slane %v2347_v38, 4  ;;  %v2386_v60 = vrot.slane %v2384_v22, 5 }
 0x14c   : > { %6132 = vmatmul.mubr.msk.bf16.gmra.mrb[12].mxu0 %vm658_vm3, %v5504_v53  ;;  %v2350_v53 = vshll.u32 %v6527_v27, 16  ;;  %v2339_v59 = vsel %vm6622_vm4, %v2334_v14, %v2338_v30  ;;  %v5232_v44 = vcombine.low %v2305_v0, %v2315_v36  ;;  %v2391_v27 = vrot.slane %v2389_v34, 4  ;;  %v8275_v0 = vld [vmem:[%s8336_s2] ss:$0 sm:$0xff] }
 0x14d   : > { %5978 = vmatmul.mubr.msk.bf16.gmra.mrb[28].mxu1 %vm658_vm3, %v6475_v19  ;;  %6135 = vmatprep.mubr.msk.bf16.mxu0 %vm658_vm3, %v5505_v33  ;;  %v6528_v33 = vld [vmem:[%s6596_s25 + $0xb8] sm:$0xf]  ;;  %v2367_v19 = vrot.slane %v2365_v20, 4  ;;  %v2400_v21 = vrot.slane %v2398_v23, 5  ;;  %v2404_v47 = vrot.slane %v2402_v25, 4 }
 0x14e   : > { %5999 = vmatprep.mubr.msk.bf16.mxu1 %vm658_vm3, %v5229_v41  ;;  %v2374_v12 = vshll.u32 %v6528_v33, 16  ;;  %v2378_v40 = vshrl.u32 %v6528_v33, 16  ;;  %v2352_v18 = vrot.slane %v2350_v53, 5  ;;  %v2370_v41 = vrot.slane %v2368_v42, 5 }
 0x14f   : > { %v2394_v53 = vrot.slane %v2392_v6, 5 }
 0x150   : > { %v2376_v52 = vrot.slane %v2374_v12, 5  ;;  %v2380_v2 = vrot.slane %v2378_v40, 4  ;;  %v2353_v20 = vsel %vm6622_vm4, %v2348_v51, %v2352_v18  ;;  %v2405_v12 = vor.u32 %v2404_v47, %v2400_v21 }
 0x151   : > { %v2395_v33 = vor.u32 %v2394_v53, %v2391_v27 }
 0x152   : > { %v2381_v7 = vor.u32 %v2380_v2, %v2376_v52  ;;  %v2406_v13 = vrot.slane %v2405_v12, 4 }
 0x153   : > { %v2396_v40 = vrot.slane %v2395_v33, 4 }
 0x154   : > { %6136 = vmatmul.mubr.msk.bf16.gmra.mrb[16].mxu0 %vm658_vm3, %v5506_v37  ;;  %v2357_v37 = vor.u32 %v2356_v11, %v2352_v18  ;;  %v2382_v15 = vrot.slane %v2381_v7, 4  ;;  %v2411_v9 = vsel %vm6622_vm4, %v2406_v13, %v2410_v17 }
 0x155   : > { %6000 = vmatmul.mubr.msk.bf16.vlgmr.msra.gmra.mrb[16].mxu1 %vm658_vm3, %v7990_v1  ;;  %6139 = vmatprep.mubr.msk.bf16.mxu0 %vm658_vm3, %v5507_v3  ;;  %v2371_v1 = vor.u32 %v2370_v41, %v2367_v19  ;;  %v5233_v3 = vcombine.low %v2329_v10, %v2339_v59  ;;  %v2401_v30 = vsel %vm6622_vm4, %v2396_v40, %v2400_v21 }
 0x156   : > { %6003 = vmatprep.mubr.msk.bf16.mxu1 %vm658_vm3, %v5231_v24  ;;  %v2358_v28 = vrot.slane %v2357_v37, 4  ;;  %v2387_v48 = vsel %vm6622_vm4, %v2382_v15, %v2386_v60  ;;  %v5236_v14 = vcombine.low %v2401_v30, %v2411_v9 }
 0x157   : > { %v2372_v46 = vrot.slane %v2371_v1, 4 }
 0x158   : > { %v2363_v42 = vsel %vm6622_vm4, %v2358_v28, %v2362_v45 }
 0x159   : > { %v5234_v62 = vcombine.low %v2353_v20, %v2363_v42 }
 0x15c   : > { %6140 = vmatmul.mubr.msk.bf16.gmra.mrb[20].mxu0 %vm658_vm3, %v5508_v8  ;;  %v2377_v8 = vsel %vm6622_vm4, %v2372_v46, %v2376_v52 }
 0x15d   : > { %6004 = vmatmul.mubr.msk.bf16.gmra.mrb[20].mxu1 %vm658_vm3, %v5232_v44  ;;  %6143 = vmatprep.mubr.msk.bf16.mxu0 %vm658_vm3, %v5509_v56  ;;  %v5235_v56 = vcombine.low %v2377_v8, %v2387_v48 }
 0x15e   : > { %6007 = vmatprep.mubr.msk.bf16.mxu1 %vm658_vm3, %v5233_v3 }
 0x164   : > { %6144 = vmatmul.mubr.msk.bf16.gmra.mrb[24].mxu0 %vm658_vm3, %v5510_v43 }
 0x165   : > { %6008 = vmatmul.mubr.msk.bf16.gmra.mrb[24].mxu1 %vm658_vm3, %v5234_v62  ;;  %6147 = vmatprep.mubr.msk.bf16.mxu0 %vm658_vm3, %v5511_v50 }
 0x166   : > { %6011 = vmatprep.mubr.msk.bf16.mxu1 %vm658_vm3, %v5235_v56 }
 0x16c   : > { %6148 = vmatmul.mubr.msk.bf16.gmra.mrb[28].mxu0 %vm658_vm3, %v5512_v29 }
 0x16d   : > { %6012 = vmatmul.mubr.msk.bf16.gmra.mrb[28].mxu1 %vm658_vm3, %v5236_v14 }
 0x1e8   : > { %v5951_v63 = vpop.f32.mrb[0].mxu1 }
 0x1e9   : > { %v1821_v4 = vpop.f32.mrb[1].mxu1 }
 0x1ea   : > { %v5952_v43 = vpop.f32.mrb[2].mxu1 }
 0x1eb   : > { %v1824_v16 = vpop.f32.mrb[3].mxu1 }
 0x1f0   : > { %v5955_v58 = vpop.f32.mrb[4].mxu1 }
 0x1f1   : > { %v1837_v50 = vpop.f32.mrb[5].mxu1 }
 0x1f2   : > { %v5956_v54 = vpop.f32.mrb[6].mxu1 }
 0x1f3   : > { %v1840_v18 = vpop.f32.mrb[7].mxu1 }
 0x1f8   : > { %v5959_v11 = vpop.f32.mrb[8].mxu1 }
 0x1f9   : > { %v1853_v32 = vpop.f32.mrb[9].mxu1 }
 0x1fa   : > { %v5960_v24 = vpop.f32.mrb[10].mxu1 }
 0x1fb   : > { %v1856_v19 = vpop.f32.mrb[11].mxu1 }
 0x200   : > { %v5963_v41 = vpop.f32.mrb[12].mxu1 }
 0x201   : > { %v1869_v52 = vpop.f32.mrb[13].mxu1 }
 0x202   : > { %v5964_v5 = vpop.f32.mrb[14].mxu1 }
 0x203   : > { %v1872_v55 = vpop.f32.mrb[15].mxu1 }
 0x207   : > { %v6121_v29 = vpop.f32.mrb[0].mxu0 }
 0x208   : > { %v6153_v2 = vadd.f32 %v6121_v29, %v5951_v63  ;;  %v4572_v39 = vpop.f32.mrb[1].mxu0 }
 0x209   : > { %v6154_v36 = vadd.f32 %v4572_v39, %v1821_v4  ;;  %v6122_v10 = vpop.f32.mrb[2].mxu0 }
 0x20a   : > { %v6155_v59 = vadd.f32 %v6122_v10, %v5952_v43  ;;  %v4575_v38 = vpop.f32.mrb[3].mxu0  ;;  %v4740_v26 = vadd.f32 %v6153_v2, %v8275_v0 }
 0x20b   : > { %v6156_v37 = vadd.f32 %v4575_v38, %v1824_v16  ;;  %v4738_v34 = vadd.f32 %v6154_v36, %v8275_v0 }
 0x20c   : > { %v4741_v35 = vadd.f32 %v6155_v59, %v8275_v0 }
 0x20d   : > { %v4739_v6 = vadd.f32 %v6156_v37, %v8275_v0 }
 0x20e   : > { %v5605_v49 = vpack.c.bf16 %v4741_v35, %v4740_v26 }
 0x20f   : > { %v5600_v23 = vpack.c.bf16 %v4739_v6, %v4738_v34  ;;  %v6125_v25 = vpop.f32.mrb[4].mxu0 }
 0x210   : > { %5677 = vst [vmem:[%s8284_s20 + $0x8] sm:$0xff] %v5605_v49   ;;  %v6157_v1 = vadd.f32 %v6125_v25, %v5955_v58  ;;  %v4588_v7 = vpop.f32.mrb[5].mxu0 }
 0x211   : > { %5601 = vst [vmem:[%s8284_s20] sm:$0xff] %v5600_v23   ;;  %v6158_v61 = vadd.f32 %v4588_v7, %v1837_v50  ;;  %v6126_v22 = vpop.f32.mrb[6].mxu0 }
 0x212   : > { %v6159_v44 = vadd.f32 %v6126_v22, %v5956_v54  ;;  %v4591_v3 = vpop.f32.mrb[7].mxu0  ;;  %v4744_v28 = vadd.f32 %v6157_v1, %v8275_v0 }
 0x213   : > { %v6160_v51 = vadd.f32 %v4591_v3, %v1840_v18  ;;  %v4742_v27 = vadd.f32 %v6158_v61, %v8275_v0 }
 0x214   : > { %v4745_v45 = vadd.f32 %v6159_v44, %v8275_v0 }
 0x215   : > { %v4743_v53 = vadd.f32 %v6160_v51, %v8275_v0 }
 0x216   : > { %v5615_v21 = vpack.c.bf16 %v4745_v45, %v4744_v28 }
 0x217   : > { %v5610_v47 = vpack.c.bf16 %v4743_v53, %v4742_v27  ;;  %v6129_v46 = vpop.f32.mrb[8].mxu0 }
 0x218   : > { %5679 = vst [vmem:[%s8284_s20 + $0x18] sm:$0xff] %v5615_v21   ;;  %v6161_v15 = vadd.f32 %v6129_v46, %v5959_v11  ;;  %v4604_v60 = vpop.f32.mrb[9].mxu0 }
 0x219   : > { %5678 = vst [vmem:[%s8284_s20 + $0x10] sm:$0xff] %v5610_v47   ;;  %v6162_v20 = vadd.f32 %v4604_v60, %v1853_v32  ;;  %v6130_v42 = vpop.f32.mrb[10].mxu0 }
 0x21a   : > { %v6163_v33 = vadd.f32 %v6130_v42, %v5960_v24  ;;  %v4607_v12 = vpop.f32.mrb[11].mxu0  ;;  %v4748_v57 = vadd.f32 %v6161_v15, %v8275_v0 }
 0x21b   : > { %v6164_v31 = vadd.f32 %v4607_v12, %v1856_v19  ;;  %v4746_v48 = vadd.f32 %v6162_v20, %v8275_v0 }
 0x21c   : > { %v4749_v8 = vadd.f32 %v6163_v33, %v8275_v0 }
 0x21d   : > { %v4747_v62 = vadd.f32 %v6164_v31, %v8275_v0 }
 0x21e   : > { %v5625_v56 = vpack.c.bf16 %v4749_v8, %v4748_v57 }
 0x21f   : > { %v5620_v40 = vpack.c.bf16 %v4747_v62, %v4746_v48  ;;  %v6133_v13 = vpop.f32.mrb[12].mxu0 }
 0x220   : > { %5681 = vst [vmem:[%s8284_s20 + $0x28] sm:$0xff] %v5625_v56   ;;  %v6165_v17 = vadd.f32 %v6133_v13, %v5963_v41  ;;  %v4620_v30 = vpop.f32.mrb[13].mxu0 }
 0x221   : > { %5680 = vst [vmem:[%s8284_s20 + $0x20] sm:$0xff] %v5620_v40   ;;  %v6166_v9 = vadd.f32 %v4620_v30, %v1869_v52  ;;  %v6134_v14 = vpop.f32.mrb[14].mxu0 }
 0x222   : > { %v6167_v63 = vadd.f32 %v6134_v14, %v5964_v5  ;;  %v4623_v4 = vpop.f32.mrb[15].mxu0  ;;  %v4752_v16 = vadd.f32 %v6165_v17, %v8275_v0 }
 0x223   : > { %v6168_v43 = vadd.f32 %v4623_v4, %v1872_v55  ;;  %v4750_v50 = vadd.f32 %v6166_v9, %v8275_v0 }
 0x224   : > { %v4753_v58 = vadd.f32 %v6167_v63, %v8275_v0 }
 0x225   : > { %v4751_v54 = vadd.f32 %v6168_v43, %v8275_v0 }
 0x226   : > { %v5635_v18 = vpack.c.bf16 %v4753_v58, %v4752_v16 }
 0x227   : > { %v5630_v11 = vpack.c.bf16 %v4751_v54, %v4750_v50  ;;  %v6137_v32 = vpop.f32.mrb[16].mxu0 }
 0x228   : > { %5683 = vst [vmem:[%s8284_s20 + $0x38] sm:$0xff] %v5635_v18   ;;  %v6001_v24 = vpop.f32.mrb[16].mxu1  ;;  %v4636_v19 = vpop.f32.mrb[17].mxu0 }
 0x229   : > { %5682 = vst [vmem:[%s8284_s20 + $0x30] sm:$0xff] %v5630_v11   ;;  %v6169_v41 = vadd.f32 %v6137_v32, %v6001_v24  ;;  %v2611_v52 = vpop.f32.mrb[17].mxu1  ;;  %v6138_v5 = vpop.f32.mrb[18].mxu0 }
 0x22a   : > { %v6170_v55 = vadd.f32 %v4636_v19, %v2611_v52  ;;  %v6002_v29 = vpop.f32.mrb[18].mxu1  ;;  %v4639_v2 = vpop.f32.mrb[19].mxu0 }
 0x22b   : > { %v6171_v39 = vadd.f32 %v6138_v5, %v6002_v29  ;;  %v2614_v36 = vpop.f32.mrb[19].mxu1  ;;  %v4756_v59 = vadd.f32 %v6169_v41, %v8275_v0 }
 0x22c   : > { %v6172_v10 = vadd.f32 %v4639_v2, %v2614_v36  ;;  %v4754_v37 = vadd.f32 %v6170_v55, %v8275_v0 }
 0x22d   : > { %v4757_v38 = vadd.f32 %v6171_v39, %v8275_v0 }
 0x22e   : > { %v4755_v26 = vadd.f32 %v6172_v10, %v8275_v0 }
 0x22f   : > { %v5645_v35 = vpack.c.bf16 %v4757_v38, %v4756_v59  ;;  %v6141_v34 = vpop.f32.mrb[20].mxu0 }
 0x230   : > { %v5640_v6 = vpack.c.bf16 %v4755_v26, %v4754_v37  ;;  %v6005_v49 = vpop.f32.mrb[20].mxu1  ;;  %v4652_v23 = vpop.f32.mrb[21].mxu0 }
 0x231   : > { %5685 = vst [vmem:[%s8284_s20 + $0x48] sm:$0xff] %v5645_v35   ;;  %v6173_v25 = vadd.f32 %v6141_v34, %v6005_v49  ;;  %v2627_v1 = vpop.f32.mrb[21].mxu1  ;;  %v6142_v7 = vpop.f32.mrb[22].mxu0 }
 0x232   : > { %5684 = vst [vmem:[%s8284_s20 + $0x40] sm:$0xff] %v5640_v6   ;;  %v6174_v61 = vadd.f32 %v4652_v23, %v2627_v1  ;;  %v6006_v22 = vpop.f32.mrb[22].mxu1  ;;  %v4655_v44 = vpop.f32.mrb[23].mxu0 }
 0x233   : > { %v6175_v3 = vadd.f32 %v6142_v7, %v6006_v22  ;;  %v2630_v51 = vpop.f32.mrb[23].mxu1  ;;  %v4760_v45 = vadd.f32 %v6173_v25, %v8275_v0 }
 0x234   : > { %v6176_v28 = vadd.f32 %v4655_v44, %v2630_v51  ;;  %v4758_v53 = vadd.f32 %v6174_v61, %v8275_v0 }
 0x235   : > { %v4761_v27 = vadd.f32 %v6175_v3, %v8275_v0 }
 0x236   : > { %v4759_v21 = vadd.f32 %v6176_v28, %v8275_v0 }
 0x237   : > { %v5655_v47 = vpack.c.bf16 %v4761_v27, %v4760_v45  ;;  %v6145_v46 = vpop.f32.mrb[24].mxu0 }
 0x238   : > { %v5650_v15 = vpack.c.bf16 %v4759_v21, %v4758_v53  ;;  %v6009_v60 = vpop.f32.mrb[24].mxu1  ;;  %v4668_v20 = vpop.f32.mrb[25].mxu0 }
 0x239   : > { %5687 = vst [vmem:[%s8284_s20 + $0x58] sm:$0xff] %v5655_v47   ;;  %v6177_v42 = vadd.f32 %v6145_v46, %v6009_v60  ;;  %v2643_v33 = vpop.f32.mrb[25].mxu1  ;;  %v6146_v12 = vpop.f32.mrb[26].mxu0 }
 0x23a   : > { %5686 = vst [vmem:[%s8284_s20 + $0x50] sm:$0xff] %v5650_v15   ;;  %v6178_v31 = vadd.f32 %v4668_v20, %v2643_v33  ;;  %v6010_v57 = vpop.f32.mrb[26].mxu1  ;;  %v4671_v8 = vpop.f32.mrb[27].mxu0 }
 0x23b   : > { %v6179_v48 = vadd.f32 %v6146_v12, %v6010_v57  ;;  %v2646_v62 = vpop.f32.mrb[27].mxu1  ;;  %v4764_v40 = vadd.f32 %v6177_v42, %v8275_v0 }
 0x23c   : > { %v6180_v56 = vadd.f32 %v4671_v8, %v2646_v62  ;;  %v4762_v17 = vadd.f32 %v6178_v31, %v8275_v0 }
 0x23d   : > { %v4765_v13 = vadd.f32 %v6179_v48, %v8275_v0 }
 0x23e   : > { %v4763_v30 = vadd.f32 %v6180_v56, %v8275_v0 }
 0x23f   : > { %v5665_v9 = vpack.c.bf16 %v4765_v13, %v4764_v40  ;;  %v6149_v14 = vpop.f32.mrb[28].mxu0 }
 0x240   : > { %v5660_v63 = vpack.c.bf16 %v4763_v30, %v4762_v17  ;;  %v6013_v4 = vpop.f32.mrb[28].mxu1  ;;  %v4684_v43 = vpop.f32.mrb[29].mxu0 }
 0x241   : > { %5689 = vst [vmem:[%s8284_s20 + $0x68] sm:$0xff] %v5665_v9   ;;  %v6181_v16 = vadd.f32 %v6149_v14, %v6013_v4  ;;  %v2659_v58 = vpop.f32.mrb[29].mxu1  ;;  %v6150_v50 = vpop.f32.mrb[30].mxu0 }
 0x242   : > { %5688 = vst [vmem:[%s8284_s20 + $0x60] sm:$0xff] %v5660_v63   ;;  %v6182_v54 = vadd.f32 %v4684_v43, %v2659_v58  ;;  %v6014_v18 = vpop.f32.mrb[30].mxu1  ;;  %v4687_v11 = vpop.f32.mrb[31].mxu0 }
 0x243   : > { %v6183_v32 = vadd.f32 %v6150_v50, %v6014_v18  ;;  %v2662_v24 = vpop.f32.mrb[31].mxu1  ;;  %v4768_v41 = vadd.f32 %v6181_v16, %v8275_v0 }
 0x244   : > { %v6184_v19 = vadd.f32 %v4687_v11, %v2662_v24  ;;  %v4766_v5 = vadd.f32 %v6182_v54, %v8275_v0 }
 0x245   : > { %v4769_v52 = vadd.f32 %v6183_v32, %v8275_v0 }
 0x246   : > { %v4767_v55 = vadd.f32 %v6184_v19, %v8275_v0 }
 0x247   : > { %v5675_v29 = vpack.c.bf16 %v4769_v52, %v4768_v41 }
 0x248   : > { %v5670_v2 = vpack.c.bf16 %v4767_v55, %v4766_v5 }
 0x249   : > { %5691 = vst [vmem:[%s8284_s20 + $0x78] sm:$0xff] %v5675_v29  }
 0x24a   : > { %5690 = vst [vmem:[%s8284_s20 + $0x70] sm:$0xff] %v5670_v2  }
 0x24b PF: > { %s13_s12 = sadd.s32 1, %s6539_s12  }
 0x24c   : > { %p10_p4 = scmp.ge.s32.totalorder %s13_s12, 4  }
 0x24e   :  { %12 = sbr.rel (!%p10_p4) target bundleno = 1 (0x1), region = 72 }

// kernel: cnn_forward.6
= control target key start
LH: loop header
LB: loop body
LE: loop exit
PB: predicated region body
PF: predicated region fallthrough
CT: control target
= control target key end

     0   :  { %s5170_s12 = smov 0   ;;  %s6170_s0 = inlined_call_operand.vmem [shape: bf16[8,5,9,128], index: 0, kind: input, shape index: {}]   ;;  %s6171_s1 = inlined_call_operand.vmem [shape: bf16[9,128,128], index: 1, kind: input, shape index: {}]   ;;  %s6172_s2 = inlined_call_operand.vmem [shape: f32[1,128], index: 2, kind: input, shape index: {}]   ;;  %s6173_s3 = inlined_call_operand.vmem [shape: bf16[2,32,128], index: 3, kind: output, shape index: {}]  }
   0x1 LB: > { %s5176_s13 = sadd.s32 4294967295, %s5148_s12   ;;  %p3453_p0 = scmp.ge.s32.totalorder %s5148_s12, 1  ;;  %s5148_s12 = sphi %s5170_s12, %s13_s12  }
   0x2   : > { %p139_p1 = scmp.lt.s32.totalorder %s5148_s12, 3 }
   0x4   : > { %p140_p2 = pnand %p3453_p0, %p139_p1 }
   0x5   : > { %v5014_v0 = vld [vmem:[%s6171_s1 + $0x40] sm:$0xff] (!%p140_p2)   ;;  %s3454_s16 = sshll.u32 (!%p140_p2), %s5176_s13, 2  ;;  %v5015_v1 = vld [vmem:[%s6171_s1 + $0x48] sm:$0xff] (!%p140_p2)   ;;  %v5016_v2 = vld [vmem:[%s6171_s1 + $0x50] sm:$0xff] (!%p140_p2)   ;;  %vm445_vm0 = vsmask.f32 (!%p140_p2), 3328 }
   0x6   : > { %143 = sbr.rel (%p140_p2) target bundleno = 806 (0x326), region = 32  ;;  %p165_p3 = scmp.lt.s32.totalorder (!%p140_p2), %s3454_s16, 7  ;;  %4157 = vmatprep.subr.bf16.mxu0 (!%p140_p2), %v5014_v0  ;;  %4337 = vmatprep.subr.bf16.mxu1 (!%p140_p2), %v5014_v0  ;;  %v5017_v3 = vld [vmem:[%s6171_s1 + $0x58] sm:$0xff] (!%p140_p2)   ;;  %v5018_v8 = vld [vmem:[%s6171_s1 + $0x60] sm:$0xff] (!%p140_p2)   ;;  %vm446_vm1 = vsmask.f32 (!%p140_p2), 7440 }
   0x7   : > { %4158 = vmatpush3.bf16.msra.mxu0 (!%p140_p2), %v5014_v0  ;;  %4338 = vmatpush3.bf16.msra.mxu1 (!%p140_p2), %v5014_v0  ;;  %v5019_v24 = vld [vmem:[%s6171_s1 + $0x68] sm:$0xff] (!%p140_p2)   ;;  %vm5218_vm2 = vmor (!%p140_p2), %vm445_vm0, %vm446_vm1  ;;  %v5020_v39 = vld [vmem:[%s6171_s1 + $0x70] sm:$0xff] (!%p140_p2)   ;;  %p171_p4 = scmp.lt.s32.totalorder (!%p140_p2), %s5176_s13, 1 }
   0x8   : > { %4159 = vmatprep.subr.bf16.mxu0 (!%p140_p2), %v5015_v1  ;;  %4339 = vmatprep.subr.bf16.mxu1 (!%p140_p2), %v5015_v1  ;;  %v5021_v52 = vld [vmem:[%s6171_s1 + $0x78] sm:$0xff] (!%p140_p2)   ;;  %v5023_v55 = vld [vmem:[%s6171_s1] sm:$0xff] (!%p140_p2)   ;;  %v5025_v58 = vld [vmem:[%s6171_s1 + $0x8] sm:$0xff] (!%p140_p2)  }
   0x9   : > { %v5026_v60 = vld [vmem:[%s6171_s1 + $0x10] sm:$0xff] (!%p140_p2)   ;;  %v5027_v61 = vld [vmem:[%s6171_s1 + $0x18] sm:$0xff] (!%p140_p2)   ;;  %v5028_v0 = vld [vmem:[%s6171_s1 + $0x20] sm:$0xff] (!%p140_p2)  }
   0xb   : > { %4160 = vmatpush3.bf16.msra.mxu0 (!%p140_p2), %v5015_v1  ;;  %4340 = vmatpush3.bf16.msra.mxu1 (!%p140_p2), %v5015_v1 }
   0xc   : > { %4161 = vmatprep.subr.bf16.mxu0 (!%p140_p2), %v5016_v2  ;;  %4341 = vmatprep.subr.bf16.mxu1 (!%p140_p2), %v5016_v2 }
   0xd   : > { %s6177_s16 = smov (!%p165_p3, %s3454_s16), 7  ;;  %s6179_s13 = smov (!%p171_p4, %s5176_s13), 1 }
   0xe   : > { %s5005_s21 = smul.u32 40, %s6177_s16  ;;  %s3781_s23 = sshll.u32 %s6179_s13, 4 }
   0xf   : > { %4162 = vmatpush3.bf16.msra.mxu0 %v5016_v2  ;;  %4342 = vmatpush3.bf16.msra.mxu1 %v5016_v2  ;;  %s175_s27 = scalar_lea.vmem %s6173_s3, %s3781_s23 }
  0x10   : > { %s5196_s26 = scalar_lea.vmem %s6170_s0, %s5005_s21  ;;  %4163 = vmatprep.subr.bf16.mxu0 %v5017_v3  ;;  %4343 = vmatprep.subr.bf16.mxu1 %v5017_v3 }
  0x11   : > { %v5199_v4 = vld [vmem:[%s5196_s26 + $0x28] ss:$8 sps:$4 sm:$0xff]   ;;  %v437_v5 = vld [vmem:[%s5196_s26] sm:$0xf]  ;;  %v438_v6 = vld [vmem:[%s5196_s26 + $0x4] sm:$0x1] }
  0x12   : > { %4173 = vmatprep.mubr.bf16.mxu0 %v5199_v4  ;;  %v439_v7 = vld [vmem:[%s5196_s26 + $0x8] sm:$0xf]  ;;  %v440_v9 = vld [vmem:[%s5196_s26 + $0xc] sm:$0x1]  ;;  %v449_v10 = vshrl.u32 %v437_v5, 16  ;;  %v452_v11 = vshll.u32 %v437_v5, 16 }
  0x13   : > { %v458_v12 = vshll.u32 %v438_v6, 16  ;;  %v463_v13 = vshrl.u32 %v439_v7, 16  ;;  %v466_v14 = vshll.u32 %v439_v7, 16  ;;  %v472_v15 = vshll.u32 %v440_v9, 16  ;;  %v441_v19 = vld [vmem:[%s5196_s26 + $0x10] sm:$0xf]  ;;  %4164 = vmatpush3.bf16.msra.mxu0 %v5017_v3  ;;  %4344 = vmatpush3.bf16.msra.mxu1 %v5017_v3 }
  0x14   : > { %v451_v16 = vrot.slane %v449_v10, 4  ;;  %v454_v17 = vrot.slane %v452_v11, 5  ;;  %v442_v22 = vld [vmem:[%s5196_s26 + $0x14] sm:$0x1]  ;;  %v443_v23 = vld [vmem:[%s5196_s26 + $0x18] sm:$0xf]  ;;  %4165 = vmatprep.subr.bf16.mxu0 %v5018_v8  ;;  %4345 = vmatprep.subr.bf16.mxu1 %v5018_v8 }
  0x15   : > { %v465_v18 = vrot.slane %v463_v13, 4  ;;  %v460_v20 = vrot.slane %v458_v12, 5  ;;  %v468_v21 = vrot.slane %v466_v14, 5  ;;  %v474_v26 = vrot.slane %v472_v15, 5  ;;  %v444_v27 = vld [vmem:[%s5196_s26 + $0x1c] sm:$0x1] }
  0x16   : > { %v455_v25 = vor.u32 %v454_v17, %v451_v16  ;;  %v477_v28 = vshrl.u32 %v441_v19, 16  ;;  %v480_v29 = vshll.u32 %v441_v19, 16  ;;  %v486_v32 = vshll.u32 %v442_v22, 16  ;;  %v5243_v56 = vld [vmem:[%s5196_s26 + $0x38] ss:$8 sps:$4 sm:$0xff]   ;;  %v5029_v5 = vld [vmem:[%s6171_s1 + $0x28] sm:$0xff]  }
  0x17   : > { %v469_v31 = vor.u32 %v468_v21, %v465_v18  ;;  %v491_v33 = vshrl.u32 %v443_v23, 16  ;;  %v494_v34 = vshll.u32 %v443_v23, 16  ;;  %v500_v38 = vshll.u32 %v444_v27, 16  ;;  %4166 = vmatpush3.bf16.msra.mxu0 %v5018_v8  ;;  %4346 = vmatpush3.bf16.msra.mxu1 %v5018_v8  ;;  %v5032_v59 = vld [vmem:[%s5196_s26] ss:$8 sps:$4 sm:$0xff]   ;;  %v5030_v12 = vld [vmem:[%s6171_s1 + $0x30] sm:$0xff]  }
  0x18   : > { %v456_v35 = vrot.slane %v455_v25, 4  ;;  %v479_v36 = vrot.slane %v477_v28, 4  ;;  %v482_v37 = vrot.slane %v480_v29, 5  ;;  %4167 = vmatprep.subr.bf16.mxu0 %v5019_v24  ;;  %4347 = vmatprep.subr.bf16.mxu1 %v5019_v24  ;;  %v488_v48 = vrot.slane %v486_v32, 5  ;;  %v3712_v62 = vld [vmem:[%s5196_s26 + $0x28] sm:$0xf] }
  0x19   : > { %v470_v40 = vrot.slane %v469_v31, 4  ;;  %v493_v41 = vrot.slane %v491_v33, 4  ;;  %v496_v42 = vrot.slane %v494_v34, 5  ;;  %v502_v49 = vrot.slane %v500_v38, 5  ;;  %v3714_v63 = vld [vmem:[%s5196_s26 + $0x30] sm:$0xf] }
  0x1a   : > { %v461_v43 = vsel %vm5218_vm2, %v456_v35, %v460_v20  ;;  %v483_v44 = vor.u32 %v482_v37, %v479_v36  ;;  %v1657_v1 = vshrl.u32 %v3712_v62, 16  ;;  %v1660_v2 = vshll.u32 %v3712_v62, 16  ;;  %v3713_v6 = vld [vmem:[%s5196_s26 + $0x2c] sm:$0x1]  ;;  %v3715_v7 = vld [vmem:[%s5196_s26 + $0x34] sm:$0x1] }
  0x1b   : > { %v475_v45 = vsel %vm5218_vm2, %v470_v40, %v474_v26  ;;  %v497_v46 = vor.u32 %v496_v42, %v493_v41  ;;  %4168 = vmatpush3.bf16.msra.mxu0 %v5019_v24  ;;  %4348 = vmatpush3.bf16.msra.mxu1 %v5019_v24  ;;  %v1671_v3 = vshrl.u32 %v3714_v63, 16  ;;  %v1666_v13 = vshll.u32 %v3713_v6, 16  ;;  %v5031_v17 = vld [vmem:[%s6171_s1 + $0x38] sm:$0xff]   ;;  %v5033_v22 = vld [vmem:[%s6171_s1 + $0x80] sm:$0xff]   ;;  %v5035_v26 = vld [vmem:[%s6171_s1 + $0x88] sm:$0xff]  }
  0x1c   : > { %v5229_v47 = vcombine.low %v461_v43, %v475_v45  ;;  %v484_v50 = vrot.slane %v483_v44, 4  ;;  %4169 = vmatprep.subr.bf16.mxu0 %v5020_v39  ;;  %4349 = vmatprep.subr.bf16.mxu1 %v5020_v39  ;;  %v1659_v8 = vrot.slane %v1657_v1, 4  ;;  %v1662_v9 = vrot.slane %v1660_v2, 5  ;;  %v5034_v23 = vld [vmem:[%s5196_s26 + $0x10] ss:$8 sps:$4 sm:$0xff]   ;;  %v5038_v37 = vld [vmem:[%s6171_s1 + $0xa0] sm:$0xff]  }
  0x1d   : > { %v498_v51 = vrot.slane %v497_v46, 4  ;;  %v1673_v10 = vrot.slane %v1671_v3, 4  ;;  %v1680_v14 = vshll.u32 %v3715_v7, 16  ;;  %v1668_v18 = vrot.slane %v1666_v13, 5  ;;  %v5036_v28 = vld [vmem:[%s6171_s1 + $0x90] sm:$0xff]   ;;  %v5037_v29 = vld [vmem:[%s6171_s1 + $0x98] sm:$0xff]  }
  0x1e   : > { %4353 = vmatprep.mubr.bf16.mxu1 %v5229_v47  ;;  %v489_v53 = vsel %vm5218_vm2, %v484_v50, %v488_v48  ;;  %v1663_v15 = vor.u32 %v1662_v9, %v1659_v8  ;;  %v3716_v31 = vld [vmem:[%s5196_s26 + $0x38] sm:$0xf]  ;;  %v3718_v32 = vld [vmem:[%s5196_s26 + $0x40] sm:$0xf]  ;;  %v3717_v38 = vld [vmem:[%s5196_s26 + $0x3c] sm:$0x1] }
  0x1f   : > { %4170 = vmatpush3.bf16.msra.mxu0 %v5020_v39  ;;  %4350 = vmatpush3.bf16.msra.mxu1 %v5020_v39  ;;  %v503_v54 = vsel %vm5218_vm2, %v498_v51, %v502_v49  ;;  %v1682_v19 = vrot.slane %v1680_v14, 5  ;;  %v1685_v33 = vshrl.u32 %v3716_v31, 16  ;;  %v1688_v34 = vshll.u32 %v3716_v31, 16  ;;  %v3719_v39 = vld [vmem:[%s5196_s26 + $0x44] sm:$0x1]  ;;  %v5039_v44 = vld [vmem:[%s6171_s1 + $0xa8] sm:$0xff]  }
  0x20   : > { %4171 = vmatprep.subr.bf16.mxu0 %v5021_v52  ;;  %4351 = vmatprep.subr.bf16.mxu1 %v5021_v52  ;;  %v5245_v57 = vcombine.low %v489_v53, %v503_v54  ;;  %v1664_v20 = vrot.slane %v1663_v15, 4  ;;  %v1699_v35 = vshrl.u32 %v3718_v32, 16  ;;  %v1702_v36 = vshll.u32 %v3718_v32, 16  ;;  %v5040_v49 = vld [vmem:[%s6171_s1 + $0xb0] sm:$0xff]   ;;  %v5041_v54 = vld [vmem:[%s6171_s1 + $0xb8] sm:$0xff]   ;;  %v5046_v1 = vld [vmem:[%s6171_s1 + $0xe0] sm:$0xff]  }
  0x21   : > { %v1687_v40 = vrot.slane %v1685_v33, 4  ;;  %v1690_v41 = vrot.slane %v1688_v34, 5  ;;  %v1694_v45 = vshll.u32 %v3717_v38, 16  ;;  %v1708_v46 = vshll.u32 %v3719_v39, 16  ;;  %v5323_v62 = vld [vmem:[%s5196_s26 + $0x78] ss:$8 sps:$4 sm:$0xff]  }
  0x22   : > { %v1669_v24 = vsel %vm5218_vm2, %v1664_v20, %v1668_v18  ;;  %v1701_v42 = vrot.slane %v1699_v35, 4  ;;  %v1704_v43 = vrot.slane %v1702_v36, 5  ;;  %v3586_v2 = vld [vmem:[%s5196_s26 + $0x58] sm:$0xf]  ;;  %v5047_v7 = vld [vmem:[%s6171_s1 + $0xe8] sm:$0xff]   ;;  %v5048_v14 = vld [vmem:[%s6171_s1 + $0xf0] sm:$0xff]  }
  0x23   : > { %4172 = vmatpush3.bf16.msra.mxu0 %v5021_v52  ;;  %4352 = vmatpush3.bf16.msra.mxu1 %v5021_v52  ;;  %v1696_v50 = vrot.slane %v1694_v45, 5  ;;  %v1710_v51 = vrot.slane %v1708_v46, 5  ;;  %v926_v6 = vshll.u32 %v3586_v2, 16  ;;  %v3587_v13 = vld [vmem:[%s5196_s26 + $0x5c] sm:$0x1]  ;;  %v5056_v32 = vld [vmem:[%s6171_s1 + $0x110] sm:$0xff]  }
  0x24   : > { %4177 = vmatprep.subr.bf16.mxu0 %v5023_v55  ;;  %4357 = vmatprep.subr.bf16.mxu1 %v5023_v55  ;;  %v1705_v48 = vor.u32 %v1704_v43, %v1701_v42  ;;  %v932_v18 = vshll.u32 %v3587_v13, 16  ;;  %v3588_v33 = vld [vmem:[%s5196_s26 + $0x60] sm:$0xf]  ;;  %v5057_v34 = vld [vmem:[%s6171_s1 + $0x118] sm:$0xff]   ;;  %v3590_v35 = vld [vmem:[%s5196_s26 + $0x68] sm:$0xf] }
  0x25   : > { %v937_v36 = vshrl.u32 %v3588_v33, 16  ;;  %v951_v38 = vshrl.u32 %v3590_v35, 16  ;;  %v954_v39 = vshll.u32 %v3590_v35, 16  ;;  %v5058_v42 = vld [vmem:[%s6171_s1 + $0x120] sm:$0xff]  }
  0x26   : > { %4174 = vmatmul.mubr.bf16.vlgmr.msra.gmra.mrb[0].mxu0 %v5243_v56  ;;  %4354 = vmatmul.mubr.bf16.vlgmr.msra.gmra.mrb[0].mxu1 %v5245_v57  ;;  %v1706_v53 = vrot.slane %v1705_v48, 4  ;;  %v5470_v35 = vld [vmem:[%s6171_s1 + $0x160] sm:$0xff]  }
  0x27   : > { %4178 = vmatpush3.bf16.msra.mxu0 %v5023_v55  ;;  %4358 = vmatpush3.bf16.msra.mxu1 %v5023_v55  ;;  %v5042_v55 = vld [vmem:[%s6171_s1 + $0xc0] sm:$0xff]  }
  0x28   : > { %4179 = vmatprep.subr.bf16.mxu0 %v5025_v58  ;;  %4359 = vmatprep.subr.bf16.mxu1 %v5025_v58 }
  0x29   : > { %4193 = vmatprep.mubr.bf16.mxu0 %v5032_v59  ;;  %4373 = vmatprep.mubr.bf16.mxu1 %v5199_v4  ;;  %v1674_v4 = vshll.u32 %v3714_v63, 16  ;;  %v5044_v63 = vld [vmem:[%s6171_s1 + $0xd0] sm:$0xff]  }
  0x2b   : > { %4180 = vmatpush3.bf16.msra.mxu0 %v5025_v58  ;;  %4360 = vmatpush3.bf16.msra.mxu1 %v5025_v58  ;;  %v1676_v11 = vrot.slane %v1674_v4, 5  ;;  %v1711_v58 = vsel %vm5218_vm2, %v1706_v53, %v1710_v51  ;;  %v5387_v51 = vld [vmem:[%s6171_s1 + $0x128] sm:$0xff]  }
  0x2c   : > { %4181 = vmatprep.subr.bf16.mxu0 %v5026_v60  ;;  %4361 = vmatprep.subr.bf16.mxu1 %v5026_v60  ;;  %v3591_v53 = vld [vmem:[%s5196_s26 + $0x6c] sm:$0x1] }
  0x2d   : > { %v1677_v16 = vor.u32 %v1676_v11, %v1673_v10  ;;  %v928_v11 = vrot.slane %v926_v6, 5 }
  0x2f   : > { %4182 = vmatpush3.bf16.msra.mxu0 %v5026_v60  ;;  %4362 = vmatpush3.bf16.msra.mxu1 %v5026_v60  ;;  %v1678_v21 = vrot.slane %v1677_v16, 4  ;;  %v5043_v60 = vld [vmem:[%s6171_s1 + $0xc8] sm:$0xff]  }
  0x30   : > { %4183 = vmatprep.subr.bf16.mxu0 %v5027_v61  ;;  %4363 = vmatprep.subr.bf16.mxu1 %v5027_v61 }
  0x31   : > { %v1683_v25 = vsel %vm5218_vm2, %v1678_v21, %v1682_v19  ;;  %v5049_v19 = vld [vmem:[%s6171_s1 + $0xf8] sm:$0xff]  }
  0x32   : > { %v3720_v27 = vcombine.low %v1669_v24, %v1683_v25  ;;  %v5051_v24 = vld [vmem:[%s6171_s1 + $0x100] sm:$0xff]  }
  0x33   : > { %4184 = vmatpush3.bf16.msra.mxu0 %v5027_v61  ;;  %4364 = vmatpush3.bf16.msra.mxu1 %v5027_v61  ;;  %v5050_v61 = vld [vmem:[%s5196_s26 + $0x50] ss:$8 sps:$4 sm:$0xff]   ;;  %v5353_v25 = vld [vmem:[%s5196_s26 + $0x60] ss:$8 sps:$4 sm:$0xff]  }
  0x34   : > { %4185 = vmatprep.subr.bf16.mxu0 %v5028_v0  ;;  %4365 = vmatprep.subr.bf16.mxu1 %v5028_v0 }
  0x37   : > { %4186 = vmatpush3.bf16.msra.mxu0 %v5028_v0  ;;  %4366 = vmatpush3.bf16.msra.mxu1 %v5028_v0  ;;  %v5045_v0 = vld [vmem:[%s6171_s1 + $0xd8] sm:$0xff]  }
  0x38   : > { %4187 = vmatprep.subr.bf16.mxu0 %v5029_v5  ;;  %4367 = vmatprep.subr.bf16.mxu1 %v5029_v5 }
  0x3b   : > { %4188 = vmatpush3.bf16.msra.mxu0 %v5029_v5  ;;  %4368 = vmatpush3.bf16.msra.mxu1 %v5029_v5  ;;  %v923_v5 = vshrl.u32 %v3586_v2, 16 }
  0x3c   : > { %4189 = vmatprep.subr.bf16.mxu0 %v5030_v12  ;;  %4369 = vmatprep.subr.bf16.mxu1 %v5030_v12 }
  0x3d   : > { %v925_v10 = vrot.slane %v923_v5, 4 }
  0x3f   : > { %4190 = vmatpush3.bf16.msra.mxu0 %v5030_v12  ;;  %4370 = vmatpush3.bf16.msra.mxu1 %v5030_v12  ;;  %v3585_v12 = vld [vmem:[%s5196_s26 + $0x54] sm:$0x1] }
  0x40   : > { %4191 = vmatprep.subr.bf16.mxu0 %v5031_v17  ;;  %4371 = vmatprep.subr.bf16.mxu1 %v5031_v17  ;;  %v918_v16 = vshll.u32 %v3585_v12, 16 }
  0x42   : > { %v920_v21 = vrot.slane %v918_v16, 5 }
  0x43   : > { %4192 = vmatpush3.bf16.msra.mxu0 %v5031_v17  ;;  %4372 = vmatpush3.bf16.msra.mxu1 %v5031_v17  ;;  %v929_v17 = vor.u32 %v928_v11, %v925_v10  ;;  %v5407_v10 = vld [vmem:[%s6171_s1 + $0x138] sm:$0xff]  }
  0x44   : > { %4197 = vmatprep.subr.bf16.mxu0 %v5033_v22  ;;  %4377 = vmatprep.subr.bf16.mxu1 %v5033_v22 }
  0x46   : > { %4194 = vmatmul.mubr.bf16.vlgmr.msra.gmra.mrb[0].mxu0 %v5034_v23  ;;  %4374 = vmatmul.mubr.bf16.vlgmr.msra.gmra.mrb[0].mxu1 %v5243_v56  ;;  %v934_v23 = vrot.slane %v932_v18, 5 }
  0x47   : > { %4198 = vmatpush3.bf16.msra.mxu0 %v5033_v22  ;;  %4378 = vmatpush3.bf16.msra.mxu1 %v5033_v22  ;;  %v930_v22 = vrot.slane %v929_v17, 4  ;;  %v5420_v17 = vld [vmem:[%s6171_s1 + $0x140] sm:$0xff]  }
  0x48   : > { %4199 = vmatprep.subr.bf16.mxu0 %v5035_v26  ;;  %4379 = vmatprep.subr.bf16.mxu1 %v5035_v26 }
  0x49   : > { %4213 = vmatprep.mubr.bf16.mxu0 %v5229_v47  ;;  %4393 = vmatprep.mubr.bf16.mxu1 %v3720_v27  ;;  %v1691_v47 = vor.u32 %v1690_v41, %v1687_v40  ;;  %v3722_v40 = vld [vmem:[%s5196_s26 + $0x78] sm:$0xf]  ;;  %v3724_v41 = vld [vmem:[%s5196_s26 + $0x80] sm:$0xf] }
  0x4a   : > { %v1888_v43 = vshrl.u32 %v3722_v40, 16  ;;  %v1902_v45 = vshrl.u32 %v3724_v41, 16  ;;  %v1905_v46 = vshll.u32 %v3724_v41, 16  ;;  %v3727_v41 = vld [vmem:[%s5196_s26 + $0x8c] sm:$0x1] }
  0x4b   : > { %4200 = vmatpush3.bf16.msra.mxu0 %v5035_v26  ;;  %4380 = vmatpush3.bf16.msra.mxu1 %v5035_v26  ;;  %v1692_v52 = vrot.slane %v1691_v47, 4  ;;  %v5356_v26 = vld [vmem:[%s5196_s26 + $0x88] ss:$8 sps:$4 sm:$0xff]   ;;  %v939_v47 = vrot.slane %v937_v36, 4 }
  0x4c   : > { %4201 = vmatprep.subr.bf16.mxu0 %v5036_v28  ;;  %4381 = vmatprep.subr.bf16.mxu1 %v5036_v28 }
  0x4d   : > { %v1697_v56 = vsel %vm5218_vm2, %v1692_v52, %v1696_v50  ;;  %v956_v50 = vrot.slane %v954_v39, 5  ;;  %v3589_v52 = vld [vmem:[%s5196_s26 + $0x64] sm:$0x1] }
  0x4e   : > { %v3721_v59 = vcombine.low %v1697_v56, %v1711_v58  ;;  %v1904_v56 = vrot.slane %v1902_v45, 4  ;;  %v1907_v58 = vrot.slane %v1905_v46, 5 }
  0x4f   : > { %4202 = vmatpush3.bf16.msra.mxu0 %v5036_v28  ;;  %4382 = vmatpush3.bf16.msra.mxu1 %v5036_v28  ;;  %v935_v28 = vsel %vm5218_vm2, %v930_v22, %v934_v23  ;;  %v5448_v23 = vld [vmem:[%s6171_s1 + $0x150] sm:$0xff]  }
  0x50   : > { %4203 = vmatprep.subr.bf16.mxu0 %v5037_v29  ;;  %4383 = vmatprep.subr.bf16.mxu1 %v5037_v29 }
  0x53   : > { %4204 = vmatpush3.bf16.msra.mxu0 %v5037_v29  ;;  %4384 = vmatpush3.bf16.msra.mxu1 %v5037_v29  ;;  %v5055_v29 = vld [vmem:[%s6171_s1 + $0x108] sm:$0xff]  }
  0x54   : > { %4205 = vmatprep.subr.bf16.mxu0 %v5038_v37  ;;  %4385 = vmatprep.subr.bf16.mxu1 %v5038_v37 }
  0x57   : > { %4206 = vmatpush3.bf16.msra.mxu0 %v5038_v37  ;;  %4386 = vmatpush3.bf16.msra.mxu1 %v5038_v37  ;;  %v940_v37 = vshll.u32 %v3588_v33, 16 }
  0x58   : > { %4207 = vmatprep.subr.bf16.mxu0 %v5039_v44  ;;  %4387 = vmatprep.subr.bf16.mxu1 %v5039_v44 }
  0x59   : > { %v942_v48 = vrot.slane %v940_v37, 5 }
  0x5b   : > { %4208 = vmatpush3.bf16.msra.mxu0 %v5039_v44  ;;  %4388 = vmatpush3.bf16.msra.mxu1 %v5039_v44  ;;  %v1891_v44 = vshll.u32 %v3722_v40, 16  ;;  %v5479_v40 = vld [vmem:[%s6171_s1 + $0x168] sm:$0xff]  }
  0x5c   : > { %4209 = vmatprep.subr.bf16.mxu0 %v5040_v49  ;;  %4389 = vmatprep.subr.bf16.mxu1 %v5040_v49 }
  0x5f   : > { %4210 = vmatpush3.bf16.msra.mxu0 %v5040_v49  ;;  %4390 = vmatpush3.bf16.msra.mxu1 %v5040_v49  ;;  %v953_v49 = vrot.slane %v951_v38, 4 }
  0x60   : > { %4211 = vmatprep.subr.bf16.mxu0 %v5041_v54  ;;  %4391 = vmatprep.subr.bf16.mxu1 %v5041_v54 }
  0x63   : > { %4212 = vmatpush3.bf16.msra.mxu0 %v5041_v54  ;;  %4392 = vmatpush3.bf16.msra.mxu1 %v5041_v54  ;;  %v1890_v54 = vrot.slane %v1888_v43, 4 }
  0x64   : > { %4217 = vmatprep.subr.bf16.mxu0 %v5042_v55  ;;  %4397 = vmatprep.subr.bf16.mxu1 %v5042_v55 }
  0x66   : > { %4214 = vmatmul.mubr.bf16.vlgmr.msra.gmra.mrb[0].mxu0 %v5245_v57  ;;  %4394 = vmatmul.mubr.bf16.vlgmr.msra.gmra.mrb[0].mxu1 %v3721_v59  ;;  %v3584_v57 = vld [vmem:[%s5196_s26 + $0x50] sm:$0xf]  ;;  %v943_v59 = vor.u32 %v942_v48, %v939_v47 }
  0x67   : > { %4218 = vmatpush3.bf16.msra.mxu0 %v5042_v55  ;;  %4398 = vmatpush3.bf16.msra.mxu1 %v5042_v55  ;;  %v909_v3 = vshrl.u32 %v3584_v57, 16  ;;  %v912_v4 = vshll.u32 %v3584_v57, 16  ;;  %v1893_v55 = vrot.slane %v1891_v44, 5  ;;  %v3725_v57 = vld [vmem:[%s5196_s26 + $0x84] sm:$0x1]  ;;  %v1925_v44 = vshll.u32 %v3727_v41, 16 }
  0x68   : > { %4219 = vmatprep.subr.bf16.mxu0 %v5043_v60  ;;  %4399 = vmatprep.subr.bf16.mxu1 %v5043_v60  ;;  %v1911_v5 = vshll.u32 %v3725_v57, 16  ;;  %v944_v6 = vrot.slane %v943_v59, 4  ;;  %v5490_v47 = vld [vmem:[%s6171_s1 + $0x170] sm:$0xff]   ;;  %v5523_v59 = vld [vmem:[%s6171_s1 + $0x188] sm:$0xff]  }
  0x69   : > { %4233 = vmatprep.mubr.bf16.mxu0 %v5050_v61  ;;  %4413 = vmatprep.mubr.bf16.mxu1 %v5323_v62  ;;  %v911_v8 = vrot.slane %v909_v3, 4  ;;  %v914_v9 = vrot.slane %v912_v4, 5  ;;  %v957_v61 = vor.u32 %v956_v50, %v953_v49  ;;  %v1894_v2 = vor.u32 %v1893_v55, %v1890_v54  ;;  %v3678_v57 = vld [vmem:[%s5196_s26 + $0x8] sm:$0xf] }
  0x6a   : > { %v1908_v4 = vor.u32 %v1907_v58, %v1904_v56  ;;  %v1927_v49 = vrot.slane %v1925_v44, 5  ;;  %v5512_v56 = vld [vmem:[%s6171_s1 + $0x180] sm:$0xff]  }
  0x6b   : > { %4220 = vmatpush3.bf16.msra.mxu0 %v5043_v60  ;;  %4400 = vmatpush3.bf16.msra.mxu1 %v5043_v60  ;;  %v915_v15 = vor.u32 %v914_v9, %v911_v8  ;;  %v946_v60 = vshll.u32 %v3589_v52, 16  ;;  %v958_v8 = vrot.slane %v957_v61, 4  ;;  %v1895_v11 = vrot.slane %v1894_v2, 4  ;;  %v5529_v61 = vld [vmem:[%s5196_s26 + $0x30] ss:$8 sps:$4 sm:$0xff]  }
  0x6c   : > { %4221 = vmatprep.subr.bf16.mxu0 %v5044_v63  ;;  %4401 = vmatprep.subr.bf16.mxu1 %v5044_v63  ;;  %v1909_v13 = vrot.slane %v1908_v4, 4  ;;  %v3680_v2 = vld [vmem:[%s5196_s26 + $0x10] sm:$0xf]  ;;  %v1369_v4 = vshrl.u32 %v3678_v57, 16 }
  0x6d   : > { %v916_v20 = vrot.slane %v915_v15, 4 }
  0x6f   : > { %4222 = vmatpush3.bf16.msra.mxu0 %v5044_v63  ;;  %4402 = vmatpush3.bf16.msra.mxu1 %v5044_v63  ;;  %v921_v27 = vsel %vm5218_vm2, %v916_v20, %v920_v21  ;;  %v960_v63 = vshll.u32 %v3591_v53, 16  ;;  %v5435_v21 = vld [vmem:[%s6171_s1 + $0x148] sm:$0xff]   ;;  %v5499_v53 = vld [vmem:[%s6171_s1 + $0x178] sm:$0xff]  }
  0x70   : > { %4223 = vmatprep.subr.bf16.mxu0 %v5045_v0  ;;  %4403 = vmatprep.subr.bf16.mxu1 %v5045_v0  ;;  %v5365_v31 = vcombine.low %v921_v27, %v935_v28  ;;  %v3726_v27 = vld [vmem:[%s5196_s26 + $0x88] sm:$0xf]  ;;  %v3728_v28 = vld [vmem:[%s5196_s26 + $0x90] sm:$0xf] }
  0x71   : > { %v962_v9 = vrot.slane %v960_v63, 5  ;;  %v1930_v33 = vshrl.u32 %v3728_v28, 16  ;;  %v5540_v63 = vld [vmem:[%s6171_s1 + $0x190] sm:$0xff]  }
  0x73   : > { %4224 = vmatpush3.bf16.msra.mxu0 %v5045_v0  ;;  %4404 = vmatpush3.bf16.msra.mxu1 %v5045_v0  ;;  %v3723_v0 = vld [vmem:[%s5196_s26 + $0x7c] sm:$0x1]  ;;  %v963_v16 = vsel %vm5218_vm2, %v958_v8, %v962_v9  ;;  %v1932_v38 = vrot.slane %v1930_v33, 4  ;;  %v5571_v8 = vld [vmem:[%s6171_s1 + $0x1a8] sm:$0xff]   ;;  %v1371_v9 = vrot.slane %v1369_v4, 4  ;;  %v5656_v4 = vld [vmem:[%s6171_s1 + $0x1e0] sm:$0xff]  }
  0x74   : > { %4225 = vmatprep.subr.bf16.mxu0 %v5046_v1  ;;  %4405 = vmatprep.subr.bf16.mxu1 %v5046_v1  ;;  %v1897_v3 = vshll.u32 %v3723_v0, 16  ;;  %v5551_v0 = vld [vmem:[%s6171_s1 + $0x198] sm:$0xff]  }
  0x76   : > { %v1899_v12 = vrot.slane %v1897_v3, 5  ;;  %v5562_v3 = vld [vmem:[%s6171_s1 + $0x1a0] sm:$0xff]  }
  0x77   : > { %4226 = vmatpush3.bf16.msra.mxu0 %v5046_v1  ;;  %4406 = vmatpush3.bf16.msra.mxu1 %v5046_v1  ;;  %v5398_v1 = vld [vmem:[%s6171_s1 + $0x130] sm:$0xff]  }
  0x78   : > { %4227 = vmatprep.subr.bf16.mxu0 %v5047_v7  ;;  %4407 = vmatprep.subr.bf16.mxu1 %v5047_v7 }
  0x7b   : > { %4228 = vmatpush3.bf16.msra.mxu0 %v5047_v7  ;;  %4408 = vmatpush3.bf16.msra.mxu1 %v5047_v7  ;;  %v948_v7 = vrot.slane %v946_v60, 5  ;;  %v5526_v60 = vld [vmem:[%s5196_s26 + $0x8] ss:$8 sps:$4 sm:$0xff]  }
  0x7c   : > { %4229 = vmatprep.subr.bf16.mxu0 %v5048_v14  ;;  %4409 = vmatprep.subr.bf16.mxu1 %v5048_v14 }
  0x7d   : > { %v949_v15 = vsel %vm5218_vm2, %v944_v6, %v948_v7  ;;  %v1383_v6 = vshrl.u32 %v3680_v2, 16  ;;  %v1386_v7 = vshll.u32 %v3680_v2, 16  ;;  %v3734_v2 = vld [vmem:[%s5196_s26 + $0x38] sm:$0xf] }
  0x7e   : > { %v5422_v18 = vcombine.low %v949_v15, %v963_v16  ;;  %v3681_v15 = vld [vmem:[%s5196_s26 + $0x14] sm:$0x1] }
  0x7f   : > { %4230 = vmatpush3.bf16.msra.mxu0 %v5048_v14  ;;  %4410 = vmatpush3.bf16.msra.mxu1 %v5048_v14  ;;  %v1913_v14 = vrot.slane %v1911_v5, 5  ;;  %v1372_v5 = vshll.u32 %v3678_v57, 16  ;;  %v5582_v16 = vld [vmem:[%s6171_s1 + $0x1b0] sm:$0xff]  }
  0x80   : > { %4231 = vmatprep.subr.bf16.mxu0 %v5049_v19  ;;  %4411 = vmatprep.subr.bf16.mxu1 %v5049_v19  ;;  %v3732_v57 = vld [vmem:[%s5196_s26 + $0x30] sm:$0xf] }
  0x81   : > { %v1914_v20 = vsel %vm5218_vm2, %v1909_v13, %v1913_v14  ;;  %v1388_v13 = vrot.slane %v1386_v7, 5  ;;  %v3679_v14 = vld [vmem:[%s5196_s26 + $0xc] sm:$0x1]  ;;  %v2133_v7 = vshrl.u32 %v3734_v2, 16 }
  0x83   : > { %4232 = vmatpush3.bf16.msra.mxu0 %v5049_v19  ;;  %4412 = vmatpush3.bf16.msra.mxu1 %v5049_v19  ;;  %v1900_v19 = vsel %vm5218_vm2, %v1895_v11, %v1899_v12  ;;  %v1374_v11 = vrot.slane %v1372_v5, 5  ;;  %v1385_v12 = vrot.slane %v1383_v6, 4  ;;  %v2119_v5 = vshrl.u32 %v3732_v57, 16 }
  0x84   : > { %4237 = vmatprep.subr.bf16.mxu0 %v5051_v24  ;;  %4417 = vmatprep.subr.bf16.mxu1 %v5051_v24  ;;  %v5437_v22 = vcombine.low %v1900_v19, %v1914_v20  ;;  %v1378_v20 = vshll.u32 %v3679_v14, 16  ;;  %v2122_v6 = vshll.u32 %v3732_v57, 16 }
  0x85   : > { %v1375_v19 = vor.u32 %v1374_v11, %v1371_v9  ;;  %v2136_v9 = vshll.u32 %v3734_v2, 16 }
  0x86   : > { %4234 = vmatmul.mubr.bf16.vlgmr.msra.gmra.mrb[0].mxu0 %v5353_v25  ;;  %4414 = vmatmul.mubr.bf16.vlgmr.msra.gmra.mrb[0].mxu1 %v5356_v26  ;;  %v1380_v33 = vrot.slane %v1378_v20, 5  ;;  %v3685_v20 = vld [vmem:[%s5196_s26 + $0x24] sm:$0x1] }
  0x87   : > { %4238 = vmatpush3.bf16.msra.mxu0 %v5051_v24  ;;  %4418 = vmatpush3.bf16.msra.mxu1 %v5051_v24  ;;  %v5459_v24 = vld [vmem:[%s6171_s1 + $0x158] sm:$0xff]  }
  0x88   : > { %4239 = vmatprep.subr.bf16.mxu0 %v5055_v29  ;;  %4419 = vmatprep.subr.bf16.mxu1 %v5055_v29 }
  0x89   : > { %4253 = vmatprep.mubr.bf16.mxu0 %v5323_v62  ;;  %4433 = vmatprep.mubr.bf16.mxu1 %v5365_v31 }
  0x8b   : > { %4240 = vmatpush3.bf16.msra.mxu0 %v5055_v29  ;;  %4420 = vmatpush3.bf16.msra.mxu1 %v5055_v29  ;;  %v1916_v29 = vshrl.u32 %v3726_v27, 16 }
  0x8c   : > { %4241 = vmatprep.subr.bf16.mxu0 %v5056_v32  ;;  %4421 = vmatprep.subr.bf16.mxu1 %v5056_v32 }
  0x8d   : > { %v1918_v36 = vrot.slane %v1916_v29, 4  ;;  %v5591_v29 = vld [vmem:[%s6171_s1 + $0x1b8] sm:$0xff]  }
  0x8f   : > { %4242 = vmatpush3.bf16.msra.mxu0 %v5056_v32  ;;  %4422 = vmatpush3.bf16.msra.mxu1 %v5056_v32  ;;  %v1919_v32 = vshll.u32 %v3726_v27, 16  ;;  %v1389_v27 = vor.u32 %v1388_v13, %v1385_v12 }
  0x90   : > { %4243 = vmatprep.subr.bf16.mxu0 %v5057_v34  ;;  %4423 = vmatprep.subr.bf16.mxu1 %v5057_v34 }
  0x91   : > { %v1921_v37 = vrot.slane %v1919_v32, 5  ;;  %v1376_v32 = vrot.slane %v1375_v19, 4  ;;  %v3683_v19 = vld [vmem:[%s5196_s26 + $0x1c] sm:$0x1] }
  0x93   : > { %4244 = vmatpush3.bf16.msra.mxu0 %v5057_v34  ;;  %4424 = vmatpush3.bf16.msra.mxu1 %v5057_v34  ;;  %v1933_v34 = vshll.u32 %v3728_v28, 16  ;;  %v1922_v43 = vor.u32 %v1921_v37, %v1918_v36  ;;  %v1392_v28 = vshll.u32 %v3681_v15, 16  ;;  %v5600_v37 = vld [vmem:[%s6171_s1 + $0x1c0] sm:$0xff]   ;;  %v1381_v41 = vsel %vm5218_vm2, %v1376_v32, %v1380_v33  ;;  %v5665_v15 = vld [vmem:[%s6171_s1 + $0x1e8] sm:$0xff]  }
  0x94   : > { %4245 = vmatprep.subr.bf16.mxu0 %v5058_v42  ;;  %4425 = vmatprep.subr.bf16.mxu1 %v5058_v42  ;;  %v2135_v32 = vrot.slane %v2133_v7, 4  ;;  %v2138_v33 = vrot.slane %v2136_v9, 5  ;;  %v5687_v9 = vld [vmem:[%s6171_s1 + $0x1f8] sm:$0xff]  }
  0x95   : > { %v1935_v39 = vrot.slane %v1933_v34, 5  ;;  %v1923_v48 = vrot.slane %v1922_v43, 4  ;;  %v1390_v34 = vrot.slane %v1389_v27, 4  ;;  %v1394_v36 = vrot.slane %v1392_v28, 5  ;;  %v5619_v43 = vld [vmem:[%s6171_s1 + $0x1c8] sm:$0xff]  }
  0x96   : > { %v2121_v27 = vrot.slane %v2119_v5, 4  ;;  %v2124_v28 = vrot.slane %v2122_v6, 5 }
  0x97   : > { %4246 = vmatpush3.bf16.msra.mxu0 %v5058_v42  ;;  %4426 = vmatpush3.bf16.msra.mxu1 %v5058_v42  ;;  %v3729_v42 = vld [vmem:[%s5196_s26 + $0x94] sm:$0x1]  ;;  %v1936_v45 = vor.u32 %v1935_v39, %v1932_v38  ;;  %v1928_v54 = vsel %vm5218_vm2, %v1923_v48, %v1927_v49  ;;  %v5603_v38 = vld [vmem:[%s5196_s26 + $0x18] ss:$8 sps:$4 sm:$0xff]  }
  0x98   : > { %4247 = vmatprep.subr.bf16.mxu0 %v5387_v51  ;;  %4427 = vmatprep.subr.bf16.mxu1 %v5387_v51  ;;  %v1939_v46 = vshll.u32 %v3729_v42, 16  ;;  %v5606_v39 = vld [vmem:[%s5196_s26 + $0x40] ss:$8 sps:$4 sm:$0xff]   ;;  %v1395_v42 = vsel %vm5218_vm2, %v1390_v34, %v1394_v36  ;;  %v5644_v48 = vld [vmem:[%s6171_s1 + $0x1d8] sm:$0xff]   ;;  %v1406_v36 = vshll.u32 %v3683_v19, 16 }
  0x99   : > { %v1937_v50 = vrot.slane %v1936_v45, 4  ;;  %v5621_v44 = vcombine.low %v1381_v41, %v1395_v42  ;;  %v5632_v45 = vld [vmem:[%s6171_s1 + $0x1d0] sm:$0xff]   ;;  %v3684_v49 = vld [vmem:[%s5196_s26 + $0x20] sm:$0xf]  ;;  %v1420_v42 = vshll.u32 %v3685_v20, 16 }
  0x9a   : > { %v1941_v52 = vrot.slane %v1939_v46, 5  ;;  %v3682_v46 = vld [vmem:[%s5196_s26 + $0x18] sm:$0xf]  ;;  %v1408_v5 = vrot.slane %v1406_v36, 5 }
  0x9b   : > { %4248 = vmatpush3.bf16.msra.mxu0 %v5387_v51  ;;  %4428 = vmatpush3.bf16.msra.mxu1 %v5387_v51  ;;  %v1422_v7 = vrot.slane %v1420_v42, 5  ;;  %v5739_v42 = vld [vmem:[%s6171_s1 + $0x218] sm:$0xff]  }
  0x9c   : > { %4249 = vmatprep.subr.bf16.mxu0 %v5398_v1  ;;  %4429 = vmatprep.subr.bf16.mxu1 %v5398_v1  ;;  %v1942_v55 = vsel %vm5218_vm2, %v1937_v50, %v1941_v52  ;;  %v1397_v50 = vshrl.u32 %v3682_v46, 16  ;;  %v1400_v52 = vshll.u32 %v3682_v46, 16  ;;  %v3733_v46 = vld [vmem:[%s5196_s26 + $0x34] sm:$0x1] }
  0x9d   : > { %v5514_v58 = vcombine.low %v1928_v54, %v1942_v55  ;;  %v1411_v54 = vshrl.u32 %v3684_v49, 16  ;;  %v1414_v55 = vshll.u32 %v3684_v49, 16  ;;  %v3735_v49 = vld [vmem:[%s5196_s26 + $0x3c] sm:$0x1] }
  0x9e   : > { %v1399_v11 = vrot.slane %v1397_v50, 4  ;;  %v1402_v12 = vrot.slane %v1400_v52, 5  ;;  %v5678_v50 = vld [vmem:[%s6171_s1 + $0x1f0] sm:$0xff]   ;;  %v2125_v52 = vor.u32 %v2124_v28, %v2121_v27  ;;  %v2142_v57 = vshll.u32 %v3735_v49, 16  ;;  %v5700_v27 = vld [vmem:[%s6171_s1 + $0x200] sm:$0xff]  }
  0x9f   : > { %4250 = vmatpush3.bf16.msra.mxu0 %v5398_v1  ;;  %4430 = vmatpush3.bf16.msra.mxu1 %v5398_v1  ;;  %v1413_v13 = vrot.slane %v1411_v54, 4  ;;  %v1416_v14 = vrot.slane %v1414_v55, 5  ;;  %v2128_v54 = vshll.u32 %v3733_v46, 16  ;;  %v2139_v55 = vor.u32 %v2138_v33, %v2135_v32  ;;  %v3736_v46 = vld [vmem:[%s5196_s26 + $0x40] sm:$0xf] }
  0xa0   : > { %4251 = vmatprep.subr.bf16.mxu0 %v5407_v10  ;;  %4431 = vmatprep.subr.bf16.mxu1 %v5407_v10  ;;  %v1403_v34 = vor.u32 %v1402_v12, %v1399_v11  ;;  %v2126_v11 = vrot.slane %v2125_v52, 4  ;;  %v3738_v49 = vld [vmem:[%s5196_s26 + $0x48] sm:$0xf]  ;;  %v2147_v52 = vshrl.u32 %v3736_v46, 16 }
  0xa1   : > { %v1417_v41 = vor.u32 %v1416_v14, %v1413_v13  ;;  %v2130_v12 = vrot.slane %v2128_v54, 5  ;;  %v2140_v13 = vrot.slane %v2139_v55, 4  ;;  %v2144_v14 = vrot.slane %v2142_v57, 5 }
  0xa2   : > { %v1404_v2 = vrot.slane %v1403_v34, 4  ;;  %v5715_v34 = vld [vmem:[%s6171_s1 + $0x208] sm:$0xff]   ;;  %v2150_v54 = vshll.u32 %v3736_v46, 16  ;;  %v2161_v55 = vshrl.u32 %v3738_v49, 16  ;;  %v2164_v57 = vshll.u32 %v3738_v49, 16  ;;  %v5770_v46 = vld [vmem:[%s6171_s1 + $0x230] sm:$0xff]  }
  0xa3   : > { %4252 = vmatpush3.bf16.msra.mxu0 %v5407_v10  ;;  %4432 = vmatpush3.bf16.msra.mxu1 %v5407_v10  ;;  %v1418_v6 = vrot.slane %v1417_v41, 4  ;;  %v2131_v32 = vsel %vm5218_vm2, %v2126_v11, %v2130_v12  ;;  %v2145_v33 = vsel %vm5218_vm2, %v2140_v13, %v2144_v14  ;;  %v5728_v41 = vld [vmem:[%s6171_s1 + $0x210] sm:$0xff]   ;;  %v5759_v12 = vld [vmem:[%s6171_s1 + $0x228] sm:$0xff]   ;;  %v3737_v13 = vld [vmem:[%s5196_s26 + $0x44] sm:$0x1] }
  0xa4   : > { %4257 = vmatprep.subr.bf16.mxu0 %v5420_v17  ;;  %4437 = vmatprep.subr.bf16.mxu1 %v5420_v17  ;;  %v1409_v19 = vsel %vm5218_vm2, %v1404_v2, %v1408_v5  ;;  %v5717_v36 = vcombine.low %v2131_v32, %v2145_v33  ;;  %v5750_v2 = vld [vmem:[%s6171_s1 + $0x220] sm:$0xff]   ;;  %v2149_v5 = vrot.slane %v2147_v52, 4  ;;  %v2166_v11 = vrot.slane %v2164_v57, 5  ;;  %v3739_v14 = vld [vmem:[%s5196_s26 + $0x4c] sm:$0x1]  ;;  %v5779_v57 = vld [vmem:[%s6171_s1 + $0x238] sm:$0xff]  }
  0xa5   : > { %v1423_v20 = vsel %vm5218_vm2, %v1418_v6, %v1422_v7  ;;  %v2152_v6 = vrot.slane %v2150_v54, 5  ;;  %v2163_v7 = vrot.slane %v2161_v55, 4  ;;  %v2170_v33 = vshll.u32 %v3739_v14, 16  ;;  %v5104_v14 = vld [vmem:[%s6171_s1 + $0x50] sm:$0xff]  }
  0xa6   : > { %4254 = vmatmul.mubr.bf16.vlgmr.msra.gmra.mrb[0].mxu0 %v5356_v26  ;;  %4434 = vmatmul.mubr.bf16.vlgmr.msra.gmra.mrb[0].mxu1 %v5422_v18  ;;  %v5702_v28 = vcombine.low %v1409_v19, %v1423_v20  ;;  %v2156_v20 = vshll.u32 %v3737_v13, 16  ;;  %v5103_v13 = vld [vmem:[%s6171_s1 + $0x48] sm:$0xff]  }
  0xa7   : > { %4258 = vmatpush3.bf16.msra.mxu0 %v5420_v17  ;;  %4438 = vmatpush3.bf16.msra.mxu1 %v5420_v17  ;;  %v2153_v19 = vor.u32 %v2152_v6, %v2149_v5  ;;  %v2167_v32 = vor.u32 %v2166_v11, %v2163_v7  ;;  %v2172_v55 = vrot.slane %v2170_v33, 5  ;;  %v5102_v11 = vld [vmem:[%s6171_s1 + $0x40] sm:$0xff]   ;;  %v5109_v33 = vld [vmem:[%s6171_s1 + $0x78] sm:$0xff]  }
  0xa8   : > { %4259 = vmatprep.subr.bf16.mxu0 %v5435_v21  ;;  %4439 = vmatprep.subr.bf16.mxu1 %v5435_v21  ;;  %v2158_v52 = vrot.slane %v2156_v20, 5  ;;  %v5107_v20 = vld [vmem:[%s6171_s1 + $0x68] sm:$0xff]  }
  0xa9   : > { %4273 = vmatprep.mubr.bf16.mxu0 %v5365_v31  ;;  %4453 = vmatprep.mubr.bf16.mxu1 %v5437_v22  ;;  %v2154_v49 = vrot.slane %v2153_v19, 4  ;;  %v2168_v54 = vrot.slane %v2167_v32, 4  ;;  %v5105_v19 = vld [vmem:[%s6171_s1 + $0x58] sm:$0xff]   ;;  %v5108_v32 = vld [vmem:[%s6171_s1 + $0x70] sm:$0xff]  }
  0xab   : > { %4260 = vmatpush3.bf16.msra.mxu0 %v5435_v21  ;;  %4440 = vmatpush3.bf16.msra.mxu1 %v5435_v21  ;;  %v2159_v5 = vsel %vm5218_vm2, %v2154_v49, %v2158_v52  ;;  %v2173_v6 = vsel %vm5218_vm2, %v2168_v54, %v2172_v55  ;;  %v5110_v49 = vld [vmem:[%s6171_s1] sm:$0xff]   ;;  %v5111_v52 = vld [vmem:[%s6171_s1 + $0x8] sm:$0xff]   ;;  %v5112_v54 = vld [vmem:[%s5196_s26 + $0x50] ss:$8 sps:$4 sm:$0xff]  }
  0xac   : > { %4261 = vmatprep.subr.bf16.mxu0 %v5448_v23  ;;  %4441 = vmatprep.subr.bf16.mxu1 %v5448_v23  ;;  %v5789_v7 = vcombine.low %v2159_v5, %v2173_v6  ;;  %v5113_v55 = vld [vmem:[%s5196_s26 + $0x78] ss:$8 sps:$4 sm:$0xff]   ;;  %v5114_v5 = vld [vmem:[%s6171_s1 + $0x10] sm:$0xff]  }
  0xad   : > { %v5115_v6 = vld [vmem:[%s6171_s1 + $0x18] sm:$0xff]  }
  0xaf   : > { %4262 = vmatpush3.bf16.msra.mxu0 %v5448_v23  ;;  %4442 = vmatpush3.bf16.msra.mxu1 %v5448_v23 }
  0xb0   : > { %4263 = vmatprep.subr.bf16.mxu0 %v5459_v24  ;;  %4443 = vmatprep.subr.bf16.mxu1 %v5459_v24 }
  0xb3   : > { %4264 = vmatpush3.bf16.msra.mxu0 %v5459_v24  ;;  %4444 = vmatpush3.bf16.msra.mxu1 %v5459_v24 }
  0xb4   : > { %4265 = vmatprep.subr.bf16.mxu0 %v5470_v35  ;;  %4445 = vmatprep.subr.bf16.mxu1 %v5470_v35 }
  0xb7   : > { %4266 = vmatpush3.bf16.msra.mxu0 %v5470_v35  ;;  %4446 = vmatpush3.bf16.msra.mxu1 %v5470_v35 }
  0xb8   : > { %4267 = vmatprep.subr.bf16.mxu0 %v5479_v40  ;;  %4447 = vmatprep.subr.bf16.mxu1 %v5479_v40 }
  0xbb   : > { %4268 = vmatpush3.bf16.msra.mxu0 %v5479_v40  ;;  %4448 = vmatpush3.bf16.msra.mxu1 %v5479_v40 }
  0xbc   : > { %4269 = vmatprep.subr.bf16.mxu0 %v5490_v47  ;;  %4449 = vmatprep.subr.bf16.mxu1 %v5490_v47 }
  0xbf   : > { %4270 = vmatpush3.bf16.msra.mxu0 %v5490_v47  ;;  %4450 = vmatpush3.bf16.msra.mxu1 %v5490_v47 }
  0xc0   : > { %4271 = vmatprep.subr.bf16.mxu0 %v5499_v53  ;;  %4451 = vmatprep.subr.bf16.mxu1 %v5499_v53 }
  0xc3   : > { %4272 = vmatpush3.bf16.msra.mxu0 %v5499_v53  ;;  %4452 = vmatpush3.bf16.msra.mxu1 %v5499_v53 }
  0xc4   : > { %4277 = vmatprep.subr.bf16.mxu0 %v5512_v56  ;;  %4457 = vmatprep.subr.bf16.mxu1 %v5512_v56 }
  0xc6   : > { %4274 = vmatmul.mubr.bf16.vlgmr.msra.gmra.mrb[0].mxu0 %v5422_v18  ;;  %4454 = vmatmul.mubr.bf16.vlgmr.msra.gmra.mrb[0].mxu1 %v5514_v58 }
  0xc7   : > { %4278 = vmatpush3.bf16.msra.mxu0 %v5512_v56  ;;  %4458 = vmatpush3.bf16.msra.mxu1 %v5512_v56 }
  0xc8   : > { %4279 = vmatprep.subr.bf16.mxu0 %v5523_v59  ;;  %4459 = vmatprep.subr.bf16.mxu1 %v5523_v59 }
  0xc9   : > { %4293 = vmatprep.mubr.bf16.mxu0 %v5526_v60  ;;  %4473 = vmatprep.mubr.bf16.mxu1 %v5529_v61 }
  0xcb   : > { %4280 = vmatpush3.bf16.msra.mxu0 %v5523_v59  ;;  %4460 = vmatpush3.bf16.msra.mxu1 %v5523_v59 }
  0xcc   : > { %4281 = vmatprep.subr.bf16.mxu0 %v5540_v63  ;;  %4461 = vmatprep.subr.bf16.mxu1 %v5540_v63 }
  0xcf   : > { %4282 = vmatpush3.bf16.msra.mxu0 %v5540_v63  ;;  %4462 = vmatpush3.bf16.msra.mxu1 %v5540_v63 }
  0xd0   : > { %4283 = vmatprep.subr.bf16.mxu0 %v5551_v0  ;;  %4463 = vmatprep.subr.bf16.mxu1 %v5551_v0 }
  0xd3   : > { %4284 = vmatpush3.bf16.msra.mxu0 %v5551_v0  ;;  %4464 = vmatpush3.bf16.msra.mxu1 %v5551_v0 }
  0xd4   : > { %4285 = vmatprep.subr.bf16.mxu0 %v5562_v3  ;;  %4465 = vmatprep.subr.bf16.mxu1 %v5562_v3 }
  0xd7   : > { %4286 = vmatpush3.bf16.msra.mxu0 %v5562_v3  ;;  %4466 = vmatpush3.bf16.msra.mxu1 %v5562_v3 }
  0xd8   : > { %4287 = vmatprep.subr.bf16.mxu0 %v5571_v8  ;;  %4467 = vmatprep.subr.bf16.mxu1 %v5571_v8 }
  0xdb   : > { %4288 = vmatpush3.bf16.msra.mxu0 %v5571_v8  ;;  %4468 = vmatpush3.bf16.msra.mxu1 %v5571_v8 }
  0xdc   : > { %4289 = vmatprep.subr.bf16.mxu0 %v5582_v16  ;;  %4469 = vmatprep.subr.bf16.mxu1 %v5582_v16 }
  0xdf   : > { %4290 = vmatpush3.bf16.msra.mxu0 %v5582_v16  ;;  %4470 = vmatpush3.bf16.msra.mxu1 %v5582_v16 }
  0xe0   : > { %4291 = vmatprep.subr.bf16.mxu0 %v5591_v29  ;;  %4471 = vmatprep.subr.bf16.mxu1 %v5591_v29 }
  0xe3   : > { %4292 = vmatpush3.bf16.msra.mxu0 %v5591_v29  ;;  %4472 = vmatpush3.bf16.msra.mxu1 %v5591_v29 }
  0xe4   : > { %4297 = vmatprep.subr.bf16.mxu0 %v5600_v37  ;;  %4477 = vmatprep.subr.bf16.mxu1 %v5600_v37 }
  0xe6   : > { %4294 = vmatmul.mubr.bf16.vlgmr.msra.gmra.mrb[0].mxu0 %v5603_v38  ;;  %4474 = vmatmul.mubr.bf16.vlgmr.msra.gmra.mrb[0].mxu1 %v5606_v39 }
  0xe7   : > { %4298 = vmatpush3.bf16.msra.mxu0 %v5600_v37  ;;  %4478 = vmatpush3.bf16.msra.mxu1 %v5600_v37 }
  0xe8   : > { %4299 = vmatprep.subr.bf16.mxu0 %v5619_v43  ;;  %4479 = vmatprep.subr.bf16.mxu1 %v5619_v43 }
  0xe9   : > { %4313 = vmatprep.mubr.bf16.mxu0 %v5529_v61  ;;  %4493 = vmatprep.mubr.bf16.mxu1 %v5621_v44 }
  0xeb   : > { %4300 = vmatpush3.bf16.msra.mxu0 %v5619_v43  ;;  %4480 = vmatpush3.bf16.msra.mxu1 %v5619_v43 }
  0xec   : > { %4301 = vmatprep.subr.bf16.mxu0 %v5632_v45  ;;  %4481 = vmatprep.subr.bf16.mxu1 %v5632_v45 }
  0xef   : > { %4302 = vmatpush3.bf16.msra.mxu0 %v5632_v45  ;;  %4482 = vmatpush3.bf16.msra.mxu1 %v5632_v45 }
  0xf0   : > { %4303 = vmatprep.subr.bf16.mxu0 %v5644_v48  ;;  %4483 = vmatprep.subr.bf16.mxu1 %v5644_v48 }
  0xf3   : > { %4304 = vmatpush3.bf16.msra.mxu0 %v5644_v48  ;;  %4484 = vmatpush3.bf16.msra.mxu1 %v5644_v48 }
  0xf4   : > { %4305 = vmatprep.subr.bf16.mxu0 %v5656_v4  ;;  %4485 = vmatprep.subr.bf16.mxu1 %v5656_v4 }
  0xf7   : > { %4306 = vmatpush3.bf16.msra.mxu0 %v5656_v4  ;;  %4486 = vmatpush3.bf16.msra.mxu1 %v5656_v4 }
  0xf8   : > { %4307 = vmatprep.subr.bf16.mxu0 %v5665_v15  ;;  %4487 = vmatprep.subr.bf16.mxu1 %v5665_v15 }
  0xfb   : > { %4308 = vmatpush3.bf16.msra.mxu0 %v5665_v15  ;;  %4488 = vmatpush3.bf16.msra.mxu1 %v5665_v15 }
  0xfc   : > { %4309 = vmatprep.subr.bf16.mxu0 %v5678_v50  ;;  %4489 = vmatprep.subr.bf16.mxu1 %v5678_v50 }
  0xff   : > { %4310 = vmatpush3.bf16.msra.mxu0 %v5678_v50  ;;  %4490 = vmatpush3.bf16.msra.mxu1 %v5678_v50 }
 0x100   : > { %4311 = vmatprep.subr.bf16.mxu0 %v5687_v9  ;;  %4491 = vmatprep.subr.bf16.mxu1 %v5687_v9 }
 0x103   : > { %4312 = vmatpush3.bf16.msra.mxu0 %v5687_v9  ;;  %4492 = vmatpush3.bf16.msra.mxu1 %v5687_v9 }
 0x104   : > { %4317 = vmatprep.subr.bf16.mxu0 %v5700_v27  ;;  %4497 = vmatprep.subr.bf16.mxu1 %v5700_v27 }
 0x106   : > { %4314 = vmatmul.mubr.bf16.vlgmr.msra.gmra.mrb[0].mxu0 %v5606_v39  ;;  %4494 = vmatmul.mubr.bf16.vlgmr.msra.gmra.mrb[0].mxu1 %v5702_v28 }
 0x107   : > { %4318 = vmatpush3.bf16.msra.mxu0 %v5700_v27  ;;  %4498 = vmatpush3.bf16.msra.mxu1 %v5700_v27 }
 0x108   : > { %4319 = vmatprep.subr.bf16.mxu0 %v5715_v34  ;;  %4499 = vmatprep.subr.bf16.mxu1 %v5715_v34 }
 0x109   : > { %4333 = vmatprep.mubr.bf16.mxu0 %v5621_v44  ;;  %4513 = vmatprep.mubr.bf16.mxu1 %v5717_v36 }
 0x10b   : > { %4320 = vmatpush3.bf16.msra.mxu0 %v5715_v34  ;;  %4500 = vmatpush3.bf16.msra.mxu1 %v5715_v34 }
 0x10c   : > { %4321 = vmatprep.subr.bf16.mxu0 %v5728_v41  ;;  %4501 = vmatprep.subr.bf16.mxu1 %v5728_v41 }
 0x10f   : > { %4322 = vmatpush3.bf16.msra.mxu0 %v5728_v41  ;;  %4502 = vmatpush3.bf16.msra.mxu1 %v5728_v41 }
 0x110   : > { %4323 = vmatprep.subr.bf16.mxu0 %v5739_v42  ;;  %4503 = vmatprep.subr.bf16.mxu1 %v5739_v42 }
 0x113   : > { %4324 = vmatpush3.bf16.msra.mxu0 %v5739_v42  ;;  %4504 = vmatpush3.bf16.msra.mxu1 %v5739_v42 }
 0x114   : > { %4325 = vmatprep.subr.bf16.mxu0 %v5750_v2  ;;  %4505 = vmatprep.subr.bf16.mxu1 %v5750_v2 }
 0x117   : > { %4326 = vmatpush3.bf16.msra.mxu0 %v5750_v2  ;;  %4506 = vmatpush3.bf16.msra.mxu1 %v5750_v2 }
 0x118   : > { %4327 = vmatprep.subr.bf16.mxu0 %v5759_v12  ;;  %4507 = vmatprep.subr.bf16.mxu1 %v5759_v12 }
 0x11b   : > { %4328 = vmatpush3.bf16.msra.mxu0 %v5759_v12  ;;  %4508 = vmatpush3.bf16.msra.mxu1 %v5759_v12 }
 0x11c   : > { %4329 = vmatprep.subr.bf16.mxu0 %v5770_v46  ;;  %4509 = vmatprep.subr.bf16.mxu1 %v5770_v46 }
 0x11f   : > { %4330 = vmatpush3.bf16.msra.mxu0 %v5770_v46  ;;  %4510 = vmatpush3.bf16.msra.mxu1 %v5770_v46 }
 0x120   : > { %4331 = vmatprep.subr.bf16.mxu0 %v5779_v57  ;;  %4511 = vmatprep.subr.bf16.mxu1 %v5779_v57 }
 0x123   : > { %4332 = vmatpush3.bf16.msra.mxu0 %v5779_v57  ;;  %4512 = vmatpush3.bf16.msra.mxu1 %v5779_v57 }
 0x124   : > { %4517 = vmatprep.subr.bf16.mxu0 %v5102_v11  ;;  %4697 = vmatprep.subr.bf16.mxu1 %v5102_v11 }
 0x126   : > { %4334 = vmatmul.mubr.bf16.vlgmr.msra.gmra.mrb[0].mxu0 %v5702_v28  ;;  %4514 = vmatmul.mubr.bf16.vlgmr.msra.gmra.mrb[0].mxu1 %v5789_v7 }
 0x127   : > { %4518 = vmatpush3.bf16.msra.mxu0 %v5102_v11  ;;  %4698 = vmatpush3.bf16.msra.mxu1 %v5102_v11  ;;  %v5116_v11 = vld [vmem:[%s6171_s1 + $0x20] sm:$0xff]  }
 0x128   : > { %4519 = vmatprep.subr.bf16.mxu0 %v5103_v13  ;;  %4699 = vmatprep.subr.bf16.mxu1 %v5103_v13 }
 0x129   : > { %4533 = vmatprep.mubr.bf16.mxu0 %v5323_v62  ;;  %4713 = vmatprep.mubr.bf16.mxu1 %v5365_v31  ;;  %v5106_v62 = vld [vmem:[%s6171_s1 + $0x60] sm:$0xff]  }
 0x12b   : > { %4520 = vmatpush3.bf16.msra.mxu0 %v5103_v13  ;;  %4700 = vmatpush3.bf16.msra.mxu1 %v5103_v13  ;;  %v5117_v13 = vld [vmem:[%s6171_s1 + $0x28] sm:$0xff]  }
 0x12c   : > { %4521 = vmatprep.subr.bf16.mxu0 %v5104_v14  ;;  %4701 = vmatprep.subr.bf16.mxu1 %v5104_v14 }
 0x12f   : > { %4522 = vmatpush3.bf16.msra.mxu0 %v5104_v14  ;;  %4702 = vmatpush3.bf16.msra.mxu1 %v5104_v14  ;;  %v5118_v14 = vld [vmem:[%s6171_s1 + $0x30] sm:$0xff]  }
 0x130   : > { %4523 = vmatprep.subr.bf16.mxu0 %v5105_v19  ;;  %4703 = vmatprep.subr.bf16.mxu1 %v5105_v19 }
 0x133   : > { %4524 = vmatpush3.bf16.msra.mxu0 %v5105_v19  ;;  %4704 = vmatpush3.bf16.msra.mxu1 %v5105_v19  ;;  %v5119_v19 = vld [vmem:[%s6171_s1 + $0x38] sm:$0xff]  }
 0x134   : > { %4525 = vmatprep.subr.bf16.mxu0 %v5106_v62  ;;  %4705 = vmatprep.subr.bf16.mxu1 %v5106_v62 }
 0x137   : > { %4526 = vmatpush3.bf16.msra.mxu0 %v5106_v62  ;;  %4706 = vmatpush3.bf16.msra.mxu1 %v5106_v62  ;;  %v5120_v62 = vld [vmem:[%s6171_s1 + $0x80] sm:$0xff]  }
 0x138   : > { %4527 = vmatprep.subr.bf16.mxu0 %v5107_v20  ;;  %4707 = vmatprep.subr.bf16.mxu1 %v5107_v20 }
 0x13b   : > { %4528 = vmatpush3.bf16.msra.mxu0 %v5107_v20  ;;  %4708 = vmatpush3.bf16.msra.mxu1 %v5107_v20  ;;  %v5121_v20 = vld [vmem:[%s6171_s1 + $0x88] sm:$0xff]  }
 0x13c   : > { %4529 = vmatprep.subr.bf16.mxu0 %v5108_v32  ;;  %4709 = vmatprep.subr.bf16.mxu1 %v5108_v32 }
 0x13f   : > { %4530 = vmatpush3.bf16.msra.mxu0 %v5108_v32  ;;  %4710 = vmatpush3.bf16.msra.mxu1 %v5108_v32  ;;  %v5126_v32 = vld [vmem:[%s6171_s1 + $0xb0] sm:$0xff]  }
 0x140   : > { %4531 = vmatprep.subr.bf16.mxu0 %v5109_v33  ;;  %4711 = vmatprep.subr.bf16.mxu1 %v5109_v33 }
 0x143   : > { %4532 = vmatpush3.bf16.msra.mxu0 %v5109_v33  ;;  %4712 = vmatpush3.bf16.msra.mxu1 %v5109_v33  ;;  %v5127_v33 = vld [vmem:[%s6171_s1 + $0xb8] sm:$0xff]  }
 0x144   : > { %4537 = vmatprep.subr.bf16.mxu0 %v5110_v49  ;;  %4717 = vmatprep.subr.bf16.mxu1 %v5110_v49 }
 0x146   : > { %4534 = vmatmul.mubr.bf16.vlgmr.msra.gmra.mrb[4].mxu0 %v5356_v26  ;;  %4714 = vmatmul.mubr.bf16.vlgmr.msra.gmra.mrb[4].mxu1 %v5422_v18 }
 0x147   : > { %4538 = vmatpush3.bf16.msra.mxu0 %v5110_v49  ;;  %4718 = vmatpush3.bf16.msra.mxu1 %v5110_v49  ;;  %v5128_v49 = vld [vmem:[%s6171_s1 + $0xc0] sm:$0xff]  }
 0x148   : > { %4539 = vmatprep.subr.bf16.mxu0 %v5111_v52  ;;  %4719 = vmatprep.subr.bf16.mxu1 %v5111_v52 }
 0x149   : > { %4553 = vmatprep.mubr.bf16.mxu0 %v5112_v54  ;;  %4733 = vmatprep.mubr.bf16.mxu1 %v5113_v55  ;;  %v5133_v54 = vld [vmem:[%s6171_s1 + $0xe8] sm:$0xff]   ;;  %v5134_v55 = vld [vmem:[%s6171_s1 + $0xf0] sm:$0xff]  }
 0x14b   : > { %4540 = vmatpush3.bf16.msra.mxu0 %v5111_v52  ;;  %4720 = vmatpush3.bf16.msra.mxu1 %v5111_v52  ;;  %v5129_v52 = vld [vmem:[%s6171_s1 + $0xc8] sm:$0xff]  }
 0x14c   : > { %4541 = vmatprep.subr.bf16.mxu0 %v5114_v5  ;;  %4721 = vmatprep.subr.bf16.mxu1 %v5114_v5 }
 0x14f   : > { %4542 = vmatpush3.bf16.msra.mxu0 %v5114_v5  ;;  %4722 = vmatpush3.bf16.msra.mxu1 %v5114_v5  ;;  %v5135_v5 = vld [vmem:[%s6171_s1 + $0xf8] sm:$0xff]  }
 0x150   : > { %4543 = vmatprep.subr.bf16.mxu0 %v5115_v6  ;;  %4723 = vmatprep.subr.bf16.mxu1 %v5115_v6 }
 0x153   : > { %4544 = vmatpush3.bf16.msra.mxu0 %v5115_v6  ;;  %4724 = vmatpush3.bf16.msra.mxu1 %v5115_v6  ;;  %v5136_v6 = vld [vmem:[%s6171_s1 + $0x100] sm:$0xff]  }
 0x154   : > { %4545 = vmatprep.subr.bf16.mxu0 %v5116_v11  ;;  %4725 = vmatprep.subr.bf16.mxu1 %v5116_v11 }
 0x157   : > { %4546 = vmatpush3.bf16.msra.mxu0 %v5116_v11  ;;  %4726 = vmatpush3.bf16.msra.mxu1 %v5116_v11  ;;  %v5137_v11 = vld [vmem:[%s6171_s1 + $0x108] sm:$0xff]  }
 0x158   : > { %4547 = vmatprep.subr.bf16.mxu0 %v5117_v13  ;;  %4727 = vmatprep.subr.bf16.mxu1 %v5117_v13 }
 0x15b   : > { %4548 = vmatpush3.bf16.msra.mxu0 %v5117_v13  ;;  %4728 = vmatpush3.bf16.msra.mxu1 %v5117_v13  ;;  %v5139_v13 = vld [vmem:[%s6171_s1 + $0x118] sm:$0xff]  }
 0x15c   : > { %4549 = vmatprep.subr.bf16.mxu0 %v5118_v14  ;;  %4729 = vmatprep.subr.bf16.mxu1 %v5118_v14 }
 0x15f   : > { %4550 = vmatpush3.bf16.msra.mxu0 %v5118_v14  ;;  %4730 = vmatpush3.bf16.msra.mxu1 %v5118_v14  ;;  %v5141_v14 = vld [vmem:[%s6171_s1 + $0x128] sm:$0xff]  }
 0x160   : > { %4551 = vmatprep.subr.bf16.mxu0 %v5119_v19  ;;  %4731 = vmatprep.subr.bf16.mxu1 %v5119_v19 }
 0x163   : > { %4552 = vmatpush3.bf16.msra.mxu0 %v5119_v19  ;;  %4732 = vmatpush3.bf16.msra.mxu1 %v5119_v19 }
 0x164   : > { %4557 = vmatprep.subr.bf16.mxu0 %v5120_v62  ;;  %4737 = vmatprep.subr.bf16.mxu1 %v5120_v62 }
 0x166   : > { %4554 = vmatmul.mubr.bf16.vlgmr.msra.gmra.mrb[4].mxu0 %v5353_v25  ;;  %4734 = vmatmul.mubr.bf16.vlgmr.msra.gmra.mrb[4].mxu1 %v5356_v26  ;;  %v5122_v25 = vld [vmem:[%s6171_s1 + $0x90] sm:$0xff]   ;;  %v5123_v26 = vld [vmem:[%s6171_s1 + $0x98] sm:$0xff]  }
 0x167   : > { %4558 = vmatpush3.bf16.msra.mxu0 %v5120_v62  ;;  %4738 = vmatpush3.bf16.msra.mxu1 %v5120_v62 }
 0x168   : > { %4559 = vmatprep.subr.bf16.mxu0 %v5121_v20  ;;  %4739 = vmatprep.subr.bf16.mxu1 %v5121_v20 }
 0x169   : > { %4573 = vmatprep.mubr.bf16.mxu0 %v5365_v31  ;;  %4753 = vmatprep.mubr.bf16.mxu1 %v5437_v22  ;;  %v5124_v31 = vld [vmem:[%s6171_s1 + $0xa0] sm:$0xff]   ;;  %v5125_v22 = vld [vmem:[%s6171_s1 + $0xa8] sm:$0xff]  }
 0x16b   : > { %4560 = vmatpush3.bf16.msra.mxu0 %v5121_v20  ;;  %4740 = vmatpush3.bf16.msra.mxu1 %v5121_v20 }
 0x16c   : > { %4561 = vmatprep.subr.bf16.mxu0 %v5122_v25  ;;  %4741 = vmatprep.subr.bf16.mxu1 %v5122_v25 }
 0x16f   : > { %4562 = vmatpush3.bf16.msra.mxu0 %v5122_v25  ;;  %4742 = vmatpush3.bf16.msra.mxu1 %v5122_v25 }
 0x170   : > { %4563 = vmatprep.subr.bf16.mxu0 %v5123_v26  ;;  %4743 = vmatprep.subr.bf16.mxu1 %v5123_v26 }
 0x173   : > { %4564 = vmatpush3.bf16.msra.mxu0 %v5123_v26  ;;  %4744 = vmatpush3.bf16.msra.mxu1 %v5123_v26 }
 0x174   : > { %4565 = vmatprep.subr.bf16.mxu0 %v5124_v31  ;;  %4745 = vmatprep.subr.bf16.mxu1 %v5124_v31 }
 0x177   : > { %4566 = vmatpush3.bf16.msra.mxu0 %v5124_v31  ;;  %4746 = vmatpush3.bf16.msra.mxu1 %v5124_v31 }
 0x178   : > { %4567 = vmatprep.subr.bf16.mxu0 %v5125_v22  ;;  %4747 = vmatprep.subr.bf16.mxu1 %v5125_v22 }
 0x17b   : > { %4568 = vmatpush3.bf16.msra.mxu0 %v5125_v22  ;;  %4748 = vmatpush3.bf16.msra.mxu1 %v5125_v22 }
 0x17c   : > { %4569 = vmatprep.subr.bf16.mxu0 %v5126_v32  ;;  %4749 = vmatprep.subr.bf16.mxu1 %v5126_v32 }
 0x17f   : > { %4570 = vmatpush3.bf16.msra.mxu0 %v5126_v32  ;;  %4750 = vmatpush3.bf16.msra.mxu1 %v5126_v32 }
 0x180   : > { %4571 = vmatprep.subr.bf16.mxu0 %v5127_v33  ;;  %4751 = vmatprep.subr.bf16.mxu1 %v5127_v33 }
 0x183   : > { %4572 = vmatpush3.bf16.msra.mxu0 %v5127_v33  ;;  %4752 = vmatpush3.bf16.msra.mxu1 %v5127_v33 }
 0x184   : > { %4577 = vmatprep.subr.bf16.mxu0 %v5128_v49  ;;  %4757 = vmatprep.subr.bf16.mxu1 %v5128_v49 }
 0x186   : > { %4574 = vmatmul.mubr.bf16.vlgmr.msra.gmra.mrb[4].mxu0 %v5422_v18  ;;  %4754 = vmatmul.mubr.bf16.vlgmr.msra.gmra.mrb[4].mxu1 %v5514_v58  ;;  %v5130_v18 = vld [vmem:[%s6171_s1 + $0xd0] sm:$0xff]   ;;  %v5131_v58 = vld [vmem:[%s6171_s1 + $0xd8] sm:$0xff]  }
 0x187   : > { %4578 = vmatpush3.bf16.msra.mxu0 %v5128_v49  ;;  %4758 = vmatpush3.bf16.msra.mxu1 %v5128_v49 }
 0x188   : > { %4579 = vmatprep.subr.bf16.mxu0 %v5129_v52  ;;  %4759 = vmatprep.subr.bf16.mxu1 %v5129_v52 }
 0x189   : > { %4593 = vmatprep.mubr.bf16.mxu0 %v5526_v60  ;;  %4773 = vmatprep.mubr.bf16.mxu1 %v5529_v61  ;;  %v5132_v60 = vld [vmem:[%s6171_s1 + $0xe0] sm:$0xff]  }
 0x18b   : > { %4580 = vmatpush3.bf16.msra.mxu0 %v5129_v52  ;;  %4760 = vmatpush3.bf16.msra.mxu1 %v5129_v52 }
 0x18c   : > { %4581 = vmatprep.subr.bf16.mxu0 %v5130_v18  ;;  %4761 = vmatprep.subr.bf16.mxu1 %v5130_v18 }
 0x18f   : > { %4582 = vmatpush3.bf16.msra.mxu0 %v5130_v18  ;;  %4762 = vmatpush3.bf16.msra.mxu1 %v5130_v18 }
 0x190   : > { %4583 = vmatprep.subr.bf16.mxu0 %v5131_v58  ;;  %4763 = vmatprep.subr.bf16.mxu1 %v5131_v58 }
 0x193   : > { %4584 = vmatpush3.bf16.msra.mxu0 %v5131_v58  ;;  %4764 = vmatpush3.bf16.msra.mxu1 %v5131_v58 }
 0x194   : > { %4585 = vmatprep.subr.bf16.mxu0 %v5132_v60  ;;  %4765 = vmatprep.subr.bf16.mxu1 %v5132_v60 }
 0x197   : > { %4586 = vmatpush3.bf16.msra.mxu0 %v5132_v60  ;;  %4766 = vmatpush3.bf16.msra.mxu1 %v5132_v60  ;;  %v6040_v60 = vld [vmem:[%s5196_s26 + $0x90] ss:$8 sps:$4 sm:$0xff]  }
 0x198   : > { %4587 = vmatprep.subr.bf16.mxu0 %v5133_v54  ;;  %4767 = vmatprep.subr.bf16.mxu1 %v5133_v54 }
 0x19b   : > { %4588 = vmatpush3.bf16.msra.mxu0 %v5133_v54  ;;  %4768 = vmatpush3.bf16.msra.mxu1 %v5133_v54 }
 0x19c   : > { %4589 = vmatprep.subr.bf16.mxu0 %v5134_v55  ;;  %4769 = vmatprep.subr.bf16.mxu1 %v5134_v55 }
 0x19f   : > { %4590 = vmatpush3.bf16.msra.mxu0 %v5134_v55  ;;  %4770 = vmatpush3.bf16.msra.mxu1 %v5134_v55 }
 0x1a0   : > { %4591 = vmatprep.subr.bf16.mxu0 %v5135_v5  ;;  %4771 = vmatprep.subr.bf16.mxu1 %v5135_v5 }
 0x1a3   : > { %4592 = vmatpush3.bf16.msra.mxu0 %v5135_v5  ;;  %4772 = vmatpush3.bf16.msra.mxu1 %v5135_v5 }
 0x1a4   : > { %4597 = vmatprep.subr.bf16.mxu0 %v5136_v6  ;;  %4777 = vmatprep.subr.bf16.mxu1 %v5136_v6 }
 0x1a6   : > { %4594 = vmatmul.mubr.bf16.vlgmr.msra.gmra.mrb[4].mxu0 %v5603_v38  ;;  %4774 = vmatmul.mubr.bf16.vlgmr.msra.gmra.mrb[4].mxu1 %v5606_v39  ;;  %v5138_v38 = vld [vmem:[%s6171_s1 + $0x110] sm:$0xff]  }
 0x1a7   : > { %4598 = vmatpush3.bf16.msra.mxu0 %v5136_v6  ;;  %4778 = vmatpush3.bf16.msra.mxu1 %v5136_v6 }
 0x1a8   : > { %4599 = vmatprep.subr.bf16.mxu0 %v5137_v11  ;;  %4779 = vmatprep.subr.bf16.mxu1 %v5137_v11 }
 0x1a9   : > { %4613 = vmatprep.mubr.bf16.mxu0 %v5529_v61  ;;  %4793 = vmatprep.mubr.bf16.mxu1 %v5621_v44  ;;  %v5140_v61 = vld [vmem:[%s6171_s1 + $0x120] sm:$0xff]  }
 0x1ab   : > { %4600 = vmatpush3.bf16.msra.mxu0 %v5137_v11  ;;  %4780 = vmatpush3.bf16.msra.mxu1 %v5137_v11 }
 0x1ac   : > { %4601 = vmatprep.subr.bf16.mxu0 %v5138_v38  ;;  %4781 = vmatprep.subr.bf16.mxu1 %v5138_v38 }
 0x1af   : > { %4602 = vmatpush3.bf16.msra.mxu0 %v5138_v38  ;;  %4782 = vmatpush3.bf16.msra.mxu1 %v5138_v38 }
 0x1b0   : > { %4603 = vmatprep.subr.bf16.mxu0 %v5139_v13  ;;  %4783 = vmatprep.subr.bf16.mxu1 %v5139_v13 }
 0x1b3   : > { %4604 = vmatpush3.bf16.msra.mxu0 %v5139_v13  ;;  %4784 = vmatpush3.bf16.msra.mxu1 %v5139_v13  ;;  %v3764_v13 = vld [vmem:[%s5196_s26 + $0x80] sm:$0xf] }
 0x1b4   : > { %4605 = vmatprep.subr.bf16.mxu0 %v5140_v61  ;;  %4785 = vmatprep.subr.bf16.mxu1 %v5140_v61 }
 0x1b7   : > { %4606 = vmatpush3.bf16.msra.mxu0 %v5140_v61  ;;  %4786 = vmatpush3.bf16.msra.mxu1 %v5140_v61  ;;  %v3766_v61 = vld [vmem:[%s5196_s26 + $0x88] sm:$0xf] }
 0x1b8   : > { %4607 = vmatprep.subr.bf16.mxu0 %v5387_v51  ;;  %4787 = vmatprep.subr.bf16.mxu1 %v5387_v51  ;;  %v5098_v51 = vld [vmem:[%s5196_s26 + $0x58] ss:$8 sps:$4 sm:$0xff]  }
 0x1bb   : > { %4608 = vmatpush3.bf16.msra.mxu0 %v5141_v14  ;;  %4788 = vmatpush3.bf16.msra.mxu1 %v5141_v14  ;;  %v3246_v14 = vshll.u32 %v3764_v13, 16 }
 0x1bc   : > { %4609 = vmatprep.subr.bf16.mxu0 %v5398_v1  ;;  %4789 = vmatprep.subr.bf16.mxu1 %v5398_v1 }
 0x1bf   : > { %4610 = vmatpush3.bf16.msra.mxu0 %v5398_v1  ;;  %4790 = vmatpush3.bf16.msra.mxu1 %v5398_v1  ;;  %v5977_v1 = vld [vmem:[%s5196_s26 + $0x80] ss:$8 sps:$4 sm:$0xff]  }
 0x1c0   : > { %4611 = vmatprep.subr.bf16.mxu0 %v5407_v10  ;;  %4791 = vmatprep.subr.bf16.mxu1 %v5407_v10 }
 0x1c3   : > { %4612 = vmatpush3.bf16.msra.mxu0 %v5407_v10  ;;  %4792 = vmatpush3.bf16.msra.mxu1 %v5407_v10  ;;  %v3754_v10 = vld [vmem:[%s5196_s26 + $0x58] sm:$0xf] }
 0x1c4   : > { %4617 = vmatprep.subr.bf16.mxu0 %v5420_v17  ;;  %4797 = vmatprep.subr.bf16.mxu1 %v5420_v17 }
 0x1c6   : > { %4614 = vmatmul.mubr.bf16.vlgmr.msra.gmra.mrb[4].mxu0 %v5606_v39  ;;  %4794 = vmatmul.mubr.bf16.vlgmr.msra.gmra.mrb[4].mxu1 %v5702_v28 }
 0x1c7   : > { %4618 = vmatpush3.bf16.msra.mxu0 %v5420_v17  ;;  %4798 = vmatpush3.bf16.msra.mxu1 %v5420_v17  ;;  %v3756_v17 = vld [vmem:[%s5196_s26 + $0x60] sm:$0xf] }
 0x1c8   : > { %4619 = vmatprep.subr.bf16.mxu0 %v5435_v21  ;;  %4799 = vmatprep.subr.bf16.mxu1 %v5435_v21 }
 0x1c9   : > { %4633 = vmatprep.mubr.bf16.mxu0 %v5621_v44  ;;  %4813 = vmatprep.mubr.bf16.mxu1 %v5717_v36 }
 0x1cb   : > { %4620 = vmatpush3.bf16.msra.mxu0 %v5435_v21  ;;  %4800 = vmatpush3.bf16.msra.mxu1 %v5435_v21  ;;  %v2698_v21 = vshrl.u32 %v3754_v10, 16 }
 0x1cc   : > { %4621 = vmatprep.subr.bf16.mxu0 %v5448_v23  ;;  %4801 = vmatprep.subr.bf16.mxu1 %v5448_v23 }
 0x1cf   : > { %4622 = vmatpush3.bf16.msra.mxu0 %v5448_v23  ;;  %4802 = vmatpush3.bf16.msra.mxu1 %v5448_v23  ;;  %v2701_v23 = vshll.u32 %v3754_v10, 16 }
 0x1d0   : > { %4623 = vmatprep.subr.bf16.mxu0 %v5459_v24  ;;  %4803 = vmatprep.subr.bf16.mxu1 %v5459_v24 }
 0x1d3   : > { %4624 = vmatpush3.bf16.msra.mxu0 %v5459_v24  ;;  %4804 = vmatpush3.bf16.msra.mxu1 %v5459_v24  ;;  %v2712_v24 = vshrl.u32 %v3756_v17, 16 }
 0x1d4   : > { %4625 = vmatprep.subr.bf16.mxu0 %v5470_v35  ;;  %4805 = vmatprep.subr.bf16.mxu1 %v5470_v35 }
 0x1d7   : > { %4626 = vmatpush3.bf16.msra.mxu0 %v5470_v35  ;;  %4806 = vmatpush3.bf16.msra.mxu1 %v5470_v35  ;;  %v2715_v35 = vshll.u32 %v3756_v17, 16 }
 0x1d8   : > { %4627 = vmatprep.subr.bf16.mxu0 %v5479_v40  ;;  %4807 = vmatprep.subr.bf16.mxu1 %v5479_v40 }
 0x1db   : > { %4628 = vmatpush3.bf16.msra.mxu0 %v5479_v40  ;;  %4808 = vmatpush3.bf16.msra.mxu1 %v5479_v40  ;;  %v2700_v40 = vrot.slane %v2698_v21, 4 }
 0x1dc   : > { %4629 = vmatprep.subr.bf16.mxu0 %v5490_v47  ;;  %4809 = vmatprep.subr.bf16.mxu1 %v5490_v47 }
 0x1df   : > { %4630 = vmatpush3.bf16.msra.mxu0 %v5490_v47  ;;  %4810 = vmatpush3.bf16.msra.mxu1 %v5490_v47  ;;  %v2703_v47 = vrot.slane %v2701_v23, 5  ;;  %v3759_v23 = vld [vmem:[%s5196_s26 + $0x6c] sm:$0x1] }
 0x1e0   : > { %4631 = vmatprep.subr.bf16.mxu0 %v5499_v53  ;;  %4811 = vmatprep.subr.bf16.mxu1 %v5499_v53 }
 0x1e1   : > { %v2704_v44 = vor.u32 %v2703_v47, %v2700_v40  ;;  %v3248_v40 = vrot.slane %v3246_v14, 5 }
 0x1e3   : > { %4632 = vmatpush3.bf16.msra.mxu0 %v5499_v53  ;;  %4812 = vmatpush3.bf16.msra.mxu1 %v5499_v53  ;;  %v2714_v53 = vrot.slane %v2712_v24, 4  ;;  %v2705_v49 = vrot.slane %v2704_v44, 4  ;;  %v3761_v24 = vld [vmem:[%s5196_s26 + $0x74] sm:$0x1]  ;;  %v3765_v44 = vld [vmem:[%s5196_s26 + $0x84] sm:$0x1] }
 0x1e4   : > { %4637 = vmatprep.subr.bf16.mxu0 %v5512_v56  ;;  %4817 = vmatprep.subr.bf16.mxu1 %v5512_v56 }
 0x1e6   : > { %4634 = vmatmul.mubr.bf16.vlgmr.msra.gmra.mrb[4].mxu0 %v5702_v28  ;;  %4814 = vmatmul.mubr.bf16.vlgmr.msra.gmra.mrb[4].mxu1 %v5789_v7 }
 0x1e7   : > { %4638 = vmatpush3.bf16.msra.mxu0 %v5512_v56  ;;  %4818 = vmatpush3.bf16.msra.mxu1 %v5512_v56  ;;  %v2717_v56 = vrot.slane %v2715_v35, 5 }
 0x1e8   : > { %4639 = vmatprep.subr.bf16.mxu0 %v5523_v59  ;;  %4819 = vmatprep.subr.bf16.mxu1 %v5523_v59 }
 0x1e9   : > { %4653 = vmatprep.mubr.bf16.mxu0 %v5098_v51  ;;  %4833 = vmatprep.mubr.bf16.mxu1 %v5977_v1  ;;  %v3257_v51 = vshrl.u32 %v3766_v61, 16 }
 0x1eb   : > { %4640 = vmatpush3.bf16.msra.mxu0 %v5523_v59  ;;  %4820 = vmatpush3.bf16.msra.mxu1 %v5523_v59  ;;  %v3755_v59 = vld [vmem:[%s5196_s26 + $0x5c] sm:$0x1]  ;;  %v3259_v47 = vrot.slane %v3257_v51, 4 }
 0x1ec   : > { %4641 = vmatprep.subr.bf16.mxu0 %v5540_v63  ;;  %4821 = vmatprep.subr.bf16.mxu1 %v5540_v63  ;;  %v2707_v19 = vshll.u32 %v3755_v59, 16 }
 0x1ee   : > { %v2709_v52 = vrot.slane %v2707_v19, 5  ;;  %v3767_v19 = vld [vmem:[%s5196_s26 + $0x8c] sm:$0x1] }
 0x1ef   : > { %4642 = vmatpush3.bf16.msra.mxu0 %v5540_v63  ;;  %4822 = vmatpush3.bf16.msra.mxu1 %v5540_v63  ;;  %v3757_v63 = vld [vmem:[%s5196_s26 + $0x64] sm:$0x1] }
 0x1f0   : > { %4643 = vmatprep.subr.bf16.mxu0 %v5551_v0  ;;  %4823 = vmatprep.subr.bf16.mxu1 %v5551_v0  ;;  %v2721_v62 = vshll.u32 %v3757_v63, 16  ;;  %v2710_v54 = vsel %vm5218_vm2, %v2705_v49, %v2709_v52  ;;  %v2749_v63 = vshll.u32 %v3761_v24, 16  ;;  %v3266_v52 = vshll.u32 %v3767_v19, 16 }
 0x1f2   : > { %v2723_v58 = vrot.slane %v2721_v62, 5  ;;  %v3252_v62 = vshll.u32 %v3765_v44, 16 }
 0x1f3   : > { %4644 = vmatpush3.bf16.msra.mxu0 %v5551_v0  ;;  %4824 = vmatpush3.bf16.msra.mxu1 %v5551_v0 }
 0x1f4   : > { %4645 = vmatprep.subr.bf16.mxu0 %v5562_v3  ;;  %4825 = vmatprep.subr.bf16.mxu1 %v5562_v3 }
 0x1f7   : > { %4646 = vmatpush3.bf16.msra.mxu0 %v5562_v3  ;;  %4826 = vmatpush3.bf16.msra.mxu1 %v5562_v3  ;;  %v2718_v3 = vor.u32 %v2717_v56, %v2714_v53  ;;  %v2735_v56 = vshll.u32 %v3759_v23, 16 }
 0x1f8   : > { %4647 = vmatprep.subr.bf16.mxu0 %v5571_v8  ;;  %4827 = vmatprep.subr.bf16.mxu1 %v5571_v8 }
 0x1f9   : > { %v6006_v39 = vpop.f32.mrb[0].mxu0  ;;  %v6008_v0 = vpop.f32.mrb[0].mxu1  ;;  %v2719_v18 = vrot.slane %v2718_v3, 4 }
 0x1fa   : > { %v2237_v28 = vmax.f32 %v6006_v39, %v6008_v0  ;;  %v6012_v36 = vpop.f32.mrb[1].mxu0  ;;  %v6014_v7 = vpop.f32.mrb[1].mxu1  ;;  %v3774_v39 = vld [vmem:[%s6172_s2] ss:$0 sm:$0xff] }
 0x1fb   : > { %v2235_v20 = vmax.f32 %v6012_v36, %v6014_v7  ;;  %v6018_v25 = vpop.f32.mrb[2].mxu0  ;;  %v6020_v26 = vpop.f32.mrb[2].mxu1  ;;  %4648 = vmatpush3.bf16.msra.mxu0 %v5571_v8  ;;  %4828 = vmatpush3.bf16.msra.mxu1 %v5571_v8  ;;  %v5100_v8 = vld [vmem:[%s5196_s26 + $0x68] ss:$8 sps:$4 sm:$0xff]   ;;  %v2724_v55 = vsel %vm5218_vm2, %v2719_v18, %v2723_v58 }
 0x1fc   : > { %v2238_v31 = vmax.f32 %v6018_v25, %v6020_v26  ;;  %v6026_v22 = vpop.f32.mrb[3].mxu0  ;;  %v6028_v32 = vpop.f32.mrb[3].mxu1  ;;  %4649 = vmatprep.subr.bf16.mxu0 %v5582_v16  ;;  %4829 = vmatprep.subr.bf16.mxu1 %v5582_v16 }
 0x1fd   : > { %v2236_v33 = vmax.f32 %v6026_v22, %v6028_v32 }
 0x1ff   : > { %4650 = vmatpush3.bf16.msra.mxu0 %v5582_v16  ;;  %4830 = vmatpush3.bf16.msra.mxu1 %v5582_v16  ;;  %v6050_v16 = vcombine.low %v2710_v54, %v2724_v55  ;;  %v3254_v55 = vrot.slane %v3252_v62, 5 }
 0x200   : > { %4651 = vmatprep.subr.bf16.mxu0 %v5591_v29  ;;  %4831 = vmatprep.subr.bf16.mxu1 %v5591_v29 }
 0x203   : > { %4652 = vmatpush3.bf16.msra.mxu0 %v5591_v29  ;;  %4832 = vmatpush3.bf16.msra.mxu1 %v5591_v29  ;;  %v3758_v29 = vld [vmem:[%s5196_s26 + $0x68] sm:$0xf] }
 0x204   : > { %4657 = vmatprep.subr.bf16.mxu0 %v5600_v37  ;;  %4837 = vmatprep.subr.bf16.mxu1 %v5600_v37  ;;  %v2726_v5 = vshrl.u32 %v3758_v29, 16  ;;  %v2729_v6 = vshll.u32 %v3758_v29, 16 }
 0x206   : > { %4654 = vmatmul.mubr.bf16.vlgmr.msra.gmra.mrb[4].mxu0 %v5100_v8  ;;  %4834 = vmatmul.mubr.bf16.vlgmr.msra.gmra.mrb[4].mxu1 %v6040_v60  ;;  %v2728_v10 = vrot.slane %v2726_v5, 4  ;;  %v2751_v8 = vrot.slane %v2749_v63, 5 }
 0x207   : > { %4658 = vmatpush3.bf16.msra.mxu0 %v5600_v37  ;;  %4838 = vmatpush3.bf16.msra.mxu1 %v5600_v37  ;;  %v3760_v37 = vld [vmem:[%s5196_s26 + $0x70] sm:$0xf] }
 0x208   : > { %4659 = vmatprep.subr.bf16.mxu0 %v5619_v43  ;;  %4839 = vmatprep.subr.bf16.mxu1 %v5619_v43  ;;  %v2740_v11 = vshrl.u32 %v3760_v37, 16  ;;  %v2743_v38 = vshll.u32 %v3760_v37, 16  ;;  %v3268_v37 = vrot.slane %v3266_v52, 5 }
 0x209   : > { %4673 = vmatprep.mubr.bf16.mxu0 %v5977_v1  ;;  %4853 = vmatprep.mubr.bf16.mxu1 %v6050_v16  ;;  %v3260_v1 = vshll.u32 %v3766_v61, 16 }
 0x20a   : > { %v2742_v17 = vrot.slane %v2740_v11, 4  ;;  %v2745_v21 = vrot.slane %v2743_v38, 5 }
 0x20b   : > { %4660 = vmatpush3.bf16.msra.mxu0 %v5619_v43  ;;  %4840 = vmatpush3.bf16.msra.mxu1 %v5619_v43  ;;  %v3243_v43 = vshrl.u32 %v3764_v13, 16  ;;  %v3262_v53 = vrot.slane %v3260_v1, 5  ;;  %v3771_v1 = vld [vmem:[%s5196_s26 + $0x9c] sm:$0x1] }
 0x20c   : > { %4661 = vmatprep.subr.bf16.mxu0 %v5632_v45  ;;  %4841 = vmatprep.subr.bf16.mxu1 %v5632_v45  ;;  %v2746_v59 = vor.u32 %v2745_v21, %v2742_v17  ;;  %v3294_v21 = vshll.u32 %v3771_v1, 16 }
 0x20d   : > { %v3245_v35 = vrot.slane %v3243_v43, 4  ;;  %v3263_v49 = vor.u32 %v3262_v53, %v3259_v47 }
 0x20e   : > { %v2747_v58 = vrot.slane %v2746_v59, 4 }
 0x20f   : > { %4662 = vmatpush3.bf16.msra.mxu0 %v5632_v45  ;;  %4842 = vmatpush3.bf16.msra.mxu1 %v5632_v45  ;;  %v2731_v45 = vrot.slane %v2729_v6, 5  ;;  %v3249_v3 = vor.u32 %v3248_v40, %v3245_v35  ;;  %v3264_v29 = vrot.slane %v3263_v49, 4  ;;  %v3296_v35 = vrot.slane %v3294_v21, 5 }
 0x210   : > { %4663 = vmatprep.subr.bf16.mxu0 %v5644_v48  ;;  %4843 = vmatprep.subr.bf16.mxu1 %v5644_v48 }
 0x211   : > { %v3250_v54 = vrot.slane %v3249_v3, 4  ;;  %v3269_v38 = vsel %vm5218_vm2, %v3264_v29, %v3268_v37 }
 0x213   : > { %4664 = vmatpush3.bf16.msra.mxu0 %v5644_v48  ;;  %4844 = vmatpush3.bf16.msra.mxu1 %v5644_v48  ;;  %v2732_v48 = vor.u32 %v2731_v45, %v2728_v10  ;;  %v3255_v11 = vsel %vm5218_vm2, %v3250_v54, %v3254_v55 }
 0x214   : > { %4665 = vmatprep.subr.bf16.mxu0 %v5656_v4  ;;  %4845 = vmatprep.subr.bf16.mxu1 %v5656_v4 }
 0x215   : > { %v2733_v18 = vrot.slane %v2732_v48, 4 }
 0x217   : > { %4666 = vmatpush3.bf16.msra.mxu0 %v5656_v4  ;;  %4846 = vmatpush3.bf16.msra.mxu1 %v5656_v4  ;;  %v2737_v4 = vrot.slane %v2735_v56, 5 }
 0x218   : > { %4667 = vmatprep.subr.bf16.mxu0 %v5665_v15  ;;  %4847 = vmatprep.subr.bf16.mxu1 %v5665_v15 }
 0x219   : > { %v2738_v5 = vsel %vm5218_vm2, %v2733_v18, %v2737_v4 }
 0x21b   : > { %4668 = vmatpush3.bf16.msra.mxu0 %v5665_v15  ;;  %4848 = vmatpush3.bf16.msra.mxu1 %v5665_v15  ;;  %v2752_v15 = vsel %vm5218_vm2, %v2747_v58, %v2751_v8 }
 0x21c   : > { %4669 = vmatprep.subr.bf16.mxu0 %v5678_v50  ;;  %4849 = vmatprep.subr.bf16.mxu1 %v5678_v50  ;;  %v6095_v6 = vcombine.low %v2738_v5, %v2752_v15 }
 0x21f   : > { %4670 = vmatpush3.bf16.msra.mxu0 %v5678_v50  ;;  %4850 = vmatpush3.bf16.msra.mxu1 %v5678_v50  ;;  %v3772_v50 = vcombine.low %v3255_v11, %v3269_v38 }
 0x220   : > { %4671 = vmatprep.subr.bf16.mxu0 %v5687_v9  ;;  %4851 = vmatprep.subr.bf16.mxu1 %v5687_v9 }
 0x223   : > { %4672 = vmatpush3.bf16.msra.mxu0 %v5687_v9  ;;  %4852 = vmatpush3.bf16.msra.mxu1 %v5687_v9  ;;  %v3768_v9 = vld [vmem:[%s5196_s26 + $0x90] sm:$0xf] }
 0x224   : > { %4677 = vmatprep.subr.bf16.mxu0 %v5700_v27  ;;  %4857 = vmatprep.subr.bf16.mxu1 %v5700_v27  ;;  %v3274_v13 = vshll.u32 %v3768_v9, 16 }
 0x226   : > { %4674 = vmatmul.mubr.bf16.vlgmr.msra.gmra.mrb[4].mxu0 %v6040_v60  ;;  %4854 = vmatmul.mubr.bf16.vlgmr.msra.gmra.mrb[4].mxu1 %v6095_v6  ;;  %v3770_v60 = vld [vmem:[%s5196_s26 + $0x98] sm:$0xf]  ;;  %v3276_v43 = vrot.slane %v3274_v13, 5 }
 0x227   : > { %4678 = vmatpush3.bf16.msra.mxu0 %v5700_v27  ;;  %4858 = vmatpush3.bf16.msra.mxu1 %v5700_v27  ;;  %v3271_v27 = vshrl.u32 %v3768_v9, 16  ;;  %v3288_v61 = vshll.u32 %v3770_v60, 16 }
 0x228   : > { %4679 = vmatprep.subr.bf16.mxu0 %v5715_v34  ;;  %4859 = vmatprep.subr.bf16.mxu1 %v5715_v34 }
 0x229   : > { %4693 = vmatprep.mubr.bf16.mxu0 %v6050_v16  ;;  %4873 = vmatprep.mubr.bf16.mxu1 %v3772_v50  ;;  %v3285_v16 = vshrl.u32 %v3770_v60, 16  ;;  %v3290_v51 = vrot.slane %v3288_v61, 5 }
 0x22b   : > { %4680 = vmatpush3.bf16.msra.mxu0 %v5715_v34  ;;  %4860 = vmatpush3.bf16.msra.mxu1 %v5715_v34  ;;  %v3273_v34 = vrot.slane %v3271_v27, 4  ;;  %v3287_v14 = vrot.slane %v3285_v16, 4 }
 0x22c   : > { %4681 = vmatprep.subr.bf16.mxu0 %v5728_v41  ;;  %4861 = vmatprep.subr.bf16.mxu1 %v5728_v41 }
 0x22d   : > { %v3277_v10 = vor.u32 %v3276_v43, %v3273_v34  ;;  %v3291_v17 = vor.u32 %v3290_v51, %v3287_v14 }
 0x22f   : > { %4682 = vmatpush3.bf16.msra.mxu0 %v5728_v41  ;;  %4862 = vmatpush3.bf16.msra.mxu1 %v5728_v41  ;;  %v3769_v41 = vld [vmem:[%s5196_s26 + $0x94] sm:$0x1]  ;;  %v3292_v24 = vrot.slane %v3291_v17, 4 }
 0x230   : > { %4683 = vmatprep.subr.bf16.mxu0 %v5739_v42  ;;  %4863 = vmatprep.subr.bf16.mxu1 %v5739_v42  ;;  %v3280_v45 = vshll.u32 %v3769_v41, 16 }
 0x232   : > { %v3282_v23 = vrot.slane %v3280_v45, 5 }
 0x233   : > { %4684 = vmatpush3.bf16.msra.mxu0 %v5739_v42  ;;  %4864 = vmatpush3.bf16.msra.mxu1 %v5739_v42  ;;  %v3278_v42 = vrot.slane %v3277_v10, 4 }
 0x234   : > { %4685 = vmatprep.subr.bf16.mxu0 %v5750_v2  ;;  %4865 = vmatprep.subr.bf16.mxu1 %v5750_v2 }
 0x237   : > { %4686 = vmatpush3.bf16.msra.mxu0 %v5750_v2  ;;  %4866 = vmatpush3.bf16.msra.mxu1 %v5750_v2  ;;  %v3283_v2 = vsel %vm5218_vm2, %v3278_v42, %v3282_v23 }
 0x238   : > { %4687 = vmatprep.subr.bf16.mxu0 %v5759_v12  ;;  %4867 = vmatprep.subr.bf16.mxu1 %v5759_v12 }
 0x23b   : > { %4688 = vmatpush3.bf16.msra.mxu0 %v5759_v12  ;;  %4868 = vmatpush3.bf16.msra.mxu1 %v5759_v12  ;;  %v3297_v12 = vsel %vm5218_vm2, %v3292_v24, %v3296_v35 }
 0x23c   : > { %4689 = vmatprep.subr.bf16.mxu0 %v5770_v46  ;;  %4869 = vmatprep.subr.bf16.mxu1 %v5770_v46  ;;  %v3773_v40 = vcombine.low %v3283_v2, %v3297_v12 }
 0x23f   : > { %4690 = vmatpush3.bf16.msra.mxu0 %v5770_v46  ;;  %4870 = vmatpush3.bf16.msra.mxu1 %v5770_v46 }
 0x240   : > { %4691 = vmatprep.subr.bf16.mxu0 %v5779_v57  ;;  %4871 = vmatprep.subr.bf16.mxu1 %v5779_v57 }
 0x243   : > { %4692 = vmatpush3.bf16.msra.mxu0 %v5779_v57  ;;  %4872 = vmatpush3.bf16.msra.mxu1 %v5779_v57 }
 0x246   : > { %4694 = vmatmul.mubr.bf16.vlgmr.msra.gmra.mrb[4].mxu0 %v6095_v6  ;;  %4874 = vmatmul.mubr.bf16.vlgmr.msra.gmra.mrb[4].mxu1 %v3773_v40 }
 0x319   : > { %v4695_v46 = vpop.f32.mrb[4].mxu0  ;;  %v4875_v47 = vpop.f32.mrb[4].mxu1 }
 0x31a   : > { %v2816_v30 = vmax.f32 %v2237_v28, %v4695_v46  ;;  %v2795_v53 = vpop.f32.mrb[5].mxu0  ;;  %v3340_v48 = vpop.f32.mrb[5].mxu1 }
 0x31b   : > { %v2814_v56 = vmax.f32 %v2235_v20, %v2795_v53  ;;  %v4696_v59 = vpop.f32.mrb[6].mxu0  ;;  %v4876_v63 = vpop.f32.mrb[6].mxu1 }
 0x31c   : > { %v3361_v57 = vmax.f32 %v2816_v30, %v4875_v47  ;;  %v2817_v44 = vmax.f32 %v2238_v31, %v4696_v59  ;;  %v2798_v19 = vpop.f32.mrb[7].mxu0  ;;  %v3343_v3 = vpop.f32.mrb[7].mxu1 }
 0x31d   : > { %v3359_v0 = vmax.f32 %v2814_v56, %v3340_v48  ;;  %v2815_v28 = vmax.f32 %v2236_v33, %v2798_v19 }
 0x31e   : > { %v3362_v36 = vmax.f32 %v2817_v44, %v4876_v63  ;;  %v3372_v20 = vadd.f32 %v3774_v39, %v3361_v57 }
 0x31f   : > { %v3360_v7 = vmax.f32 %v2815_v28, %v3343_v3  ;;  %v3370_v49 = vadd.f32 %v3774_v39, %v3359_v0 }
 0x320   : > { %v3373_v62 = vadd.f32 %v3774_v39, %v3362_v36 }
 0x321   : > { %v3371_v25 = vadd.f32 %v3774_v39, %v3360_v7 }
 0x322   : > { %v3794_v26 = vpack.c.bf16 %v3373_v62, %v3372_v20 }
 0x323   : > { %v3789_v31 = vpack.c.bf16 %v3371_v25, %v3370_v49 }
 0x324   : > { %3796 = vst [vmem:[%s175_s27 + $0x8] sm:$0xff] %v3794_v26  }
 0x325   : > { %3790 = vst [vmem:[%s175_s27] sm:$0xff] %v3789_v31  }
 0x326 PF: > { %s13_s12 = sadd.s32 1, %s5148_s12  }
 0x327   : > { %p10_p5 = scmp.ge.s32.totalorder %s13_s12, 4  }
 0x329   :  { %12 = sbr.rel (!%p10_p5) target bundleno = 1 (0x1), region = 77 }

// kernel: cnn_forward.7
= control target key start
LH: loop header
LB: loop body
LE: loop exit
PB: predicated region body
PF: predicated region fallthrough
CT: control target
= control target key end

     0   :  { %vm2233_vm0 = vmmov 0   ;;  %s2760_s1 = inlined_call_operand.vmem [shape: bf16[2048,128], index: 1, kind: input, shape index: {}]   ;;  %s2761_s0 = inlined_call_operand.vmem [shape: bf16[8,2048], index: 0, kind: input, shape index: {}]   ;;  %s2762_s3 = inlined_call_operand.vmem [shape: bf16[128,128], index: 3, kind: input, shape index: {}]   ;;  %s2763_s5 = inlined_call_operand.vmem [shape: bf16[128,128], index: 5, kind: input, shape index: {}]   ;;  %s2764_s2 = inlined_call_operand.vmem [shape: f32[1,128], index: 2, kind: input, shape index: {}]   ;;  %s2765_s4 = inlined_call_operand.vmem [shape: f32[1,128], index: 4, kind: input, shape index: {}]   ;;  %s2766_s6 = inlined_call_operand.vmem [shape: f32[1,128], index: 6, kind: input, shape index: {}]   ;;  %s2767_s7 = inlined_call_operand.vmem [shape: f32[8,128], index: 7, kind: output, shape index: {}]  }
   0x1   :  { %v2072_v0 = vld [vmem:[%s2760_s1 + $0x40] sm:$0xff]   ;;  %v2076_v4 = vld [vmem:[%s2760_s1 + $0x48] sm:$0xff]   ;;  %v2080_v8 = vld [vmem:[%s2760_s1 + $0x50] sm:$0xff]  }
   0x2   :  { %v2073_v1 = vld [vmem:[%s2760_s1 + $0xc0] sm:$0xff]   ;;  %1836 = vmatprep.subr.bf16.mxu0 %v2072_v0  ;;  %v2077_v5 = vld [vmem:[%s2760_s1 + $0xc8] sm:$0xff]   ;;  %v2081_v9 = vld [vmem:[%s2760_s1 + $0xd0] sm:$0xff]  }
   0x3   :  { %v2074_v2 = vld [vmem:[%s2760_s1] sm:$0xff]   ;;  %1858 = vmatprep.subr.bf16.mxu1 %v2073_v1  ;;  %v2078_v6 = vld [vmem:[%s2760_s1 + $0x8] sm:$0xff]   ;;  %v2082_v10 = vld [vmem:[%s2760_s1 + $0x10] sm:$0xff]  }
   0x4   :  { %v2075_v3 = vld [vmem:[%s2760_s1 + $0x80] sm:$0xff]   ;;  %1837 = vmatpush3.bf16.msra.mxu0 %v2074_v2  ;;  %v2079_v7 = vld [vmem:[%s2760_s1 + $0x88] sm:$0xff]   ;;  %v2083_v11 = vld [vmem:[%s2760_s1 + $0x90] sm:$0xff]  }
   0x5   :  { %1859 = vmatpush3.bf16.msra.mxu1 %v2075_v3  ;;  %1838 = vmatprep.subr.bf16.mxu0 %v2076_v4  ;;  %v2084_v12 = vld [vmem:[%s2760_s1 + $0x58] sm:$0xff]   ;;  %v2088_v16 = vld [vmem:[%s2760_s1 + $0x60] sm:$0xff]   ;;  %v2092_v20 = vld [vmem:[%s2760_s1 + $0x68] sm:$0xff]  }
   0x6   :  { %1860 = vmatprep.subr.bf16.mxu1 %v2077_v5  ;;  %v2085_v13 = vld [vmem:[%s2760_s1 + $0xd8] sm:$0xff]   ;;  %v2089_v17 = vld [vmem:[%s2760_s1 + $0xe0] sm:$0xff]   ;;  %v2093_v21 = vld [vmem:[%s2760_s1 + $0xe8] sm:$0xff]  }
   0x7   :  { %v2086_v14 = vld [vmem:[%s2760_s1 + $0x18] sm:$0xff]   ;;  %v2090_v18 = vld [vmem:[%s2760_s1 + $0x20] sm:$0xff]   ;;  %v2094_v22 = vld [vmem:[%s2760_s1 + $0x28] sm:$0xff]  }
   0x8   :  { %1839 = vmatpush3.bf16.msra.mxu0 %v2078_v6  ;;  %v2087_v15 = vld [vmem:[%s2760_s1 + $0x98] sm:$0xff]   ;;  %v2091_v19 = vld [vmem:[%s2760_s1 + $0xa0] sm:$0xff]   ;;  %v2095_v23 = vld [vmem:[%s2760_s1 + $0xa8] sm:$0xff]  }
   0x9   :  { %1861 = vmatpush3.bf16.msra.mxu1 %v2079_v7  ;;  %1840 = vmatprep.subr.bf16.mxu0 %v2080_v8  ;;  %v2096_v24 = vld [vmem:[%s2760_s1 + $0x70] sm:$0xff]   ;;  %v2100_v28 = vld [vmem:[%s2760_s1 + $0x78] sm:$0xff]   ;;  %v27_v32 = vld [vmem:[%s2761_s0] sm:$0xff] }
   0xa   :  { %1862 = vmatprep.subr.bf16.mxu1 %v2081_v9  ;;  %v2097_v25 = vld [vmem:[%s2760_s1 + $0xf0] sm:$0xff]   ;;  %v2101_v29 = vld [vmem:[%s2760_s1 + $0xf8] sm:$0xff]   ;;  %v28_v33 = vld [vmem:[%s2761_s0 + $0x8] sm:$0xff]  ;;  %v1674_v34 = vcombine.low %v27_v32, %v27_v32  ;;  %v1675_v35 = vcombine.high %v27_v32, %v27_v32 }
   0xb   :  { %v2098_v26 = vld [vmem:[%s2760_s1 + $0x30] sm:$0xff]   ;;  %v2102_v30 = vld [vmem:[%s2760_s1 + $0x38] sm:$0xff]   ;;  %v1676_v36 = vcombine.low %v28_v33, %v28_v33  ;;  %v1677_v37 = vcombine.high %v28_v33, %v28_v33  ;;  %v2108_v38 = vld [vmem:[%s2760_s1 + $0x140] sm:$0xff]  }
   0xc   :  { %1841 = vmatpush3.bf16.msra.mxu0 %v2082_v10  ;;  %v2099_v27 = vld [vmem:[%s2760_s1 + $0xb0] sm:$0xff]   ;;  %v2103_v31 = vld [vmem:[%s2760_s1 + $0xb8] sm:$0xff]   ;;  %v2109_v39 = vld [vmem:[%s2760_s1 + $0x1c0] sm:$0xff]   ;;  %1154 = vmatprep.mubr.bf16.mxu0 %v1675_v35 }
   0xd   :  { %1863 = vmatpush3.bf16.msra.mxu1 %v2083_v11  ;;  %1842 = vmatprep.subr.bf16.mxu0 %v2084_v12  ;;  %v2110_v40 = vld [vmem:[%s2760_s1 + $0x100] sm:$0xff]   ;;  %v2112_v42 = vld [vmem:[%s2760_s1 + $0x148] sm:$0xff]   ;;  %v2116_v46 = vld [vmem:[%s2760_s1 + $0x150] sm:$0xff]  }
   0xe   :  { %1864 = vmatprep.subr.bf16.mxu1 %v2085_v13  ;;  %1194 = vmatprep.mubr.bf16.mxu1 %v1677_v37  ;;  %v2111_v41 = vld [vmem:[%s2760_s1 + $0x180] sm:$0xff]   ;;  %v2113_v43 = vld [vmem:[%s2760_s1 + $0x1c8] sm:$0xff]   ;;  %v2117_v47 = vld [vmem:[%s2760_s1 + $0x1d0] sm:$0xff]  }
   0xf   :  { %v2114_v44 = vld [vmem:[%s2760_s1 + $0x108] sm:$0xff]   ;;  %v2118_v48 = vld [vmem:[%s2760_s1 + $0x110] sm:$0xff]   ;;  %v2120_v50 = vld [vmem:[%s2760_s1 + $0x158] sm:$0xff]  }
  0x10   :  { %1843 = vmatpush3.bf16.msra.mxu0 %v2086_v14  ;;  %v2115_v45 = vld [vmem:[%s2760_s1 + $0x188] sm:$0xff]   ;;  %v2119_v49 = vld [vmem:[%s2760_s1 + $0x190] sm:$0xff]   ;;  %v2121_v51 = vld [vmem:[%s2760_s1 + $0x1d8] sm:$0xff]  }
  0x11   :  { %1865 = vmatpush3.bf16.msra.mxu1 %v2087_v15  ;;  %1844 = vmatprep.subr.bf16.mxu0 %v2088_v16  ;;  %v2122_v52 = vld [vmem:[%s2760_s1 + $0x118] sm:$0xff]   ;;  %v2124_v54 = vld [vmem:[%s2760_s1 + $0x160] sm:$0xff]   ;;  %v2128_v58 = vld [vmem:[%s2760_s1 + $0x168] sm:$0xff]  }
  0x12   :  { %1866 = vmatprep.subr.bf16.mxu1 %v2089_v17  ;;  %v2123_v53 = vld [vmem:[%s2760_s1 + $0x198] sm:$0xff]   ;;  %v2125_v55 = vld [vmem:[%s2760_s1 + $0x1e0] sm:$0xff]   ;;  %v2129_v59 = vld [vmem:[%s2760_s1 + $0x1e8] sm:$0xff]  }
  0x13   :  { %v2126_v56 = vld [vmem:[%s2760_s1 + $0x120] sm:$0xff]   ;;  %v2130_v60 = vld [vmem:[%s2760_s1 + $0x128] sm:$0xff]   ;;  %v2132_v62 = vld [vmem:[%s2760_s1 + $0x170] sm:$0xff]  }
  0x14   :  { %1845 = vmatpush3.bf16.msra.mxu0 %v2090_v18  ;;  %v2127_v57 = vld [vmem:[%s2760_s1 + $0x1a0] sm:$0xff]   ;;  %v2131_v61 = vld [vmem:[%s2760_s1 + $0x1a8] sm:$0xff]   ;;  %v2133_v63 = vld [vmem:[%s2760_s1 + $0x1f0] sm:$0xff]  }
  0x15   :  { %1867 = vmatpush3.bf16.msra.mxu1 %v2091_v19  ;;  %1846 = vmatprep.subr.bf16.mxu0 %v2092_v20  ;;  %v2134_v0 = vld [vmem:[%s2760_s1 + $0x130] sm:$0xff]   ;;  %v2136_v2 = vld [vmem:[%s2760_s1 + $0x178] sm:$0xff]   ;;  %v2144_v12 = vld [vmem:[%s2760_s1 + $0x240] sm:$0xff]  }
  0x16   :  { %1868 = vmatprep.subr.bf16.mxu1 %v2093_v21  ;;  %v2135_v1 = vld [vmem:[%s2760_s1 + $0x1b0] sm:$0xff]   ;;  %v2137_v3 = vld [vmem:[%s2760_s1 + $0x1f8] sm:$0xff]   ;;  %v2145_v13 = vld [vmem:[%s2760_s1 + $0x2c0] sm:$0xff]  }
  0x17   :  { %v2138_v4 = vld [vmem:[%s2760_s1 + $0x138] sm:$0xff]   ;;  %v29_v6 = vld [vmem:[%s2761_s0 + $0x10] sm:$0xff]  ;;  %v2146_v14 = vld [vmem:[%s2760_s1 + $0x200] sm:$0xff]  }
  0x18   :  { %1847 = vmatpush3.bf16.msra.mxu0 %v2094_v22  ;;  %v2139_v5 = vld [vmem:[%s2760_s1 + $0x1b8] sm:$0xff]   ;;  %v1678_v7 = vcombine.low %v29_v6, %v29_v6  ;;  %v1679_v8 = vcombine.high %v29_v6, %v29_v6  ;;  %v2147_v15 = vld [vmem:[%s2760_s1 + $0x280] sm:$0xff]   ;;  %v2148_v16 = vld [vmem:[%s2760_s1 + $0x248] sm:$0xff]  }
  0x19   :  { %1869 = vmatpush3.bf16.msra.mxu1 %v2095_v23  ;;  %1848 = vmatprep.subr.bf16.mxu0 %v2096_v24  ;;  %v30_v9 = vld [vmem:[%s2761_s0 + $0x18] sm:$0xff]  ;;  %v2149_v17 = vld [vmem:[%s2760_s1 + $0x2c8] sm:$0xff]   ;;  %v2152_v20 = vld [vmem:[%s2760_s1 + $0x250] sm:$0xff]  }
  0x1a   :  { %1870 = vmatprep.subr.bf16.mxu1 %v2097_v25  ;;  %v1680_v10 = vcombine.low %v30_v9, %v30_v9  ;;  %v1681_v11 = vcombine.high %v30_v9, %v30_v9  ;;  %v2150_v18 = vld [vmem:[%s2760_s1 + $0x208] sm:$0xff]   ;;  %v2153_v21 = vld [vmem:[%s2760_s1 + $0x2d0] sm:$0xff]   ;;  %v2156_v24 = vld [vmem:[%s2760_s1 + $0x258] sm:$0xff]  }
  0x1b   :  { %v2151_v19 = vld [vmem:[%s2760_s1 + $0x288] sm:$0xff]   ;;  %v2154_v22 = vld [vmem:[%s2760_s1 + $0x210] sm:$0xff]   ;;  %v2157_v25 = vld [vmem:[%s2760_s1 + $0x2d8] sm:$0xff]  }
  0x1c   :  { %1849 = vmatpush3.bf16.msra.mxu0 %v2098_v26  ;;  %v2155_v23 = vld [vmem:[%s2760_s1 + $0x290] sm:$0xff]   ;;  %v2158_v26 = vld [vmem:[%s2760_s1 + $0x218] sm:$0xff]   ;;  %v2164_v32 = vld [vmem:[%s2760_s1 + $0x268] sm:$0xff]  }
  0x1d   :  { %1871 = vmatpush3.bf16.msra.mxu1 %v2099_v27  ;;  %1850 = vmatprep.subr.bf16.mxu0 %v2100_v28  ;;  %v2159_v27 = vld [vmem:[%s2760_s1 + $0x298] sm:$0xff]   ;;  %v2160_v28 = vld [vmem:[%s2760_s1 + $0x260] sm:$0xff]   ;;  %v2165_v33 = vld [vmem:[%s2760_s1 + $0x2e8] sm:$0xff]  }
  0x1e   :  { %1872 = vmatprep.subr.bf16.mxu1 %v2101_v29  ;;  %v2161_v29 = vld [vmem:[%s2760_s1 + $0x2e0] sm:$0xff]   ;;  %v2167_v35 = vld [vmem:[%s2760_s1 + $0x2a8] sm:$0xff]   ;;  %v2169_v37 = vld [vmem:[%s2760_s1 + $0x2f0] sm:$0xff]  }
  0x1f   :  { %v2200_v6 = vld [vmem:[%s2760_s1 + $0x368] sm:$0xff]  }
  0x20   :  { %1851 = vmatpush3.bf16.msra.mxu0 %v2102_v30  ;;  %v2162_v30 = vld [vmem:[%s2760_s1 + $0x220] sm:$0xff]   ;;  %v2203_v9 = vld [vmem:[%s2760_s1 + $0x3a8] sm:$0xff]  }
  0x21   :  { %1873 = vmatpush3.bf16.msra.mxu1 %v2103_v31  ;;  %1880 = vmatprep.subr.bf16.mxu0 %v2108_v38  ;;  %v2163_v31 = vld [vmem:[%s2760_s1 + $0x2a0] sm:$0xff]   ;;  %v2170_v38 = vld [vmem:[%s2760_s1 + $0x230] sm:$0xff]  }
  0x22   :  { %1902 = vmatprep.subr.bf16.mxu1 %v2109_v39  ;;  %v2171_v39 = vld [vmem:[%s2760_s1 + $0x2b0] sm:$0xff]  }
  0x23   :  { %1155 = vmatmul.mubr.bf16.vlgmr.msra.gmra.mrb[0].mxu0 %v1674_v34  ;;  %v2166_v34 = vld [vmem:[%s2760_s1 + $0x228] sm:$0xff]  }
  0x24   :  { %1195 = vmatmul.mubr.bf16.vlgmr.msra.gmra.mrb[0].mxu1 %v1676_v36  ;;  %1881 = vmatpush3.bf16.msra.mxu0 %v2110_v40  ;;  %v2168_v36 = vld [vmem:[%s2760_s1 + $0x270] sm:$0xff]   ;;  %v2172_v40 = vld [vmem:[%s2760_s1 + $0x278] sm:$0xff]  }
  0x25   :  { %1903 = vmatpush3.bf16.msra.mxu1 %v2111_v41  ;;  %1882 = vmatprep.subr.bf16.mxu0 %v2112_v42  ;;  %v2173_v41 = vld [vmem:[%s2760_s1 + $0x2f8] sm:$0xff]  }
  0x26   :  { %1904 = vmatprep.subr.bf16.mxu1 %v2113_v43  ;;  %1234 = vmatprep.mubr.bf16.mxu0 %v1679_v8  ;;  %v2174_v42 = vld [vmem:[%s2760_s1 + $0x238] sm:$0xff]   ;;  %v2202_v8 = vld [vmem:[%s2760_s1 + $0x328] sm:$0xff]  }
  0x27   :  { %1274 = vmatprep.mubr.bf16.mxu1 %v1681_v11  ;;  %v2175_v43 = vld [vmem:[%s2760_s1 + $0x2b8] sm:$0xff]   ;;  %v2205_v11 = vld [vmem:[%s2760_s1 + $0x3f0] sm:$0xff]  }
  0x28   :  { %1883 = vmatpush3.bf16.msra.mxu0 %v2114_v44  ;;  %v31_v44 = vld [vmem:[%s2761_s0 + $0x20] sm:$0xff] }
  0x29   :  { %1905 = vmatpush3.bf16.msra.mxu1 %v2115_v45  ;;  %1884 = vmatprep.subr.bf16.mxu0 %v2116_v46  ;;  %v32_v45 = vld [vmem:[%s2761_s0 + $0x28] sm:$0xff]  ;;  %v1682_v46 = vcombine.low %v31_v44, %v31_v44 }
  0x2a   :  { %1906 = vmatprep.subr.bf16.mxu1 %v2117_v47  ;;  %v1683_v47 = vcombine.high %v31_v44, %v31_v44 }
  0x2c   :  { %1885 = vmatpush3.bf16.msra.mxu0 %v2118_v48  ;;  %v1684_v48 = vcombine.low %v32_v45, %v32_v45 }
  0x2d   :  { %1907 = vmatpush3.bf16.msra.mxu1 %v2119_v49  ;;  %1886 = vmatprep.subr.bf16.mxu0 %v2120_v50  ;;  %v1685_v49 = vcombine.high %v32_v45, %v32_v45  ;;  %v2180_v50 = vld [vmem:[%s2760_s1 + $0x340] sm:$0xff]  }
  0x2e   :  { %1908 = vmatprep.subr.bf16.mxu1 %v2121_v51  ;;  %v2181_v51 = vld [vmem:[%s2760_s1 + $0x3c0] sm:$0xff]  }
  0x30   :  { %1887 = vmatpush3.bf16.msra.mxu0 %v2122_v52  ;;  %v2182_v52 = vld [vmem:[%s2760_s1 + $0x300] sm:$0xff]  }
  0x31   :  { %1909 = vmatpush3.bf16.msra.mxu1 %v2123_v53  ;;  %1888 = vmatprep.subr.bf16.mxu0 %v2124_v54  ;;  %v2183_v53 = vld [vmem:[%s2760_s1 + $0x380] sm:$0xff]   ;;  %v2184_v54 = vld [vmem:[%s2760_s1 + $0x348] sm:$0xff]  }
  0x32   :  { %1910 = vmatprep.subr.bf16.mxu1 %v2125_v55  ;;  %v2185_v55 = vld [vmem:[%s2760_s1 + $0x3c8] sm:$0xff]  }
  0x34   :  { %1889 = vmatpush3.bf16.msra.mxu0 %v2126_v56  ;;  %v2186_v56 = vld [vmem:[%s2760_s1 + $0x308] sm:$0xff]  }
  0x35   :  { %1911 = vmatpush3.bf16.msra.mxu1 %v2127_v57  ;;  %1890 = vmatprep.subr.bf16.mxu0 %v2128_v58  ;;  %v2187_v57 = vld [vmem:[%s2760_s1 + $0x388] sm:$0xff]   ;;  %v2188_v58 = vld [vmem:[%s2760_s1 + $0x350] sm:$0xff]  }
  0x36   :  { %1912 = vmatprep.subr.bf16.mxu1 %v2129_v59  ;;  %v2189_v59 = vld [vmem:[%s2760_s1 + $0x3d0] sm:$0xff]  }
  0x38   :  { %1891 = vmatpush3.bf16.msra.mxu0 %v2130_v60  ;;  %v2190_v60 = vld [vmem:[%s2760_s1 + $0x310] sm:$0xff]  }
  0x39   :  { %1913 = vmatpush3.bf16.msra.mxu1 %v2131_v61  ;;  %1892 = vmatprep.subr.bf16.mxu0 %v2132_v62  ;;  %v2191_v61 = vld [vmem:[%s2760_s1 + $0x390] sm:$0xff]   ;;  %v2192_v62 = vld [vmem:[%s2760_s1 + $0x358] sm:$0xff]  }
  0x3a   :  { %1914 = vmatprep.subr.bf16.mxu1 %v2133_v63  ;;  %v2193_v63 = vld [vmem:[%s2760_s1 + $0x3d8] sm:$0xff]  }
  0x3c   :  { %1893 = vmatpush3.bf16.msra.mxu0 %v2134_v0  ;;  %v2194_v0 = vld [vmem:[%s2760_s1 + $0x318] sm:$0xff]  }
  0x3d   :  { %1915 = vmatpush3.bf16.msra.mxu1 %v2135_v1  ;;  %1894 = vmatprep.subr.bf16.mxu0 %v2136_v2  ;;  %v2195_v1 = vld [vmem:[%s2760_s1 + $0x398] sm:$0xff]   ;;  %v2196_v2 = vld [vmem:[%s2760_s1 + $0x360] sm:$0xff]  }
  0x3e   :  { %1916 = vmatprep.subr.bf16.mxu1 %v2137_v3  ;;  %v2197_v3 = vld [vmem:[%s2760_s1 + $0x3e0] sm:$0xff]  }
  0x40   :  { %1895 = vmatpush3.bf16.msra.mxu0 %v2138_v4  ;;  %v2198_v4 = vld [vmem:[%s2760_s1 + $0x320] sm:$0xff]  }
  0x41   :  { %1917 = vmatpush3.bf16.msra.mxu1 %v2139_v5  ;;  %1924 = vmatprep.subr.bf16.mxu0 %v2144_v12  ;;  %v2199_v5 = vld [vmem:[%s2760_s1 + $0x3a0] sm:$0xff]   ;;  %v2206_v12 = vld [vmem:[%s2760_s1 + $0x330] sm:$0xff]  }
  0x42   :  { %1946 = vmatprep.subr.bf16.mxu1 %v2145_v13  ;;  %v2207_v13 = vld [vmem:[%s2760_s1 + $0x3b0] sm:$0xff]  }
  0x43   :  { %1235 = vmatmul.mubr.bf16.vlgmr.msra.gmra.mrb[4].mxu0 %v1678_v7  ;;  %v2201_v7 = vld [vmem:[%s2760_s1 + $0x3e8] sm:$0xff]  }
  0x44   :  { %1275 = vmatmul.mubr.bf16.vlgmr.msra.gmra.mrb[4].mxu1 %v1680_v10  ;;  %1925 = vmatpush3.bf16.msra.mxu0 %v2146_v14  ;;  %v2204_v10 = vld [vmem:[%s2760_s1 + $0x370] sm:$0xff]   ;;  %v2208_v14 = vld [vmem:[%s2760_s1 + $0x378] sm:$0xff]  }
  0x45   :  { %1947 = vmatpush3.bf16.msra.mxu1 %v2147_v15  ;;  %1926 = vmatprep.subr.bf16.mxu0 %v2148_v16  ;;  %v2209_v15 = vld [vmem:[%s2760_s1 + $0x3f8] sm:$0xff]  }
  0x46   :  { %1948 = vmatprep.subr.bf16.mxu1 %v2149_v17  ;;  %1314 = vmatprep.mubr.bf16.mxu0 %v1683_v47  ;;  %v2210_v16 = vld [vmem:[%s2760_s1 + $0x338] sm:$0xff]  }
  0x47   :  { %1354 = vmatprep.mubr.bf16.mxu1 %v1685_v49  ;;  %v2211_v17 = vld [vmem:[%s2760_s1 + $0x3b8] sm:$0xff]  }
  0x48   :  { %1927 = vmatpush3.bf16.msra.mxu0 %v2150_v18  ;;  %v33_v18 = vld [vmem:[%s2761_s0 + $0x30] sm:$0xff] }
  0x49   :  { %1949 = vmatpush3.bf16.msra.mxu1 %v2151_v19  ;;  %1928 = vmatprep.subr.bf16.mxu0 %v2152_v20  ;;  %v34_v19 = vld [vmem:[%s2761_s0 + $0x38] sm:$0xff]  ;;  %v1686_v20 = vcombine.low %v33_v18, %v33_v18 }
  0x4a   :  { %1950 = vmatprep.subr.bf16.mxu1 %v2153_v21  ;;  %v1687_v21 = vcombine.high %v33_v18, %v33_v18 }
  0x4c   :  { %1929 = vmatpush3.bf16.msra.mxu0 %v2154_v22  ;;  %v1688_v22 = vcombine.low %v34_v19, %v34_v19 }
  0x4d   :  { %1951 = vmatpush3.bf16.msra.mxu1 %v2155_v23  ;;  %1930 = vmatprep.subr.bf16.mxu0 %v2156_v24  ;;  %v1689_v23 = vcombine.high %v34_v19, %v34_v19  ;;  %v2232_v24 = vmov 0.0  }
  0x4e   :  { %1952 = vmatprep.subr.bf16.mxu1 %v2157_v25  ;;  %v2216_v25 = vld [vmem:[%s2762_s3] sm:$0xff]  }
  0x50   :  { %1931 = vmatpush3.bf16.msra.mxu0 %v2158_v26  ;;  %v2217_v26 = vld [vmem:[%s2762_s3 + $0x8] sm:$0xff]  }
  0x51   :  { %1953 = vmatpush3.bf16.msra.mxu1 %v2159_v27  ;;  %1932 = vmatprep.subr.bf16.mxu0 %v2160_v28  ;;  %v2218_v27 = vld [vmem:[%s2762_s3 + $0x10] sm:$0xff]   ;;  %v2219_v28 = vld [vmem:[%s2762_s3 + $0x18] sm:$0xff]  }
  0x52   :  { %1954 = vmatprep.subr.bf16.mxu1 %v2161_v29  ;;  %v2220_v29 = vld [vmem:[%s2762_s3 + $0x20] sm:$0xff]  }
  0x54   :  { %1933 = vmatpush3.bf16.msra.mxu0 %v2162_v30  ;;  %v2221_v30 = vld [vmem:[%s2762_s3 + $0x28] sm:$0xff]  }
  0x55   :  { %1955 = vmatpush3.bf16.msra.mxu1 %v2163_v31  ;;  %1934 = vmatprep.subr.bf16.mxu0 %v2164_v32  ;;  %v2222_v31 = vld [vmem:[%s2762_s3 + $0x30] sm:$0xff]   ;;  %v2223_v32 = vld [vmem:[%s2762_s3 + $0x38] sm:$0xff]  }
  0x56   :  { %1956 = vmatprep.subr.bf16.mxu1 %v2165_v33  ;;  %v2224_v33 = vld [vmem:[%s2763_s5] sm:$0xff]  }
  0x58   :  { %1935 = vmatpush3.bf16.msra.mxu0 %v2166_v34  ;;  %v2225_v34 = vld [vmem:[%s2763_s5 + $0x8] sm:$0xff]  }
  0x59   :  { %1957 = vmatpush3.bf16.msra.mxu1 %v2167_v35  ;;  %1936 = vmatprep.subr.bf16.mxu0 %v2168_v36  ;;  %v2226_v35 = vld [vmem:[%s2763_s5 + $0x10] sm:$0xff]   ;;  %v2227_v36 = vld [vmem:[%s2763_s5 + $0x18] sm:$0xff]  }
  0x5a   :  { %1958 = vmatprep.subr.bf16.mxu1 %v2169_v37  ;;  %v2228_v37 = vld [vmem:[%s2763_s5 + $0x20] sm:$0xff]  }
  0x5c   :  { %1937 = vmatpush3.bf16.msra.mxu0 %v2170_v38 }
  0x5d   :  { %1959 = vmatpush3.bf16.msra.mxu1 %v2171_v39  ;;  %1938 = vmatprep.subr.bf16.mxu0 %v2172_v40  ;;  %v1673_v40 = vld [vmem:[%s2764_s2] ss:$0 sm:$0xff] }
  0x5e   :  { %1960 = vmatprep.subr.bf16.mxu1 %v2173_v41 }
  0x60   :  { %1939 = vmatpush3.bf16.msra.mxu0 %v2174_v42 }
  0x61   :  { %1961 = vmatpush3.bf16.msra.mxu1 %v2175_v43  ;;  %1968 = vmatprep.subr.bf16.mxu0 %v2180_v50  ;;  %v2229_v43 = vld [vmem:[%s2763_s5 + $0x28] sm:$0xff]  }
  0x62   :  { %1990 = vmatprep.subr.bf16.mxu1 %v2181_v51 }
  0x63   :  { %1315 = vmatmul.mubr.bf16.vlgmr.msra.gmra.mrb[8].mxu0 %v1682_v46 }
  0x64   :  { %1355 = vmatmul.mubr.bf16.vlgmr.msra.gmra.mrb[8].mxu1 %v1684_v48  ;;  %1969 = vmatpush3.bf16.msra.mxu0 %v2182_v52 }
  0x65   :  { %1991 = vmatpush3.bf16.msra.mxu1 %v2183_v53  ;;  %1970 = vmatprep.subr.bf16.mxu0 %v2184_v54 }
  0x66   :  { %1992 = vmatprep.subr.bf16.mxu1 %v2185_v55  ;;  %1394 = vmatprep.mubr.bf16.mxu0 %v1687_v21 }
  0x67   :  { %1434 = vmatprep.mubr.bf16.mxu1 %v1689_v23 }
  0x68   :  { %1971 = vmatpush3.bf16.msra.mxu0 %v2186_v56 }
  0x69   :  { %1993 = vmatpush3.bf16.msra.mxu1 %v2187_v57  ;;  %1972 = vmatprep.subr.bf16.mxu0 %v2188_v58 }
  0x6a   :  { %1994 = vmatprep.subr.bf16.mxu1 %v2189_v59 }
  0x6c   :  { %1973 = vmatpush3.bf16.msra.mxu0 %v2190_v60 }
  0x6d   :  { %1995 = vmatpush3.bf16.msra.mxu1 %v2191_v61  ;;  %1974 = vmatprep.subr.bf16.mxu0 %v2192_v62 }
  0x6e   :  { %1996 = vmatprep.subr.bf16.mxu1 %v2193_v63 }
  0x70   :  { %1975 = vmatpush3.bf16.msra.mxu0 %v2194_v0 }
  0x71   :  { %1997 = vmatpush3.bf16.msra.mxu1 %v2195_v1  ;;  %1976 = vmatprep.subr.bf16.mxu0 %v2196_v2 }
  0x72   :  { %1998 = vmatprep.subr.bf16.mxu1 %v2197_v3 }
  0x74   :  { %1977 = vmatpush3.bf16.msra.mxu0 %v2198_v4 }
  0x75   :  { %1999 = vmatpush3.bf16.msra.mxu1 %v2199_v5  ;;  %1978 = vmatprep.subr.bf16.mxu0 %v2200_v6 }
  0x76   :  { %2000 = vmatprep.subr.bf16.mxu1 %v2201_v7 }
  0x78   :  { %1979 = vmatpush3.bf16.msra.mxu0 %v2202_v8 }
  0x79   :  { %2001 = vmatpush3.bf16.msra.mxu1 %v2203_v9  ;;  %1980 = vmatprep.subr.bf16.mxu0 %v2204_v10 }
  0x7a   :  { %2002 = vmatprep.subr.bf16.mxu1 %v2205_v11 }
  0x7c   :  { %1981 = vmatpush3.bf16.msra.mxu0 %v2206_v12 }
  0x7d   :  { %2003 = vmatpush3.bf16.msra.mxu1 %v2207_v13  ;;  %1982 = vmatprep.subr.bf16.mxu0 %v2208_v14 }
  0x7e   :  { %2004 = vmatprep.subr.bf16.mxu1 %v2209_v15 }
  0x80   :  { %1983 = vmatpush3.bf16.msra.mxu0 %v2210_v16 }
  0x81   :  { %2005 = vmatpush3.bf16.msra.mxu1 %v2211_v17  ;;  %2030 = vmatprep.subr.bf16.mxu0 %v2232_v24 }
  0x82   :  { %2050 = vmatprep.subr.bf16.mxu1 %v2232_v24 }
  0x83   :  { %1395 = vmatmul.mubr.bf16.vlgmr.msra.gmra.mrb[12].mxu0 %v1686_v20 }
  0x84   :  { %1435 = vmatmul.mubr.bf16.vlgmr.msra.gmra.mrb[12].mxu1 %v1688_v22  ;;  %2031 = vmatpush3.bf16.msra.mxu0 %v2216_v25 }
  0x85   :  { %2032 = vmatprep.subr.bf16.mxu0 %v2232_v24  ;;  %2046 = vmatprep.mubr.msk.bf16.mxu0 %vm2233_vm0, %v2232_v24 }
  0x86   :  { %2066 = vmatprep.mubr.msk.bf16.mxu1 %vm2233_vm0, %v2232_v24  ;;  %2051 = vmatpush3.bf16.msra.mxu1 %v2224_v33 }
  0x87   :  { %2052 = vmatprep.subr.bf16.mxu1 %v2232_v24 }
  0x88   :  { %2033 = vmatpush3.bf16.msra.mxu0 %v2217_v26 }
  0x89   :  { %2034 = vmatprep.subr.bf16.mxu0 %v2232_v24 }
  0x8a   :  { %2053 = vmatpush3.bf16.msra.mxu1 %v2225_v34 }
  0x8b   :  { %2054 = vmatprep.subr.bf16.mxu1 %v2232_v24 }
  0x8c   :  { %2035 = vmatpush3.bf16.msra.mxu0 %v2218_v27  ;;  %v2230_v27 = vld [vmem:[%s2763_s5 + $0x30] sm:$0xff]  }
  0x8d   :  { %2036 = vmatprep.subr.bf16.mxu0 %v2232_v24 }
  0x8e   :  { %2055 = vmatpush3.bf16.msra.mxu1 %v2226_v35 }
  0x8f   :  { %2056 = vmatprep.subr.bf16.mxu1 %v2232_v24 }
  0x90   :  { %2037 = vmatpush3.bf16.msra.mxu0 %v2219_v28  ;;  %v2231_v28 = vld [vmem:[%s2763_s5 + $0x38] sm:$0xff]  }
  0x91   :  { %2038 = vmatprep.subr.bf16.mxu0 %v2232_v24 }
  0x92   :  { %2057 = vmatpush3.bf16.msra.mxu1 %v2227_v36 }
  0x93   :  { %2058 = vmatprep.subr.bf16.mxu1 %v2232_v24 }
  0x94   :  { %2039 = vmatpush3.bf16.msra.mxu0 %v2220_v29  ;;  %v1818_v29 = vld [vmem:[%s2765_s4] ss:$0 sm:$0xff] }
  0x95   :  { %2040 = vmatprep.subr.bf16.mxu0 %v2232_v24 }
  0x96   :  { %2059 = vmatpush3.bf16.msra.mxu1 %v2228_v37 }
  0x97   :  { %2060 = vmatprep.subr.bf16.mxu1 %v2232_v24 }
  0x98   :  { %2041 = vmatpush3.bf16.msra.mxu0 %v2221_v30 }
  0x99   :  { %2042 = vmatprep.subr.bf16.mxu0 %v2232_v24 }
  0x9a   :  { %2061 = vmatpush3.bf16.msra.mxu1 %v2229_v43 }
  0x9b   :  { %2062 = vmatprep.subr.bf16.mxu1 %v2232_v24 }
  0x9c   :  { %2043 = vmatpush3.bf16.msra.mxu0 %v2222_v31 }
  0x9d   :  { %2044 = vmatprep.subr.bf16.mxu0 %v2232_v24 }
  0x9e   :  { %2063 = vmatpush3.bf16.msra.mxu1 %v2230_v27 }
  0x9f   :  { %2064 = vmatprep.subr.bf16.mxu1 %v2232_v24  ;;  %v1827_v24 = vld [vmem:[%s2766_s6] ss:$0 sm:$0xff] }
  0xa0   :  { %2045 = vmatpush3.bf16.msra.mxu0 %v2223_v32 }
  0xa2   :  { %2065 = vmatpush3.bf16.msra.mxu1 %v2231_v28 }
  0xf6   :  { %v1852_v38 = vpop.f32.mrb[0].mxu0 }
  0xf7   :  { %v1874_v39 = vpop.f32.mrb[0].mxu1  ;;  %v1853_v41 = vpop.f32.mrb[1].mxu0 }
  0xf8   :  { %v1875_v42 = vpop.f32.mrb[1].mxu1  ;;  %v1854_v44 = vadd.f32 %v1853_v41, %v1852_v38  ;;  %v1855_v46 = vpop.f32.mrb[2].mxu0 }
  0xf9   :  { %v1876_v45 = vadd.f32 %v1875_v42, %v1874_v39  ;;  %v1877_v47 = vpop.f32.mrb[2].mxu1  ;;  %v1856_v48 = vpop.f32.mrb[3].mxu0 }
  0xfa   :  { %v1878_v49 = vpop.f32.mrb[3].mxu1  ;;  %v1157_v50 = vadd.f32 %v1854_v44, %v1673_v40 }
  0xfc   :  { %v1197_v51 = vadd.f32 %v1876_v45, %v1157_v50 }
 0x116   :  { %v1896_v52 = vpop.f32.mrb[4].mxu0 }
 0x117   :  { %v1918_v53 = vpop.f32.mrb[4].mxu1  ;;  %v1897_v54 = vpop.f32.mrb[5].mxu0 }
 0x118   :  { %v1919_v55 = vpop.f32.mrb[5].mxu1  ;;  %v1898_v56 = vadd.f32 %v1897_v54, %v1896_v52  ;;  %v1899_v58 = vpop.f32.mrb[6].mxu0 }
 0x119   :  { %v1920_v57 = vadd.f32 %v1919_v55, %v1918_v53  ;;  %v1921_v59 = vpop.f32.mrb[6].mxu1  ;;  %v1900_v60 = vpop.f32.mrb[7].mxu0 }
 0x11a   :  { %v1922_v61 = vpop.f32.mrb[7].mxu1  ;;  %v1237_v62 = vadd.f32 %v1898_v56, %v1197_v51 }
 0x11c   :  { %v1277_v63 = vadd.f32 %v1920_v57, %v1237_v62 }
 0x136   :  { %v1940_v0 = vpop.f32.mrb[8].mxu0 }
 0x137   :  { %v1962_v1 = vpop.f32.mrb[8].mxu1  ;;  %v1941_v2 = vpop.f32.mrb[9].mxu0 }
 0x138   :  { %v1942_v3 = vadd.f32 %v1941_v2, %v1940_v0  ;;  %v1963_v4 = vpop.f32.mrb[9].mxu1  ;;  %v1943_v5 = vpop.f32.mrb[10].mxu0 }
 0x139   :  { %v1964_v6 = vadd.f32 %v1963_v4, %v1962_v1  ;;  %v1965_v7 = vpop.f32.mrb[10].mxu1  ;;  %v1944_v8 = vpop.f32.mrb[11].mxu0 }
 0x13a   :  { %v1317_v9 = vadd.f32 %v1942_v3, %v1277_v63  ;;  %v1966_v10 = vpop.f32.mrb[11].mxu1 }
 0x13c   :  { %v1357_v11 = vadd.f32 %v1964_v6, %v1317_v9 }
 0x156   :  { %v1984_v12 = vpop.f32.mrb[12].mxu0 }
 0x157   :  { %v2006_v13 = vpop.f32.mrb[12].mxu1  ;;  %v1985_v14 = vpop.f32.mrb[13].mxu0 }
 0x158   :  { %v1986_v15 = vadd.f32 %v1985_v14, %v1984_v12  ;;  %v2007_v16 = vpop.f32.mrb[13].mxu1  ;;  %v1987_v17 = vpop.f32.mrb[14].mxu0 }
 0x159   :  { %v2008_v18 = vadd.f32 %v2007_v16, %v2006_v13  ;;  %v2009_v19 = vpop.f32.mrb[14].mxu1  ;;  %v1988_v20 = vpop.f32.mrb[15].mxu0 }
 0x15a   :  { %v1397_v21 = vadd.f32 %v1986_v15, %v1357_v11  ;;  %v2010_v22 = vpop.f32.mrb[15].mxu1 }
 0x15c   :  { %v1437_v23 = vadd.f32 %v2008_v18, %v1397_v21 }
 0x15e   :  { %v1442_v25 = vmax.f32 %v1437_v23, 0.0 }
 0x160   :  { %v1443_v26 = vpack.c.bf16 %v1442_v25, %v1442_v25 }
 0x162   :  { %2047 = vmatmul.mubr.bf16.vlgmr.msra.gmra.mrb[16].mxu0 %v1443_v26 }
 0x235   :  { %v1549_v30 = vpop.f32.mrb[16].mxu0 }
 0x236   :  { %v1550_v31 = vadd.f32 %v1818_v29, %v1549_v30  ;;  %v2048_v32 = vpop.f32.mrb[17].mxu0 }
 0x237   :  { %v1552_v33 = vpop.f32.mrb[18].mxu0 }
 0x238   :  { %v1555_v34 = vmax.f32 %v1550_v31, 0.0  ;;  %v2049_v35 = vpop.f32.mrb[19].mxu0 }
 0x23a   :  { %v1556_v36 = vpack.c.bf16 %v1555_v34, %v1555_v34 }
 0x23c   :  { %2067 = vmatmul.mubr.bf16.vlgmr.msra.gmra.mrb[16].mxu1 %v1556_v36 }
 0x30f   :  { %v1662_v37 = vpop.f32.mrb[16].mxu1 }
 0x310   :  { %v1663_v38 = vadd.f32 %v1827_v24, %v1662_v37  ;;  %v2068_v39 = vpop.f32.mrb[17].mxu1 }
 0x311   :  { %v1665_v40 = vpop.f32.mrb[18].mxu1 }
 0x312   :  { %1668 = vst [vmem:[%s2767_s7] sm:$0xff] %v1663_v38  ;;  %v2069_v41 = vpop.f32.mrb[19].mxu1 }

</bundles_post_ra>
